<compile_context>
chip_gen: v6e
topology: v6e:2x2x1
jax: 0.10.0
libtpu: 0.0.40
codegen_flags: <defaults>
</compile_context>

<pallas_src>
import functools

import jax
import jax.numpy as jnp
import numpy as np
from jax.experimental import pallas as pl
from jax.experimental.pallas import tpu as pltpu

EPS = 1e-5
BF16 = jnp.bfloat16
F32 = jnp.float32


@functools.lru_cache(maxsize=None)
def _vmem_limit_bytes():
    """Generation-aware scoped-VMEM limit: ~3/4 of physical VMEM, capped at
    96 MiB (128 MiB chips -> 96 MiB; v7x 64 MiB -> 48 MiB)."""
    try:
        cap = int(pltpu.get_tpu_info().vmem_capacity_bytes)
    except Exception:
        cap = 64 * 1024 * 1024
    return max(32 * 1024 * 1024, min(96 * 1024 * 1024, (cap * 3) // 4))


def _compiler_params():
    # Batch tiles are fully independent (BN stats are per-tile outputs reduced
    # between passes), so the grid axis is "parallel" -> megacore sharding.
    return pltpu.CompilerParams(
        dimension_semantics=("parallel",),
        vmem_limit_bytes=_vmem_limit_bytes())


# --------------------------------------------------------------------------- #
# kernel helpers (inlined at trace time)
# --------------------------------------------------------------------------- #
def _fill_padded(pad_ref, x, NB, H, W, C):
    """Write x into the interior of a (NB, H+2, W+2, C) f32 scratch; zero ONLY
    the 1-element halo rows/cols (no full-buffer zero fill). Re-done every grid
    step (see header note about per-core scratch under megacore)."""
    pad_ref[:, 1:H + 1, 1:W + 1, :] = x.astype(pad_ref.dtype)
    zrow = jnp.zeros((NB, 1, W + 2, C), pad_ref.dtype)
    pad_ref[:, 0:1, :, :] = zrow
    pad_ref[:, H + 1:H + 2, :, :] = zrow
    zcol = jnp.zeros((NB, H + 2, 1, C), pad_ref.dtype)
    pad_ref[:, :, 0:1, :] = zcol
    pad_ref[:, :, W + 1:W + 2, :] = zcol


def _im2col(pad_ref, pat_ref, NB, H, W, C):
    """Build the (NB, H, W, 9*C) bf16 im2col buffer from the padded f32
    scratch, so the 3x3 conv is a single K=9*C MXU matmul."""
    for t in range(9):
        ky, kx = divmod(t, 3)
        win = pad_ref[:, ky:ky + H, kx:kx + W, :]
        pat_ref[:, :, :, t * C:(t + 1) * C] = win.astype(pat_ref.dtype)


def _conv3x3_per_tap(pad_ref, w_ref, NB, H, W, Cin, Cout):
    """3x3 conv as 9 accumulating K=Cin dots (no 9x im2col buffer). Used for
    large Cin (>= cutoff) where K=Cin already fills the MXU and the im2col
    buffer would dominate VMEM (especially v7x's 64 MiB)."""
    NHW = NB * H * W
    acc = jnp.zeros((NHW, Cout), jnp.float32)
    for t in range(9):
        ky, kx = divmod(t, 3)
        win = pad_ref[:, ky:ky + H, kx:kx + W, :].reshape(NHW, Cin)
        acc = acc + jnp.dot(win.astype(BF16), w_ref[t * Cin:(t + 1) * Cin, :],
                            preferred_element_type=jnp.float32)
    return acc


def _store_stats(stat_ref, y2d):
    """Per-tile channel sum / sum-of-squares (f32, pre-bf16-downcast) into a
    (1, 2, C) output block; reduced across tiles in the wrapper.
    TODO(synk): E[x^2]-E[x]^2 can cancel for very large activations; switch to
    a per-tile Welford merge if that ever matters."""
    stat_ref[:, 0:1, :] = jnp.sum(y2d, axis=0, keepdims=True)[None]
    stat_ref[:, 1:2, :] = jnp.sum(y2d * y2d, axis=0, keepdims=True)[None]


# --------------------------------------------------------------------------- #
# pass 1: conv3x3 (main) + conv1x1 (shortcut) in one MXU dot, bf16 outputs
# --------------------------------------------------------------------------- #
def _conv1_kernel(*refs, NB, H, W, Cin, Cout, use_im2col):
    NHW = NB * H * W
    if use_im2col:
        x_ref, w_ref, y1_ref, ysc_ref, s1_ref, ssc_ref, pad_scr, pat_scr = refs
    else:
        x_ref, w_ref, ws_ref, y1_ref, ysc_ref, s1_ref, ssc_ref, pad_scr = refs

    _fill_padded(pad_scr, x_ref[...], NB, H, W, Cin)

    if use_im2col:
        # One MXU matmul: w_ref is (9*Cin, 2*Cout) with the 1x1 shortcut weight
        # embedded in the centre-tap rows of the second Cout columns.
        _im2col(pad_scr, pat_scr, NB, H, W, Cin)
        y = jnp.dot(pat_scr[...].reshape(NHW, 9 * Cin), w_ref[...],
                    preferred_element_type=jnp.float32)          # (NHW, 2*Cout)
        y1, ysc = y[:, :Cout], y[:, Cout:]
    else:
        y1 = _conv3x3_per_tap(pad_scr, w_ref, NB, H, W, Cin, Cout)
        centre = pad_scr[:, 1:H + 1, 1:W + 1, :].reshape(NHW, Cin)
        ysc = jnp.dot(centre.astype(BF16), ws_ref[...],
                      preferred_element_type=jnp.float32)

    y1_ref[...] = y1.reshape(NB, H, W, Cout).astype(y1_ref.dtype)
    ysc_ref[...] = ysc.reshape(NB, H, W, Cout).astype(ysc_ref.dtype)
    _store_stats(s1_ref, y1)
    _store_stats(ssc_ref, ysc)


# --------------------------------------------------------------------------- #
# pass 2: fused BN1 (scale/shift) + ReLU + conv3x3, bf16 output + stats
# --------------------------------------------------------------------------- #
def _conv2_kernel(*refs, NB, H, W, Cout, use_im2col):
    NHW = NB * H * W
    if use_im2col:
        y1_ref, a1_ref, b1_ref, w2_ref, y2_ref, s2_ref, pad_scr, pat_scr = refs
    else:
        y1_ref, a1_ref, b1_ref, w2_ref, y2_ref, s2_ref, pad_scr = refs

    # fused BN1 scale/shift + ReLU on the upcast bf16 input (f32 VPU math)
    h = jnp.maximum(y1_ref[...].astype(jnp.float32) * a1_ref[...] + b1_ref[...],
                    0.0)
    _fill_padded(pad_scr, h, NB, H, W, Cout)
    if use_im2col:
        _im2col(pad_scr, pat_scr, NB, H, W, Cout)
        y2 = jnp.dot(pat_scr[...].reshape(NHW, 9 * Cout), w2_ref[...],
                     preferred_element_type=jnp.float32)
    else:
        y2 = _conv3x3_per_tap(pad_scr, w2_ref, NB, H, W, Cout, Cout)
    y2_ref[...] = y2.reshape(NB, H, W, Cout).astype(y2_ref.dtype)
    _store_stats(s2_ref, y2)


# --------------------------------------------------------------------------- #
# pass 3: fused BN2 + BN_shortcut (scale/shift), add, ReLU
# --------------------------------------------------------------------------- #
def _add_relu_kernel(y2_ref, ysc_ref, a2_ref, b2_ref, asc_ref, bsc_ref, out_ref):
    left = y2_ref[...].astype(jnp.float32) * a2_ref[...] + b2_ref[...]
    sc = ysc_ref[...].astype(jnp.float32) * asc_ref[...] + bsc_ref[...]
    out_ref[...] = jnp.maximum(left + sc, 0.0).astype(out_ref.dtype)


# --------------------------------------------------------------------------- #
# wrapper
# --------------------------------------------------------------------------- #
def _bn_scale_shift(stats, count, gamma, beta):
    """Reduce per-tile (sum, sumsq) -> fused BN scale/shift (a, b), f32."""
    s = jnp.sum(stats[:, 0, :], axis=0)
    ss = jnp.sum(stats[:, 1, :], axis=0)
    mean = s / count
    var = jnp.maximum(ss / count - mean * mean, 0.0)   # clamp: avoid rsqrt(<0)
    a = gamma.reshape(-1) * jax.lax.rsqrt(var + EPS)
    b = beta.reshape(-1) - mean * a
    return a.reshape(1, -1).astype(F32), b.reshape(1, -1).astype(F32)


def _pick_batch_tile(N, H, W, Cin, Cout, use_i2c1, use_i2c2, vmem_limit):
    """Largest batch tile whose worst-pass VMEM footprint fits ~60% of the
    limit while keeping >= 2 grid steps (pipelining / megacore balance)."""
    budget = int(vmem_limit * 0.6)
    hw = H * W

    def footprint(nb):
        pad1 = 4 * nb * (H + 2) * (W + 2) * Cin
        pad2 = 4 * nb * (H + 2) * (W + 2) * Cout
        pat1 = 2 * nb * hw * 9 * Cin if use_i2c1 else 0
        pat2 = 2 * nb * hw * 9 * Cout if use_i2c2 else 0
        io1 = 2 * (4 * nb * hw * Cin) + 2 * (2 * 2 * nb * hw * Cout)  # dbl-buf
        io2 = 2 * (2 * nb * hw * Cout) * 2
        live = 4 * nb * hw * 2 * Cout + 4 * nb * hw * max(Cin, Cout)
        return max(pad1 + pat1 + io1, pad2 + pat2 + io2) + live

    divisors = [d for d in range(1, N + 1) if N % d == 0]
    fitting = [d for d in divisors if footprint(d) <= budget] or [1]
    pref = [d for d in fitting if N // d >= 2]
    return max(pref) if pref else max(fitting)


def resblock_forward(x_nhwc, params, *, batch_tile=None,
                     im2col_channel_cutoff=256):
    """x_nhwc: (N, H, W, Cin) float32 -> (N, H, W, Cout) float32.
    Activations stay NHWC across blocks; NCHW is converted once at the network
    boundary (resblock_forward_nchw)."""
    N, H, W, Cin = x_nhwc.shape
    Cout = params["w1"].shape[-1]
    use_i2c1 = Cin < im2col_channel_cutoff
    use_i2c2 = Cout < im2col_channel_cutoff

    vmem_limit = _vmem_limit_bytes()
    if batch_tile is None:
        batch_tile = _pick_batch_tile(N, H, W, Cin, Cout, use_i2c1, use_i2c2,
                                      vmem_limit)
    assert N % batch_tile == 0
    NB = batch_tile
    G = N // NB
    NHW = N * H * W

    x = x_nhwc.astype(F32)
    w1f = params["w1"].reshape(9 * Cin, Cout)
    w2f = params["w2"].reshape(9 * Cout, Cout).astype(BF16)

    act_in_spec = pl.BlockSpec((NB, H, W, Cin), lambda i: (i, 0, 0, 0))
    act_spec = pl.BlockSpec((NB, H, W, Cout), lambda i: (i, 0, 0, 0))
    stat_spec = pl.BlockSpec((1, 2, Cout), lambda i: (i, 0, 0))
    row_spec = pl.BlockSpec((1, Cout), lambda i: (0, 0))

    act_bf16 = jax.ShapeDtypeStruct((N, H, W, Cout), BF16)
    stat_shape = jax.ShapeDtypeStruct((G, 2, Cout), F32)

    # ---- pass 1: conv1 (3x3) + shortcut (1x1), pre-BN bf16 + partial stats --
    if use_i2c1:
        # fold the 1x1 shortcut into the centre-tap rows of a combined weight
        ws_embed = jnp.zeros((9 * Cin, Cout), F32).at[4 * Cin:5 * Cin, :].set(
            params["ws"])
        w_comb = jnp.concatenate([w1f, ws_embed], axis=1).astype(BF16)
        ins1 = (x, w_comb)
        in_specs1 = [act_in_spec,
                     pl.BlockSpec((9 * Cin, 2 * Cout), lambda i: (0, 0))]
        scratch1 = [pltpu.VMEM((NB, H + 2, W + 2, Cin), F32),
                    pltpu.VMEM((NB, H, W, 9 * Cin), BF16)]
        flops1 = 2 * NHW * 9 * Cin * 2 * Cout
    else:
        ins1 = (x, w1f.astype(BF16), params["ws"].astype(BF16))
        in_specs1 = [act_in_spec,
                     pl.BlockSpec((9 * Cin, Cout), lambda i: (0, 0)),
                     pl.BlockSpec((Cin, Cout), lambda i: (0, 0))]
        scratch1 = [pltpu.VMEM((NB, H + 2, W + 2, Cin), F32)]
        flops1 = 2 * NHW * Cin * Cout * 10
    bytes1 = 4 * NHW * Cin + 2 * 2 * NHW * Cout + 2 * 9 * Cin * 2 * Cout

    y1, ysc, s1, ssc = pl.pallas_call(
        functools.partial(_conv1_kernel, NB=NB, H=H, W=W, Cin=Cin, Cout=Cout,
                          use_im2col=use_i2c1),
        grid=(G,),
        in_specs=in_specs1,
        out_specs=[act_spec, act_spec, stat_spec, stat_spec],
        out_shape=[act_bf16, act_bf16, stat_shape, stat_shape],
        scratch_shapes=scratch1,
        compiler_params=_compiler_params(),
        cost_estimate=pl.CostEstimate(flops=flops1, transcendentals=0,
                                      bytes_accessed=bytes1),
    )(*ins1)

    a1, b1 = _bn_scale_shift(s1, NHW, params["g1"], params["b1"])
    asc, bsc = _bn_scale_shift(ssc, NHW, params["gs"], params["bs"])

    # ---- pass 2: BN1+ReLU fused scale/shift, conv2 (3x3), bf16 + stats ------
    scratch2 = [pltpu.VMEM((NB, H + 2, W + 2, Cout), F32)]
    if use_i2c2:
        scratch2.append(pltpu.VMEM((NB, H, W, 9 * Cout), BF16))
    flops2 = 2 * NHW * 9 * Cout * Cout + 4 * NHW * Cout
    bytes2 = 2 * 2 * NHW * Cout + 2 * 9 * Cout * Cout
    y2, s2 = pl.pallas_call(
        functools.partial(_conv2_kernel, NB=NB, H=H, W=W, Cout=Cout,
                          use_im2col=use_i2c2),
        grid=(G,),
        in_specs=[act_spec, row_spec, row_spec,
                  pl.BlockSpec((9 * Cout, Cout), lambda i: (0, 0))],
        out_specs=[act_spec, stat_shape and act_spec if False else act_spec,
                   ][0:1] + [stat_spec],
        out_shape=[act_bf16, stat_shape],
        scratch_shapes=scratch2,
        compiler_params=_compiler_params(),
        cost_estimate=pl.CostEstimate(flops=flops2, transcendentals=0,
                                      bytes_accessed=bytes2),
    )(y1, a1, b1, w2f)

    a2, b2 = _bn_scale_shift(s2, NHW, params["g2"], params["b2"])

    # ---- pass 3: BN2 + BN_sc fused scale/shift, add, ReLU -------------------
    # TODO(synk): when chaining blocks, fuse this pass into the next block's
    # pass-1 input read instead of a standalone HBM-bound elementwise pass.
    flops3 = 8 * NHW * Cout
    bytes3 = 2 * 2 * NHW * Cout + 4 * NHW * Cout
    out_nhwc = pl.pallas_call(
        _add_relu_kernel,
        grid=(G,),
        in_specs=[act_spec, act_spec, row_spec, row_spec, row_spec, row_spec],
        out_specs=act_spec,
        out_shape=jax.ShapeDtypeStruct((N, H, W, Cout), F32),
        compiler_params=_compiler_params(),
        cost_estimate=pl.CostEstimate(flops=flops3, transcendentals=0,
                                      bytes_accessed=bytes3),
    )(y2, ysc, a2, b2, asc, bsc)

    return out_nhwc


def resblock_forward_nchw(x_nchw, params, **kwargs):
    """NCHW boundary adapter (PyTorch layout). In a multi-block network these
    two transposes are paid once for the whole net, not once per block."""
    x_nhwc = jnp.transpose(x_nchw, (0, 2, 3, 1))
    out = resblock_forward(x_nhwc, params, **kwargs)
    return jnp.transpose(out, (0, 3, 1, 2))


# --------------------------------------------------------------------------- #
# pure-JAX reference (PyTorch training-mode BN semantics) and params
# --------------------------------------------------------------------------- #
def resblock_reference(x_nchw, params):
    x = jnp.transpose(x_nchw, (0, 2, 3, 1)).astype(jnp.float32)

    def conv(inp, w, pad):
        return jax.lax.conv_general_dilated(
            inp, w, (1, 1), [(pad, pad), (pad, pad)],
            dimension_numbers=("NHWC", "HWIO", "NHWC"),
            precision=jax.lax.Precision.HIGHEST)

    def bn(inp, g, b):
        mean = jnp.mean(inp, axis=(0, 1, 2), keepdims=True)
        var = jnp.mean((inp - mean) ** 2, axis=(0, 1, 2), keepdims=True)
        return (inp - mean) * jax.lax.rsqrt(var + EPS) * g + b

    h = jax.nn.relu(bn(conv(x, params["w1"], 1), params["g1"], params["b1"]))
    left = bn(conv(h, params["w2"], 1), params["g2"], params["b2"])
    sc = bn(conv(x, params["ws"][None, None], 0), params["gs"], params["bs"])
    return jnp.transpose(jax.nn.relu(left + sc), (0, 3, 1, 2))


def init_params(key, in_channel, out_channel):
    ks = jax.random.split(key, 9)
    f32 = jnp.float32
    return {
        # conv weights stored HWIO (kernel_h, kernel_w, in, out)
        "w1": (jax.random.normal(ks[0], (3, 3, in_channel, out_channel)) * 0.2).astype(f32),
        "w2": (jax.random.normal(ks[1], (3, 3, out_channel, out_channel)) * 0.2).astype(f32),
        "ws": (jax.random.normal(ks[2], (in_channel, out_channel)) * 0.2).astype(f32),
        "g1": (1.0 + 0.1 * jax.random.normal(ks[3], (1, out_channel))).astype(f32),
        "b1": (0.1 * jax.random.normal(ks[4], (1, out_channel))).astype(f32),
        "g2": (1.0 + 0.1 * jax.random.normal(ks[5], (1, out_channel))).astype(f32),
        "b2": (0.1 * jax.random.normal(ks[6], (1, out_channel))).astype(f32),
        "gs": (1.0 + 0.1 * jax.random.normal(ks[7], (1, out_channel))).astype(f32),
        "bs": (0.1 * jax.random.normal(ks[8], (1, out_channel))).astype(f32),
    }


if __name__ == "__main__":
    key = jax.random.PRNGKey(0)
    kx, kp = jax.random.split(key)

    N, Cin, Cout, H, W = 2, 4, 8, 16, 16
    x = jax.random.normal(kx, (N, Cin, H, W), dtype=jnp.float32)
    params = init_params(kp, Cin, Cout)

    fwd = jax.jit(resblock_forward_nchw)
    out = jax.block_until_ready(fwd(x, params))

    ref = jax.block_until_ready(resblock_reference(x, params))
    assert out.shape == (N, Cout, H, W), out.shape
    # bf16 MXU inputs + bf16 inter-pass activations vs. a Precision.HIGHEST f32
    # reference -> tolerance reflects ~0.4% relative bf16 rounding per stage.
    if not np.allclose(np.asarray(out), np.asarray(ref), atol=1e-1, rtol=1e-1):
        err = float(np.max(np.abs(np.asarray(out) - np.asarray(ref))))
        raise AssertionError(
            f"Pallas ResBlock output mismatch vs reference (max abs err {err})")

    print("KERNEL_OK")
</pallas_src>

<mosaic_0001>
module attributes {stable_mosaic.version = 11 : i64} {
  func.func @_conv1_kernel(%arg0: i32, %arg1: memref<1x16x16x4xf32, #tpu.memory_space<vmem>>, %arg2: memref<36x16xbf16, #tpu.memory_space<vmem>>, %arg3: memref<1x16x16x8xbf16, #tpu.memory_space<vmem>>, %arg4: memref<1x16x16x8xbf16, #tpu.memory_space<vmem>>, %arg5: memref<1x2x8xf32, #tpu.memory_space<vmem>>, %arg6: memref<1x2x8xf32, #tpu.memory_space<vmem>>, %arg7: memref<1x18x18x4xf32, #tpu.memory_space<vmem>>, %arg8: memref<1x16x16x36xbf16, #tpu.memory_space<vmem>>) attributes {dimension_semantics = [#tpu.dimension_semantics<parallel>], iteration_bounds = array<i64: 2>, scalar_prefetch = 0 : i64, scratch_operands = 2 : i64, tpu.core_type = #tpu.core_type<tc>, window_params = [{transform_indices = @transform_0, window_bounds = array<i64: 1, 16, 16, 4>}, {pipeline_mode = #tpu.pipeline_mode<synchronous>, transform_indices = @transform_1, window_bounds = array<i64: 36, 16>}, {transform_indices = @transform_2, window_bounds = array<i64: 1, 16, 16, 8>}, {transform_indices = @transform_3, window_bounds = array<i64: 1, 16, 16, 8>}, {transform_indices = @transform_4, window_bounds = array<i64: 1, 2, 8>}, {transform_indices = @transform_5, window_bounds = array<i64: 1, 2, 8>}]} {
    %c0 = arith.constant 0 : index
    %c0_0 = arith.constant 0 : index
    %c0_1 = arith.constant 0 : index
    %c0_2 = arith.constant 0 : index
    %0 = vector.load %arg1[%c0, %c0_0, %c0_1, %c0_2] : memref<1x16x16x4xf32, #tpu.memory_space<vmem>>, vector<1x16x16x4xf32>
    %c0_3 = arith.constant 0 : index
    %c1 = arith.constant 1 : index
    %c1_4 = arith.constant 1 : index
    %c0_5 = arith.constant 0 : index
    %1 = vector.load %arg7[%c0_3, %c1, %c1_4, %c0_5] : memref<1x18x18x4xf32, #tpu.memory_space<vmem>>, vector<1x16x16x4xf32>
    tpu.vector_store %arg7[%c0_3, %c1, %c1_4, %c0_5], %0 {strides = array<i32>} : memref<1x18x18x4xf32, #tpu.memory_space<vmem>>, vector<1x16x16x4xf32>,
    %cst = arith.constant 0.000000e+00 : f32
    %2 = vector.broadcast %cst : f32 to vector<1x1x18x4xf32>
    %c0_6 = arith.constant 0 : index
    %c0_7 = arith.constant 0 : index
    %c0_8 = arith.constant 0 : index
    %c0_9 = arith.constant 0 : index
    %3 = vector.load %arg7[%c0_6, %c0_7, %c0_8, %c0_9] : memref<1x18x18x4xf32, #tpu.memory_space<vmem>>, vector<1x1x18x4xf32>
    tpu.vector_store %arg7[%c0_6, %c0_7, %c0_8, %c0_9], %2 {strides = array<i32>} : memref<1x18x18x4xf32, #tpu.memory_space<vmem>>, vector<1x1x18x4xf32>,
    %c0_10 = arith.constant 0 : index
    %c17 = arith.constant 17 : index
    %c0_11 = arith.constant 0 : index
    %c0_12 = arith.constant 0 : index
    %4 = vector.load %arg7[%c0_10, %c17, %c0_11, %c0_12] : memref<1x18x18x4xf32, #tpu.memory_space<vmem>>, vector<1x1x18x4xf32>
    tpu.vector_store %arg7[%c0_10, %c17, %c0_11, %c0_12], %2 {strides = array<i32>} : memref<1x18x18x4xf32, #tpu.memory_space<vmem>>, vector<1x1x18x4xf32>,
    %cst_13 = arith.constant 0.000000e+00 : f32
    %5 = vector.broadcast %cst_13 : f32 to vector<1x18x1x4xf32>
    %c0_14 = arith.constant 0 : index
    %c0_15 = arith.constant 0 : index
    %c0_16 = arith.constant 0 : index
    %c0_17 = arith.constant 0 : index
    %6 = vector.load %arg7[%c0_14, %c0_15, %c0_16, %c0_17] : memref<1x18x18x4xf32, #tpu.memory_space<vmem>>, vector<1x18x1x4xf32>
    tpu.vector_store %arg7[%c0_14, %c0_15, %c0_16, %c0_17], %5 {strides = array<i32>} : memref<1x18x18x4xf32, #tpu.memory_space<vmem>>, vector<1x18x1x4xf32>,
    %c0_18 = arith.constant 0 : index
    %c0_19 = arith.constant 0 : index
    %c17_20 = arith.constant 17 : index
    %c0_21 = arith.constant 0 : index
    %7 = vector.load %arg7[%c0_18, %c0_19, %c17_20, %c0_21] : memref<1x18x18x4xf32, #tpu.memory_space<vmem>>, vector<1x18x1x4xf32>
    tpu.vector_store %arg7[%c0_18, %c0_19, %c17_20, %c0_21], %5 {strides = array<i32>} : memref<1x18x18x4xf32, #tpu.memory_space<vmem>>, vector<1x18x1x4xf32>,
    %c0_22 = arith.constant 0 : index
    %c0_23 = arith.constant 0 : index
    %c0_24 = arith.constant 0 : index
    %c0_25 = arith.constant 0 : index
    %8 = vector.load %arg7[%c0_22, %c0_23, %c0_24, %c0_25] : memref<1x18x18x4xf32, #tpu.memory_space<vmem>>, vector<1x16x16x4xf32>
    %9 = arith.truncf %8 : vector<1x16x16x4xf32> to vector<1x16x16x4xbf16>
    %c0_26 = arith.constant 0 : index
    %c0_27 = arith.constant 0 : index
    %c0_28 = arith.constant 0 : index
    %c0_29 = arith.constant 0 : index
    %10 = vector.load %arg8[%c0_26, %c0_27, %c0_28, %c0_29] : memref<1x16x16x36xbf16, #tpu.memory_space<vmem>>, vector<1x16x16x4xbf16>
    tpu.vector_store %arg8[%c0_26, %c0_27, %c0_28, %c0_29], %9 {strides = array<i32>} : memref<1x16x16x36xbf16, #tpu.memory_space<vmem>>, vector<1x16x16x4xbf16>,
    %c0_30 = arith.constant 0 : index
    %c0_31 = arith.constant 0 : index
    %c1_32 = arith.constant 1 : index
    %c0_33 = arith.constant 0 : index
    %11 = vector.load %arg7[%c0_30, %c0_31, %c1_32, %c0_33] : memref<1x18x18x4xf32, #tpu.memory_space<vmem>>, vector<1x16x16x4xf32>
    %12 = arith.truncf %11 : vector<1x16x16x4xf32> to vector<1x16x16x4xbf16>
    %c0_34 = arith.constant 0 : index
    %c0_35 = arith.constant 0 : index
    %c0_36 = arith.constant 0 : index
    %c4 = arith.constant 4 : index
    %13 = vector.load %arg8[%c0_34, %c0_35, %c0_36, %c4] : memref<1x16x16x36xbf16, #tpu.memory_space<vmem>>, vector<1x16x16x4xbf16>
    tpu.vector_store %arg8[%c0_34, %c0_35, %c0_36, %c4], %12 {strides = array<i32>} : memref<1x16x16x36xbf16, #tpu.memory_space<vmem>>, vector<1x16x16x4xbf16>,
    %c0_37 = arith.constant 0 : index
    %c0_38 = arith.constant 0 : index
    %c2 = arith.constant 2 : index
    %c0_39 = arith.constant 0 : index
    %14 = vector.load %arg7[%c0_37, %c0_38, %c2, %c0_39] : memref<1x18x18x4xf32, #tpu.memory_space<vmem>>, vector<1x16x16x4xf32>
    %15 = arith.truncf %14 : vector<1x16x16x4xf32> to vector<1x16x16x4xbf16>
    %c0_40 = arith.constant 0 : index
    %c0_41 = arith.constant 0 : index
    %c0_42 = arith.constant 0 : index
    %c8 = arith.constant 8 : index
    %16 = vector.load %arg8[%c0_40, %c0_41, %c0_42, %c8] : memref<1x16x16x36xbf16, #tpu.memory_space<vmem>>, vector<1x16x16x4xbf16>
    tpu.vector_store %arg8[%c0_40, %c0_41, %c0_42, %c8], %15 {strides = array<i32>} : memref<1x16x16x36xbf16, #tpu.memory_space<vmem>>, vector<1x16x16x4xbf16>,
    %c0_43 = arith.constant 0 : index
    %c1_44 = arith.constant 1 : index
    %c0_45 = arith.constant 0 : index
    %c0_46 = arith.constant 0 : index
    %17 = vector.load %arg7[%c0_43, %c1_44, %c0_45, %c0_46] : memref<1x18x18x4xf32, #tpu.memory_space<vmem>>, vector<1x16x16x4xf32>
    %18 = arith.truncf %17 : vector<1x16x16x4xf32> to vector<1x16x16x4xbf16>
    %c0_47 = arith.constant 0 : index
    %c0_48 = arith.constant 0 : index
    %c0_49 = arith.constant 0 : index
    %c12 = arith.constant 12 : index
    %19 = vector.load %arg8[%c0_47, %c0_48, %c0_49, %c12] : memref<1x16x16x36xbf16, #tpu.memory_space<vmem>>, vector<1x16x16x4xbf16>
    tpu.vector_store %arg8[%c0_47, %c0_48, %c0_49, %c12], %18 {strides = array<i32>} : memref<1x16x16x36xbf16, #tpu.memory_space<vmem>>, vector<1x16x16x4xbf16>,
    %c0_50 = arith.constant 0 : index
    %c1_51 = arith.constant 1 : index
    %c1_52 = arith.constant 1 : index
    %c0_53 = arith.constant 0 : index
    %20 = vector.load %arg7[%c0_50, %c1_51, %c1_52, %c0_53] : memref<1x18x18x4xf32, #tpu.memory_space<vmem>>, vector<1x16x16x4xf32>
    %21 = arith.truncf %20 : vector<1x16x16x4xf32> to vector<1x16x16x4xbf16>
    %c0_54 = arith.constant 0 : index
    %c0_55 = arith.constant 0 : index
    %c0_56 = arith.constant 0 : index
    %c16 = arith.constant 16 : index
    %22 = vector.load %arg8[%c0_54, %c0_55, %c0_56, %c16] : memref<1x16x16x36xbf16, #tpu.memory_space<vmem>>, vector<1x16x16x4xbf16>
    tpu.vector_store %arg8[%c0_54, %c0_55, %c0_56, %c16], %21 {strides = array<i32>} : memref<1x16x16x36xbf16, #tpu.memory_space<vmem>>, vector<1x16x16x4xbf16>,
    %c0_57 = arith.constant 0 : index
    %c1_58 = arith.constant 1 : index
    %c2_59 = arith.constant 2 : index
    %c0_60 = arith.constant 0 : index
    %23 = vector.load %arg7[%c0_57, %c1_58, %c2_59, %c0_60] : memref<1x18x18x4xf32, #tpu.memory_space<vmem>>, vector<1x16x16x4xf32>
    %24 = arith.truncf %23 : vector<1x16x16x4xf32> to vector<1x16x16x4xbf16>
    %c0_61 = arith.constant 0 : index
    %c0_62 = arith.constant 0 : index
    %c0_63 = arith.constant 0 : index
    %c20 = arith.constant 20 : index
    %25 = vector.load %arg8[%c0_61, %c0_62, %c0_63, %c20] : memref<1x16x16x36xbf16, #tpu.memory_space<vmem>>, vector<1x16x16x4xbf16>
    tpu.vector_store %arg8[%c0_61, %c0_62, %c0_63, %c20], %24 {strides = array<i32>} : memref<1x16x16x36xbf16, #tpu.memory_space<vmem>>, vector<1x16x16x4xbf16>,
    %c0_64 = arith.constant 0 : index
    %c2_65 = arith.constant 2 : index
    %c0_66 = arith.constant 0 : index
    %c0_67 = arith.constant 0 : index
    %26 = vector.load %arg7[%c0_64, %c2_65, %c0_66, %c0_67] : memref<1x18x18x4xf32, #tpu.memory_space<vmem>>, vector<1x16x16x4xf32>
    %27 = arith.truncf %26 : vector<1x16x16x4xf32> to vector<1x16x16x4xbf16>
    %c0_68 = arith.constant 0 : index
    %c0_69 = arith.constant 0 : index
    %c0_70 = arith.constant 0 : index
    %c24 = arith.constant 24 : index
    %28 = vector.load %arg8[%c0_68, %c0_69, %c0_70, %c24] : memref<1x16x16x36xbf16, #tpu.memory_space<vmem>>, vector<1x16x16x4xbf16>
    tpu.vector_store %arg8[%c0_68, %c0_69, %c0_70, %c24], %27 {strides = array<i32>} : memref<1x16x16x36xbf16, #tpu.memory_space<vmem>>, vector<1x16x16x4xbf16>,
    %c0_71 = arith.constant 0 : index
    %c2_72 = arith.constant 2 : index
    %c1_73 = arith.constant 1 : index
    %c0_74 = arith.constant 0 : index
    %29 = vector.load %arg7[%c0_71, %c2_72, %c1_73, %c0_74] : memref<1x18x18x4xf32, #tpu.memory_space<vmem>>, vector<1x16x16x4xf32>
    %30 = arith.truncf %29 : vector<1x16x16x4xf32> to vector<1x16x16x4xbf16>
    %c0_75 = arith.constant 0 : index
    %c0_76 = arith.constant 0 : index
    %c0_77 = arith.constant 0 : index
    %c28 = arith.constant 28 : index
    %31 = vector.load %arg8[%c0_75, %c0_76, %c0_77, %c28] : memref<1x16x16x36xbf16, #tpu.memory_space<vmem>>, vector<1x16x16x4xbf16>
    tpu.vector_store %arg8[%c0_75, %c0_76, %c0_77, %c28], %30 {strides = array<i32>} : memref<1x16x16x36xbf16, #tpu.memory_space<vmem>>, vector<1x16x16x4xbf16>,
    %c0_78 = arith.constant 0 : index
    %c2_79 = arith.constant 2 : index
    %c2_80 = arith.constant 2 : index
    %c0_81 = arith.constant 0 : index
    %32 = vector.load %arg7[%c0_78, %c2_79, %c2_80, %c0_81] : memref<1x18x18x4xf32, #tpu.memory_space<vmem>>, vector<1x16x16x4xf32>
    %33 = arith.truncf %32 : vector<1x16x16x4xf32> to vector<1x16x16x4xbf16>
    %c0_82 = arith.constant 0 : index
    %c0_83 = arith.constant 0 : index
    %c0_84 = arith.constant 0 : index
    %c32 = arith.constant 32 : index
    %34 = vector.load %arg8[%c0_82, %c0_83, %c0_84, %c32] : memref<1x16x16x36xbf16, #tpu.memory_space<vmem>>, vector<1x16x16x4xbf16>
    tpu.vector_store %arg8[%c0_82, %c0_83, %c0_84, %c32], %33 {strides = array<i32>} : memref<1x16x16x36xbf16, #tpu.memory_space<vmem>>, vector<1x16x16x4xbf16>,
    %c0_85 = arith.constant 0 : index
    %c0_86 = arith.constant 0 : index
    %c0_87 = arith.constant 0 : index
    %c0_88 = arith.constant 0 : index
    %35 = vector.load %arg8[%c0_85, %c0_86, %c0_87, %c0_88] : memref<1x16x16x36xbf16, #tpu.memory_space<vmem>>, vector<1x16x16x36xbf16>
    %36 = vector.shape_cast %35 : vector<1x16x16x36xbf16> to vector<256x36xbf16>
    %c0_89 = arith.constant 0 : index
    %c0_90 = arith.constant 0 : index
    %37 = vector.load %arg2[%c0_89, %c0_90] : memref<36x16xbf16, #tpu.memory_space<vmem>>, vector<36x16xbf16>
    %cst_91 = arith.constant dense<0.000000e+00> : vector<256x16xf32>
    %38 = tpu.matmul %36, %37, %cst_91 {dimension_numbers = #tpu.dot_dimension_numbers<[1], [0], [0], [1], [0, 0, 1, 1], [], []>} : vector<256x36xbf16>, vector<36x16xbf16>, vector<256x16xf32> -> vector<256x16xf32>
    %39 = vector.extract_strided_slice %38 {offsets = [0, 0], sizes = [256, 8], strides = [1, 1]} : vector<256x16xf32> to vector<256x8xf32>
    %40 = vector.extract_strided_slice %38 {offsets = [0, 8], sizes = [256, 8], strides = [1, 1]} : vector<256x16xf32> to vector<256x8xf32>
    %41 = vector.shape_cast %39 : vector<256x8xf32> to vector<1x16x16x8xf32>
    %42 = arith.truncf %41 : vector<1x16x16x8xf32> to vector<1x16x16x8xbf16>
    %c0_92 = arith.constant 0 : index
    %c0_93 = arith.constant 0 : index
    %c0_94 = arith.constant 0 : index
    %c0_95 = arith.constant 0 : index
    %43 = vector.load %arg3[%c0_92, %c0_93, %c0_94, %c0_95] : memref<1x16x16x8xbf16, #tpu.memory_space<vmem>>, vector<1x16x16x8xbf16>
    tpu.vector_store %arg3[%c0_92, %c0_93, %c0_94, %c0_95], %42 {strides = array<i32>} : memref<1x16x16x8xbf16, #tpu.memory_space<vmem>>, vector<1x16x16x8xbf16>,
    %44 = vector.shape_cast %40 : vector<256x8xf32> to vector<1x16x16x8xf32>
    %45 = arith.truncf %44 : vector<1x16x16x8xf32> to vector<1x16x16x8xbf16>
    %c0_96 = arith.constant 0 : index
    %c0_97 = arith.constant 0 : index
    %c0_98 = arith.constant 0 : index
    %c0_99 = arith.constant 0 : index
    %46 = vector.load %arg4[%c0_96, %c0_97, %c0_98, %c0_99] : memref<1x16x16x8xbf16, #tpu.memory_space<vmem>>, vector<1x16x16x8xbf16>
    tpu.vector_store %arg4[%c0_96, %c0_97, %c0_98, %c0_99], %45 {strides = array<i32>} : memref<1x16x16x8xbf16, #tpu.memory_space<vmem>>, vector<1x16x16x8xbf16>,
    %cst_100 = arith.constant dense<0.000000e+00> : vector<8xf32>
    %47 = vector.multi_reduction <add>, %39, %cst_100 [0] : vector<256x8xf32> to vector<8xf32>
    %48 = vector.shape_cast %47 : vector<8xf32> to vector<1x8xf32>
    %49 = vector.shape_cast %48 : vector<1x8xf32> to vector<1x1x8xf32>
    %c0_101 = arith.constant 0 : index
    %c0_102 = arith.constant 0 : index
    %c0_103 = arith.constant 0 : index
    %50 = vector.load %arg5[%c0_101, %c0_102, %c0_103] : memref<1x2x8xf32, #tpu.memory_space<vmem>>, vector<1x1x8xf32>
    tpu.vector_store %arg5[%c0_101, %c0_102, %c0_103], %49 {strides = array<i32>} : memref<1x2x8xf32, #tpu.memory_space<vmem>>, vector<1x1x8xf32>,
    %51 = arith.mulf %39, %39 : vector<256x8xf32>
    %cst_104 = arith.constant dense<0.000000e+00> : vector<8xf32>
    %52 = vector.multi_reduction <add>, %51, %cst_104 [0] : vector<256x8xf32> to vector<8xf32>
    %53 = vector.shape_cast %52 : vector<8xf32> to vector<1x8xf32>
    %54 = vector.shape_cast %53 : vector<1x8xf32> to vector<1x1x8xf32>
    %c0_105 = arith.constant 0 : index
    %c1_106 = arith.constant 1 : index
    %c0_107 = arith.constant 0 : index
    %55 = vector.load %arg5[%c0_105, %c1_106, %c0_107] : memref<1x2x8xf32, #tpu.memory_space<vmem>>, vector<1x1x8xf32>
    tpu.vector_store %arg5[%c0_105, %c1_106, %c0_107], %54 {strides = array<i32>} : memref<1x2x8xf32, #tpu.memory_space<vmem>>, vector<1x1x8xf32>,
    %cst_108 = arith.constant dense<0.000000e+00> : vector<8xf32>
    %56 = vector.multi_reduction <add>, %40, %cst_108 [0] : vector<256x8xf32> to vector<8xf32>
    %57 = vector.shape_cast %56 : vector<8xf32> to vector<1x8xf32>
    %58 = vector.shape_cast %57 : vector<1x8xf32> to vector<1x1x8xf32>
    %c0_109 = arith.constant 0 : index
    %c0_110 = arith.constant 0 : index
    %c0_111 = arith.constant 0 : index
    %59 = vector.load %arg6[%c0_109, %c0_110, %c0_111] : memref<1x2x8xf32, #tpu.memory_space<vmem>>, vector<1x1x8xf32>
    tpu.vector_store %arg6[%c0_109, %c0_110, %c0_111], %58 {strides = array<i32>} : memref<1x2x8xf32, #tpu.memory_space<vmem>>, vector<1x1x8xf32>,
    %60 = arith.mulf %40, %40 : vector<256x8xf32>
    %cst_112 = arith.constant dense<0.000000e+00> : vector<8xf32>
    %61 = vector.multi_reduction <add>, %60, %cst_112 [0] : vector<256x8xf32> to vector<8xf32>
    %62 = vector.shape_cast %61 : vector<8xf32> to vector<1x8xf32>
    %63 = vector.shape_cast %62 : vector<1x8xf32> to vector<1x1x8xf32>
    %c0_113 = arith.constant 0 : index
    %c1_114 = arith.constant 1 : index
    %c0_115 = arith.constant 0 : index
    %64 = vector.load %arg6[%c0_113, %c1_114, %c0_115] : memref<1x2x8xf32, #tpu.memory_space<vmem>>, vector<1x1x8xf32>
    tpu.vector_store %arg6[%c0_113, %c1_114, %c0_115], %63 {strides = array<i32>} : memref<1x2x8xf32, #tpu.memory_space<vmem>>, vector<1x1x8xf32>,
    return
  }
  func.func @transform_0(%arg0: i32) -> (i32, i32, i32, i32) {
    %c0_i32 = arith.constant 0 : i32
    %c0_i32_0 = arith.constant 0 : i32
    %c0_i32_1 = arith.constant 0 : i32
    %c0_i32_2 = arith.constant 0 : i32
    return %arg0, %c0_i32, %c0_i32_0, %c0_i32_1 : i32, i32, i32, i32
  }
  func.func @transform_1(%arg0: i32) -> (i32, i32) {
    %c0_i32 = arith.constant 0 : i32
    %c0_i32_0 = arith.constant 0 : i32
    %c0_i32_1 = arith.constant 0 : i32
    return %c0_i32, %c0_i32_0 : i32, i32
  }
  func.func @transform_2(%arg0: i32) -> (i32, i32, i32, i32) {
    %c0_i32 = arith.constant 0 : i32
    %c0_i32_0 = arith.constant 0 : i32
    %c0_i32_1 = arith.constant 0 : i32
    %c0_i32_2 = arith.constant 0 : i32
    return %arg0, %c0_i32, %c0_i32_0, %c0_i32_1 : i32, i32, i32, i32
  }
  func.func @transform_3(%arg0: i32) -> (i32, i32, i32, i32) {
    %c0_i32 = arith.constant 0 : i32
    %c0_i32_0 = arith.constant 0 : i32
    %c0_i32_1 = arith.constant 0 : i32
    %c0_i32_2 = arith.constant 0 : i32
    return %arg0, %c0_i32, %c0_i32_0, %c0_i32_1 : i32, i32, i32, i32
  }
  func.func @transform_4(%arg0: i32) -> (i32, i32, i32) {
    %c0_i32 = arith.constant 0 : i32
    %c0_i32_0 = arith.constant 0 : i32
    %c0_i32_1 = arith.constant 0 : i32
    return %arg0, %c0_i32, %c0_i32_0 : i32, i32, i32
  }
  func.func @transform_5(%arg0: i32) -> (i32, i32, i32) {
    %c0_i32 = arith.constant 0 : i32
    %c0_i32_0 = arith.constant 0 : i32
    %c0_i32_1 = arith.constant 0 : i32
    return %arg0, %c0_i32, %c0_i32_0 : i32, i32, i32
  }
}

module attributes {stable_mosaic.version = 11 : i64} {
  func.func @_conv2_kernel(%arg0: i32, %arg1: memref<1x16x16x8xbf16, #tpu.memory_space<vmem>>, %arg2: memref<1x8xf32, #tpu.memory_space<vmem>>, %arg3: memref<1x8xf32, #tpu.memory_space<vmem>>, %arg4: memref<72x8xbf16, #tpu.memory_space<vmem>>, %arg5: memref<1x16x16x8xbf16, #tpu.memory_space<vmem>>, %arg6: memref<1x2x8xf32, #tpu.memory_space<vmem>>, %arg7: memref<1x18x18x8xf32, #tpu.memory_space<vmem>>, %arg8: memref<1x16x16x72xbf16, #tpu.memory_space<vmem>>) attributes {dimension_semantics = [#tpu.dimension_semantics<parallel>], iteration_bounds = array<i64: 2>, scalar_prefetch = 0 : i64, scratch_operands = 2 : i64, tpu.core_type = #tpu.core_type<tc>, window_params = [{transform_indices = @transform_0, window_bounds = array<i64: 1, 16, 16, 8>}, {pipeline_mode = #tpu.pipeline_mode<synchronous>, transform_indices = @transform_1, window_bounds = array<i64: 1, 8>}, {pipeline_mode = #tpu.pipeline_mode<synchronous>, transform_indices = @transform_2, window_bounds = array<i64: 1, 8>}, {pipeline_mode = #tpu.pipeline_mode<synchronous>, transform_indices = @transform_3, window_bounds = array<i64: 72, 8>}, {transform_indices = @transform_4, window_bounds = array<i64: 1, 16, 16, 8>}, {transform_indices = @transform_5, window_bounds = array<i64: 1, 2, 8>}]} {
    %c0 = arith.constant 0 : index
    %c0_0 = arith.constant 0 : index
    %c0_1 = arith.constant 0 : index
    %c0_2 = arith.constant 0 : index
    %0 = vector.load %arg1[%c0, %c0_0, %c0_1, %c0_2] : memref<1x16x16x8xbf16, #tpu.memory_space<vmem>>, vector<1x16x16x8xbf16>
    %1 = arith.extf %0 : vector<1x16x16x8xbf16> to vector<1x16x16x8xf32>
    %c0_3 = arith.constant 0 : index
    %c0_4 = arith.constant 0 : index
    %2 = vector.load %arg2[%c0_3, %c0_4] : memref<1x8xf32, #tpu.memory_space<vmem>>, vector<1x8xf32>
    %3 = vector.shape_cast %2 : vector<1x8xf32> to vector<1x1x1x8xf32>
    %4 = vector.broadcast %3 : vector<1x1x1x8xf32> to vector<1x16x16x8xf32>
    %5 = arith.mulf %1, %4 : vector<1x16x16x8xf32>
    %c0_5 = arith.constant 0 : index
    %c0_6 = arith.constant 0 : index
    %6 = vector.load %arg3[%c0_5, %c0_6] : memref<1x8xf32, #tpu.memory_space<vmem>>, vector<1x8xf32>
    %7 = vector.shape_cast %6 : vector<1x8xf32> to vector<1x1x1x8xf32>
    %8 = vector.broadcast %7 : vector<1x1x1x8xf32> to vector<1x16x16x8xf32>
    %9 = arith.addf %5, %8 : vector<1x16x16x8xf32>
    %cst = arith.constant 0.000000e+00 : f32
    %10 = vector.broadcast %cst : f32 to vector<1x16x16x8xf32>
    %11 = arith.maximumf %9, %10 : vector<1x16x16x8xf32>
    %c0_7 = arith.constant 0 : index
    %c1 = arith.constant 1 : index
    %c1_8 = arith.constant 1 : index
    %c0_9 = arith.constant 0 : index
    %12 = vector.load %arg7[%c0_7, %c1, %c1_8, %c0_9] : memref<1x18x18x8xf32, #tpu.memory_space<vmem>>, vector<1x16x16x8xf32>
    tpu.vector_store %arg7[%c0_7, %c1, %c1_8, %c0_9], %11 {strides = array<i32>} : memref<1x18x18x8xf32, #tpu.memory_space<vmem>>, vector<1x16x16x8xf32>,
    %cst_10 = arith.constant 0.000000e+00 : f32
    %13 = vector.broadcast %cst_10 : f32 to vector<1x1x18x8xf32>
    %c0_11 = arith.constant 0 : index
    %c0_12 = arith.constant 0 : index
    %c0_13 = arith.constant 0 : index
    %c0_14 = arith.constant 0 : index
    %14 = vector.load %arg7[%c0_11, %c0_12, %c0_13, %c0_14] : memref<1x18x18x8xf32, #tpu.memory_space<vmem>>, vector<1x1x18x8xf32>
    tpu.vector_store %arg7[%c0_11, %c0_12, %c0_13, %c0_14], %13 {strides = array<i32>} : memref<1x18x18x8xf32, #tpu.memory_space<vmem>>, vector<1x1x18x8xf32>,
    %c0_15 = arith.constant 0 : index
    %c17 = arith.constant 17 : index
    %c0_16 = arith.constant 0 : index
    %c0_17 = arith.constant 0 : index
    %15 = vector.load %arg7[%c0_15, %c17, %c0_16, %c0_17] : memref<1x18x18x8xf32, #tpu.memory_space<vmem>>, vector<1x1x18x8xf32>
    tpu.vector_store %arg7[%c0_15, %c17, %c0_16, %c0_17], %13 {strides = array<i32>} : memref<1x18x18x8xf32, #tpu.memory_space<vmem>>, vector<1x1x18x8xf32>,
    %cst_18 = arith.constant 0.000000e+00 : f32
    %16 = vector.broadcast %cst_18 : f32 to vector<1x18x1x8xf32>
    %c0_19 = arith.constant 0 : index
    %c0_20 = arith.constant 0 : index
    %c0_21 = arith.constant 0 : index
    %c0_22 = arith.constant 0 : index
    %17 = vector.load %arg7[%c0_19, %c0_20, %c0_21, %c0_22] : memref<1x18x18x8xf32, #tpu.memory_space<vmem>>, vector<1x18x1x8xf32>
    tpu.vector_store %arg7[%c0_19, %c0_20, %c0_21, %c0_22], %16 {strides = array<i32>} : memref<1x18x18x8xf32, #tpu.memory_space<vmem>>, vector<1x18x1x8xf32>,
    %c0_23 = arith.constant 0 : index
    %c0_24 = arith.constant 0 : index
    %c17_25 = arith.constant 17 : index
    %c0_26 = arith.constant 0 : index
    %18 = vector.load %arg7[%c0_23, %c0_24, %c17_25, %c0_26] : memref<1x18x18x8xf32, #tpu.memory_space<vmem>>, vector<1x18x1x8xf32>
    tpu.vector_store %arg7[%c0_23, %c0_24, %c17_25, %c0_26], %16 {strides = array<i32>} : memref<1x18x18x8xf32, #tpu.memory_space<vmem>>, vector<1x18x1x8xf32>,
    %c0_27 = arith.constant 0 : index
    %c0_28 = arith.constant 0 : index
    %c0_29 = arith.constant 0 : index
    %c0_30 = arith.constant 0 : index
    %19 = vector.load %arg7[%c0_27, %c0_28, %c0_29, %c0_30] : memref<1x18x18x8xf32, #tpu.memory_space<vmem>>, vector<1x16x16x8xf32>
    %20 = arith.truncf %19 : vector<1x16x16x8xf32> to vector<1x16x16x8xbf16>
    %c0_31 = arith.constant 0 : index
    %c0_32 = arith.constant 0 : index
    %c0_33 = arith.constant 0 : index
    %c0_34 = arith.constant 0 : index
    %21 = vector.load %arg8[%c0_31, %c0_32, %c0_33, %c0_34] : memref<1x16x16x72xbf16, #tpu.memory_space<vmem>>, vector<1x16x16x8xbf16>
    tpu.vector_store %arg8[%c0_31, %c0_32, %c0_33, %c0_34], %20 {strides = array<i32>} : memref<1x16x16x72xbf16, #tpu.memory_space<vmem>>, vector<1x16x16x8xbf16>,
    %c0_35 = arith.constant 0 : index
    %c0_36 = arith.constant 0 : index
    %c1_37 = arith.constant 1 : index
    %c0_38 = arith.constant 0 : index
    %22 = vector.load %arg7[%c0_35, %c0_36, %c1_37, %c0_38] : memref<1x18x18x8xf32, #tpu.memory_space<vmem>>, vector<1x16x16x8xf32>
    %23 = arith.truncf %22 : vector<1x16x16x8xf32> to vector<1x16x16x8xbf16>
    %c0_39 = arith.constant 0 : index
    %c0_40 = arith.constant 0 : index
    %c0_41 = arith.constant 0 : index
    %c8 = arith.constant 8 : index
    %24 = vector.load %arg8[%c0_39, %c0_40, %c0_41, %c8] : memref<1x16x16x72xbf16, #tpu.memory_space<vmem>>, vector<1x16x16x8xbf16>
    tpu.vector_store %arg8[%c0_39, %c0_40, %c0_41, %c8], %23 {strides = array<i32>} : memref<1x16x16x72xbf16, #tpu.memory_space<vmem>>, vector<1x16x16x8xbf16>,
    %c0_42 = arith.constant 0 : index
    %c0_43 = arith.constant 0 : index
    %c2 = arith.constant 2 : index
    %c0_44 = arith.constant 0 : index
    %25 = vector.load %arg7[%c0_42, %c0_43, %c2, %c0_44] : memref<1x18x18x8xf32, #tpu.memory_space<vmem>>, vector<1x16x16x8xf32>
    %26 = arith.truncf %25 : vector<1x16x16x8xf32> to vector<1x16x16x8xbf16>
    %c0_45 = arith.constant 0 : index
    %c0_46 = arith.constant 0 : index
    %c0_47 = arith.constant 0 : index
    %c16 = arith.constant 16 : index
    %27 = vector.load %arg8[%c0_45, %c0_46, %c0_47, %c16] : memref<1x16x16x72xbf16, #tpu.memory_space<vmem>>, vector<1x16x16x8xbf16>
    tpu.vector_store %arg8[%c0_45, %c0_46, %c0_47, %c16], %26 {strides = array<i32>} : memref<1x16x16x72xbf16, #tpu.memory_space<vmem>>, vector<1x16x16x8xbf16>,
    %c0_48 = arith.constant 0 : index
    %c1_49 = arith.constant 1 : index
    %c0_50 = arith.constant 0 : index
    %c0_51 = arith.constant 0 : index
    %28 = vector.load %arg7[%c0_48, %c1_49, %c0_50, %c0_51] : memref<1x18x18x8xf32, #tpu.memory_space<vmem>>, vector<1x16x16x8xf32>
    %29 = arith.truncf %28 : vector<1x16x16x8xf32> to vector<1x16x16x8xbf16>
    %c0_52 = arith.constant 0 : index
    %c0_53 = arith.constant 0 : index
    %c0_54 = arith.constant 0 : index
    %c24 = arith.constant 24 : index
    %30 = vector.load %arg8[%c0_52, %c0_53, %c0_54, %c24] : memref<1x16x16x72xbf16, #tpu.memory_space<vmem>>, vector<1x16x16x8xbf16>
    tpu.vector_store %arg8[%c0_52, %c0_53, %c0_54, %c24], %29 {strides = array<i32>} : memref<1x16x16x72xbf16, #tpu.memory_space<vmem>>, vector<1x16x16x8xbf16>,
    %c0_55 = arith.constant 0 : index
    %c1_56 = arith.constant 1 : index
    %c1_57 = arith.constant 1 : index
    %c0_58 = arith.constant 0 : index
    %31 = vector.load %arg7[%c0_55, %c1_56, %c1_57, %c0_58] : memref<1x18x18x8xf32, #tpu.memory_space<vmem>>, vector<1x16x16x8xf32>
    %32 = arith.truncf %31 : vector<1x16x16x8xf32> to vector<1x16x16x8xbf16>
    %c0_59 = arith.constant 0 : index
    %c0_60 = arith.constant 0 : index
    %c0_61 = arith.constant 0 : index
    %c32 = arith.constant 32 : index
    %33 = vector.load %arg8[%c0_59, %c0_60, %c0_61, %c32] : memref<1x16x16x72xbf16, #tpu.memory_space<vmem>>, vector<1x16x16x8xbf16>
    tpu.vector_store %arg8[%c0_59, %c0_60, %c0_61, %c32], %32 {strides = array<i32>} : memref<1x16x16x72xbf16, #tpu.memory_space<vmem>>, vector<1x16x16x8xbf16>,
    %c0_62 = arith.constant 0 : index
    %c1_63 = arith.constant 1 : index
    %c2_64 = arith.constant 2 : index
    %c0_65 = arith.constant 0 : index
    %34 = vector.load %arg7[%c0_62, %c1_63, %c2_64, %c0_65] : memref<1x18x18x8xf32, #tpu.memory_space<vmem>>, vector<1x16x16x8xf32>
    %35 = arith.truncf %34 : vector<1x16x16x8xf32> to vector<1x16x16x8xbf16>
    %c0_66 = arith.constant 0 : index
    %c0_67 = arith.constant 0 : index
    %c0_68 = arith.constant 0 : index
    %c40 = arith.constant 40 : index
    %36 = vector.load %arg8[%c0_66, %c0_67, %c0_68, %c40] : memref<1x16x16x72xbf16, #tpu.memory_space<vmem>>, vector<1x16x16x8xbf16>
    tpu.vector_store %arg8[%c0_66, %c0_67, %c0_68, %c40], %35 {strides = array<i32>} : memref<1x16x16x72xbf16, #tpu.memory_space<vmem>>, vector<1x16x16x8xbf16>,
    %c0_69 = arith.constant 0 : index
    %c2_70 = arith.constant 2 : index
    %c0_71 = arith.constant 0 : index
    %c0_72 = arith.constant 0 : index
    %37 = vector.load %arg7[%c0_69, %c2_70, %c0_71, %c0_72] : memref<1x18x18x8xf32, #tpu.memory_space<vmem>>, vector<1x16x16x8xf32>
    %38 = arith.truncf %37 : vector<1x16x16x8xf32> to vector<1x16x16x8xbf16>
    %c0_73 = arith.constant 0 : index
    %c0_74 = arith.constant 0 : index
    %c0_75 = arith.constant 0 : index
    %c48 = arith.constant 48 : index
    %39 = vector.load %arg8[%c0_73, %c0_74, %c0_75, %c48] : memref<1x16x16x72xbf16, #tpu.memory_space<vmem>>, vector<1x16x16x8xbf16>
    tpu.vector_store %arg8[%c0_73, %c0_74, %c0_75, %c48], %38 {strides = array<i32>} : memref<1x16x16x72xbf16, #tpu.memory_space<vmem>>, vector<1x16x16x8xbf16>,
    %c0_76 = arith.constant 0 : index
    %c2_77 = arith.constant 2 : index
    %c1_78 = arith.constant 1 : index
    %c0_79 = arith.constant 0 : index
    %40 = vector.load %arg7[%c0_76, %c2_77, %c1_78, %c0_79] : memref<1x18x18x8xf32, #tpu.memory_space<vmem>>, vector<1x16x16x8xf32>
    %41 = arith.truncf %40 : vector<1x16x16x8xf32> to vector<1x16x16x8xbf16>
    %c0_80 = arith.constant 0 : index
    %c0_81 = arith.constant 0 : index
    %c0_82 = arith.constant 0 : index
    %c56 = arith.constant 56 : index
    %42 = vector.load %arg8[%c0_80, %c0_81, %c0_82, %c56] : memref<1x16x16x72xbf16, #tpu.memory_space<vmem>>, vector<1x16x16x8xbf16>
    tpu.vector_store %arg8[%c0_80, %c0_81, %c0_82, %c56], %41 {strides = array<i32>} : memref<1x16x16x72xbf16, #tpu.memory_space<vmem>>, vector<1x16x16x8xbf16>,
    %c0_83 = arith.constant 0 : index
    %c2_84 = arith.constant 2 : index
    %c2_85 = arith.constant 2 : index
    %c0_86 = arith.constant 0 : index
    %43 = vector.load %arg7[%c0_83, %c2_84, %c2_85, %c0_86] : memref<1x18x18x8xf32, #tpu.memory_space<vmem>>, vector<1x16x16x8xf32>
    %44 = arith.truncf %43 : vector<1x16x16x8xf32> to vector<1x16x16x8xbf16>
    %c0_87 = arith.constant 0 : index
    %c0_88 = arith.constant 0 : index
    %c0_89 = arith.constant 0 : index
    %c64 = arith.constant 64 : index
    %45 = vector.load %arg8[%c0_87, %c0_88, %c0_89, %c64] : memref<1x16x16x72xbf16, #tpu.memory_space<vmem>>, vector<1x16x16x8xbf16>
    tpu.vector_store %arg8[%c0_87, %c0_88, %c0_89, %c64], %44 {strides = array<i32>} : memref<1x16x16x72xbf16, #tpu.memory_space<vmem>>, vector<1x16x16x8xbf16>,
    %c0_90 = arith.constant 0 : index
    %c0_91 = arith.constant 0 : index
    %c0_92 = arith.constant 0 : index
    %c0_93 = arith.constant 0 : index
    %46 = vector.load %arg8[%c0_90, %c0_91, %c0_92, %c0_93] : memref<1x16x16x72xbf16, #tpu.memory_space<vmem>>, vector<1x16x16x72xbf16>
    %47 = vector.shape_cast %46 : vector<1x16x16x72xbf16> to vector<256x72xbf16>
    %c0_94 = arith.constant 0 : index
    %c0_95 = arith.constant 0 : index
    %48 = vector.load %arg4[%c0_94, %c0_95] : memref<72x8xbf16, #tpu.memory_space<vmem>>, vector<72x8xbf16>
    %cst_96 = arith.constant dense<0.000000e+00> : vector<256x8xf32>
    %49 = tpu.matmul %47, %48, %cst_96 {dimension_numbers = #tpu.dot_dimension_numbers<[1], [0], [0], [1], [0, 0, 1, 1], [], []>} : vector<256x72xbf16>, vector<72x8xbf16>, vector<256x8xf32> -> vector<256x8xf32>
    %50 = vector.shape_cast %49 : vector<256x8xf32> to vector<1x16x16x8xf32>
    %51 = arith.truncf %50 : vector<1x16x16x8xf32> to vector<1x16x16x8xbf16>
    %c0_97 = arith.constant 0 : index
    %c0_98 = arith.constant 0 : index
    %c0_99 = arith.constant 0 : index
    %c0_100 = arith.constant 0 : index
    %52 = vector.load %arg5[%c0_97, %c0_98, %c0_99, %c0_100] : memref<1x16x16x8xbf16, #tpu.memory_space<vmem>>, vector<1x16x16x8xbf16>
    tpu.vector_store %arg5[%c0_97, %c0_98, %c0_99, %c0_100], %51 {strides = array<i32>} : memref<1x16x16x8xbf16, #tpu.memory_space<vmem>>, vector<1x16x16x8xbf16>,
    %cst_101 = arith.constant dense<0.000000e+00> : vector<8xf32>
    %53 = vector.multi_reduction <add>, %49, %cst_101 [0] : vector<256x8xf32> to vector<8xf32>
    %54 = vector.shape_cast %53 : vector<8xf32> to vector<1x8xf32>
    %55 = vector.shape_cast %54 : vector<1x8xf32> to vector<1x1x8xf32>
    %c0_102 = arith.constant 0 : index
    %c0_103 = arith.constant 0 : index
    %c0_104 = arith.constant 0 : index
    %56 = vector.load %arg6[%c0_102, %c0_103, %c0_104] : memref<1x2x8xf32, #tpu.memory_space<vmem>>, vector<1x1x8xf32>
    tpu.vector_store %arg6[%c0_102, %c0_103, %c0_104], %55 {strides = array<i32>} : memref<1x2x8xf32, #tpu.memory_space<vmem>>, vector<1x1x8xf32>,
    %57 = arith.mulf %49, %49 : vector<256x8xf32>
    %cst_105 = arith.constant dense<0.000000e+00> : vector<8xf32>
    %58 = vector.multi_reduction <add>, %57, %cst_105 [0] : vector<256x8xf32> to vector<8xf32>
    %59 = vector.shape_cast %58 : vector<8xf32> to vector<1x8xf32>
    %60 = vector.shape_cast %59 : vector<1x8xf32> to vector<1x1x8xf32>
    %c0_106 = arith.constant 0 : index
    %c1_107 = arith.constant 1 : index
    %c0_108 = arith.constant 0 : index
    %61 = vector.load %arg6[%c0_106, %c1_107, %c0_108] : memref<1x2x8xf32, #tpu.memory_space<vmem>>, vector<1x1x8xf32>
    tpu.vector_store %arg6[%c0_106, %c1_107, %c0_108], %60 {strides = array<i32>} : memref<1x2x8xf32, #tpu.memory_space<vmem>>, vector<1x1x8xf32>,
    return
  }
  func.func @transform_0(%arg0: i32) -> (i32, i32, i32, i32) {
    %c0_i32 = arith.constant 0 : i32
    %c0_i32_0 = arith.constant 0 : i32
    %c0_i32_1 = arith.constant 0 : i32
    %c0_i32_2 = arith.constant 0 : i32
    return %arg0, %c0_i32, %c0_i32_0, %c0_i32_1 : i32, i32, i32, i32
  }
  func.func @transform_1(%arg0: i32) -> (i32, i32) {
    %c0_i32 = arith.constant 0 : i32
    %c0_i32_0 = arith.constant 0 : i32
    %c0_i32_1 = arith.constant 0 : i32
    return %c0_i32, %c0_i32_0 : i32, i32
  }
  func.func @transform_2(%arg0: i32) -> (i32, i32) {
    %c0_i32 = arith.constant 0 : i32
    %c0_i32_0 = arith.constant 0 : i32
    %c0_i32_1 = arith.constant 0 : i32
    return %c0_i32, %c0_i32_0 : i32, i32
  }
  func.func @transform_3(%arg0: i32) -> (i32, i32) {
    %c0_i32 = arith.constant 0 : i32
    %c0_i32_0 = arith.constant 0 : i32
    %c0_i32_1 = arith.constant 0 : i32
    return %c0_i32, %c0_i32_0 : i32, i32
  }
  func.func @transform_4(%arg0: i32) -> (i32, i32, i32, i32) {
    %c0_i32 = arith.constant 0 : i32
    %c0_i32_0 = arith.constant 0 : i32
    %c0_i32_1 = arith.constant 0 : i32
    %c0_i32_2 = arith.constant 0 : i32
    return %arg0, %c0_i32, %c0_i32_0, %c0_i32_1 : i32, i32, i32, i32
  }
  func.func @transform_5(%arg0: i32) -> (i32, i32, i32) {
    %c0_i32 = arith.constant 0 : i32
    %c0_i32_0 = arith.constant 0 : i32
    %c0_i32_1 = arith.constant 0 : i32
    return %arg0, %c0_i32, %c0_i32_0 : i32, i32, i32
  }
}

module attributes {stable_mosaic.version = 11 : i64} {
  func.func @_add_relu_kernel(%arg0: i32, %arg1: memref<1x16x16x8xbf16, #tpu.memory_space<vmem>>, %arg2: memref<1x16x16x8xbf16, #tpu.memory_space<vmem>>, %arg3: memref<1x8xf32, #tpu.memory_space<vmem>>, %arg4: memref<1x8xf32, #tpu.memory_space<vmem>>, %arg5: memref<1x8xf32, #tpu.memory_space<vmem>>, %arg6: memref<1x8xf32, #tpu.memory_space<vmem>>, %arg7: memref<1x16x16x8xf32, #tpu.memory_space<vmem>>) attributes {dimension_semantics = [#tpu.dimension_semantics<parallel>], iteration_bounds = array<i64: 2>, scalar_prefetch = 0 : i64, scratch_operands = 0 : i64, tpu.core_type = #tpu.core_type<tc>, window_params = [{transform_indices = @transform_0, window_bounds = array<i64: 1, 16, 16, 8>}, {transform_indices = @transform_1, window_bounds = array<i64: 1, 16, 16, 8>}, {pipeline_mode = #tpu.pipeline_mode<synchronous>, transform_indices = @transform_2, window_bounds = array<i64: 1, 8>}, {pipeline_mode = #tpu.pipeline_mode<synchronous>, transform_indices = @transform_3, window_bounds = array<i64: 1, 8>}, {pipeline_mode = #tpu.pipeline_mode<synchronous>, transform_indices = @transform_4, window_bounds = array<i64: 1, 8>}, {pipeline_mode = #tpu.pipeline_mode<synchronous>, transform_indices = @transform_5, window_bounds = array<i64: 1, 8>}, {transform_indices = @transform_6, window_bounds = array<i64: 1, 16, 16, 8>}]} {
    %c0 = arith.constant 0 : index
    %c0_0 = arith.constant 0 : index
    %c0_1 = arith.constant 0 : index
    %c0_2 = arith.constant 0 : index
    %0 = vector.load %arg1[%c0, %c0_0, %c0_1, %c0_2] : memref<1x16x16x8xbf16, #tpu.memory_space<vmem>>, vector<1x16x16x8xbf16>
    %1 = arith.extf %0 : vector<1x16x16x8xbf16> to vector<1x16x16x8xf32>
    %c0_3 = arith.constant 0 : index
    %c0_4 = arith.constant 0 : index
    %2 = vector.load %arg3[%c0_3, %c0_4] : memref<1x8xf32, #tpu.memory_space<vmem>>, vector<1x8xf32>
    %3 = vector.shape_cast %2 : vector<1x8xf32> to vector<1x1x1x8xf32>
    %4 = vector.broadcast %3 : vector<1x1x1x8xf32> to vector<1x16x16x8xf32>
    %5 = arith.mulf %1, %4 : vector<1x16x16x8xf32>
    %c0_5 = arith.constant 0 : index
    %c0_6 = arith.constant 0 : index
    %6 = vector.load %arg4[%c0_5, %c0_6] : memref<1x8xf32, #tpu.memory_space<vmem>>, vector<1x8xf32>
    %7 = vector.shape_cast %6 : vector<1x8xf32> to vector<1x1x1x8xf32>
    %8 = vector.broadcast %7 : vector<1x1x1x8xf32> to vector<1x16x16x8xf32>
    %9 = arith.addf %5, %8 : vector<1x16x16x8xf32>
    %c0_7 = arith.constant 0 : index
    %c0_8 = arith.constant 0 : index
    %c0_9 = arith.constant 0 : index
    %c0_10 = arith.constant 0 : index
    %10 = vector.load %arg2[%c0_7, %c0_8, %c0_9, %c0_10] : memref<1x16x16x8xbf16, #tpu.memory_space<vmem>>, vector<1x16x16x8xbf16>
    %11 = arith.extf %10 : vector<1x16x16x8xbf16> to vector<1x16x16x8xf32>
    %c0_11 = arith.constant 0 : index
    %c0_12 = arith.constant 0 : index
    %12 = vector.load %arg5[%c0_11, %c0_12] : memref<1x8xf32, #tpu.memory_space<vmem>>, vector<1x8xf32>
    %13 = vector.shape_cast %12 : vector<1x8xf32> to vector<1x1x1x8xf32>
    %14 = vector.broadcast %13 : vector<1x1x1x8xf32> to vector<1x16x16x8xf32>
    %15 = arith.mulf %11, %14 : vector<1x16x16x8xf32>
    %c0_13 = arith.constant 0 : index
    %c0_14 = arith.constant 0 : index
    %16 = vector.load %arg6[%c0_13, %c0_14] : memref<1x8xf32, #tpu.memory_space<vmem>>, vector<1x8xf32>
    %17 = vector.shape_cast %16 : vector<1x8xf32> to vector<1x1x1x8xf32>
    %18 = vector.broadcast %17 : vector<1x1x1x8xf32> to vector<1x16x16x8xf32>
    %19 = arith.addf %15, %18 : vector<1x16x16x8xf32>
    %20 = arith.addf %9, %19 : vector<1x16x16x8xf32>
    %cst = arith.constant 0.000000e+00 : f32
    %21 = vector.broadcast %cst : f32 to vector<1x16x16x8xf32>
    %22 = arith.maximumf %20, %21 : vector<1x16x16x8xf32>
    %c0_15 = arith.constant 0 : index
    %c0_16 = arith.constant 0 : index
    %c0_17 = arith.constant 0 : index
    %c0_18 = arith.constant 0 : index
    %23 = vector.load %arg7[%c0_15, %c0_16, %c0_17, %c0_18] : memref<1x16x16x8xf32, #tpu.memory_space<vmem>>, vector<1x16x16x8xf32>
    tpu.vector_store %arg7[%c0_15, %c0_16, %c0_17, %c0_18], %22 {strides = array<i32>} : memref<1x16x16x8xf32, #tpu.memory_space<vmem>>, vector<1x16x16x8xf32>,
    return
  }
  func.func @transform_0(%arg0: i32) -> (i32, i32, i32, i32) {
    %c0_i32 = arith.constant 0 : i32
    %c0_i32_0 = arith.constant 0 : i32
    %c0_i32_1 = arith.constant 0 : i32
    %c0_i32_2 = arith.constant 0 : i32
    return %arg0, %c0_i32, %c0_i32_0, %c0_i32_1 : i32, i32, i32, i32
  }
  func.func @transform_1(%arg0: i32) -> (i32, i32, i32, i32) {
    %c0_i32 = arith.constant 0 : i32
    %c0_i32_0 = arith.constant 0 : i32
    %c0_i32_1 = arith.constant 0 : i32
    %c0_i32_2 = arith.constant 0 : i32
    return %arg0, %c0_i32, %c0_i32_0, %c0_i32_1 : i32, i32, i32, i32
  }
  func.func @transform_2(%arg0: i32) -> (i32, i32) {
    %c0_i32 = arith.constant 0 : i32
    %c0_i32_0 = arith.constant 0 : i32
    %c0_i32_1 = arith.constant 0 : i32
    return %c0_i32, %c0_i32_0 : i32, i32
  }
  func.func @transform_3(%arg0: i32) -> (i32, i32) {
    %c0_i32 = arith.constant 0 : i32
    %c0_i32_0 = arith.constant 0 : i32
    %c0_i32_1 = arith.constant 0 : i32
    return %c0_i32, %c0_i32_0 : i32, i32
  }
  func.func @transform_4(%arg0: i32) -> (i32, i32) {
    %c0_i32 = arith.constant 0 : i32
    %c0_i32_0 = arith.constant 0 : i32
    %c0_i32_1 = arith.constant 0 : i32
    return %c0_i32, %c0_i32_0 : i32, i32
  }
  func.func @transform_5(%arg0: i32) -> (i32, i32) {
    %c0_i32 = arith.constant 0 : i32
    %c0_i32_0 = arith.constant 0 : i32
    %c0_i32_1 = arith.constant 0 : i32
    return %c0_i32, %c0_i32_0 : i32, i32
  }
  func.func @transform_6(%arg0: i32) -> (i32, i32, i32, i32) {
    %c0_i32 = arith.constant 0 : i32
    %c0_i32_0 = arith.constant 0 : i32
    %c0_i32_1 = arith.constant 0 : i32
    %c0_i32_2 = arith.constant 0 : i32
    return %arg0, %c0_i32, %c0_i32_0, %c0_i32_1 : i32, i32, i32, i32
  }
}

</mosaic_0001>

<bundles_post_ra>
// kernel: resblock_forward_nchw.5
= control target key start
LH: loop header
LB: loop body
LE: loop exit
PB: predicated region body
PF: predicated region fallthrough
CT: control target
= control target key end

     0   :  { %s949_s21 = smov 0   ;;  %s1223_s0 = inlined_call_operand.vmem [shape: bf16[2,16,16,8], index: 0, kind: input, shape index: {}]   ;;  %s1224_s1 = inlined_call_operand.vmem [shape: bf16[2,16,16,8], index: 1, kind: input, shape index: {}]   ;;  %s1225_s2 = inlined_call_operand.vmem [shape: f32[1,8], index: 2, kind: input, shape index: {}]   ;;  %s1226_s3 = inlined_call_operand.vmem [shape: f32[1,8], index: 3, kind: input, shape index: {}]   ;;  %s1227_s4 = inlined_call_operand.vmem [shape: f32[1,8], index: 4, kind: input, shape index: {}]   ;;  %s1228_s5 = inlined_call_operand.vmem [shape: f32[1,8], index: 5, kind: input, shape index: {}]   ;;  %s1229_s6 = inlined_call_operand.vmem [shape: f32[2,16,16,8], index: 6, kind: output, shape index: {}]  }
   0x1 LB: > { %s720_s22 = sadd.s32 4294967295, %s912_s21   ;;  %p724_p0 = scmp.ge.s32.totalorder %s912_s21, 1  ;;  %s912_s21 = sphi %s949_s21, %s16_s21  }
   0x2   : > { %p222_p1 = scmp.lt.s32.totalorder %s912_s21, 3 }
   0x4   : > { %p223_p2 = pnand %p724_p0, %p222_p1 }
   0x5   : > { %p257_p3 = scmp.lt.s32.totalorder (!%p223_p2), %s720_s22, 1 }
   0x6   : > { %226 = sbr.rel (%p223_p2) target bundleno = 86 (0x56), region = 44 }
   0xb   : > { %s1231_s22 = smov (!%p257_p3, %s720_s22), 1  ;;  %v973_v0 = vld [vmem:[%s1225_s2] ss:$0 sm:$0xff]  ;;  %vm620_vm0 = vcmask 64512  }
   0xc   : > { %s737_s23 = sshll.u32 %s1231_s22, 7  ;;  %v978_v1 = vld [vmem:[%s1227_s4] ss:$0 sm:$0xff]  ;;  %s739_s14 = sshll.u32 %s1231_s22, 8 }
   0xd   : > { %s963_s26 = scalar_lea.vmem %s1223_s0, %s737_s23  ;;  %s968_s29 = scalar_lea.vmem %s1224_s1, %s737_s23  ;;  %v987_v10 = vld [vmem:[%s1226_s3] ss:$0 sm:$0xff] }
   0xe   : > { %v741_v2 = vld [vmem:[%s963_s26] sm:$0xff]   ;;  %v868_v4 = vld [vmem:[%s963_s26 + $0x8] sm:$0xff]   ;;  %v869_v24 = vld [vmem:[%s963_s26 + $0x10] sm:$0xff]   ;;  %s1016_s17 = scalar_lea.vmem %s1229_s6, %s739_s14 }
   0xf   : > { %v805_v3 = vld [vmem:[%s968_s29] sm:$0xff]   ;;  %v742_v5 = vunpack.c.l.bf16 %v741_v2  ;;  %v743_v7 = vunpack.c.h.bf16 %v741_v2  ;;  %v883_v9 = vld [vmem:[%s968_s29 + $0x8] sm:$0xff]   ;;  %v746_v12 = vunpack.c.l.bf16 %v868_v4  ;;  %v747_v14 = vunpack.c.h.bf16 %v868_v4  ;;  %v884_v25 = vld [vmem:[%s968_s29 + $0x10] sm:$0xff]  }
  0x10   : > { %v806_v6 = vunpack.c.l.bf16 %v805_v3  ;;  %v807_v8 = vunpack.c.h.bf16 %v805_v3  ;;  %v992_v11 = vld [vmem:[%s1228_s5] ss:$0 sm:$0xff]  ;;  %v810_v13 = vunpack.c.l.bf16 %v883_v9  ;;  %v811_v15 = vunpack.c.h.bf16 %v883_v9  ;;  %v870_v42 = vld [vmem:[%s963_s26 + $0x18] sm:$0xff]  }
  0x11   : > { %v343_v16 = vmul.f32 %v742_v5, %v973_v0  ;;  %v344_v18 = vmul.f32 %v743_v7, %v973_v0  ;;  %v345_v20 = vmul.f32 %v746_v12, %v973_v0  ;;  %v346_v22 = vmul.f32 %v747_v14, %v973_v0  ;;  %v885_v43 = vld [vmem:[%s968_s29 + $0x18] sm:$0xff]   ;;  %v871_v52 = vld [vmem:[%s963_s26 + $0x20] sm:$0xff]   ;;  %v872_v14 = vld [vmem:[%s963_s26 + $0x28] sm:$0xff]  }
  0x12   : > { %v485_v17 = vmul.f32 %v806_v6, %v978_v1  ;;  %v486_v19 = vmul.f32 %v807_v8, %v978_v1  ;;  %v487_v21 = vmul.f32 %v810_v13, %v978_v1  ;;  %v488_v23 = vmul.f32 %v811_v15, %v978_v1  ;;  %v886_v57 = vld [vmem:[%s968_s29 + $0x20] sm:$0xff]   ;;  %v887_v15 = vld [vmem:[%s968_s29 + $0x28] sm:$0xff]  }
  0x13   : > { %v382_v26 = vadd.f32 %v987_v10, %v343_v16  ;;  %v383_v28 = vadd.f32 %v987_v10, %v344_v18  ;;  %v384_v30 = vadd.f32 %v987_v10, %v345_v20  ;;  %v385_v32 = vadd.f32 %v987_v10, %v346_v22 }
  0x14   : > { %v524_v27 = vadd.f32 %v992_v11, %v485_v17  ;;  %v525_v29 = vadd.f32 %v992_v11, %v486_v19  ;;  %v526_v31 = vadd.f32 %v992_v11, %v487_v21  ;;  %v527_v33 = vadd.f32 %v992_v11, %v488_v23 }
  0x15   : > { %v750_v36 = vunpack.c.l.bf16 %v869_v24  ;;  %v814_v37 = vunpack.c.l.bf16 %v884_v25  ;;  %v751_v40 = vunpack.c.h.bf16 %v869_v24  ;;  %v815_v41 = vunpack.c.h.bf16 %v884_v25 }
  0x16   : > { %v556_v34 = vadd.f32 %v524_v27, %v382_v26  ;;  %v557_v35 = vadd.f32 %v525_v29, %v383_v28  ;;  %v558_v38 = vadd.f32 %v526_v31, %v384_v30  ;;  %v559_v39 = vadd.f32 %v527_v33, %v385_v32  ;;  %v873_v32 = vld [vmem:[%s963_s26 + $0x30] sm:$0xff]  }
  0x17   : > { %v347_v46 = vmul.f32 %v750_v36, %v973_v0  ;;  %v489_v47 = vmul.f32 %v814_v37, %v978_v1  ;;  %v348_v50 = vmul.f32 %v751_v40, %v973_v0  ;;  %v490_v51 = vmul.f32 %v815_v41, %v978_v1  ;;  %v888_v37 = vld [vmem:[%s968_s29 + $0x30] sm:$0xff]  }
  0x18   : > { %v588_v44 = vmax.f32 %v556_v34, 0.0  ;;  %v589_v45 = vmax.f32 %v557_v35, 0.0  ;;  %v590_v48 = vmax.f32 %v558_v38, 0.0  ;;  %v591_v49 = vmax.f32 %v559_v39, 0.0 }
  0x19   : > { %v386_v53 = vadd.f32 %v987_v10, %v347_v46  ;;  %v528_v54 = vadd.f32 %v992_v11, %v489_v47  ;;  %v754_v55 = vunpack.c.l.bf16 %v870_v42  ;;  %v818_v56 = vunpack.c.l.bf16 %v885_v43  ;;  %v874_v46 = vld [vmem:[%s963_s26 + $0x38] sm:$0xff]  }
  0x1a   : > { %621 = vst.msk [vmem:[%s1016_s17] sm:$0xff] %vm620_vm0, %v588_v44  ;;  %622 = vst.msk [vmem:[%s1016_s17 + $0x8] sm:$0xff] %vm620_vm0, %v589_v45  ;;  %v387_v58 = vadd.f32 %v987_v10, %v348_v50  ;;  %v529_v59 = vadd.f32 %v992_v11, %v490_v51  ;;  %v755_v60 = vunpack.c.h.bf16 %v870_v42  ;;  %v819_v61 = vunpack.c.h.bf16 %v885_v43 }
  0x1b   : > { %623 = vst.msk [vmem:[%s1016_s17 + $0x10] sm:$0xff] %vm620_vm0, %v590_v48  ;;  %624 = vst.msk [vmem:[%s1016_s17 + $0x18] sm:$0xff] %vm620_vm0, %v591_v49  ;;  %v560_v62 = vadd.f32 %v528_v54, %v386_v53  ;;  %v349_v63 = vmul.f32 %v754_v55, %v973_v0  ;;  %v491_v2 = vmul.f32 %v818_v56, %v978_v1  ;;  %v758_v3 = vunpack.c.l.bf16 %v871_v52  ;;  %v889_v55 = vld [vmem:[%s968_s29 + $0x38] sm:$0xff]  }
  0x1c   : > { %v561_v4 = vadd.f32 %v529_v59, %v387_v58  ;;  %v350_v5 = vmul.f32 %v755_v60, %v973_v0  ;;  %v492_v6 = vmul.f32 %v819_v61, %v978_v1  ;;  %v822_v7 = vunpack.c.l.bf16 %v886_v57 }
  0x1d   : > { %v592_v8 = vmax.f32 %v560_v62, 0.0  ;;  %v388_v9 = vadd.f32 %v987_v10, %v349_v63  ;;  %v530_v12 = vadd.f32 %v992_v11, %v491_v2  ;;  %v351_v13 = vmul.f32 %v758_v3, %v973_v0 }
  0x1e   : > { %v593_v16 = vmax.f32 %v561_v4, 0.0  ;;  %v389_v17 = vadd.f32 %v987_v10, %v350_v5  ;;  %v531_v18 = vadd.f32 %v992_v11, %v492_v6  ;;  %v493_v19 = vmul.f32 %v822_v7, %v978_v1  ;;  %v875_v6 = vld [vmem:[%s963_s26 + $0x40] sm:$0xff]  }
  0x1f   : > { %625 = vst.msk [vmem:[%s1016_s17 + $0x20] sm:$0xff] %vm620_vm0, %v592_v8  ;;  %v562_v20 = vadd.f32 %v530_v12, %v388_v9  ;;  %v390_v21 = vadd.f32 %v987_v10, %v351_v13  ;;  %v759_v22 = vunpack.c.h.bf16 %v871_v52  ;;  %v823_v23 = vunpack.c.h.bf16 %v886_v57  ;;  %v890_v13 = vld [vmem:[%s968_s29 + $0x40] sm:$0xff]  }
  0x20   : > { %626 = vst.msk [vmem:[%s1016_s17 + $0x28] sm:$0xff] %vm620_vm0, %v593_v16  ;;  %v563_v24 = vadd.f32 %v531_v18, %v389_v17  ;;  %v532_v25 = vadd.f32 %v992_v11, %v493_v19  ;;  %v762_v26 = vunpack.c.l.bf16 %v872_v14  ;;  %v826_v27 = vunpack.c.l.bf16 %v887_v15 }
  0x21   : > { %v594_v28 = vmax.f32 %v562_v20, 0.0  ;;  %v352_v29 = vmul.f32 %v759_v22, %v973_v0  ;;  %v494_v30 = vmul.f32 %v823_v23, %v978_v1  ;;  %v763_v31 = vunpack.c.h.bf16 %v872_v14 }
  0x22   : > { %v595_v33 = vmax.f32 %v563_v24, 0.0  ;;  %v564_v34 = vadd.f32 %v532_v25, %v390_v21  ;;  %v353_v35 = vmul.f32 %v762_v26, %v973_v0  ;;  %v495_v36 = vmul.f32 %v826_v27, %v978_v1  ;;  %v876_v26 = vld [vmem:[%s963_s26 + $0x48] sm:$0xff]  }
  0x23   : > { %627 = vst.msk [vmem:[%s1016_s17 + $0x30] sm:$0xff] %vm620_vm0, %v594_v28  ;;  %v391_v38 = vadd.f32 %v987_v10, %v352_v29  ;;  %v533_v39 = vadd.f32 %v992_v11, %v494_v30  ;;  %v354_v40 = vmul.f32 %v763_v31, %v973_v0  ;;  %v827_v41 = vunpack.c.h.bf16 %v887_v15  ;;  %v891_v27 = vld [vmem:[%s968_s29 + $0x48] sm:$0xff]  }
  0x24   : > { %628 = vst.msk [vmem:[%s1016_s17 + $0x38] sm:$0xff] %vm620_vm0, %v595_v33  ;;  %v596_v42 = vmax.f32 %v564_v34, 0.0  ;;  %v392_v43 = vadd.f32 %v987_v10, %v353_v35  ;;  %v534_v44 = vadd.f32 %v992_v11, %v495_v36  ;;  %v766_v45 = vunpack.c.l.bf16 %v873_v32 }
  0x25   : > { %v565_v47 = vadd.f32 %v533_v39, %v391_v38  ;;  %v393_v48 = vadd.f32 %v987_v10, %v354_v40  ;;  %v496_v49 = vmul.f32 %v827_v41, %v978_v1  ;;  %v830_v50 = vunpack.c.l.bf16 %v888_v37  ;;  %v877_v40 = vld [vmem:[%s963_s26 + $0x50] sm:$0xff]  }
  0x26   : > { %629 = vst.msk [vmem:[%s1016_s17 + $0x40] sm:$0xff] %vm620_vm0, %v596_v42  ;;  %v566_v51 = vadd.f32 %v534_v44, %v392_v43  ;;  %v355_v52 = vmul.f32 %v766_v45, %v973_v0  ;;  %v767_v53 = vunpack.c.h.bf16 %v873_v32  ;;  %v831_v54 = vunpack.c.h.bf16 %v888_v37  ;;  %v892_v45 = vld [vmem:[%s968_s29 + $0x50] sm:$0xff]  }
  0x27   : > { %v597_v56 = vmax.f32 %v565_v47, 0.0  ;;  %v535_v57 = vadd.f32 %v992_v11, %v496_v49  ;;  %v497_v58 = vmul.f32 %v830_v50, %v978_v1  ;;  %v770_v59 = vunpack.c.l.bf16 %v874_v46 }
  0x28   : > { %v598_v60 = vmax.f32 %v566_v51, 0.0  ;;  %v394_v61 = vadd.f32 %v987_v10, %v355_v52  ;;  %v356_v62 = vmul.f32 %v767_v53, %v973_v0  ;;  %v498_v63 = vmul.f32 %v831_v54, %v978_v1 }
  0x29   : > { %630 = vst.msk [vmem:[%s1016_s17 + $0x48] sm:$0xff] %vm620_vm0, %v597_v56  ;;  %v567_v2 = vadd.f32 %v535_v57, %v393_v48  ;;  %v536_v3 = vadd.f32 %v992_v11, %v497_v58  ;;  %v357_v4 = vmul.f32 %v770_v59, %v973_v0  ;;  %v834_v5 = vunpack.c.l.bf16 %v889_v55 }
  0x2a   : > { %631 = vst.msk [vmem:[%s1016_s17 + $0x50] sm:$0xff] %vm620_vm0, %v598_v60  ;;  %v395_v7 = vadd.f32 %v987_v10, %v356_v62  ;;  %v537_v8 = vadd.f32 %v992_v11, %v498_v63  ;;  %v771_v9 = vunpack.c.h.bf16 %v874_v46  ;;  %v835_v12 = vunpack.c.h.bf16 %v889_v55  ;;  %v878_v62 = vld [vmem:[%s963_s26 + $0x58] sm:$0xff]  }
  0x2b   : > { %v599_v14 = vmax.f32 %v567_v2, 0.0  ;;  %v568_v15 = vadd.f32 %v536_v3, %v394_v61  ;;  %v396_v16 = vadd.f32 %v987_v10, %v357_v4  ;;  %v499_v17 = vmul.f32 %v834_v5, %v978_v1  ;;  %v893_v5 = vld [vmem:[%s968_s29 + $0x58] sm:$0xff]  }
  0x2c   : > { %v569_v18 = vadd.f32 %v537_v8, %v395_v7  ;;  %v358_v19 = vmul.f32 %v771_v9, %v973_v0  ;;  %v500_v20 = vmul.f32 %v835_v12, %v978_v1  ;;  %v774_v21 = vunpack.c.l.bf16 %v875_v6 }
  0x2d   : > { %632 = vst.msk [vmem:[%s1016_s17 + $0x58] sm:$0xff] %vm620_vm0, %v599_v14  ;;  %v600_v22 = vmax.f32 %v568_v15, 0.0  ;;  %v538_v23 = vadd.f32 %v992_v11, %v499_v17  ;;  %v838_v24 = vunpack.c.l.bf16 %v890_v13  ;;  %v775_v25 = vunpack.c.h.bf16 %v875_v6 }
  0x2e   : > { %v601_v28 = vmax.f32 %v569_v18, 0.0  ;;  %v397_v29 = vadd.f32 %v987_v10, %v358_v19  ;;  %v539_v30 = vadd.f32 %v992_v11, %v500_v20  ;;  %v359_v31 = vmul.f32 %v774_v21, %v973_v0  ;;  %v879_v20 = vld [vmem:[%s963_s26 + $0x60] sm:$0xff]  }
  0x2f   : > { %633 = vst.msk [vmem:[%s1016_s17 + $0x60] sm:$0xff] %vm620_vm0, %v600_v22  ;;  %v570_v32 = vadd.f32 %v538_v23, %v396_v16  ;;  %v501_v33 = vmul.f32 %v838_v24, %v978_v1  ;;  %v360_v34 = vmul.f32 %v775_v25, %v973_v0  ;;  %v839_v35 = vunpack.c.h.bf16 %v890_v13  ;;  %v894_v25 = vld [vmem:[%s968_s29 + $0x60] sm:$0xff]  }
  0x30   : > { %634 = vst.msk [vmem:[%s1016_s17 + $0x68] sm:$0xff] %vm620_vm0, %v601_v28  ;;  %v571_v36 = vadd.f32 %v539_v30, %v397_v29  ;;  %v398_v37 = vadd.f32 %v987_v10, %v359_v31  ;;  %v778_v38 = vunpack.c.l.bf16 %v876_v26  ;;  %v842_v39 = vunpack.c.l.bf16 %v891_v27 }
  0x31   : > { %v602_v41 = vmax.f32 %v570_v32, 0.0  ;;  %v540_v42 = vadd.f32 %v992_v11, %v501_v33  ;;  %v399_v43 = vadd.f32 %v987_v10, %v360_v34  ;;  %v502_v44 = vmul.f32 %v839_v35, %v978_v1  ;;  %v880_v34 = vld [vmem:[%s963_s26 + $0x68] sm:$0xff]  }
  0x32   : > { %v603_v46 = vmax.f32 %v571_v36, 0.0  ;;  %v361_v47 = vmul.f32 %v778_v38, %v973_v0  ;;  %v503_v48 = vmul.f32 %v842_v39, %v978_v1  ;;  %v779_v49 = vunpack.c.h.bf16 %v876_v26 }
  0x33   : > { %635 = vst.msk [vmem:[%s1016_s17 + $0x70] sm:$0xff] %vm620_vm0, %v602_v41  ;;  %v572_v50 = vadd.f32 %v540_v42, %v398_v37  ;;  %v541_v51 = vadd.f32 %v992_v11, %v502_v44  ;;  %v843_v52 = vunpack.c.h.bf16 %v891_v27  ;;  %v782_v53 = vunpack.c.l.bf16 %v877_v40 }
  0x34   : > { %636 = vst.msk [vmem:[%s1016_s17 + $0x78] sm:$0xff] %vm620_vm0, %v603_v46  ;;  %v400_v54 = vadd.f32 %v987_v10, %v361_v47  ;;  %v542_v55 = vadd.f32 %v992_v11, %v503_v48  ;;  %v362_v56 = vmul.f32 %v779_v49, %v973_v0  ;;  %v846_v57 = vunpack.c.l.bf16 %v892_v45 }
  0x35   : > { %v604_v58 = vmax.f32 %v572_v50, 0.0  ;;  %v573_v59 = vadd.f32 %v541_v51, %v399_v43  ;;  %v504_v60 = vmul.f32 %v843_v52, %v978_v1  ;;  %v363_v61 = vmul.f32 %v782_v53, %v973_v0  ;;  %v895_v43 = vld [vmem:[%s968_s29 + $0x68] sm:$0xff]  }
  0x36   : > { %v574_v63 = vadd.f32 %v542_v55, %v400_v54  ;;  %v401_v2 = vadd.f32 %v987_v10, %v362_v56  ;;  %v505_v3 = vmul.f32 %v846_v57, %v978_v1  ;;  %v783_v4 = vunpack.c.h.bf16 %v877_v40  ;;  %v881_v56 = vld [vmem:[%s963_s26 + $0x70] sm:$0xff]  }
  0x37   : > { %637 = vst.msk [vmem:[%s1016_s17 + $0x80] sm:$0xff] %vm620_vm0, %v604_v58  ;;  %v605_v6 = vmax.f32 %v573_v59, 0.0  ;;  %v543_v7 = vadd.f32 %v992_v11, %v504_v60  ;;  %v402_v8 = vadd.f32 %v987_v10, %v363_v61  ;;  %v847_v9 = vunpack.c.h.bf16 %v892_v45  ;;  %v896_v57 = vld [vmem:[%s968_s29 + $0x70] sm:$0xff]  }
  0x38   : > { %v606_v12 = vmax.f32 %v574_v63, 0.0  ;;  %v544_v13 = vadd.f32 %v992_v11, %v505_v3  ;;  %v364_v14 = vmul.f32 %v783_v4, %v973_v0  ;;  %v786_v15 = vunpack.c.l.bf16 %v878_v62 }
  0x39   : > { %638 = vst.msk [vmem:[%s1016_s17 + $0x88] sm:$0xff] %vm620_vm0, %v605_v6  ;;  %v575_v16 = vadd.f32 %v543_v7, %v401_v2  ;;  %v506_v17 = vmul.f32 %v847_v9, %v978_v1  ;;  %v850_v18 = vunpack.c.l.bf16 %v893_v5  ;;  %v787_v19 = vunpack.c.h.bf16 %v878_v62 }
  0x3a   : > { %639 = vst.msk [vmem:[%s1016_s17 + $0x90] sm:$0xff] %vm620_vm0, %v606_v12  ;;  %v576_v21 = vadd.f32 %v544_v13, %v402_v8  ;;  %v403_v22 = vadd.f32 %v987_v10, %v364_v14  ;;  %v365_v23 = vmul.f32 %v786_v15, %v973_v0  ;;  %v851_v24 = vunpack.c.h.bf16 %v893_v5  ;;  %v882_v14 = vld [vmem:[%s963_s26 + $0x78] sm:$0xff]  }
  0x3b   : > { %v607_v26 = vmax.f32 %v575_v16, 0.0  ;;  %v545_v27 = vadd.f32 %v992_v11, %v506_v17  ;;  %v507_v28 = vmul.f32 %v850_v18, %v978_v1  ;;  %v366_v29 = vmul.f32 %v787_v19, %v973_v0  ;;  %v897_v15 = vld [vmem:[%s968_s29 + $0x78] sm:$0xff]  }
  0x3c   : > { %v608_v30 = vmax.f32 %v576_v21, 0.0  ;;  %v404_v31 = vadd.f32 %v987_v10, %v365_v23  ;;  %v508_v32 = vmul.f32 %v851_v24, %v978_v1  ;;  %v790_v33 = vunpack.c.l.bf16 %v879_v20 }
  0x3d   : > { %640 = vst.msk [vmem:[%s1016_s17 + $0x98] sm:$0xff] %vm620_vm0, %v607_v26  ;;  %v577_v35 = vadd.f32 %v545_v27, %v403_v22  ;;  %v546_v36 = vadd.f32 %v992_v11, %v507_v28  ;;  %v405_v37 = vadd.f32 %v987_v10, %v366_v29  ;;  %v854_v38 = vunpack.c.l.bf16 %v894_v25 }
  0x3e   : > { %641 = vst.msk [vmem:[%s1016_s17 + $0xa0] sm:$0xff] %vm620_vm0, %v608_v30  ;;  %v547_v39 = vadd.f32 %v992_v11, %v508_v32  ;;  %v367_v40 = vmul.f32 %v790_v33, %v973_v0  ;;  %v791_v41 = vunpack.c.h.bf16 %v879_v20  ;;  %v855_v42 = vunpack.c.h.bf16 %v894_v25 }
  0x3f   : > { %v609_v44 = vmax.f32 %v577_v35, 0.0  ;;  %v578_v45 = vadd.f32 %v546_v36, %v404_v31  ;;  %v509_v46 = vmul.f32 %v854_v38, %v978_v1  ;;  %v794_v47 = vunpack.c.l.bf16 %v880_v34 }
  0x40   : > { %v579_v48 = vadd.f32 %v547_v39, %v405_v37  ;;  %v406_v49 = vadd.f32 %v987_v10, %v367_v40  ;;  %v368_v50 = vmul.f32 %v791_v41, %v973_v0  ;;  %v510_v51 = vmul.f32 %v855_v42, %v978_v1 }
  0x41   : > { %642 = vst.msk [vmem:[%s1016_s17 + $0xa8] sm:$0xff] %vm620_vm0, %v609_v44  ;;  %v610_v52 = vmax.f32 %v578_v45, 0.0  ;;  %v548_v53 = vadd.f32 %v992_v11, %v509_v46  ;;  %v369_v54 = vmul.f32 %v794_v47, %v973_v0  ;;  %v858_v55 = vunpack.c.l.bf16 %v895_v43 }
  0x42   : > { %v611_v58 = vmax.f32 %v579_v48, 0.0  ;;  %v407_v59 = vadd.f32 %v987_v10, %v368_v50  ;;  %v549_v60 = vadd.f32 %v992_v11, %v510_v51  ;;  %v795_v61 = vunpack.c.h.bf16 %v880_v34 }
  0x43   : > { %643 = vst.msk [vmem:[%s1016_s17 + $0xb0] sm:$0xff] %vm620_vm0, %v610_v52  ;;  %v580_v62 = vadd.f32 %v548_v53, %v406_v49  ;;  %v408_v63 = vadd.f32 %v987_v10, %v369_v54  ;;  %v511_v2 = vmul.f32 %v858_v55, %v978_v1  ;;  %v859_v3 = vunpack.c.h.bf16 %v895_v43 }
  0x44   : > { %644 = vst.msk [vmem:[%s1016_s17 + $0xb8] sm:$0xff] %vm620_vm0, %v611_v58  ;;  %v581_v4 = vadd.f32 %v549_v60, %v407_v59  ;;  %v370_v5 = vmul.f32 %v795_v61, %v973_v0  ;;  %v798_v6 = vunpack.c.l.bf16 %v881_v56  ;;  %v862_v7 = vunpack.c.l.bf16 %v896_v57 }
  0x45   : > { %v612_v8 = vmax.f32 %v580_v62, 0.0  ;;  %v550_v9 = vadd.f32 %v992_v11, %v511_v2  ;;  %v512_v12 = vmul.f32 %v859_v3, %v978_v1  ;;  %v799_v13 = vunpack.c.h.bf16 %v881_v56 }
  0x46   : > { %v613_v16 = vmax.f32 %v581_v4, 0.0  ;;  %v409_v17 = vadd.f32 %v987_v10, %v370_v5  ;;  %v371_v18 = vmul.f32 %v798_v6, %v973_v0  ;;  %v513_v19 = vmul.f32 %v862_v7, %v978_v1 }
  0x47   : > { %645 = vst.msk [vmem:[%s1016_s17 + $0xc0] sm:$0xff] %vm620_vm0, %v612_v8  ;;  %v582_v20 = vadd.f32 %v550_v9, %v408_v63  ;;  %v551_v21 = vadd.f32 %v992_v11, %v512_v12  ;;  %v372_v22 = vmul.f32 %v799_v13, %v973_v0  ;;  %v863_v23 = vunpack.c.h.bf16 %v896_v57 }
  0x48   : > { %646 = vst.msk [vmem:[%s1016_s17 + $0xc8] sm:$0xff] %vm620_vm0, %v613_v16  ;;  %v410_v24 = vadd.f32 %v987_v10, %v371_v18  ;;  %v552_v25 = vadd.f32 %v992_v11, %v513_v19  ;;  %v802_v26 = vunpack.c.l.bf16 %v882_v14  ;;  %v866_v27 = vunpack.c.l.bf16 %v897_v15 }
  0x49   : > { %v614_v28 = vmax.f32 %v582_v20, 0.0  ;;  %v583_v29 = vadd.f32 %v551_v21, %v409_v17  ;;  %v411_v30 = vadd.f32 %v987_v10, %v372_v22  ;;  %v514_v31 = vmul.f32 %v863_v23, %v978_v1 }
  0x4a   : > { %v584_v32 = vadd.f32 %v552_v25, %v410_v24  ;;  %v373_v33 = vmul.f32 %v802_v26, %v973_v0  ;;  %v515_v34 = vmul.f32 %v866_v27, %v978_v1  ;;  %v803_v35 = vunpack.c.h.bf16 %v882_v14 }
  0x4b   : > { %647 = vst.msk [vmem:[%s1016_s17 + $0xd0] sm:$0xff] %vm620_vm0, %v614_v28  ;;  %v615_v36 = vmax.f32 %v583_v29, 0.0  ;;  %v553_v37 = vadd.f32 %v992_v11, %v514_v31  ;;  %v867_v38 = vunpack.c.h.bf16 %v897_v15 }
  0x4c   : > { %v616_v39 = vmax.f32 %v584_v32, 0.0  ;;  %v412_v40 = vadd.f32 %v987_v10, %v373_v33  ;;  %v554_v41 = vadd.f32 %v992_v11, %v515_v34  ;;  %v374_v42 = vmul.f32 %v803_v35, %v973_v0 }
  0x4d   : > { %648 = vst.msk [vmem:[%s1016_s17 + $0xd8] sm:$0xff] %vm620_vm0, %v615_v36  ;;  %v585_v43 = vadd.f32 %v553_v37, %v411_v30  ;;  %v516_v44 = vmul.f32 %v867_v38, %v978_v1 }
  0x4e   : > { %649 = vst.msk [vmem:[%s1016_s17 + $0xe0] sm:$0xff] %vm620_vm0, %v616_v39  ;;  %v586_v45 = vadd.f32 %v554_v41, %v412_v40  ;;  %v413_v46 = vadd.f32 %v987_v10, %v374_v42 }
  0x4f   : > { %v617_v47 = vmax.f32 %v585_v43, 0.0  ;;  %v555_v48 = vadd.f32 %v992_v11, %v516_v44 }
  0x50   : > { %v618_v49 = vmax.f32 %v586_v45, 0.0 }
  0x51   : > { %650 = vst.msk [vmem:[%s1016_s17 + $0xe8] sm:$0xff] %vm620_vm0, %v617_v47  ;;  %v587_v50 = vadd.f32 %v555_v48, %v413_v46 }
  0x52   : > { %651 = vst.msk [vmem:[%s1016_s17 + $0xf0] sm:$0xff] %vm620_vm0, %v618_v49 }
  0x53   : > { %v619_v0 = vmax.f32 %v587_v50, 0.0 }
  0x55   : > { %652 = vst.msk [vmem:[%s1016_s17 + $0xf8] sm:$0xff] %vm620_vm0, %v619_v0 }
  0x56 PF: > { %s16_s21 = sadd.s32 1, %s912_s21  }
  0x57   : > { %p13_p4 = scmp.ge.s32.totalorder %s16_s21, 4  }
  0x59   :  { %15 = sbr.rel (!%p13_p4) target bundleno = 1 (0x1), region = 77 }

// kernel: resblock_forward_nchw.4
= control target key start
LH: loop header
LB: loop body
LE: loop exit
PB: predicated region body
PF: predicated region fallthrough
CT: control target
= control target key end

     0   :  { %s4454_s18 = smov 0   ;;  %s5534_s0 = inlined_call_operand.vmem [shape: bf16[2,16,16,8], index: 0, kind: input, shape index: {}]   ;;  %s5535_s1 = inlined_call_operand.vmem [shape: f32[1,8], index: 1, kind: input, shape index: {}]   ;;  %s5536_s2 = inlined_call_operand.vmem [shape: f32[1,8], index: 2, kind: input, shape index: {}]   ;;  %s5537_s3 = inlined_call_operand.vmem [shape: bf16[72,8], index: 3, kind: input, shape index: {}]   ;;  %s5538_s4 = inlined_call_operand.vmem [shape: bf16[2,16,16,8], index: 4, kind: output, shape index: {0}]   ;;  %s5539_s5 = inlined_call_operand.vmem [shape: f32[2,2,8], index: 5, kind: output, shape index: {1}]  }
   0x1 LB: > { %s3520_s19 = sadd.s32 4294967295, %s4413_s18   ;;  %p3524_p0 = scmp.ge.s32.totalorder %s4413_s18, 1  ;;  %s4413_s18 = sphi %s4454_s18, %s16_s18  }
   0x2   : > { %p190_p1 = scmp.lt.s32.totalorder %s4413_s18, 3 }
   0x4   : > { %p191_p2 = pnand %p3524_p0, %p190_p1 }
   0x5   : > { %p4464_p3 = scmp.lt.s32.totalorder (!%p191_p2), %s3520_s19, 1  ;;  %s4416_s29 = smov (!%p191_p2), 8  }
   0x6   : > { %194 = sbr.rel (%p191_p2) target bundleno = 895 (0x37f), region = 36  ;;  %s4417_s30 = smov (!%p191_p2), 16  }
   0x7   : > { %s4418_s6 = smov (!%p191_p2), 24   ;;  %s4419_s7 = smov (!%p191_p2), 32  }
   0x8   : > { %s4420_s8 = smov (!%p191_p2), 40   ;;  %s4421_s9 = smov (!%p191_p2), 48  }
   0x9   : > { %s4422_s14 = smov (!%p191_p2), 56   ;;  %s4423_s22 = smov (!%p191_p2), 64  }
   0xb   : > { %vm412_vm0 = vcmask 64512   ;;  %vm453_vm1 = vcmask 57344   ;;  %vm447_vm2 = vcmask 58368   ;;  %v4415_v0 = vmov 0.0   ;;  %s5542_s19 = smov (!%p4464_p3, %s3520_s19), 1 }
   0xc   : > { %445 = vst.msk [vmem:[#allocation2] sm:$0xff] %vm412_vm0, %v4415_v0  ;;  %446 = vst.msk [vmem:[#allocation2 + $0x8] sm:$0xff] %vm412_vm0, %v4415_v0  ;;  %s3891_s21 = sshll.u32 %s5542_s19, 7  ;;  %v4527_v1 = vld [vmem:[%s5535_s1] ss:$0 sm:$0xff]  ;;  %vm650_vm3 = vcmask 60416  }
   0xd   : > { %450 = vst.msk [vmem:[#allocation2 + $0x198] sm:$0xff] %vm412_vm0, %v4415_v0  ;;  %451 = vst.msk [vmem:[#allocation2 + $0x1a0] sm:$0xff] %vm412_vm0, %v4415_v0  ;;  %s4522_s24 = scalar_lea.vmem %s5534_s0, %s3891_s21  ;;  %v4536_v11 = vld [vmem:[%s5536_s2] ss:$0 sm:$0xff]  ;;  %vm907_vm4 = vcmask 126016   ;;  %vm1164_vm5 = vcmask 191616  }
   0xe   : > { %455 = vst.msk [vmem:[#allocation2 + $0x18] sm:$0x1] %vm453_vm1, %v4415_v0  ;;  %456 = vst.msk [vmem:[#allocation2 + $0x30] sm:$0x1] %vm453_vm1, %v4415_v0  ;;  %v4214_v2 = vld [vmem:[%s4522_s24] sm:$0xff]   ;;  %v4277_v3 = vld [vmem:[%s4522_s24 + $0x8] sm:$0xff]  }
   0xf   : > { %457 = vst.msk [vmem:[#allocation2 + $0x48] sm:$0x1] %vm453_vm1, %v4415_v0  ;;  %458 = vst.msk [vmem:[#allocation2 + $0x60] sm:$0x1] %vm453_vm1, %v4415_v0  ;;  %v4278_v4 = vld [vmem:[%s4522_s24 + $0x10] sm:$0xff]   ;;  %v4215_v5 = vunpack.c.l.bf16 %v4214_v2  ;;  %v4216_v6 = vunpack.c.h.bf16 %v4214_v2  ;;  %v4219_v7 = vunpack.c.l.bf16 %v4277_v3  ;;  %v4220_v8 = vunpack.c.h.bf16 %v4277_v3  ;;  %v4279_v9 = vld [vmem:[%s4522_s24 + $0x18] sm:$0xff]  }
  0x10   : > { %459 = vst.msk [vmem:[#allocation2 + $0x78] sm:$0x1] %vm453_vm1, %v4415_v0  ;;  %460 = vst.msk [vmem:[#allocation2 + $0x90] sm:$0x1] %vm453_vm1, %v4415_v0  ;;  %v4223_v13 = vunpack.c.l.bf16 %v4278_v4  ;;  %v4224_v14 = vunpack.c.h.bf16 %v4278_v4  ;;  %v4227_v15 = vunpack.c.l.bf16 %v4279_v9  ;;  %v4228_v16 = vunpack.c.h.bf16 %v4279_v9  ;;  %v4280_v33 = vld [vmem:[%s4522_s24 + $0x20] sm:$0xff]   ;;  %v4281_v38 = vld [vmem:[%s4522_s24 + $0x28] sm:$0xff]  }
  0x11   : > { %461 = vst.msk [vmem:[#allocation2 + $0xa8] sm:$0x1] %vm453_vm1, %v4415_v0  ;;  %462 = vst.msk [vmem:[#allocation2 + $0xc0] sm:$0x1] %vm453_vm1, %v4415_v0  ;;  %v308_v18 = vmul.f32 %v4215_v5, %v4527_v1  ;;  %v309_v20 = vmul.f32 %v4216_v6, %v4527_v1  ;;  %v310_v21 = vmul.f32 %v4219_v7, %v4527_v1  ;;  %v4282_v39 = vld [vmem:[%s4522_s24 + $0x30] sm:$0xff]   ;;  %v4283_v44 = vld [vmem:[%s4522_s24 + $0x38] sm:$0xff]   ;;  %v4231_v47 = vunpack.c.l.bf16 %v4280_v33 }
  0x12   : > { %463 = vst.msk [vmem:[#allocation2 + $0xd8] sm:$0x1] %vm453_vm1, %v4415_v0  ;;  %464 = vst.msk [vmem:[#allocation2 + $0xf0] sm:$0x1] %vm453_vm1, %v4415_v0  ;;  %v311_v22 = vmul.f32 %v4220_v8, %v4527_v1  ;;  %v312_v23 = vmul.f32 %v4223_v13, %v4527_v1  ;;  %v313_v24 = vmul.f32 %v4224_v14, %v4527_v1  ;;  %v4232_v48 = vunpack.c.h.bf16 %v4280_v33  ;;  %v4286_v13 = vld [vmem:[%s4522_s24 + $0x50] sm:$0xff]  }
  0x13   : > { %465 = vst.msk [vmem:[#allocation2 + $0x108] sm:$0x1] %vm453_vm1, %v4415_v0  ;;  %466 = vst.msk [vmem:[#allocation2 + $0x120] sm:$0x1] %vm453_vm1, %v4415_v0  ;;  %v683_v10 = vld [vmem:[#allocation2 + $0x1] sm:$0xff]  ;;  %v347_v25 = vadd.f32 %v4536_v11, %v308_v18  ;;  %v348_v26 = vadd.f32 %v4536_v11, %v309_v20  ;;  %v314_v27 = vmul.f32 %v4227_v15, %v4527_v1  ;;  %v4235_v49 = vunpack.c.l.bf16 %v4281_v38 }
  0x14   : > { %467 = vst.msk [vmem:[#allocation2 + $0x138] sm:$0x1] %vm453_vm1, %v4415_v0  ;;  %468 = vst.msk [vmem:[#allocation2 + $0x150] sm:$0x1] %vm453_vm1, %v4415_v0  ;;  %v3925_v17 = vpack.c.bf16 %v683_v10, %v683_v10  ;;  %v315_v28 = vmul.f32 %v4228_v16, %v4527_v1  ;;  %v349_v29 = vadd.f32 %v4536_v11, %v310_v21  ;;  %v4236_v50 = vunpack.c.h.bf16 %v4281_v38  ;;  %v4284_v10 = vld [vmem:[%s4522_s24 + $0x40] sm:$0xff]  }
  0x15   : > { %469 = vst.msk [vmem:[#allocation2 + $0x168] sm:$0x1] %vm453_vm1, %v4415_v0  ;;  %470 = vst.msk [vmem:[#allocation2 + $0x180] sm:$0x1] %vm453_vm1, %v4415_v0  ;;  %v350_v30 = vadd.f32 %v4536_v11, %v311_v22  ;;  %v351_v31 = vadd.f32 %v4536_v11, %v312_v23  ;;  %v352_v32 = vadd.f32 %v4536_v11, %v313_v24  ;;  %v379_v34 = vmax.f32 %v347_v25, 0.0 }
  0x16   : > { %473 = vst.msk [vmem:[#allocation2 + $0x29] sm:$0x1] %vm453_vm1, %v4415_v0  ;;  %474 = vst.msk [vmem:[#allocation2 + $0x41] sm:$0x1] %vm453_vm1, %v4415_v0  ;;  %811 = vrot.lane.b32.xlu0 %v3925_v17, %s4416_s29  ;;  %v380_v35 = vmax.f32 %v348_v26, 0.0  ;;  %v353_v36 = vadd.f32 %v4536_v11, %v314_v27  ;;  %v354_v37 = vadd.f32 %v4536_v11, %v315_v28  ;;  %v381_v40 = vmax.f32 %v349_v29, 0.0 }
  0x17   : > { %475 = vst.msk [vmem:[#allocation2 + $0x59] sm:$0x1] %vm453_vm1, %v4415_v0  ;;  %476 = vst.msk [vmem:[#allocation2 + $0x71] sm:$0x1] %vm453_vm1, %v4415_v0  ;;  %v382_v41 = vmax.f32 %v350_v30, 0.0  ;;  %v383_v42 = vmax.f32 %v351_v31, 0.0  ;;  %v4239_v51 = vunpack.c.l.bf16 %v4282_v39  ;;  %v4240_v52 = vunpack.c.h.bf16 %v4282_v39 }
  0x18   : > { %477 = vst.msk [vmem:[#allocation2 + $0x89] sm:$0x1] %vm453_vm1, %v4415_v0  ;;  %478 = vst.msk [vmem:[#allocation2 + $0xa1] sm:$0x1] %vm453_vm1, %v4415_v0  ;;  %v384_v43 = vmax.f32 %v352_v32, 0.0  ;;  %v385_v45 = vmax.f32 %v353_v36, 0.0  ;;  %v316_v53 = vmul.f32 %v4231_v47, %v4527_v1  ;;  %v317_v54 = vmul.f32 %v4232_v48, %v4527_v1 }
  0x19   : > { %479 = vst.msk [vmem:[#allocation2 + $0xb9] sm:$0x1] %vm453_vm1, %v4415_v0  ;;  %480 = vst.msk [vmem:[#allocation2 + $0xd1] sm:$0x1] %vm453_vm1, %v4415_v0  ;;  %v386_v46 = vmax.f32 %v354_v37, 0.0  ;;  %v4243_v55 = vunpack.c.l.bf16 %v4283_v44  ;;  %v4244_v56 = vunpack.c.h.bf16 %v4283_v44  ;;  %v318_v57 = vmul.f32 %v4235_v49, %v4527_v1  ;;  %v4287_v30 = vld [vmem:[%s4522_s24 + $0x58] sm:$0xff]  }
  0x1a   : > { %481 = vst.msk [vmem:[#allocation2 + $0xe9] sm:$0x1] %vm453_vm1, %v4415_v0  ;;  %482 = vst.msk [vmem:[#allocation2 + $0x101] sm:$0x1] %vm453_vm1, %v4415_v0  ;;  %v319_v58 = vmul.f32 %v4236_v50, %v4527_v1  ;;  %v320_v59 = vmul.f32 %v4239_v51, %v4527_v1  ;;  %v321_v60 = vmul.f32 %v4240_v52, %v4527_v1  ;;  %v4247_v29 = vunpack.c.l.bf16 %v4284_v10 }
  0x1b   : > { %483 = vst.msk [vmem:[#allocation2 + $0x119] sm:$0x1] %vm453_vm1, %v4415_v0  ;;  %484 = vst.msk [vmem:[#allocation2 + $0x131] sm:$0x1] %vm453_vm1, %v4415_v0  ;;  %v355_v61 = vadd.f32 %v4536_v11, %v316_v53  ;;  %v356_v62 = vadd.f32 %v4536_v11, %v317_v54  ;;  %v322_v63 = vmul.f32 %v4243_v55, %v4527_v1  ;;  %v4255_v38 = vunpack.c.l.bf16 %v4286_v13 }
  0x1c   : > { %485 = vst.msk [vmem:[#allocation2 + $0x149] sm:$0x1] %vm453_vm1, %v4415_v0  ;;  %486 = vst.msk [vmem:[#allocation2 + $0x161] sm:$0x1] %vm453_vm1, %v4415_v0  ;;  %v357_v2 = vadd.f32 %v4536_v11, %v318_v57  ;;  %v358_v3 = vadd.f32 %v4536_v11, %v319_v58  ;;  %v359_v4 = vadd.f32 %v4536_v11, %v320_v59  ;;  %vm2937_vm6 = vcmask 1043456  }
  0x1d   : > { %487 = vst.msk [vmem:[#allocation2 + $0x179] sm:$0x1] %vm453_vm1, %v4415_v0  ;;  %488 = vst.msk [vmem:[#allocation2 + $0x191] sm:$0x1] %vm453_vm1, %v4415_v0  ;;  %v360_v5 = vadd.f32 %v4536_v11, %v321_v60  ;;  %v387_v6 = vmax.f32 %v355_v61, 0.0  ;;  %v388_v7 = vmax.f32 %v356_v62, 0.0  ;;  %v361_v8 = vadd.f32 %v4536_v11, %v322_v63 }
  0x1e   : > { %448 = vst.msk [vmem:[#allocation2 + $0x10] sm:$0x3] %vm447_vm2, %v4415_v0  ;;  %452 = vst.msk [vmem:[#allocation2 + $0x1a8] sm:$0x3] %vm447_vm2, %v4415_v0  ;;  %v389_v16 = vmax.f32 %v357_v2, 0.0  ;;  %v390_v17 = vmax.f32 %v358_v3, 0.0 }
  0x1f   : > { %454 = vst.msk [vmem:[#allocation2] sm:$0x1] %vm453_vm1, %v4415_v0  ;;  %471 = vst.msk [vmem:[#allocation2 + $0x198] sm:$0x1] %vm453_vm1, %v4415_v0  ;;  %v391_v18 = vmax.f32 %v359_v4, 0.0  ;;  %v393_v24 = vmax.f32 %v361_v8, 0.0 }
  0x20   : > { %472 = vst.msk [vmem:[#allocation2 + $0x11] sm:$0x1] %vm453_vm1, %v4415_v0  ;;  %489 = vst.msk [vmem:[#allocation2 + $0x1a9] sm:$0x1] %vm453_vm1, %v4415_v0  ;;  %v323_v0 = vmul.f32 %v4244_v56, %v4527_v1  ;;  %v4288_v61 = vld [vmem:[%s4522_s24 + $0x60] sm:$0xff]   ;;  %v4289_v62 = vld [vmem:[%s4522_s24 + $0x68] sm:$0xff]  }
  0x21   : > { %413 = vst.msk [vmem:[#allocation2 + $0x19] sm:$0xff] %vm412_vm0, %v379_v34  ;;  %414 = vst.msk [vmem:[#allocation2 + $0x21] sm:$0xff] %vm412_vm0, %v380_v35  ;;  %v4248_v34 = vunpack.c.h.bf16 %v4284_v10  ;;  %v324_v35 = vmul.f32 %v4247_v29, %v4527_v1  ;;  %v4290_v4 = vld [vmem:[%s4522_s24 + $0x70] sm:$0xff]   ;;  %v4263_v10 = vunpack.c.l.bf16 %v4288_v61  ;;  %vm1421_vm7 = vcmask 257216  }
  0x22   : > { %415 = vst.msk [vmem:[#allocation2 + $0x31] sm:$0xff] %vm412_vm0, %v381_v40  ;;  %416 = vst.msk [vmem:[#allocation2 + $0x39] sm:$0xff] %vm412_vm0, %v382_v41  ;;  %v362_v9 = vadd.f32 %v4536_v11, %v323_v0  ;;  %v4256_v40 = vunpack.c.h.bf16 %v4286_v13  ;;  %v4259_v41 = vunpack.c.l.bf16 %v4287_v30  ;;  %v4267_v13 = vunpack.c.l.bf16 %v4289_v62 }
  0x23   : > { %417 = vst.msk [vmem:[#allocation2 + $0x49] sm:$0xff] %vm412_vm0, %v383_v42  ;;  %418 = vst.msk [vmem:[#allocation2 + $0x51] sm:$0xff] %vm412_vm0, %v384_v43  ;;  %v325_v39 = vmul.f32 %v4248_v34, %v4527_v1  ;;  %v4260_v42 = vunpack.c.h.bf16 %v4287_v30  ;;  %v363_v43 = vadd.f32 %v4536_v11, %v324_v35  ;;  %vm1678_vm8 = vcmask 322816  }
  0x24   : > { %419 = vst.msk [vmem:[#allocation2 + $0x61] sm:$0xff] %vm412_vm0, %v385_v45  ;;  %420 = vst.msk [vmem:[#allocation2 + $0x69] sm:$0xff] %vm412_vm0, %v386_v46  ;;  %v394_v25 = vmax.f32 %v362_v9, 0.0  ;;  %v328_v46 = vmul.f32 %v4255_v38, %v4527_v1  ;;  %v329_v48 = vmul.f32 %v4256_v40, %v4527_v1  ;;  %v330_v49 = vmul.f32 %v4259_v41, %v4527_v1 }
  0x25   : > { %v684_v12 = vld [vmem:[#allocation2 + $0x9] sm:$0xff]  ;;  %421 = vst.msk [vmem:[#allocation2 + $0x79] sm:$0xff] %vm412_vm0, %v387_v6  ;;  %422 = vst.msk [vmem:[#allocation2 + $0x81] sm:$0xff] %vm412_vm0, %v388_v7  ;;  %v364_v47 = vadd.f32 %v4536_v11, %v325_v39  ;;  %v331_v50 = vmul.f32 %v4260_v42, %v4527_v1  ;;  %v395_v54 = vmax.f32 %v363_v43, 0.0  ;;  %vm1935_vm9 = vcmask 388416  }
  0x26   : > { %v3926_v19 = vpack.c.bf16 %v684_v12, %v684_v12  ;;  %v4285_v12 = vld [vmem:[%s4522_s24 + $0x48] sm:$0xff]   ;;  %423 = vst.msk [vmem:[#allocation2 + $0x91] sm:$0xff] %vm412_vm0, %v389_v16  ;;  %424 = vst.msk [vmem:[#allocation2 + $0x99] sm:$0xff] %vm412_vm0, %v390_v17  ;;  %v367_v57 = vadd.f32 %v4536_v11, %v328_v46  ;;  %v368_v59 = vadd.f32 %v4536_v11, %v329_v48  ;;  %v4271_v17 = vunpack.c.l.bf16 %v4290_v4  ;;  %v490_v46 = vld [vmem:[#allocation2] sm:$0xff] }
  0x27   : > { %425 = vst.msk [vmem:[#allocation2 + $0xa9] sm:$0xff] %vm412_vm0, %v391_v18  ;;  %427 = vst.msk [vmem:[#allocation2 + $0xc1] sm:$0xff] %vm412_vm0, %v393_v24  ;;  %v4251_v36 = vunpack.c.l.bf16 %v4285_v12  ;;  %v4252_v37 = vunpack.c.h.bf16 %v4285_v12  ;;  %v396_v58 = vmax.f32 %v364_v47, 0.0  ;;  %v369_v7 = vadd.f32 %v4536_v11, %v330_v49  ;;  %v491_v48 = vld [vmem:[#allocation2 + $0x8] sm:$0xff] }
  0x28   : > { %813 = vrot.lane.b32.xlu0 %v3926_v19, %s4416_s29  ;;  %v685_v14 = vld [vmem:[#allocation2 + $0x19] sm:$0xff]  ;;  %v686_v15 = vld [vmem:[#allocation2 + $0x21] sm:$0xff]  ;;  %v392_v19 = vmax.f32 %v360_v5, 0.0  ;;  %428 = vst.msk [vmem:[#allocation2 + $0xc9] sm:$0xff] %vm412_vm0, %v394_v25  ;;  %429 = vst.msk [vmem:[#allocation2 + $0xd9] sm:$0xff] %vm412_vm0, %v395_v54  ;;  %v399_v5 = vmax.f32 %v367_v57, 0.0  ;;  %v370_v8 = vadd.f32 %v4536_v11, %v331_v50  ;;  %v4264_v12 = vunpack.c.h.bf16 %v4288_v61 }
  0x29   : > { %v3927_v20 = vpack.c.bf16 %v685_v14, %v685_v14  ;;  %v687_v21 = vld [vmem:[#allocation2 + $0x31] sm:$0xff]  ;;  %v688_v22 = vld [vmem:[#allocation2 + $0x39] sm:$0xff]  ;;  %v3928_v26 = vpack.c.bf16 %v686_v15, %v686_v15  ;;  %v326_v44 = vmul.f32 %v4251_v36, %v4527_v1  ;;  %v327_v45 = vmul.f32 %v4252_v37, %v4527_v1  ;;  %430 = vst.msk [vmem:[#allocation2 + $0xe1] sm:$0xff] %vm412_vm0, %v396_v58 }
  0x2a   : > { %v689_v23 = vld [vmem:[#allocation2 + $0x49] sm:$0xff]  ;;  %v3929_v27 = vpack.c.bf16 %v687_v21, %v687_v21  ;;  %426 = vst.msk [vmem:[#allocation2 + $0xb1] sm:$0xff] %vm412_vm0, %v392_v19  ;;  %v3930_v31 = vpack.c.bf16 %v688_v22, %v688_v22  ;;  %v690_v51 = vld [vmem:[#allocation2 + $0x51] sm:$0xff]  ;;  %v400_v6 = vmax.f32 %v368_v59, 0.0  ;;  %v4268_v14 = vunpack.c.h.bf16 %v4289_v62  ;;  %433 = vst.msk [vmem:[#allocation2 + $0x109] sm:$0xff] %vm412_vm0, %v399_v5 }
  0x2b   : > { %v691_v28 = vld [vmem:[#allocation2 + $0x61] sm:$0xff]  ;;  %815 = vrot.lane.b32.xlu1 %v3927_v20, %s4416_s29  ;;  %v3931_v32 = vpack.c.bf16 %v689_v23, %v689_v23  ;;  %v692_v52 = vld [vmem:[#allocation2 + $0x69] sm:$0xff]  ;;  %v365_v55 = vadd.f32 %v4536_v11, %v326_v44  ;;  %v366_v56 = vadd.f32 %v4536_v11, %v327_v45  ;;  %v3932_v63 = vpack.c.bf16 %v690_v51, %v690_v51  ;;  %v492_v47 = vld [vmem:[#allocation2 + $0x18] sm:$0xff] }
  0x2c   : > { %v3933_v33 = vpack.c.bf16 %v691_v28, %v691_v28  ;;  %819 = vrot.lane.b32.xlu0 %v3929_v27, %s4416_s29  ;;  %v693_v53 = vld [vmem:[#allocation2 + $0x79] sm:$0xff]  ;;  %v3934_v0 = vpack.c.bf16 %v692_v52, %v692_v52  ;;  %434 = vst.msk [vmem:[#allocation2 + $0x111] sm:$0xff] %vm412_vm0, %v400_v6  ;;  %v401_v15 = vmax.f32 %v369_v7, 0.0  ;;  %v402_v16 = vmax.f32 %v370_v8, 0.0  ;;  %v694_v23 = vld [vmem:[#allocation2 + $0x81] sm:$0xff]  ;;  %v494_v51 = vld [vmem:[#allocation2 + $0x30] sm:$0xff] }
  0x2d   : > { %v397_v60 = vmax.f32 %v365_v55, 0.0  ;;  %v3935_v2 = vpack.c.bf16 %v693_v53, %v693_v53  ;;  %v398_v3 = vmax.f32 %v366_v56, 0.0  ;;  %v695_v9 = vld [vmem:[#allocation2 + $0x91] sm:$0xff]  ;;  %v4272_v18 = vunpack.c.h.bf16 %v4290_v4  ;;  %v493_v50 = vld [vmem:[#allocation2 + $0x20] sm:$0xff]  ;;  %v496_v57 = vld [vmem:[#allocation2 + $0x48] sm:$0xff] }
  0x2e   : > { %v332_v19 = vmul.f32 %v4263_v10, %v4527_v1  ;;  %v333_v20 = vmul.f32 %v4264_v12, %v4527_v1  ;;  %v334_v21 = vmul.f32 %v4267_v13, %v4527_v1  ;;  %v335_v22 = vmul.f32 %v4268_v14, %v4527_v1  ;;  %435 = vst.msk [vmem:[#allocation2 + $0x121] sm:$0xff] %vm412_vm0, %v401_v15  ;;  %v697_v27 = vld [vmem:[#allocation2 + $0xa9] sm:$0xff]  ;;  %v699_v42 = vld [vmem:[#allocation2 + $0xc1] sm:$0xff]  ;;  %v495_v52 = vld [vmem:[#allocation2 + $0x38] sm:$0xff] }
  0x2f   : > { %817 = vrot.lane.b32.xlu1 %v3928_v26, %s4416_s29  ;;  %431 = vst.msk [vmem:[#allocation2 + $0xf1] sm:$0xff] %vm412_vm0, %v397_v60  ;;  %432 = vst.msk [vmem:[#allocation2 + $0xf9] sm:$0xff] %vm412_vm0, %v398_v3  ;;  %v3937_v24 = vpack.c.bf16 %v695_v9, %v695_v9  ;;  %v336_v25 = vmul.f32 %v4271_v17, %v4527_v1  ;;  %v337_v26 = vmul.f32 %v4272_v18, %v4527_v1  ;;  %v696_v1 = vld [vmem:[#allocation2 + $0x99] sm:$0xff]  ;;  %v700_v53 = vld [vmem:[#allocation2 + $0xc9] sm:$0xff]  ;;  %vm2193_vm10 = vcmask 454016  }
  0x30   : > { %823 = vrot.lane.b32.xlu0 %v3931_v32, %s4416_s29  ;;  %436 = vst.msk [vmem:[#allocation2 + $0x129] sm:$0xff] %vm412_vm0, %v402_v16  ;;  %v371_v28 = vadd.f32 %v4536_v11, %v332_v19  ;;  %v372_v29 = vadd.f32 %v4536_v11, %v333_v20  ;;  %v373_v30 = vadd.f32 %v4536_v11, %v334_v21  ;;  %v701_v45 = vld [vmem:[#allocation2 + $0xd9] sm:$0xff]  ;;  %v497_v58 = vld [vmem:[#allocation2 + $0x50] sm:$0xff]  ;;  %v499_v60 = vld [vmem:[#allocation2 + $0x68] sm:$0xff]  ;;  %vm2450_vm11 = vcmask 519616  }
  0x31   : > { %v375_v32 = vadd.f32 %v4536_v11, %v336_v25  ;;  %v3936_v34 = vpack.c.bf16 %v694_v23, %v694_v23  ;;  %v3939_v38 = vpack.c.bf16 %v697_v27, %v697_v27  ;;  %v698_v43 = vld [vmem:[#allocation2 + $0xb1] sm:$0xff]  ;;  %v3941_v44 = vpack.c.bf16 %v699_v42, %v699_v42  ;;  %v498_v59 = vld [vmem:[#allocation2 + $0x60] sm:$0xff]  ;;  %v504_v9 = vld [vmem:[#allocation2 + $0xa8] sm:$0xff] }
  0x32   : > { %v403_v35 = vmax.f32 %v371_v28, 0.0  ;;  %v404_v36 = vmax.f32 %v372_v29, 0.0  ;;  %v405_v37 = vmax.f32 %v373_v30, 0.0  ;;  %v3940_v49 = vpack.c.bf16 %v698_v43, %v698_v43  ;;  %v4657_v61 = vld [vmem:[#allocation2 + $0xe1] sm:$0xff]  ;;  %v502_v5 = vld [vmem:[#allocation2 + $0x90] sm:$0xff]  ;;  %v503_v6 = vld [vmem:[#allocation2 + $0x98] sm:$0xff] }
  0x33   : > { %821 = vrot.lane.b32.xlu1 %v3930_v31, %s4416_s29  ;;  %v374_v31 = vadd.f32 %v4536_v11, %v335_v22  ;;  %v407_v40 = vmax.f32 %v375_v32, 0.0  ;;  %v3943_v54 = vpack.c.bf16 %v701_v45, %v701_v45  ;;  %v3893_v55 = vpack.c.bf16 %v490_v46, %v490_v46  ;;  %v501_v4 = vld [vmem:[#allocation2 + $0x80] sm:$0xff]  ;;  %v505_v10 = vld [vmem:[#allocation2 + $0xb0] sm:$0xff]  ;;  %v507_v17 = vld [vmem:[#allocation2 + $0xc8] sm:$0xff] }
  0x34   : > { %827 = vrot.lane.b32.xlu0 %v3933_v33, %s4416_s29  ;;  %v376_v33 = vadd.f32 %v4536_v11, %v337_v26  ;;  %437 = vst.msk [vmem:[#allocation2 + $0x139] sm:$0xff] %vm412_vm0, %v403_v35  ;;  %438 = vst.msk [vmem:[#allocation2 + $0x141] sm:$0xff] %vm412_vm0, %v404_v36  ;;  %v3938_v11 = vpack.c.bf16 %v696_v1, %v696_v1  ;;  %v4655_v56 = vpack.c.bf16 %v492_v47, %v492_v47  ;;  %v506_v12 = vld [vmem:[#allocation2 + $0xc0] sm:$0xff]  ;;  %v508_v18 = vld [vmem:[#allocation2 + $0xd8] sm:$0xff]  ;;  %vm2707_vm12 = vcmask 585216  }
  0x35   : > { %v406_v39 = vmax.f32 %v374_v31, 0.0  ;;  %439 = vst.msk [vmem:[#allocation2 + $0x151] sm:$0xff] %vm412_vm0, %v405_v37  ;;  %441 = vst.msk [vmem:[#allocation2 + $0x169] sm:$0xff] %vm412_vm0, %v407_v40  ;;  %v4664_v3 = vpack.c.bf16 %v493_v50, %v493_v50  ;;  %v3942_v7 = vpack.c.bf16 %v700_v53, %v700_v53  ;;  %v4668_v8 = vpack.c.bf16 %v494_v51, %v494_v51  ;;  %v509_v19 = vld [vmem:[#allocation2 + $0xe0] sm:$0xff]  ;;  %v512_v26 = vld [vmem:[#allocation2 + $0x108] sm:$0xff] }
  0x36   : > { %v408_v41 = vmax.f32 %v376_v33, 0.0  ;;  %v703_v62 = vld [vmem:[#allocation2 + $0xf1] sm:$0xff]  ;;  %651 = vst.msk [vmem:[#allocation3] sm:$0xf] %vm650_vm3, %v3893_v55  ;;  %653 = vst.msk [vmem:[#allocation3 + $0x8] sm:$0xf] %vm650_vm3, %v4655_v56  ;;  %v3944_v13 = vpack.c.bf16 %v4657_v61, %v4657_v61  ;;  %v4677_v16 = vpack.c.bf16 %v495_v52, %v495_v52  ;;  %v4681_v20 = vpack.c.bf16 %v496_v57, %v496_v57 }
  0x37   : > { %825 = vrot.lane.b32.xlu1 %v3932_v63, %s4416_s29  ;;  %440 = vst.msk [vmem:[#allocation2 + $0x159] sm:$0xff] %vm412_vm0, %v406_v39  ;;  %v4659_v63 = vld [vmem:[#allocation2 + $0x109] sm:$0xff]  ;;  %v3945_v14 = vpack.c.bf16 %v703_v62, %v703_v62  ;;  %v4683_v21 = vpack.c.bf16 %v497_v58, %v497_v58  ;;  %v4685_v22 = vpack.c.bf16 %v498_v59, %v498_v59  ;;  %v511_v25 = vld [vmem:[#allocation2 + $0xf8] sm:$0xff]  ;;  %v514_v32 = vld [vmem:[#allocation2 + $0x120] sm:$0xff]  ;;  %vm2888_vm13 = vcmask 588800  }
  0x38   : > { %831 = vrot.lane.b32.xlu0 %v3935_v2, %s4416_s29  ;;  %442 = vst.msk [vmem:[#allocation2 + $0x171] sm:$0xff] %vm412_vm0, %v408_v41  ;;  %v500_v2 = vld [vmem:[#allocation2 + $0x78] sm:$0xff]  ;;  %v3947_v15 = vpack.c.bf16 %v4659_v63, %v4659_v63  ;;  %v4687_v23 = vpack.c.bf16 %v499_v60, %v499_v60  ;;  %v4693_v28 = vpack.c.bf16 %v501_v4, %v501_v4  ;;  %v513_v31 = vld [vmem:[#allocation2 + $0x110] sm:$0xff]  ;;  %v515_v33 = vld [vmem:[#allocation2 + $0x128] sm:$0xff] }
  0x39   : > { %654 = vst.msk [vmem:[#allocation3 + $0xc] sm:$0xf] %vm650_vm3, %v4664_v3  ;;  %655 = vst.msk [vmem:[#allocation3 + $0x10] sm:$0xf] %vm650_vm3, %v4668_v8  ;;  %v4691_v27 = vpack.c.bf16 %v500_v2, %v500_v2  ;;  %v4695_v29 = vpack.c.bf16 %v502_v5, %v502_v5  ;;  %v4697_v30 = vpack.c.bf16 %v503_v6, %v503_v6  ;;  %v704_v1 = vld [vmem:[#allocation2 + $0xf9] sm:$0xff]  ;;  %v707_v42 = vld [vmem:[#allocation2 + $0x121] sm:$0xff] }
  0x3a   : > { %656 = vst.msk [vmem:[#allocation3 + $0x14] sm:$0xf] %vm650_vm3, %v4677_v16  ;;  %657 = vst.msk [vmem:[#allocation3 + $0x18] sm:$0xf] %vm650_vm3, %v4681_v20  ;;  %v4710_v35 = vpack.c.bf16 %v505_v10, %v505_v10  ;;  %v4712_v36 = vpack.c.bf16 %v506_v12, %v506_v12  ;;  %v4714_v37 = vpack.c.bf16 %v507_v17, %v507_v17  ;;  %v706_v51 = vld [vmem:[#allocation2 + $0x111] sm:$0xff]  ;;  %v708_v60 = vld [vmem:[#allocation2 + $0x129] sm:$0xff] }
  0x3b   : > { %829 = vrot.lane.b32.xlu1 %v3934_v0, %s4416_s29  ;;  %v3894_v0 = vpack.c.bf16 %v491_v48, %v491_v48  ;;  %658 = vst.msk [vmem:[#allocation3 + $0x1c] sm:$0xf] %vm650_vm3, %v4683_v21  ;;  %659 = vst.msk [vmem:[#allocation3 + $0x20] sm:$0xf] %vm650_vm3, %v4685_v22  ;;  %v4727_v39 = vpack.c.bf16 %v509_v19, %v509_v19  ;;  %v4731_v41 = vpack.c.bf16 %v511_v25, %v511_v25  ;;  %v516_v46 = vld [vmem:[#allocation2 + $0x138] sm:$0xff]  ;;  %v517_v47 = vld [vmem:[#allocation2 + $0x140] sm:$0xff] }
  0x3c   : > { %835 = vrot.lane.b32.xlu0 %v3937_v24, %s4416_s29  ;;  %v510_v24 = vld [vmem:[#allocation2 + $0xf0] sm:$0xff]  ;;  %660 = vst.msk [vmem:[#allocation3 + $0x24] sm:$0xf] %vm650_vm3, %v4687_v23  ;;  %661 = vst.msk [vmem:[#allocation3 + $0x28] sm:$0xf] %vm650_vm3, %v4691_v27  ;;  %v3916_v43 = vpack.c.bf16 %v513_v31, %v513_v31  ;;  %v3918_v45 = vpack.c.bf16 %v515_v33, %v515_v33  ;;  %v3946_v48 = vpack.c.bf16 %v704_v1, %v704_v1  ;;  %v709_v53 = vld [vmem:[#allocation2 + $0x139] sm:$0xff] }
  0x3d   : > { %652 = vst.msk [vmem:[#allocation3 + $0x4] sm:$0xf] %vm650_vm3, %v3894_v0  ;;  %662 = vst.msk [vmem:[#allocation3 + $0x2c] sm:$0xf] %vm650_vm3, %v4693_v28  ;;  %v4729_v40 = vpack.c.bf16 %v510_v24, %v510_v24  ;;  %v3920_v50 = vpack.c.bf16 %v517_v47, %v517_v47  ;;  %v3949_v52 = vpack.c.bf16 %v707_v42, %v707_v42  ;;  %v711_v62 = vld [vmem:[#allocation2 + $0x151] sm:$0xff]  ;;  %v520_v63 = vld [vmem:[#allocation2 + $0x168] sm:$0xff] }
  0x3e   : > { %663 = vst.msk [vmem:[#allocation3 + $0x30] sm:$0xf] %vm650_vm3, %v4695_v29  ;;  %664 = vst.msk [vmem:[#allocation3 + $0x34] sm:$0xf] %vm650_vm3, %v4697_v30  ;;  %v519_v55 = vld [vmem:[#allocation2 + $0x158] sm:$0xff]  ;;  %v3948_v57 = vpack.c.bf16 %v706_v51, %v706_v51  ;;  %v3951_v61 = vpack.c.bf16 %v709_v53, %v709_v53  ;;  %v3950_v2 = vpack.c.bf16 %v708_v60, %v708_v60  ;;  %v710_v6 = vld [vmem:[#allocation2 + $0x141] sm:$0xff] }
  0x3f   : > { %833 = vrot.lane.b32.xlu1 %v3936_v34, %s4416_s29  ;;  %v4708_v34 = vpack.c.bf16 %v504_v9, %v504_v9  ;;  %666 = vst.msk [vmem:[#allocation3 + $0x3c] sm:$0xf] %vm650_vm3, %v4710_v35  ;;  %667 = vst.msk [vmem:[#allocation3 + $0x40] sm:$0xf] %vm650_vm3, %v4712_v36  ;;  %v3922_v59 = vpack.c.bf16 %v519_v55, %v519_v55  ;;  %v521_v0 = vld [vmem:[#allocation2 + $0x170] sm:$0xff]  ;;  %v3923_v4 = vpack.c.bf16 %v520_v63, %v520_v63  ;;  %v712_v12 = vld [vmem:[#allocation2 + $0x159] sm:$0xff] }
  0x40   : > { %839 = vrot.lane.b32.xlu0 %v3939_v38, %s4416_s29  ;;  %v4725_v38 = vpack.c.bf16 %v508_v18, %v508_v18  ;;  %668 = vst.msk [vmem:[#allocation3 + $0x44] sm:$0xf] %vm650_vm3, %v4714_v37  ;;  %670 = vst.msk [vmem:[#allocation3 + $0x4c] sm:$0xf] %vm650_vm3, %v4727_v39  ;;  %v3924_v5 = vpack.c.bf16 %v521_v0, %v521_v0  ;;  %v713_v9 = vld [vmem:[#allocation2 + $0x169] sm:$0xff]  ;;  %v3952_v10 = vpack.c.bf16 %v710_v6, %v710_v6  ;;  %v714_v17 = vld [vmem:[#allocation2 + $0x171] sm:$0xff] }
  0x41   : > { %665 = vst.msk [vmem:[#allocation3 + $0x38] sm:$0xf] %vm650_vm3, %v4708_v34  ;;  %671 = vst.msk [vmem:[#allocation3 + $0x50] sm:$0xf] %vm650_vm3, %v4729_v40  ;;  %v942_v19 = vld [vmem:[#allocation2 + $0x1a] sm:$0xff]  ;;  %v3956_v24 = vpack.c.bf16 %v714_v17, %v714_v17  ;;  %v941_v25 = vld [vmem:[#allocation2 + $0xa] sm:$0xff] }
  0x42   : > { %669 = vst.msk [vmem:[#allocation3 + $0x48] sm:$0xf] %vm650_vm3, %v4725_v38  ;;  %672 = vst.msk [vmem:[#allocation3 + $0x54] sm:$0xf] %vm650_vm3, %v4731_v41  ;;  %v944_v31 = vld [vmem:[#allocation2 + $0x32] sm:$0xff]  ;;  %v943_v33 = vld [vmem:[#allocation2 + $0x22] sm:$0xff] }
  0x43   : > { %837 = vrot.lane.b32.xlu1 %v3938_v11, %s4416_s29  ;;  %v3915_v11 = vpack.c.bf16 %v512_v26, %v512_v26  ;;  %674 = vst.msk [vmem:[#allocation3 + $0x5c] sm:$0xf] %vm650_vm3, %v3916_v43  ;;  %676 = vst.msk [vmem:[#allocation3 + $0x64] sm:$0xf] %vm650_vm3, %v3918_v45  ;;  %v4774_v26 = vpack.c.bf16 %v942_v19, %v942_v19  ;;  %v4779_v1 = vpack.c.bf16 %v944_v31, %v944_v31  ;;  %v946_v42 = vld [vmem:[#allocation2 + $0x4a] sm:$0xff]  ;;  %v945_v43 = vld [vmem:[#allocation2 + $0x3a] sm:$0xff] }
  0x44   : > { %843 = vrot.lane.b32.xlu0 %v3941_v44, %s4416_s29  ;;  %v3917_v44 = vpack.c.bf16 %v514_v32, %v514_v32  ;;  %678 = vst.msk [vmem:[#allocation3 + $0x6c] sm:$0xf] %vm650_vm3, %v3920_v50  ;;  %680 = vst.msk [vmem:[#allocation3 + $0x74] sm:$0xf] %vm650_vm3, %v3922_v59  ;;  %v3958_v32 = vpack.c.bf16 %v941_v25, %v941_v25  ;;  %v948_v45 = vld [vmem:[#allocation2 + $0x62] sm:$0xff]  ;;  %v947_v47 = vld [vmem:[#allocation2 + $0x52] sm:$0xff] }
  0x45   : > { %673 = vst.msk [vmem:[#allocation3 + $0x58] sm:$0xf] %vm650_vm3, %v3915_v11  ;;  %681 = vst.msk [vmem:[#allocation3 + $0x78] sm:$0xf] %vm650_vm3, %v3923_v4  ;;  %v4782_v11 = vpack.c.bf16 %v943_v33, %v943_v33  ;;  %v4798_v50 = vpack.c.bf16 %v947_v47, %v947_v47  ;;  %v949_v51 = vld [vmem:[#allocation2 + $0x6a] sm:$0xff]  ;;  %v952_v53 = vld [vmem:[#allocation2 + $0x92] sm:$0xff] }
  0x46   : > { %675 = vst.msk [vmem:[#allocation3 + $0x60] sm:$0xf] %vm650_vm3, %v3917_v44  ;;  %682 = vst.msk [vmem:[#allocation3 + $0x7c] sm:$0xf] %vm650_vm3, %v3924_v5  ;;  %v4786_v44 = vpack.c.bf16 %v946_v42, %v946_v42  ;;  %v951_v55 = vld [vmem:[#allocation2 + $0x82] sm:$0xff]  ;;  %v953_v60 = vld [vmem:[#allocation2 + $0x9a] sm:$0xff] }
  0x47   : > { %841 = vrot.lane.b32.xlu1 %v3940_v49, %s4416_s29  ;;  %v3919_v49 = vpack.c.bf16 %v516_v46, %v516_v46  ;;  %v4790_v46 = vpack.c.bf16 %v945_v43, %v945_v43  ;;  %v4814_v59 = vpack.c.bf16 %v951_v55, %v951_v55  ;;  %v4820_v63 = vpack.c.bf16 %v953_v60, %v953_v60  ;;  %v955_v0 = vld [vmem:[#allocation2 + $0xb2] sm:$0xff]  ;;  %v958_v4 = vld [vmem:[#allocation2 + $0xda] sm:$0xff]  ;;  %v957_v6 = vld [vmem:[#allocation2 + $0xca] sm:$0xff] }
  0x48   : > { %847 = vrot.lane.b32.xlu0 %v3943_v54, %s4416_s29  ;;  %v518_v54 = vld [vmem:[#allocation2 + $0x150] sm:$0xff]  ;;  %v3972_v5 = vpack.c.bf16 %v955_v0, %v955_v0  ;;  %v961_v17 = vld [vmem:[#allocation2 + $0xfa] sm:$0xff]  ;;  %v964_v19 = vld [vmem:[#allocation2 + $0x122] sm:$0xff] }
  0x49   : > { %677 = vst.msk [vmem:[#allocation3 + $0x68] sm:$0xf] %vm650_vm3, %v3919_v49  ;;  %v3921_v58 = vpack.c.bf16 %v518_v54, %v518_v54  ;;  %v950_v49 = vld [vmem:[#allocation2 + $0x7a] sm:$0xff]  ;;  %v4806_v54 = vpack.c.bf16 %v949_v51, %v949_v51  ;;  %v963_v31 = vld [vmem:[#allocation2 + $0x112] sm:$0xff] }
  0x4a   : > { %v966_v33 = vld [vmem:[#allocation2 + $0x13a] sm:$0xff]  ;;  %v3980_v42 = vpack.c.bf16 %v963_v31, %v963_v31 }
  0x4b   : > { %845 = vrot.lane.b32.xlu1 %v3942_v7, %s4416_s29  ;;  %679 = vst.msk [vmem:[#allocation3 + $0x70] sm:$0xf] %vm650_vm3, %v3921_v58  ;;  %v3953_v7 = vpack.c.bf16 %v711_v62, %v711_v62  ;;  %v954_v58 = vld [vmem:[#allocation2 + $0xaa] sm:$0xff]  ;;  %v956_v62 = vld [vmem:[#allocation2 + $0xc2] sm:$0xff]  ;;  %v3983_v47 = vpack.c.bf16 %v966_v33, %v966_v33 }
  0x4c   : > { %851 = vrot.lane.b32.xlu0 %v3945_v14, %s4416_s29  ;;  %v940_v14 = vld [vmem:[#allocation2 + $0x2] sm:$0xff] }
  0x4d   : > { %v3957_v18 = vpack.c.bf16 %v940_v14, %v940_v14  ;;  %v962_v14 = vld [vmem:[#allocation2 + $0x10a] sm:$0xff] }
  0x4f   : > { %849 = vrot.lane.b32.xlu1 %v3944_v13, %s4416_s29  ;;  %v3955_v13 = vpack.c.bf16 %v713_v9, %v713_v9  ;;  %v960_v9 = vld [vmem:[#allocation2 + $0xf2] sm:$0xff] }
  0x50   : > { %855 = vrot.lane.b32.xlu0 %v3947_v15, %s4416_s29  ;;  %v3954_v15 = vpack.c.bf16 %v712_v12, %v712_v12  ;;  %v959_v12 = vld [vmem:[#allocation2 + $0xe2] sm:$0xff] }
  0x53   : > { %853 = vrot.lane.b32.xlu1 %v3946_v48, %s4416_s29  ;;  %v4794_v48 = vpack.c.bf16 %v948_v45, %v948_v45  ;;  %v965_v45 = vld [vmem:[#allocation2 + $0x12a] sm:$0xff] }
  0x54   : > { %859 = vrot.lane.b32.xlu0 %v3949_v52, %s4416_s29  ;;  %v4802_v52 = vpack.c.bf16 %v950_v49, %v950_v49  ;;  %v968_v49 = vld [vmem:[#allocation2 + $0x152] sm:$0xff]  ;;  %v3982_v51 = vpack.c.bf16 %v965_v45, %v965_v45 }
  0x55   : > { %v3985_v55 = vpack.c.bf16 %v968_v49, %v968_v49  ;;  %v1456_v49 = vld [vmem:[#allocation2 + $0x31] sm:$0xff] }
  0x57   : > { %857 = vrot.lane.b32.xlu1 %v3948_v57, %s4416_s29  ;;  %v4810_v57 = vpack.c.bf16 %v952_v53, %v952_v53  ;;  %v967_v53 = vld [vmem:[#allocation2 + $0x142] sm:$0xff] }
  0x58   : > { %863 = vrot.lane.b32.xlu0 %v3951_v61, %s4416_s29  ;;  %v3971_v61 = vpack.c.bf16 %v954_v58, %v954_v58  ;;  %v970_v58 = vld [vmem:[#allocation2 + $0x16a] sm:$0xff]  ;;  %v3984_v60 = vpack.c.bf16 %v967_v53, %v967_v53  ;;  %v1455_v53 = vld [vmem:[#allocation2 + $0x21] sm:$0xff] }
  0x5b   : > { %861 = vrot.lane.b32.xlu1 %v3950_v2, %s4416_s29  ;;  %v3973_v2 = vpack.c.bf16 %v956_v62, %v956_v62  ;;  %v3987_v62 = vpack.c.bf16 %v970_v58, %v970_v58 }
  0x5c   : > { %867 = vrot.lane.b32.xlu0 %v3953_v7, %s4416_s29  ;;  %v3975_v7 = vpack.c.bf16 %v958_v4, %v958_v4 }
  0x5f   : > { %865 = vrot.lane.b32.xlu1 %v3952_v10, %s4416_s29  ;;  %v3974_v10 = vpack.c.bf16 %v957_v6, %v957_v6 }
  0x60   : > { %871 = vrot.lane.b32.xlu0 %v3955_v13, %s4416_s29  ;;  %v3977_v13 = vpack.c.bf16 %v960_v9, %v960_v9 }
  0x63   : > { %869 = vrot.lane.b32.xlu1 %v3954_v15, %s4416_s29  ;;  %v3976_v15 = vpack.c.bf16 %v959_v12, %v959_v12 }
  0x64   : > { %1068 = vrot.lane.b32.xlu0 %v3957_v18, %s4417_s30  ;;  %v3979_v18 = vpack.c.bf16 %v962_v14, %v962_v14 }
  0x67   : > { %873 = vrot.lane.b32.xlu1 %v3956_v24, %s4416_s29  ;;  %v3978_v24 = vpack.c.bf16 %v961_v17, %v961_v17 }
  0x68   : > { %1072 = vrot.lane.b32.xlu0 %v4774_v26, %s4417_s30 }
  0x6b   : > { %1070 = vrot.lane.b32.xlu1 %v3958_v32, %s4417_s30  ;;  %v3981_v32 = vpack.c.bf16 %v964_v19, %v964_v19 }
  0x6c   : > { %1076 = vrot.lane.b32.xlu0 %v4779_v1, %s4417_s30 }
  0x6f   : > { %1074 = vrot.lane.b32.xlu1 %v4782_v11, %s4417_s30 }
  0x70   : > { %1080 = vrot.lane.b32.xlu0 %v4786_v44, %s4417_s30 }
  0x73   : > { %1078 = vrot.lane.b32.xlu1 %v4790_v46, %s4417_s30 }
  0x74   : > { %1084 = vrot.lane.b32.xlu0 %v4794_v48, %s4417_s30 }
  0x77   : > { %1082 = vrot.lane.b32.xlu1 %v4798_v50, %s4417_s30 }
  0x78   : > { %1088 = vrot.lane.b32.xlu0 %v4802_v52, %s4417_s30 }
  0x7b   : > { %1086 = vrot.lane.b32.xlu1 %v4806_v54, %s4417_s30 }
  0x7c   : > { %1092 = vrot.lane.b32.xlu0 %v4810_v57, %s4417_s30 }
  0x7f   : > { %1090 = vrot.lane.b32.xlu1 %v4814_v59, %s4417_s30 }
  0x80   : > { %1096 = vrot.lane.b32.xlu0 %v3971_v61, %s4417_s30  ;;  %v969_v61 = vld [vmem:[#allocation2 + $0x15a] sm:$0xff] }
  0x81   : > { %v3986_v4 = vpack.c.bf16 %v969_v61, %v969_v61  ;;  %v4022_v61 = vpack.c.bf16 %v1455_v53, %v1455_v53 }
  0x83   : > { %1094 = vrot.lane.b32.xlu1 %v4820_v63, %s4417_s30 }
  0x84   : > { %1100 = vrot.lane.b32.xlu0 %v3973_v2, %s4417_s30 }
  0x87   : > { %1098 = vrot.lane.b32.xlu1 %v3972_v5, %s4417_s30  ;;  %v971_v5 = vld [vmem:[#allocation2 + $0x172] sm:$0xff] }
  0x88   : > { %1104 = vrot.lane.b32.xlu0 %v3975_v7, %s4417_s30  ;;  %v812_v25 = vpop.permute.xlu0 %811  ;;  %v3988_v9 = vpack.c.bf16 %v971_v5, %v971_v5 }
  0x89   : > { %908 = vst.msk [vmem:[#allocation3] sm:$0xf] %vm907_vm4, %v812_v25 }
  0x8b   : > { %1102 = vrot.lane.b32.xlu1 %v3974_v10, %s4417_s30 }
  0x8c   : > { %1108 = vrot.lane.b32.xlu0 %v3977_v13, %s4417_s30 }
  0x8f   : > { %1106 = vrot.lane.b32.xlu1 %v3976_v15, %s4417_s30 }
  0x90   : > { %1112 = vrot.lane.b32.xlu0 %v3979_v18, %s4417_s30 }
  0x93   : > { %1110 = vrot.lane.b32.xlu1 %v3978_v24, %s4417_s30 }
  0x94   : > { %1116 = vrot.lane.b32.xlu0 %v3981_v32, %s4417_s30 }
  0x97   : > { %1114 = vrot.lane.b32.xlu1 %v3980_v42, %s4417_s30  ;;  %v1454_v42 = vld [vmem:[#allocation2 + $0x19] sm:$0xff] }
  0x98   : > { %1120 = vrot.lane.b32.xlu0 %v3983_v47, %s4417_s30  ;;  %v4021_v45 = vpack.c.bf16 %v1454_v42, %v1454_v42 }
  0x9a   : > { %v814_v43 = vpop.permute.xlu0 %813 }
  0x9b   : > { %909 = vst.msk [vmem:[#allocation3 + $0x4] sm:$0xf] %vm907_vm4, %v814_v43  ;;  %1118 = vrot.lane.b32.xlu1 %v3982_v51, %s4417_s30 }
  0x9c   : > { %1124 = vrot.lane.b32.xlu0 %v3985_v55, %s4417_s30  ;;  %v4023_v55 = vpack.c.bf16 %v1456_v49, %v1456_v49  ;;  %v1461_v49 = vld [vmem:[#allocation2 + $0x69] sm:$0xff] }
  0x9d   : > { %v816_v0 = vpop.permute.xlu1 %815  ;;  %v4028_v53 = vpack.c.bf16 %v1461_v49, %v1461_v49  ;;  %v1468_v49 = vld [vmem:[#allocation2 + $0xc1] sm:$0xff] }
  0x9e   : > { %910 = vst.msk [vmem:[#allocation3 + $0x8] sm:$0xf] %vm907_vm4, %v816_v0  ;;  %v820_v2 = vpop.permute.xlu0 %819 }
  0x9f   : > { %1122 = vrot.lane.b32.xlu1 %v3984_v60, %s4417_s30  ;;  %912 = vst.msk [vmem:[#allocation3 + $0x10] sm:$0xf] %vm907_vm4, %v820_v2 }
  0xa0   : > { %1128 = vrot.lane.b32.xlu0 %v3987_v62, %s4417_s30  ;;  %v1457_v62 = vld [vmem:[#allocation2 + $0x39] sm:$0xff] }
  0xa1   : > { %v818_v6 = vpop.permute.xlu1 %817 }
  0xa2   : > { %911 = vst.msk [vmem:[#allocation3 + $0xc] sm:$0xf] %vm907_vm4, %v818_v6  ;;  %v824_v7 = vpop.permute.xlu0 %823 }
  0xa3   : > { %1126 = vrot.lane.b32.xlu1 %v3986_v4, %s4417_s30  ;;  %914 = vst.msk [vmem:[#allocation3 + $0x18] sm:$0xf] %vm907_vm4, %v824_v7  ;;  %v4024_v4 = vpack.c.bf16 %v1457_v62, %v1457_v62 }
  0xa4   : > { %1325 = vrot.lane.b32.xlu0 %v4655_v56, %s4418_s6 }
  0xa5   : > { %v822_v10 = vpop.permute.xlu1 %821 }
  0xa6   : > { %913 = vst.msk [vmem:[#allocation3 + $0x14] sm:$0xf] %vm907_vm4, %v822_v10  ;;  %v828_v12 = vpop.permute.xlu0 %827  ;;  %v4384_v10 = vld [vmem:[%s5537_s3 + $0x20] ss:$0 sps:$4 sm:$0xff]  }
  0xa7   : > { %1130 = vrot.lane.b32.xlu1 %v3988_v9, %s4417_s30  ;;  %916 = vst.msk [vmem:[#allocation3 + $0x20] sm:$0xf] %vm907_vm4, %v828_v12  ;;  %4365 = vmatprep.subr.msk.bf16.mxu0 %vm2937_vm6, %v4384_v10 }
  0xa8   : > { %1329 = vrot.lane.b32.xlu0 %v4668_v8, %s4418_s6  ;;  %4366 = vmatprep.subr.msk.bf16.mxu1 %vm2937_vm6, %v4384_v10 }
  0xa9   : > { %v826_v13 = vpop.permute.xlu1 %825 }
  0xaa   : > { %915 = vst.msk [vmem:[#allocation3 + $0x1c] sm:$0xf] %vm907_vm4, %v826_v13  ;;  %v832_v14 = vpop.permute.xlu0 %831  ;;  %v2228_v13 = vld [vmem:[#allocation2 + $0x49] sm:$0xff] }
  0xab   : > { %1327 = vrot.lane.b32.xlu1 %v4664_v3, %s4418_s6  ;;  %918 = vst.msk [vmem:[#allocation3 + $0x28] sm:$0xf] %vm907_vm4, %v832_v14  ;;  %v4385_v14 = vld [vmem:[%s5537_s3 + $0x18] sm:$0xff]  }
  0xac   : > { %1333 = vrot.lane.b32.xlu0 %v4681_v20, %s4418_s6 }
  0xad   : > { %v830_v56 = vpop.permute.xlu1 %829 }
  0xae   : > { %917 = vst.msk [vmem:[#allocation3 + $0x24] sm:$0xf] %vm907_vm4, %v830_v56  ;;  %v836_v15 = vpop.permute.xlu0 %835 }
  0xaf   : > { %1331 = vrot.lane.b32.xlu1 %v4677_v16, %s4418_s6  ;;  %920 = vst.msk [vmem:[#allocation3 + $0x30] sm:$0xf] %vm907_vm4, %v836_v15 }
  0xb0   : > { %1337 = vrot.lane.b32.xlu0 %v4685_v22, %s4418_s6 }
  0xb1   : > { %v834_v17 = vpop.permute.xlu1 %833 }
  0xb2   : > { %919 = vst.msk [vmem:[#allocation3 + $0x2c] sm:$0xf] %vm907_vm4, %v834_v17  ;;  %v840_v3 = vpop.permute.xlu0 %839  ;;  %v4386_v17 = vld [vmem:[%s5537_s3 + $0x10] sm:$0xff]  }
  0xb3   : > { %1335 = vrot.lane.b32.xlu1 %v4683_v21, %s4418_s6  ;;  %922 = vst.msk [vmem:[#allocation3 + $0x38] sm:$0xf] %vm907_vm4, %v840_v3 }
  0xb4   : > { %1341 = vrot.lane.b32.xlu0 %v4691_v27, %s4418_s6 }
  0xb5   : > { %v838_v18 = vpop.permute.xlu1 %837 }
  0xb6   : > { %921 = vst.msk [vmem:[#allocation3 + $0x34] sm:$0xf] %vm907_vm4, %v838_v18  ;;  %v844_v19 = vpop.permute.xlu0 %843 }
  0xb7   : > { %1339 = vrot.lane.b32.xlu1 %v4687_v23, %s4418_s6  ;;  %924 = vst.msk [vmem:[#allocation3 + $0x40] sm:$0xf] %vm907_vm4, %v844_v19  ;;  %v4387_v19 = vld [vmem:[%s5537_s3 + $0x8] sm:$0xff]  }
  0xb8   : > { %1345 = vrot.lane.b32.xlu0 %v4695_v29, %s4418_s6 }
  0xb9   : > { %v842_v24 = vpop.permute.xlu1 %841 }
  0xba   : > { %923 = vst.msk [vmem:[#allocation3 + $0x3c] sm:$0xf] %vm907_vm4, %v842_v24  ;;  %v848_v25 = vpop.permute.xlu0 %847 }
  0xbb   : > { %1343 = vrot.lane.b32.xlu1 %v4693_v28, %s4418_s6  ;;  %926 = vst.msk [vmem:[#allocation3 + $0x48] sm:$0xf] %vm907_vm4, %v848_v25 }
  0xbc   : > { %1349 = vrot.lane.b32.xlu0 %v4708_v34, %s4418_s6 }
  0xbd   : > { %v846_v31 = vpop.permute.xlu1 %845 }
  0xbe   : > { %925 = vst.msk [vmem:[#allocation3 + $0x44] sm:$0xf] %vm907_vm4, %v846_v31  ;;  %v852_v32 = vpop.permute.xlu0 %851  ;;  %v4388_v31 = vld [vmem:[%s5537_s3] sm:$0xff]  }
  0xbf   : > { %1347 = vrot.lane.b32.xlu1 %v4697_v30, %s4418_s6  ;;  %928 = vst.msk [vmem:[#allocation3 + $0x50] sm:$0xf] %vm907_vm4, %v852_v32 }
  0xc0   : > { %1353 = vrot.lane.b32.xlu0 %v4712_v36, %s4418_s6 }
  0xc1   : > { %v850_v33 = vpop.permute.xlu1 %849 }
  0xc2   : > { %927 = vst.msk [vmem:[#allocation3 + $0x4c] sm:$0xf] %vm907_vm4, %v850_v33  ;;  %v856_v43 = vpop.permute.xlu0 %855  ;;  %v1460_v33 = vld [vmem:[#allocation2 + $0x61] sm:$0xff] }
  0xc3   : > { %1351 = vrot.lane.b32.xlu1 %v4710_v35, %s4418_s6  ;;  %930 = vst.msk [vmem:[#allocation3 + $0x58] sm:$0xf] %vm907_vm4, %v856_v43  ;;  %v4027_v43 = vpack.c.bf16 %v1460_v33, %v1460_v33 }
  0xc4   : > { %1357 = vrot.lane.b32.xlu0 %v4725_v38, %s4418_s6 }
  0xc5   : > { %v854_v47 = vpop.permute.xlu1 %853 }
  0xc6   : > { %929 = vst.msk [vmem:[#allocation3 + $0x54] sm:$0xf] %vm907_vm4, %v854_v47  ;;  %v860_v51 = vpop.permute.xlu0 %859 }
  0xc7   : > { %1355 = vrot.lane.b32.xlu1 %v4714_v37, %s4418_s6  ;;  %932 = vst.msk [vmem:[#allocation3 + $0x60] sm:$0xf] %vm907_vm4, %v860_v51 }
  0xc8   : > { %1582 = vrot.lane.b32.xlu0 %v4021_v45, %s4419_s7 }
  0xc9   : > { %v858_v58 = vpop.permute.xlu1 %857 }
  0xca   : > { %931 = vst.msk [vmem:[#allocation3 + $0x5c] sm:$0xf] %vm907_vm4, %v858_v58  ;;  %v864_v60 = vpop.permute.xlu0 %863 }
  0xcb   : > { %1359 = vrot.lane.b32.xlu1 %v4727_v39, %s4418_s6  ;;  %934 = vst.msk [vmem:[#allocation3 + $0x68] sm:$0xf] %vm907_vm4, %v864_v60 }
  0xcc   : > { %1586 = vrot.lane.b32.xlu0 %v4023_v55, %s4419_s7 }
  0xcd   : > { %v862_v0 = vpop.permute.xlu1 %861 }
  0xce   : > { %933 = vst.msk [vmem:[#allocation3 + $0x64] sm:$0xf] %vm907_vm4, %v862_v0  ;;  %v868_v2 = vpop.permute.xlu0 %867 }
  0xcf   : > { %1584 = vrot.lane.b32.xlu1 %v4022_v61, %s4419_s7  ;;  %936 = vst.msk [vmem:[#allocation3 + $0x70] sm:$0xf] %vm907_vm4, %v868_v2  ;;  %v2232_v2 = vld [vmem:[#allocation2 + $0x79] sm:$0xff] }
  0xd0   : > { %1839 = vrot.lane.b32.xlu0 %v4774_v26, %s4420_s8 }
  0xd1   : > { %v866_v5 = vpop.permute.xlu1 %865 }
  0xd2   : > { %935 = vst.msk [vmem:[#allocation3 + $0x6c] sm:$0xf] %vm907_vm4, %v866_v5  ;;  %v872_v6 = vpop.permute.xlu0 %871 }
  0xd3   : > { %1588 = vrot.lane.b32.xlu1 %v4024_v4, %s4419_s7  ;;  %938 = vst.msk [vmem:[#allocation3 + $0x78] sm:$0xf] %vm907_vm4, %v872_v6 }
  0xd4   : > { %1843 = vrot.lane.b32.xlu0 %v4779_v1, %s4420_s8 }
  0xd5   : > { %v870_v7 = vpop.permute.xlu1 %869 }
  0xd6   : > { %937 = vst.msk [vmem:[#allocation3 + $0x74] sm:$0xf] %vm907_vm4, %v870_v7  ;;  %v1069_v9 = vpop.permute.xlu0 %1068 }
  0xd7   : > { %1841 = vrot.lane.b32.xlu1 %v4782_v11, %s4420_s8  ;;  %1165 = vst.msk [vmem:[#allocation3] sm:$0xf] %vm1164_vm5, %v1069_v9  ;;  %v2939_v11 = vsel %vm2937_vm6, %v4384_v10, 0  ;;  %v1464_v10 = vld [vmem:[#allocation2 + $0x91] sm:$0xff] }
  0xd8   : > { %2097 = vrot.lane.b32.xlu0 %v4668_v8, %s4421_s9  ;;  %4314 = vmatpush3.bf16.msra.mxu0 %v2939_v11 }
  0xd9   : > { %v874_v26 = vpop.permute.xlu1 %873  ;;  %4360 = vmatpush3.bf16.msra.mxu1 %v2939_v11  ;;  %4315 = vmatprep.subr.bf16.mxu0 %v4385_v14 }
  0xda   : > { %939 = vst.msk [vmem:[#allocation3 + $0x7c] sm:$0xf] %vm907_vm4, %v874_v26  ;;  %v1073_v12 = vpop.permute.xlu0 %1072  ;;  %4356 = vmatprep.subr.bf16.mxu1 %v4385_v14 }
  0xdb   : > { %1845 = vrot.lane.b32.xlu1 %v4790_v46, %s4420_s8  ;;  %1167 = vst.msk [vmem:[#allocation3 + $0x8] sm:$0xf] %vm1164_vm5, %v1073_v12 }
  0xdc   : > { %2101 = vrot.lane.b32.xlu0 %v4681_v20, %s4421_s9  ;;  %v4119_v20 = vpack.c.bf16 %v2228_v13, %v2228_v13  ;;  %4316 = vmatpush3.bf16.msra.mxu0 %v4385_v14  ;;  %v1465_v13 = vld [vmem:[#allocation2 + $0x99] sm:$0xff] }
  0xdd   : > { %v1071_v8 = vpop.permute.xlu1 %1070  ;;  %4361 = vmatpush3.bf16.msra.mxu1 %v4385_v14  ;;  %4317 = vmatprep.subr.bf16.mxu0 %v4386_v17 }
  0xde   : > { %1166 = vst.msk [vmem:[#allocation3 + $0x4] sm:$0xf] %vm1164_vm5, %v1071_v8  ;;  %v1077_v56 = vpop.permute.xlu0 %1076  ;;  %4357 = vmatprep.subr.bf16.mxu1 %v4386_v17 }
  0xdf   : > { %2099 = vrot.lane.b32.xlu1 %v4677_v16, %s4421_s9  ;;  %1169 = vst.msk [vmem:[#allocation3 + $0x10] sm:$0xf] %vm1164_vm5, %v1077_v56  ;;  %v2229_v16 = vld [vmem:[#allocation2 + $0x51] sm:$0xff]  ;;  %v4032_v56 = vpack.c.bf16 %v1465_v13, %v1465_v13 }
  0xe0   : > { %2354 = vrot.lane.b32.xlu0 %v4023_v55, %s4422_s14  ;;  %4318 = vmatpush3.bf16.msra.mxu0 %v4386_v17 }
  0xe1   : > { %v1075_v15 = vpop.permute.xlu1 %1074  ;;  %4362 = vmatpush3.bf16.msra.mxu1 %v4386_v17  ;;  %4319 = vmatprep.subr.bf16.mxu0 %v4387_v19 }
  0xe2   : > { %1168 = vst.msk [vmem:[#allocation3 + $0xc] sm:$0xf] %vm1164_vm5, %v1075_v15  ;;  %v1081_v3 = vpop.permute.xlu0 %1080  ;;  %4358 = vmatprep.subr.bf16.mxu1 %v4387_v19 }
  0xe3   : > { %2103 = vrot.lane.b32.xlu1 %v4683_v21, %s4421_s9  ;;  %1171 = vst.msk [vmem:[#allocation3 + $0x18] sm:$0xf] %vm1164_vm5, %v1081_v3  ;;  %v4120_v21 = vpack.c.bf16 %v2229_v16, %v2229_v16 }
  0xe4   : > { %2358 = vrot.lane.b32.xlu0 %v4119_v20, %s4422_s14  ;;  %4320 = vmatpush3.bf16.msra.mxu0 %v4387_v19 }
  0xe5   : > { %v1079_v18 = vpop.permute.xlu1 %1078  ;;  %4363 = vmatpush3.bf16.msra.mxu1 %v4387_v19  ;;  %4321 = vmatprep.subr.bf16.mxu0 %v4388_v31 }
  0xe6   : > { %1170 = vst.msk [vmem:[#allocation3 + $0x14] sm:$0xf] %vm1164_vm5, %v1079_v18  ;;  %v1085_v24 = vpop.permute.xlu0 %1084  ;;  %4359 = vmatprep.subr.bf16.mxu1 %v4388_v31  ;;  %v2236_v18 = vld [vmem:[#allocation2 + $0xa9] sm:$0xff] }
  0xe7   : > { %2356 = vrot.lane.b32.xlu1 %v4024_v4, %s4422_s14  ;;  %1173 = vst.msk [vmem:[#allocation3 + $0x20] sm:$0xf] %vm1164_vm5, %v1085_v24 }
  0xe8   : > { %2611 = vrot.lane.b32.xlu0 %v4779_v1, %s4423_s22  ;;  %4322 = vmatpush3.bf16.msra.mxu0 %v4388_v31 }
  0xe9   : > { %v1083_v25 = vpop.permute.xlu1 %1082  ;;  %4364 = vmatpush3.bf16.msra.mxu1 %v4388_v31 }
  0xea   : > { %1172 = vst.msk [vmem:[#allocation3 + $0x1c] sm:$0xf] %vm1164_vm5, %v1083_v25  ;;  %v1089_v32 = vpop.permute.xlu0 %1088  ;;  %v2493_v25 = vld [vmem:[#allocation2 + $0xaa] sm:$0xff] }
  0xeb   : > { %2360 = vrot.lane.b32.xlu1 %v4120_v21, %s4422_s14  ;;  %1175 = vst.msk [vmem:[#allocation3 + $0x28] sm:$0xf] %vm1164_vm5, %v1089_v32 }
  0xec   : > { %2615 = vrot.lane.b32.xlu0 %v4786_v44, %s4423_s22 }
  0xed   : > { %v1087_v1 = vpop.permute.xlu1 %1086 }
  0xee   : > { %1174 = vst.msk [vmem:[#allocation3 + $0x24] sm:$0xf] %vm1164_vm5, %v1087_v1  ;;  %v1093_v42 = vpop.permute.xlu0 %1092  ;;  %v2492_v1 = vld [vmem:[#allocation2 + $0x9a] sm:$0xff] }
  0xef   : > { %2613 = vrot.lane.b32.xlu1 %v4790_v46, %s4423_s22  ;;  %1177 = vst.msk [vmem:[#allocation3 + $0x30] sm:$0xf] %vm1164_vm5, %v1093_v42 }
  0xf0   : > { %1590 = vrot.lane.b32.xlu0 %v4119_v20, %s4419_s7 }
  0xf1   : > { %v1091_v45 = vpop.permute.xlu1 %1090 }
  0xf2   : > { %1176 = vst.msk [vmem:[#allocation3 + $0x2c] sm:$0xf] %vm1164_vm5, %v1091_v45  ;;  %v1097_v47 = vpop.permute.xlu0 %1096  ;;  %v2494_v45 = vld [vmem:[#allocation2 + $0xb2] sm:$0xff] }
  0xf3   : > { %2617 = vrot.lane.b32.xlu1 %v4798_v50, %s4423_s22  ;;  %1179 = vst.msk [vmem:[#allocation3 + $0x38] sm:$0xf] %vm1164_vm5, %v1097_v47 }
  0xf4   : > { %1594 = vrot.lane.b32.xlu0 %v4027_v43, %s4419_s7 }
  0xf5   : > { %v1095_v51 = vpop.permute.xlu1 %1094 }
  0xf6   : > { %1178 = vst.msk [vmem:[#allocation3 + $0x34] sm:$0xf] %vm1164_vm5, %v1095_v51  ;;  %v1101_v46 = vpop.permute.xlu0 %1100 }
  0xf7   : > { %1592 = vrot.lane.b32.xlu1 %v4120_v21, %s4419_s7  ;;  %1181 = vst.msk [vmem:[#allocation3 + $0x40] sm:$0xf] %vm1164_vm5, %v1101_v46  ;;  %v4160_v46 = vpack.c.bf16 %v2494_v45, %v2494_v45 }
  0xf8   : > { %1847 = vrot.lane.b32.xlu0 %v4786_v44, %s4420_s8 }
  0xf9   : > { %v1099_v55 = vpop.permute.xlu1 %1098 }
  0xfa   : > { %1180 = vst.msk [vmem:[#allocation3 + $0x3c] sm:$0xf] %vm1164_vm5, %v1099_v55  ;;  %v1105_v58 = vpop.permute.xlu0 %1104 }
  0xfb   : > { %1596 = vrot.lane.b32.xlu1 %v4028_v53, %s4419_s7  ;;  %1183 = vst.msk [vmem:[#allocation3 + $0x48] sm:$0xf] %vm1164_vm5, %v1105_v58 }
  0xfc   : > { %1851 = vrot.lane.b32.xlu0 %v4794_v48, %s4420_s8 }
  0xfd   : > { %v1103_v60 = vpop.permute.xlu1 %1102 }
  0xfe   : > { %1182 = vst.msk [vmem:[#allocation3 + $0x44] sm:$0xf] %vm1164_vm5, %v1103_v60  ;;  %v1109_v61 = vpop.permute.xlu0 %1108  ;;  %v1469_v60 = vld [vmem:[#allocation2 + $0xc9] sm:$0xff] }
  0xff   : > { %1849 = vrot.lane.b32.xlu1 %v4798_v50, %s4420_s8  ;;  %1185 = vst.msk [vmem:[#allocation3 + $0x50] sm:$0xf] %vm1164_vm5, %v1109_v61 }
 0x100   : > { %2105 = vrot.lane.b32.xlu0 %v4685_v22, %s4421_s9  ;;  %v4123_v22 = vpack.c.bf16 %v2232_v2, %v2232_v2 }
 0x101   : > { %v1107_v44 = vpop.permute.xlu1 %1106 }
 0x102   : > { %1184 = vst.msk [vmem:[#allocation3 + $0x4c] sm:$0xf] %vm1164_vm5, %v1107_v44  ;;  %v1113_v62 = vpop.permute.xlu0 %1112  ;;  %v1725_v44 = vld [vmem:[#allocation2 + $0xc2] sm:$0xff] }
 0x103   : > { %1853 = vrot.lane.b32.xlu1 %v4806_v54, %s4420_s8  ;;  %1187 = vst.msk [vmem:[#allocation3 + $0x58] sm:$0xf] %vm1164_vm5, %v1113_v62  ;;  %v4067_v2 = vpack.c.bf16 %v1725_v44, %v1725_v44  ;;  %v1986_v44 = vld [vmem:[#allocation2 + $0xf8] sm:$0xff] }
 0x104   : > { %2109 = vrot.lane.b32.xlu0 %v4691_v27, %s4421_s9  ;;  %v2233_v27 = vld [vmem:[#allocation2 + $0x81] sm:$0xff] }
 0x105   : > { %v1111_v0 = vpop.permute.xlu1 %1110  ;;  %v4124_v7 = vpack.c.bf16 %v2233_v27, %v2233_v27 }
 0x106   : > { %1186 = vst.msk [vmem:[#allocation3 + $0x54] sm:$0xf] %vm1164_vm5, %v1111_v0  ;;  %v1117_v50 = vpop.permute.xlu0 %1116  ;;  %v4036_v0 = vpack.c.bf16 %v1469_v60, %v1469_v60 }
 0x107   : > { %2107 = vrot.lane.b32.xlu1 %v4687_v23, %s4421_s9  ;;  %1189 = vst.msk [vmem:[#allocation3 + $0x60] sm:$0xf] %vm1164_vm5, %v1117_v50 }
 0x108   : > { %2362 = vrot.lane.b32.xlu0 %v4027_v43, %s4422_s14  ;;  %v4158_v43 = vpack.c.bf16 %v2492_v1, %v2492_v1 }
 0x109   : > { %v1115_v4 = vpop.permute.xlu1 %1114 }
 0x10a   : > { %1188 = vst.msk [vmem:[#allocation3 + $0x5c] sm:$0xf] %vm1164_vm5, %v1115_v4  ;;  %v1121_v5 = vpop.permute.xlu0 %1120  ;;  %v1726_v4 = vld [vmem:[#allocation2 + $0xca] sm:$0xff] }
 0x10b   : > { %2111 = vrot.lane.b32.xlu1 %v4693_v28, %s4421_s9  ;;  %1191 = vst.msk [vmem:[#allocation3 + $0x68] sm:$0xf] %vm1164_vm5, %v1121_v5 }
 0x10c   : > { %2366 = vrot.lane.b32.xlu0 %v4123_v22, %s4422_s14 }
 0x10d   : > { %v1119_v6 = vpop.permute.xlu1 %1118 }
 0x10e   : > { %1190 = vst.msk [vmem:[#allocation3 + $0x64] sm:$0xf] %vm1164_vm5, %v1119_v6  ;;  %v1125_v23 = vpop.permute.xlu0 %1124  ;;  %v4068_v6 = vpack.c.bf16 %v1726_v4, %v1726_v4 }
 0x10f   : > { %2364 = vrot.lane.b32.xlu1 %v4028_v53, %s4422_s14  ;;  %1193 = vst.msk [vmem:[#allocation3 + $0x70] sm:$0xf] %vm1164_vm5, %v1125_v23  ;;  %v4035_v53 = vpack.c.bf16 %v1468_v49, %v1468_v49  ;;  %v1985_v49 = vld [vmem:[#allocation2 + $0xf0] sm:$0xff] }
 0x110   : > { %2619 = vrot.lane.b32.xlu0 %v4794_v48, %s4423_s22  ;;  %v4031_v48 = vpack.c.bf16 %v1464_v10, %v1464_v10 }
 0x111   : > { %v1123_v9 = vpop.permute.xlu1 %1122 }
 0x112   : > { %1192 = vst.msk [vmem:[#allocation3 + $0x6c] sm:$0xf] %vm1164_vm5, %v1123_v9  ;;  %v1129_v28 = vpop.permute.xlu0 %1128 }
 0x113   : > { %2368 = vrot.lane.b32.xlu1 %v4124_v7, %s4422_s14  ;;  %1195 = vst.msk [vmem:[#allocation3 + $0x78] sm:$0xf] %vm1164_vm5, %v1129_v28  ;;  %v2240_v28 = vld [vmem:[#allocation2 + $0xd9] sm:$0xff] }
 0x114   : > { %2623 = vrot.lane.b32.xlu0 %v4802_v52, %s4423_s22 }
 0x115   : > { %v1127_v26 = vpop.permute.xlu1 %1126 }
 0x116   : > { %1194 = vst.msk [vmem:[#allocation3 + $0x74] sm:$0xf] %vm1164_vm5, %v1127_v26  ;;  %v1326_v12 = vpop.permute.xlu0 %1325 }
 0x117   : > { %2621 = vrot.lane.b32.xlu1 %v4806_v54, %s4423_s22  ;;  %1422 = vst.msk [vmem:[#allocation3] sm:$0xf] %vm1421_vm7, %v1326_v12 }
 0x118   : > { %1598 = vrot.lane.b32.xlu0 %v4123_v22, %s4419_s7 }
 0x119   : > { %v1131_v11 = vpop.permute.xlu1 %1130 }
 0x11a   : > { %1196 = vst.msk [vmem:[#allocation3 + $0x7c] sm:$0xf] %vm1164_vm5, %v1131_v11  ;;  %v1330_v8 = vpop.permute.xlu0 %1329 }
 0x11b   : > { %2625 = vrot.lane.b32.xlu1 %v4814_v59, %s4423_s22  ;;  %1424 = vst.msk [vmem:[#allocation3 + $0x8] sm:$0xf] %vm1421_vm7, %v1330_v8 }
 0x11c   : > { %1602 = vrot.lane.b32.xlu0 %v4031_v48, %s4419_s7 }
 0x11d   : > { %v1328_v14 = vpop.permute.xlu1 %1327 }
 0x11e   : > { %1423 = vst.msk [vmem:[#allocation3 + $0x4] sm:$0xf] %vm1421_vm7, %v1328_v14  ;;  %v1334_v54 = vpop.permute.xlu0 %1333 }
 0x11f   : > { %1600 = vrot.lane.b32.xlu1 %v4124_v7, %s4419_s7  ;;  %1426 = vst.msk [vmem:[#allocation3 + $0x10] sm:$0xf] %vm1421_vm7, %v1334_v54  ;;  %v2498_v54 = vld [vmem:[#allocation2 + $0xe2] sm:$0xff] }
 0x120   : > { %1855 = vrot.lane.b32.xlu0 %v4802_v52, %s4420_s8 }
 0x121   : > { %v1332_v20 = vpop.permute.xlu1 %1331 }
 0x122   : > { %1425 = vst.msk [vmem:[#allocation3 + $0xc] sm:$0xf] %vm1421_vm7, %v1332_v20  ;;  %v1338_v15 = vpop.permute.xlu0 %1337 }
 0x123   : > { %1604 = vrot.lane.b32.xlu1 %v4032_v56, %s4419_s7  ;;  %1428 = vst.msk [vmem:[#allocation3 + $0x18] sm:$0xf] %vm1421_vm7, %v1338_v15  ;;  %v4164_v15 = vpack.c.bf16 %v2498_v54, %v2498_v54 }
 0x124   : > { %1859 = vrot.lane.b32.xlu0 %v4810_v57, %s4420_s8 }
 0x125   : > { %v1336_v17 = vpop.permute.xlu1 %1335 }
 0x126   : > { %1427 = vst.msk [vmem:[#allocation3 + $0x14] sm:$0xf] %vm1421_vm7, %v1336_v17  ;;  %v1342_v3 = vpop.permute.xlu0 %1341 }
 0x127   : > { %1857 = vrot.lane.b32.xlu1 %v4814_v59, %s4420_s8  ;;  %1430 = vst.msk [vmem:[#allocation3 + $0x20] sm:$0xf] %vm1421_vm7, %v1342_v3 }
 0x128   : > { %2113 = vrot.lane.b32.xlu0 %v4695_v29, %s4421_s9  ;;  %v4127_v29 = vpack.c.bf16 %v2236_v18, %v2236_v18  ;;  %v4291_v18 = vld [vmem:[%s4522_s24 + $0x78] sm:$0xff]  }
 0x129   : > { %v1340_v52 = vpop.permute.xlu1 %1339 }
 0x12a   : > { %1429 = vst.msk [vmem:[#allocation3 + $0x1c] sm:$0xf] %vm1421_vm7, %v1340_v52  ;;  %v1346_v16 = vpop.permute.xlu0 %1345  ;;  %v1472_v52 = vld [vmem:[#allocation2 + $0xf1] sm:$0xff] }
 0x12b   : > { %1861 = vrot.lane.b32.xlu1 %v4820_v63, %s4420_s8  ;;  %1432 = vst.msk [vmem:[#allocation3 + $0x28] sm:$0xf] %vm1421_vm7, %v1346_v16  ;;  %v2491_v63 = vld [vmem:[#allocation2 + $0x92] sm:$0xff] }
 0x12c   : > { %2117 = vrot.lane.b32.xlu0 %v4708_v34, %s4421_s9  ;;  %v2237_v34 = vld [vmem:[#allocation2 + $0xb1] sm:$0xff]  ;;  %v4157_v21 = vpack.c.bf16 %v2491_v63, %v2491_v63 }
 0x12d   : > { %v1344_v57 = vpop.permute.xlu1 %1343  ;;  %v4128_v32 = vpack.c.bf16 %v2237_v34, %v2237_v34 }
 0x12e   : > { %1431 = vst.msk [vmem:[#allocation3 + $0x24] sm:$0xf] %vm1421_vm7, %v1344_v57  ;;  %v1350_v59 = vpop.permute.xlu0 %1349  ;;  %v5119_v57 = vpack.c.bf16 %v1472_v52, %v1472_v52 }
 0x12f   : > { %2115 = vrot.lane.b32.xlu1 %v4697_v30, %s4421_s9  ;;  %1434 = vst.msk [vmem:[#allocation3 + $0x30] sm:$0xf] %vm1421_vm7, %v1350_v59 }
 0x130   : > { %2370 = vrot.lane.b32.xlu0 %v4031_v48, %s4422_s14 }
 0x131   : > { %v1348_v19 = vpop.permute.xlu1 %1347 }
 0x132   : > { %1433 = vst.msk [vmem:[#allocation3 + $0x2c] sm:$0xf] %vm1421_vm7, %v1348_v19  ;;  %v1354_v24 = vpop.permute.xlu0 %1353  ;;  %v4276_v19 = vunpack.c.h.bf16 %v4291_v18 }
 0x133   : > { %2119 = vrot.lane.b32.xlu1 %v4710_v35, %s4421_s9  ;;  %1436 = vst.msk [vmem:[#allocation3 + $0x38] sm:$0xf] %vm1421_vm7, %v1354_v24  ;;  %v4159_v35 = vpack.c.bf16 %v2493_v25, %v2493_v25  ;;  %v4405_v24 = vld [vmem:[%s5535_s1] ss:$0 sm:$0xff] }
 0x134   : > { %2374 = vrot.lane.b32.xlu0 %v4127_v29, %s4422_s14 }
 0x135   : > { %v1352_v30 = vpop.permute.xlu1 %1351 }
 0x136   : > { %1435 = vst.msk [vmem:[#allocation3 + $0x34] sm:$0xf] %vm1421_vm7, %v1352_v30  ;;  %v1358_v31 = vpop.permute.xlu0 %1357  ;;  %v1473_v30 = vld [vmem:[#allocation2 + $0xf9] sm:$0xff] }
 0x137   : > { %2372 = vrot.lane.b32.xlu1 %v4032_v56, %s4422_s14  ;;  %1438 = vst.msk [vmem:[#allocation3 + $0x40] sm:$0xf] %vm1421_vm7, %v1358_v31  ;;  %v1729_v31 = vld [vmem:[#allocation2 + $0xf2] sm:$0xff] }
 0x138   : > { %2627 = vrot.lane.b32.xlu0 %v4157_v21, %s4423_s22  ;;  %v339_v21 = vmul.f32 %v4405_v24, %v4276_v19  ;;  %v4071_v45 = vpack.c.bf16 %v1729_v31, %v1729_v31  ;;  %v1477_v19 = vld [vmem:[#allocation2 + $0x129] sm:$0xff] }
 0x139   : > { %v1356_v33 = vpop.permute.xlu1 %1355 }
 0x13a   : > { %1437 = vst.msk [vmem:[#allocation3 + $0x3c] sm:$0xf] %vm1421_vm7, %v1356_v33  ;;  %v1583_v42 = vpop.permute.xlu0 %1582  ;;  %v4040_v33 = vpack.c.bf16 %v1473_v30, %v1473_v30 }
 0x13b   : > { %2376 = vrot.lane.b32.xlu1 %v4128_v32, %s4422_s14  ;;  %1679 = vst.msk [vmem:[#allocation3] sm:$0xf] %vm1678_vm8, %v1583_v42 }
 0x13c   : > { %2631 = vrot.lane.b32.xlu0 %v4159_v35, %s4423_s22 }
 0x13d   : > { %v1360_v47 = vpop.permute.xlu1 %1359 }
 0x13e   : > { %1439 = vst.msk [vmem:[#allocation3 + $0x44] sm:$0xf] %vm1421_vm7, %v1360_v47  ;;  %v1587_v51 = vpop.permute.xlu0 %1586 }
 0x13f   : > { %2629 = vrot.lane.b32.xlu1 %v4158_v43, %s4423_s22  ;;  %1681 = vst.msk [vmem:[#allocation3 + $0x8] sm:$0xf] %vm1678_vm8, %v1587_v51 }
 0x140   : > { %1606 = vrot.lane.b32.xlu0 %v4127_v29, %s4419_s7 }
 0x141   : > { %v1585_v55 = vpop.permute.xlu1 %1584 }
 0x142   : > { %1680 = vst.msk [vmem:[#allocation3 + $0x4] sm:$0xf] %vm1678_vm8, %v1585_v55  ;;  %v1840_v58 = vpop.permute.xlu0 %1839 }
 0x143   : > { %2633 = vrot.lane.b32.xlu1 %v4160_v46, %s4423_s22  ;;  %1936 = vst.msk [vmem:[#allocation3] sm:$0xf] %vm1935_vm9, %v1840_v58  ;;  %v1987_v58 = vld [vmem:[#allocation2 + $0x108] sm:$0xff] }
 0x144   : > { %1610 = vrot.lane.b32.xlu0 %v4035_v53, %s4419_s7 }
 0x145   : > { %v1589_v61 = vpop.permute.xlu1 %1588 }
 0x146   : > { %1682 = vst.msk [vmem:[#allocation3 + $0xc] sm:$0xf] %vm1678_vm8, %v1589_v61  ;;  %v1844_v62 = vpop.permute.xlu0 %1843 }
 0x147   : > { %1608 = vrot.lane.b32.xlu1 %v4128_v32, %s4419_s7  ;;  %1938 = vst.msk [vmem:[#allocation3 + $0x8] sm:$0xf] %vm1935_vm9, %v1844_v62  ;;  %v4103_v62 = vpack.c.bf16 %v1987_v58, %v1987_v58 }
 0x148   : > { %1863 = vrot.lane.b32.xlu0 %v4159_v35, %s4420_s8 }
 0x149   : > { %v1842_v50 = vpop.permute.xlu1 %1841 }
 0x14a   : > { %1937 = vst.msk [vmem:[#allocation3 + $0x4] sm:$0xf] %vm1935_vm9, %v1842_v50  ;;  %v2098_v22 = vpop.permute.xlu0 %2097  ;;  %v4102_v50 = vpack.c.bf16 %v1986_v44, %v1986_v44 }
 0x14b   : > { %1612 = vrot.lane.b32.xlu1 %v4036_v0, %s4419_s7  ;;  %2194 = vst.msk [vmem:[#allocation3] sm:$0xf] %vm2193_vm10, %v2098_v22  ;;  %v1988_v22 = vld [vmem:[#allocation2 + $0x110] sm:$0xff] }
 0x14c   : > { %1867 = vrot.lane.b32.xlu0 %v4067_v2, %s4420_s8 }
 0x14d   : > { %v1846_v5 = vpop.permute.xlu1 %1845 }
 0x14e   : > { %1939 = vst.msk [vmem:[#allocation3 + $0xc] sm:$0xf] %vm1935_vm9, %v1846_v5  ;;  %v2102_v27 = vpop.permute.xlu0 %2101  ;;  %v2244_v5 = vld [vmem:[#allocation2 + $0x109] sm:$0xff] }
 0x14f   : > { %1865 = vrot.lane.b32.xlu1 %v4160_v46, %s4420_s8  ;;  %2196 = vst.msk [vmem:[#allocation3 + $0x8] sm:$0xf] %vm2193_vm10, %v2102_v27  ;;  %v1730_v46 = vld [vmem:[#allocation2 + $0xfa] sm:$0xff] }
 0x150   : > { %2121 = vrot.lane.b32.xlu0 %v4712_v36, %s4421_s9  ;;  %v4131_v36 = vpack.c.bf16 %v2240_v28, %v2240_v28  ;;  %v4072_v61 = vpack.c.bf16 %v1730_v46, %v1730_v46  ;;  %v2245_v28 = vld [vmem:[#allocation2 + $0x111] sm:$0xff] }
 0x151   : > { %v2100_v23 = vpop.permute.xlu1 %2099 }
 0x152   : > { %2195 = vst.msk [vmem:[#allocation3 + $0x4] sm:$0xf] %vm2193_vm10, %v2100_v23  ;;  %v2355_v7 = vpop.permute.xlu0 %2354  ;;  %v4135_v23 = vpack.c.bf16 %v2244_v5, %v2244_v5 }
 0x153   : > { %1869 = vrot.lane.b32.xlu1 %v4068_v6, %s4420_s8  ;;  %2451 = vst.msk [vmem:[#allocation3] sm:$0xf] %vm2450_vm11, %v2355_v7 }
 0x154   : > { %2125 = vrot.lane.b32.xlu0 %v4725_v38, %s4421_s9  ;;  %v2241_v38 = vld [vmem:[#allocation2 + $0xe1] sm:$0xff] }
 0x155   : > { %v2104_v9 = vpop.permute.xlu1 %2103  ;;  %v4132_v8 = vpack.c.bf16 %v2241_v38, %v2241_v38 }
 0x156   : > { %2197 = vst.msk [vmem:[#allocation3 + $0xc] sm:$0xf] %vm2193_vm10, %v2104_v9  ;;  %v2359_v26 = vpop.permute.xlu0 %2358 }
 0x157   : > { %2123 = vrot.lane.b32.xlu1 %v4714_v37, %s4421_s9  ;;  %2453 = vst.msk [vmem:[#allocation3 + $0x8] sm:$0xf] %vm2450_vm11, %v2359_v26  ;;  %v2497_v37 = vld [vmem:[#allocation2 + $0xda] sm:$0xff] }
 0x158   : > { %2378 = vrot.lane.b32.xlu0 %v4035_v53, %s4422_s14  ;;  %v4163_v13 = vpack.c.bf16 %v2497_v37, %v2497_v37  ;;  %v4101_v53 = vpack.c.bf16 %v1985_v49, %v1985_v49 }
 0x159   : > { %v2357_v10 = vpop.permute.xlu1 %2356 }
 0x15a   : > { %2452 = vst.msk [vmem:[#allocation3 + $0x4] sm:$0xf] %vm2450_vm11, %v2357_v10  ;;  %v2612_v12 = vpop.permute.xlu0 %2611 }
 0x15b   : > { %2127 = vrot.lane.b32.xlu1 %v4727_v39, %s4421_s9  ;;  %2708 = vst.msk [vmem:[#allocation3] sm:$0xf] %vm2707_vm12, %v2612_v12  ;;  %v4136_v12 = vpack.c.bf16 %v2245_v28, %v2245_v28 }
 0x15c   : > { %2382 = vrot.lane.b32.xlu0 %v4131_v36, %s4422_s14 }
 0x15d   : > { %v2361_v48 = vpop.permute.xlu1 %2360 }
 0x15e   : > { %2454 = vst.msk [vmem:[#allocation3 + $0xc] sm:$0xf] %vm2450_vm11, %v2361_v48  ;;  %v2616_v11 = vpop.permute.xlu0 %2615 }
 0x15f   : > { %2380 = vrot.lane.b32.xlu1 %v4036_v0, %s4422_s14  ;;  %2710 = vst.msk [vmem:[#allocation3 + $0x8] sm:$0xf] %vm2707_vm12, %v2616_v11  ;;  %v2502_v11 = vld [vmem:[#allocation2 + $0x112] sm:$0xff] }
 0x160   : > { %2635 = vrot.lane.b32.xlu0 %v4067_v2, %s4423_s22  ;;  %v4168_v54 = vpack.c.bf16 %v2502_v11, %v2502_v11 }
 0x161   : > { %v2614_v14 = vpop.permute.xlu1 %2613 }
 0x162   : > { %2709 = vst.msk [vmem:[#allocation3 + $0x4] sm:$0xf] %vm2707_vm12, %v2614_v14  ;;  %v1591_v39 = vpop.permute.xlu0 %1590  ;;  %v1219_v14 = vld [vmem:[#allocation2 + $0x120] sm:$0xff] }
 0x163   : > { %2384 = vrot.lane.b32.xlu1 %v4132_v8, %s4422_s14  ;;  %1683 = vst.msk [vmem:[#allocation3 + $0x10] sm:$0xf] %vm1678_vm8, %v1591_v39 }
 0x164   : > { %2639 = vrot.lane.b32.xlu0 %v4163_v13, %s4423_s22 }
 0x165   : > { %v2618_v56 = vpop.permute.xlu1 %2617 }
 0x166   : > { %2711 = vst.msk [vmem:[#allocation3 + $0xc] sm:$0xf] %vm2707_vm12, %v2618_v56  ;;  %v1595_v20 = vpop.permute.xlu0 %1594  ;;  %v4011_v56 = vpack.c.bf16 %v1219_v14, %v1219_v14 }
 0x167   : > { %2637 = vrot.lane.b32.xlu1 %v4068_v6, %s4423_s22  ;;  %1685 = vst.msk [vmem:[#allocation3 + $0x18] sm:$0xf] %vm1678_vm8, %v1595_v20  ;;  %v4104_v6 = vpack.c.bf16 %v1988_v22, %v1988_v22 }
 0x168   : > { %1361 = vrot.lane.b32.xlu0 %v4729_v40, %s4418_s6  ;;  %v4275_v40 = vunpack.c.l.bf16 %v4291_v18 }
 0x169   : > { %v1593_v17 = vpop.permute.xlu1 %1592  ;;  %v4389_v3 = vld [vmem:[#allocation3] sm:$0xff]  }
 0x16a   : > { %1684 = vst.msk [vmem:[#allocation3 + $0x14] sm:$0xf] %vm1678_vm8, %v1593_v17  ;;  %v1848_v16 = vpop.permute.xlu0 %1847  ;;  %4323 = vmatprep.mubr.msk.bf16.mxu0 %vm2888_vm13, %v4389_v3  ;;  %v338_v34 = vmul.f32 %v4405_v24, %v4275_v40  ;;  %v1220_v3 = vld [vmem:[#allocation2 + $0x128] sm:$0xff] }
 0x16b   : > { %2641 = vrot.lane.b32.xlu1 %v4164_v15, %s4423_s22  ;;  %1940 = vst.msk [vmem:[#allocation3 + $0x10] sm:$0xf] %vm1935_vm9, %v1848_v16  ;;  %v1476_v16 = vld [vmem:[#allocation2 + $0x121] sm:$0xff]  ;;  %v4012_v18 = vpack.c.bf16 %v1220_v3, %v1220_v3 }
 0x16c   : > { %1614 = vrot.lane.b32.xlu0 %v4131_v36, %s4419_s7  ;;  %v2501_v36 = vld [vmem:[#allocation2 + $0x10a] sm:$0xff]  ;;  %v1733_v24 = vld [vmem:[#allocation2 + $0x122] sm:$0xff] }
 0x16d   : > { %v1597_v59 = vpop.permute.xlu1 %1596  ;;  %v4390_v29 = vld [vmem:[#allocation3 + $0x8] sm:$0xff]   ;;  %v4167_v38 = vpack.c.bf16 %v2501_v36, %v2501_v36  ;;  %v4075_v30 = vpack.c.bf16 %v1733_v24, %v1733_v24  ;;  %v1996_v24 = vld [vmem:[#allocation2 + $0x170] sm:$0xff] }
 0x16e   : > { %1686 = vst.msk [vmem:[#allocation3 + $0x1c] sm:$0xf] %vm1678_vm8, %v1597_v59  ;;  %v1852_v63 = vpop.permute.xlu0 %1851  ;;  %4324 = vmatmul.mubr.msk.bf16.vlgmr.msra.gmra.mxu0 %vm2888_vm13, %v4390_v29  ;;  %v4043_v59 = vpack.c.bf16 %v1476_v16, %v1476_v16  ;;  %v1738_v16 = vld [vmem:[#allocation2 + $0x15a] sm:$0xff] }
 0x16f   : > { %1363 = vrot.lane.b32.xlu1 %v4731_v41, %s4418_s6  ;;  %1942 = vst.msk [vmem:[#allocation3 + $0x18] sm:$0xf] %vm1935_vm9, %v1852_v63  ;;  %v4406_v41 = vld [vmem:[%s5536_s2] ss:$0 sm:$0xff] }
 0x170   : > { %1618 = vrot.lane.b32.xlu0 %v5119_v57, %s4419_s7  ;;  %v377_v32 = vadd.f32 %v4406_v41, %v338_v34  ;;  %v378_v1 = vadd.f32 %v4406_v41, %v339_v21  ;;  %v4044_v21 = vpack.c.bf16 %v1477_v19, %v1477_v19  ;;  %v1734_v41 = vld [vmem:[#allocation2 + $0x12a] sm:$0xff] }
 0x171   : > { %v1850_v25 = vpop.permute.xlu1 %1849 }
 0x172   : > { %1941 = vst.msk [vmem:[#allocation3 + $0x14] sm:$0xf] %vm1935_vm9, %v1850_v25  ;;  %v2106_v35 = vpop.permute.xlu0 %2105  ;;  %v409_v42 = vmax.f32 %v377_v32, 0.0  ;;  %v410_v43 = vmax.f32 %v378_v1, 0.0  ;;  %v1991_v1 = vld [vmem:[#allocation2 + $0x138] sm:$0xff] }
 0x173   : > { %1616 = vrot.lane.b32.xlu1 %v4132_v8, %s4419_s7  ;;  %2198 = vst.msk [vmem:[#allocation3 + $0x10] sm:$0xf] %vm2193_vm10, %v2106_v35 }
 0x174   : > { %1871 = vrot.lane.b32.xlu0 %v4163_v13, %s4420_s8  ;;  %443 = vst.msk [vmem:[#allocation2 + $0x181] sm:$0xff] %vm412_vm0, %v409_v42  ;;  %444 = vst.msk [vmem:[#allocation2 + $0x189] sm:$0xff] %vm412_vm0, %v410_v43  ;;  %v4107_v42 = vpack.c.bf16 %v1991_v1, %v1991_v1 }
 0x175   : > { %v1854_v47 = vpop.permute.xlu1 %1853 }
 0x176   : > { %1943 = vst.msk [vmem:[#allocation3 + $0x1c] sm:$0xf] %vm1935_vm9, %v1854_v47  ;;  %v2110_v51 = vpop.permute.xlu0 %2109  ;;  %v1992_v47 = vld [vmem:[#allocation2 + $0x140] sm:$0xff] }
 0x177   : > { %1620 = vrot.lane.b32.xlu1 %v4040_v33, %s4419_s7  ;;  %2200 = vst.msk [vmem:[#allocation3 + $0x18] sm:$0xf] %vm2193_vm10, %v2110_v51  ;;  %v2248_v51 = vld [vmem:[#allocation2 + $0x139] sm:$0xff] }
 0x178   : > { %1875 = vrot.lane.b32.xlu0 %v4071_v45, %s4420_s8 }
 0x179   : > { %v2108_v55 = vpop.permute.xlu1 %2107 }
 0x17a   : > { %2199 = vst.msk [vmem:[#allocation3 + $0x14] sm:$0xf] %vm2193_vm10, %v2108_v55  ;;  %v2363_v60 = vpop.permute.xlu0 %2362  ;;  %v4139_v55 = vpack.c.bf16 %v2248_v51, %v2248_v51 }
 0x17b   : > { %1873 = vrot.lane.b32.xlu1 %v4164_v15, %s4420_s8  ;;  %2455 = vst.msk [vmem:[#allocation3 + $0x10] sm:$0xf] %vm2450_vm11, %v2363_v60 }
 0x17c   : > { %2129 = vrot.lane.b32.xlu0 %v4101_v53, %s4421_s9  ;;  %v4108_v53 = vpack.c.bf16 %v1992_v47, %v1992_v47 }
 0x17d   : > { %v2112_v0 = vpop.permute.xlu1 %2111 }
 0x17e   : > { %2201 = vst.msk [vmem:[#allocation3 + $0x1c] sm:$0xf] %vm2193_vm10, %v2112_v0  ;;  %v2367_v2 = vpop.permute.xlu0 %2366  ;;  %v2505_v0 = vld [vmem:[#allocation2 + $0x13a] sm:$0xff] }
 0x17f   : > { %1877 = vrot.lane.b32.xlu1 %v4072_v61, %s4420_s8  ;;  %2457 = vst.msk [vmem:[#allocation3 + $0x18] sm:$0xf] %vm2450_vm11, %v2367_v2  ;;  %v4171_v22 = vpack.c.bf16 %v2505_v0, %v2505_v0 }
 0x180   : > { %2133 = vrot.lane.b32.xlu0 %v4103_v62, %s4421_s9 }
 0x181   : > { %v2365_v4 = vpop.permute.xlu1 %2364 }
 0x182   : > { %2456 = vst.msk [vmem:[#allocation3 + $0x14] sm:$0xf] %vm2450_vm11, %v2365_v4  ;;  %v2620_v27 = vpop.permute.xlu0 %2619 }
 0x183   : > { %2131 = vrot.lane.b32.xlu1 %v4102_v50, %s4421_s9  ;;  %2712 = vst.msk [vmem:[#allocation3 + $0x10] sm:$0xf] %vm2707_vm12, %v2620_v27 }
 0x184   : > { %2386 = vrot.lane.b32.xlu0 %v5119_v57, %s4422_s14 }
 0x185   : > { %v2369_v7 = vpop.permute.xlu1 %2368 }
 0x186   : > { %2458 = vst.msk [vmem:[#allocation3 + $0x1c] sm:$0xf] %vm2450_vm11, %v2369_v7  ;;  %v2624_v9 = vpop.permute.xlu0 %2623  ;;  %v1223_v7 = vld [vmem:[#allocation2 + $0x150] sm:$0xff] }
 0x187   : > { %2135 = vrot.lane.b32.xlu1 %v4104_v6, %s4421_s9  ;;  %2714 = vst.msk [vmem:[#allocation3 + $0x18] sm:$0xf] %vm2707_vm12, %v2624_v9 }
 0x188   : > { %2390 = vrot.lane.b32.xlu0 %v4135_v23, %s4422_s14 }
 0x189   : > { %v2622_v26 = vpop.permute.xlu1 %2621 }
 0x18a   : > { %2713 = vst.msk [vmem:[#allocation3 + $0x14] sm:$0xf] %vm2707_vm12, %v2622_v26  ;;  %v1599_v10 = vpop.permute.xlu0 %1598  ;;  %v4015_v26 = vpack.c.bf16 %v1223_v7, %v1223_v7  ;;  %v1485_v7 = vld [vmem:[#allocation2 + $0x189] sm:$0xff] }
 0x18b   : > { %2388 = vrot.lane.b32.xlu1 %v4040_v33, %s4422_s14  ;;  %1687 = vst.msk [vmem:[#allocation3 + $0x20] sm:$0xf] %vm1678_vm8, %v1599_v10  ;;  %v4076_v33 = vpack.c.bf16 %v1734_v41, %v1734_v41 }
 0x18c   : > { %2643 = vrot.lane.b32.xlu0 %v4071_v45, %s4423_s22 }
 0x18d   : > { %v2626_v48 = vpop.permute.xlu1 %2625 }
 0x18e   : > { %2715 = vst.msk [vmem:[#allocation3 + $0x1c] sm:$0xf] %vm2707_vm12, %v2626_v48  ;;  %v1603_v37 = vpop.permute.xlu0 %1602  ;;  %v1480_v48 = vld [vmem:[#allocation2 + $0x151] sm:$0xff] }
 0x18f   : > { %2392 = vrot.lane.b32.xlu1 %v4136_v12, %s4422_s14  ;;  %1689 = vst.msk [vmem:[#allocation3 + $0x28] sm:$0xf] %vm1678_vm8, %v1603_v37 }
 0x190   : > { %2647 = vrot.lane.b32.xlu0 %v4167_v38, %s4423_s22 }
 0x191   : > { %v1601_v8 = vpop.permute.xlu1 %1600  ;;  %v4391_v13 = vld [vmem:[#allocation3 + $0x10] sm:$0xff]  }
 0x192   : > { %1688 = vst.msk [vmem:[#allocation3 + $0x24] sm:$0xf] %vm1678_vm8, %v1601_v8  ;;  %v1856_v39 = vpop.permute.xlu0 %1855  ;;  %4327 = vmatprep.mubr.msk.bf16.mxu0 %vm2888_vm13, %v4391_v13  ;;  %v4047_v8 = vpack.c.bf16 %v1480_v48, %v1480_v48  ;;  %v1742_v48 = vld [vmem:[#allocation2 + $0x18a] sm:$0xff] }
 0x193   : > { %2645 = vrot.lane.b32.xlu1 %v4072_v61, %s4423_s22  ;;  %1944 = vst.msk [vmem:[#allocation3 + $0x20] sm:$0xf] %vm1935_vm9, %v1856_v39  ;;  %v2249_v61 = vld [vmem:[#allocation2 + $0x141] sm:$0xff]  ;;  %v1481_v39 = vld [vmem:[#allocation2 + $0x159] sm:$0xff] }
 0x194   : > { %1365 = vrot.lane.b32.xlu0 %v4103_v62, %s4418_s6  ;;  %v4140_v50 = vpack.c.bf16 %v2249_v61, %v2249_v61 }
 0x195   : > { %v1605_v20 = vpop.permute.xlu1 %1604  ;;  %v4392_v15 = vld [vmem:[#allocation3 + $0x18] sm:$0xff]  }
 0x196   : > { %1690 = vst.msk [vmem:[#allocation3 + $0x2c] sm:$0xf] %vm1678_vm8, %v1605_v20  ;;  %v1860_v17 = vpop.permute.xlu0 %1859  ;;  %4328 = vmatmul.mubr.msk.bf16.gmra.mxu0 %vm2888_vm13, %v4392_v15  ;;  %v4048_v15 = vpack.c.bf16 %v1481_v39, %v1481_v39 }
 0x197   : > { %2649 = vrot.lane.b32.xlu1 %v4168_v54, %s4423_s22  ;;  %1946 = vst.msk [vmem:[#allocation3 + $0x28] sm:$0xf] %vm1935_vm9, %v1860_v17 }
 0x198   : > { %1369 = vrot.lane.b32.xlu0 %v4011_v56, %s4418_s6 }
 0x199   : > { %v1858_v52 = vpop.permute.xlu1 %1857 }
 0x19a   : > { %1945 = vst.msk [vmem:[#allocation3 + $0x24] sm:$0xf] %vm1935_vm9, %v1858_v52  ;;  %v2114_v57 = vpop.permute.xlu0 %2113 }
 0x19b   : > { %1367 = vrot.lane.b32.xlu1 %v4104_v6, %s4418_s6  ;;  %2202 = vst.msk [vmem:[#allocation3 + $0x20] sm:$0xf] %vm2193_vm10, %v2114_v57  ;;  %v2506_v6 = vld [vmem:[#allocation2 + $0x142] sm:$0xff] }
 0x19c   : > { %1622 = vrot.lane.b32.xlu0 %v4135_v23, %s4419_s7  ;;  %v4172_v28 = vpack.c.bf16 %v2506_v6, %v2506_v6 }
 0x19d   : > { %v1862_v29 = vpop.permute.xlu1 %1861 }
 0x19e   : > { %1947 = vst.msk [vmem:[#allocation3 + $0x2c] sm:$0xf] %vm1935_vm9, %v1862_v29  ;;  %v2118_v40 = vpop.permute.xlu0 %2117  ;;  %v4080_v29 = vpack.c.bf16 %v1738_v16, %v1738_v16 }
 0x19f   : > { %1371 = vrot.lane.b32.xlu1 %v4012_v18, %s4418_s6  ;;  %2204 = vst.msk [vmem:[#allocation3 + $0x28] sm:$0xf] %vm2193_vm10, %v2118_v40 }
 0x1a0   : > { %1626 = vrot.lane.b32.xlu0 %v4043_v59, %s4419_s7 }
 0x1a1   : > { %v2116_v63 = vpop.permute.xlu1 %2115 }
 0x1a2   : > { %2203 = vst.msk [vmem:[#allocation3 + $0x24] sm:$0xf] %vm2193_vm10, %v2116_v63  ;;  %v2371_v34 = vpop.permute.xlu0 %2370 }
 0x1a3   : > { %1624 = vrot.lane.b32.xlu1 %v4136_v12, %s4419_s7  ;;  %2459 = vst.msk [vmem:[#allocation3 + $0x20] sm:$0xf] %vm2450_vm11, %v2371_v34  ;;  %v1224_v12 = vld [vmem:[#allocation2 + $0x158] sm:$0xff] }
 0x1a4   : > { %1879 = vrot.lane.b32.xlu0 %v4167_v38, %s4420_s8  ;;  %v4016_v11 = vpack.c.bf16 %v1224_v12, %v1224_v12 }
 0x1a5   : > { %v2120_v25 = vpop.permute.xlu1 %2119 }
 0x1a6   : > { %2205 = vst.msk [vmem:[#allocation3 + $0x2c] sm:$0xf] %vm2193_vm10, %v2120_v25  ;;  %v2375_v31 = vpop.permute.xlu0 %2374 }
 0x1a7   : > { %1628 = vrot.lane.b32.xlu1 %v4044_v21, %s4419_s7  ;;  %2461 = vst.msk [vmem:[#allocation3 + $0x28] sm:$0xf] %vm2450_vm11, %v2375_v31  ;;  %v4112_v31 = vpack.c.bf16 %v1996_v24, %v1996_v24 }
 0x1a8   : > { %1883 = vrot.lane.b32.xlu0 %v4075_v30, %s4420_s8 }
 0x1a9   : > { %v2373_v32 = vpop.permute.xlu1 %2372 }
 0x1aa   : > { %2460 = vst.msk [vmem:[#allocation3 + $0x24] sm:$0xf] %vm2450_vm11, %v2373_v32  ;;  %v2628_v35 = vpop.permute.xlu0 %2627 }
 0x1ab   : > { %1881 = vrot.lane.b32.xlu1 %v4168_v54, %s4420_s8  ;;  %2716 = vst.msk [vmem:[#allocation3 + $0x20] sm:$0xf] %vm2707_vm12, %v2628_v35 }
 0x1ac   : > { %2137 = vrot.lane.b32.xlu0 %v4011_v56, %s4421_s9  ;;  %v1737_v56 = vld [vmem:[#allocation2 + $0x152] sm:$0xff] }
 0x1ad   : > { %v2377_v43 = vpop.permute.xlu1 %2376  ;;  %v4079_v17 = vpack.c.bf16 %v1737_v56, %v1737_v56 }
 0x1ae   : > { %2462 = vst.msk [vmem:[#allocation3 + $0x2c] sm:$0xf] %vm2450_vm11, %v2377_v43  ;;  %v2632_v45 = vpop.permute.xlu0 %2631  ;;  %v2509_v43 = vld [vmem:[#allocation2 + $0x16a] sm:$0xff] }
 0x1af   : > { %1885 = vrot.lane.b32.xlu1 %v4076_v33, %s4420_s8  ;;  %2718 = vst.msk [vmem:[#allocation3 + $0x28] sm:$0xf] %vm2707_vm12, %v2632_v45 }
 0x1b0   : > { %2141 = vrot.lane.b32.xlu0 %v4107_v42, %s4421_s9 }
 0x1b1   : > { %v2630_v49 = vpop.permute.xlu1 %2629 }
 0x1b2   : > { %2717 = vst.msk [vmem:[#allocation3 + $0x24] sm:$0xf] %vm2707_vm12, %v2630_v49  ;;  %v1607_v46 = vpop.permute.xlu0 %1606  ;;  %v4175_v49 = vpack.c.bf16 %v2509_v43, %v2509_v43 }
 0x1b3   : > { %2139 = vrot.lane.b32.xlu1 %v4012_v18, %s4421_s9  ;;  %1691 = vst.msk [vmem:[#allocation3 + $0x30] sm:$0xf] %vm1678_vm8, %v1607_v46  ;;  %v1995_v18 = vld [vmem:[#allocation2 + $0x168] sm:$0xff] }
 0x1b4   : > { %2394 = vrot.lane.b32.xlu0 %v4043_v59, %s4422_s14  ;;  %v4111_v40 = vpack.c.bf16 %v1995_v18, %v1995_v18 }
 0x1b5   : > { %v2634_v58 = vpop.permute.xlu1 %2633 }
 0x1b6   : > { %2719 = vst.msk [vmem:[#allocation3 + $0x2c] sm:$0xf] %vm2707_vm12, %v2634_v58  ;;  %v1611_v60 = vpop.permute.xlu0 %1610  ;;  %v1227_v58 = vld [vmem:[#allocation2 + $0x180] sm:$0xff] }
 0x1b7   : > { %2143 = vrot.lane.b32.xlu1 %v4108_v53, %s4421_s9  ;;  %1693 = vst.msk [vmem:[#allocation3 + $0x38] sm:$0xf] %vm1678_vm8, %v1611_v60 }
 0x1b8   : > { %2398 = vrot.lane.b32.xlu0 %v4139_v55, %s4422_s14 }
 0x1b9   : > { %v1609_v44 = vpop.permute.xlu1 %1608  ;;  %v4393_v62 = vld [vmem:[#allocation3 + $0x20] sm:$0xff]  }
 0x1ba   : > { %1692 = vst.msk [vmem:[#allocation3 + $0x34] sm:$0xf] %vm1678_vm8, %v1609_v44  ;;  %v1864_v2 = vpop.permute.xlu0 %1863  ;;  %4331 = vmatprep.mubr.msk.bf16.mxu0 %vm2888_vm13, %v4393_v62  ;;  %v4019_v44 = vpack.c.bf16 %v1227_v58, %v1227_v58 }
 0x1bb   : > { %2396 = vrot.lane.b32.xlu1 %v4044_v21, %s4422_s14  ;;  %1948 = vst.msk [vmem:[#allocation3 + $0x30] sm:$0xf] %vm1935_vm9, %v1864_v2  ;;  %v1228_v2 = vld [vmem:[#allocation2 + $0x188] sm:$0xff] }
 0x1bc   : > { %2651 = vrot.lane.b32.xlu0 %v4075_v30, %s4423_s22  ;;  %v2252_v30 = vld [vmem:[#allocation2 + $0x169] sm:$0xff] }
 0x1bd   : > { %v1613_v4 = vpop.permute.xlu1 %1612  ;;  %v4394_v5 = vld [vmem:[#allocation3 + $0x28] sm:$0xff]   ;;  %v4143_v41 = vpack.c.bf16 %v2252_v30, %v2252_v30 }
 0x1be   : > { %1694 = vst.msk [vmem:[#allocation3 + $0x3c] sm:$0xf] %vm1678_vm8, %v1613_v4  ;;  %v1868_v27 = vpop.permute.xlu0 %1867  ;;  %4332 = vmatmul.mubr.msk.bf16.gmra.mxu0 %vm2888_vm13, %v4394_v5  ;;  %v4020_v5 = vpack.c.bf16 %v1228_v2, %v1228_v2 }
 0x1bf   : > { %2400 = vrot.lane.b32.xlu1 %v4140_v50, %s4422_s14  ;;  %1950 = vst.msk [vmem:[#allocation3 + $0x38] sm:$0xf] %vm1935_vm9, %v1868_v27 }
 0x1c0   : > { %2655 = vrot.lane.b32.xlu0 %v4171_v22, %s4423_s22 }
 0x1c1   : > { %v1866_v23 = vpop.permute.xlu1 %1865 }
 0x1c2   : > { %1949 = vst.msk [vmem:[#allocation3 + $0x34] sm:$0xf] %vm1935_vm9, %v1866_v23  ;;  %v2122_v9 = vpop.permute.xlu0 %2121 }
 0x1c3   : > { %2653 = vrot.lane.b32.xlu1 %v4076_v33, %s4423_s22  ;;  %2206 = vst.msk [vmem:[#allocation3 + $0x30] sm:$0xf] %vm2193_vm10, %v2122_v9  ;;  %v2253_v33 = vld [vmem:[#allocation2 + $0x171] sm:$0xff] }
 0x1c4   : > { %1373 = vrot.lane.b32.xlu0 %v4107_v42, %s4418_s6  ;;  %v4144_v47 = vpack.c.bf16 %v2253_v33, %v2253_v33 }
 0x1c5   : > { %v1870_v36 = vpop.permute.xlu1 %1869 }
 0x1c6   : > { %1951 = vst.msk [vmem:[#allocation3 + $0x3c] sm:$0xf] %vm1935_vm9, %v1870_v36  ;;  %v2126_v10 = vpop.permute.xlu0 %2125  ;;  %v4052_v36 = vpack.c.bf16 %v1485_v7, %v1485_v7 }
 0x1c7   : > { %2657 = vrot.lane.b32.xlu1 %v4172_v28, %s4423_s22  ;;  %2208 = vst.msk [vmem:[#allocation3 + $0x38] sm:$0xf] %vm2193_vm10, %v2126_v10 }
 0x1c8   : > { %1377 = vrot.lane.b32.xlu0 %v4015_v26, %s4418_s6 }
 0x1c9   : > { %v2124_v38 = vpop.permute.xlu1 %2123 }
 0x1ca   : > { %2207 = vst.msk [vmem:[#allocation3 + $0x34] sm:$0xf] %vm2193_vm10, %v2124_v38  ;;  %v2379_v37 = vpop.permute.xlu0 %2378 }
 0x1cb   : > { %1375 = vrot.lane.b32.xlu1 %v4108_v53, %s4418_s6  ;;  %2463 = vst.msk [vmem:[#allocation3 + $0x30] sm:$0xf] %vm2450_vm11, %v2379_v37  ;;  %v2510_v53 = vld [vmem:[#allocation2 + $0x172] sm:$0xff] }
 0x1cc   : > { %1630 = vrot.lane.b32.xlu0 %v4139_v55, %s4419_s7  ;;  %v4176_v61 = vpack.c.bf16 %v2510_v53, %v2510_v53 }
 0x1cd   : > { %v2128_v13 = vpop.permute.xlu1 %2127 }
 0x1ce   : > { %2209 = vst.msk [vmem:[#allocation3 + $0x3c] sm:$0xf] %vm2193_vm10, %v2128_v13  ;;  %v2383_v14 = vpop.permute.xlu0 %2382  ;;  %v4084_v13 = vpack.c.bf16 %v1742_v48, %v1742_v48 }
 0x1cf   : > { %1379 = vrot.lane.b32.xlu1 %v4016_v11, %s4418_s6  ;;  %2465 = vst.msk [vmem:[#allocation3 + $0x38] sm:$0xf] %vm2450_vm11, %v2383_v14 }
 0x1d0   : > { %1634 = vrot.lane.b32.xlu0 %v4047_v8, %s4419_s7 }
 0x1d1   : > { %v2381_v54 = vpop.permute.xlu1 %2380 }
 0x1d2   : > { %2464 = vst.msk [vmem:[#allocation3 + $0x34] sm:$0xf] %vm2450_vm11, %v2381_v54  ;;  %v2636_v20 = vpop.permute.xlu0 %2635 }
 0x1d3   : > { %1632 = vrot.lane.b32.xlu1 %v4140_v50, %s4419_s7  ;;  %2720 = vst.msk [vmem:[#allocation3 + $0x30] sm:$0xf] %vm2707_vm12, %v2636_v20  ;;  %v2000_v20 = vld [vmem:[#allocation2 + $0x1a0] sm:$0xff] }
 0x1d4   : > { %1887 = vrot.lane.b32.xlu0 %v4171_v22, %s4420_s8  ;;  %v1484_v22 = vld [vmem:[#allocation2 + $0x181] sm:$0xff]  ;;  %v4116_v16 = vpack.c.bf16 %v2000_v20, %v2000_v20 }
 0x1d5   : > { %v2385_v3 = vpop.permute.xlu1 %2384  ;;  %v4051_v27 = vpack.c.bf16 %v1484_v22, %v1484_v22 }
 0x1d6   : > { %2466 = vst.msk [vmem:[#allocation3 + $0x3c] sm:$0xf] %vm2450_vm11, %v2385_v3  ;;  %v2640_v52 = vpop.permute.xlu0 %2639  ;;  %v2256_v3 = vld [vmem:[#allocation2 + $0x199] sm:$0xff] }
 0x1d7   : > { %1636 = vrot.lane.b32.xlu1 %v4048_v15, %s4419_s7  ;;  %2722 = vst.msk [vmem:[#allocation3 + $0x38] sm:$0xf] %vm2707_vm12, %v2640_v52 }
 0x1d8   : > { %1891 = vrot.lane.b32.xlu0 %v4079_v17, %s4420_s8 }
 0x1d9   : > { %v2638_v57 = vpop.permute.xlu1 %2637 }
 0x1da   : > { %2721 = vst.msk [vmem:[#allocation3 + $0x34] sm:$0xf] %vm2707_vm12, %v2638_v57  ;;  %v1362_v59 = vpop.permute.xlu0 %1361  ;;  %v4147_v57 = vpack.c.bf16 %v2256_v3, %v2256_v3 }
 0x1db   : > { %1889 = vrot.lane.b32.xlu1 %v4172_v28, %s4420_s8  ;;  %1440 = vst.msk [vmem:[#allocation3 + $0x48] sm:$0xf] %vm1421_vm7, %v1362_v59  ;;  %v1741_v28 = vld [vmem:[#allocation2 + $0x182] sm:$0xff] }
 0x1dc   : > { %2145 = vrot.lane.b32.xlu0 %v4015_v26, %s4421_s9  ;;  %v4083_v10 = vpack.c.bf16 %v1741_v28, %v1741_v28 }
 0x1dd   : > { %v2642_v19 = vpop.permute.xlu1 %2641 }
 0x1de   : > { %2723 = vst.msk [vmem:[#allocation3 + $0x3c] sm:$0xf] %vm2707_vm12, %v2642_v19  ;;  %v1615_v63 = vpop.permute.xlu0 %1614  ;;  %v2513_v19 = vld [vmem:[#allocation2 + $0x19a] sm:$0xff] }
 0x1df   : > { %1893 = vrot.lane.b32.xlu1 %v4080_v29, %s4420_s8  ;;  %1695 = vst.msk [vmem:[#allocation3 + $0x40] sm:$0xf] %vm1678_vm8, %v1615_v63 }
 0x1e0   : > { %2149 = vrot.lane.b32.xlu0 %v4111_v40, %s4421_s9 }
 0x1e1   : > { %v1364_v34 = vpop.permute.xlu1 %1363  ;;  %v4395_v21 = vld [vmem:[#allocation3 + $0x30] sm:$0xff]  }
 0x1e2   : > { %1441 = vst.msk [vmem:[#allocation3 + $0x4c] sm:$0xf] %vm1421_vm7, %v1364_v34  ;;  %v1619_v25 = vpop.permute.xlu0 %1618  ;;  %4335 = vmatprep.mubr.msk.bf16.mxu0 %vm2888_vm13, %v4395_v21  ;;  %v4179_v34 = vpack.c.bf16 %v2513_v19, %v2513_v19 }
 0x1e3   : > { %2147 = vrot.lane.b32.xlu1 %v4016_v11, %s4421_s9  ;;  %1697 = vst.msk [vmem:[#allocation3 + $0x48] sm:$0xf] %vm1678_vm8, %v1619_v25  ;;  %v1999_v11 = vld [vmem:[#allocation2 + $0x198] sm:$0xff]  ;;  %v2514_v25 = vld [vmem:[#allocation2 + $0x1a2] sm:$0xff] }
 0x1e4   : > { %2402 = vrot.lane.b32.xlu0 %v4047_v8, %s4422_s14  ;;  %v4115_v14 = vpack.c.bf16 %v1999_v11, %v1999_v11 }
 0x1e5   : > { %v1617_v32 = vpop.permute.xlu1 %1616  ;;  %v4396_v1 = vld [vmem:[#allocation3 + $0x38] sm:$0xff]  }
 0x1e6   : > { %1696 = vst.msk [vmem:[#allocation3 + $0x44] sm:$0xf] %vm1678_vm8, %v1617_v32  ;;  %v1872_v35 = vpop.permute.xlu0 %1871  ;;  %4336 = vmatmul.mubr.msk.bf16.gmra.mxu0 %vm2888_vm13, %v4396_v1  ;;  %v4180_v32 = vpack.c.bf16 %v2514_v25, %v2514_v25 }
 0x1e7   : > { %2151 = vrot.lane.b32.xlu1 %v4112_v31, %s4421_s9  ;;  %1952 = vst.msk [vmem:[#allocation3 + $0x40] sm:$0xf] %vm1935_vm9, %v1872_v35 }
 0x1e8   : > { %2406 = vrot.lane.b32.xlu0 %v4143_v41, %s4422_s14 }
 0x1e9   : > { %v1621_v42 = vpop.permute.xlu1 %1620 }
 0x1ea   : > { %1698 = vst.msk [vmem:[#allocation3 + $0x4c] sm:$0xf] %vm1678_vm8, %v1621_v42  ;;  %v1876_v45 = vpop.permute.xlu0 %1875 }
 0x1eb   : > { %2404 = vrot.lane.b32.xlu1 %v4048_v15, %s4422_s14  ;;  %1954 = vst.msk [vmem:[#allocation3 + $0x48] sm:$0xf] %vm1935_vm9, %v1876_v45 }
 0x1ec   : > { %2659 = vrot.lane.b32.xlu0 %v4079_v17, %s4423_s22 }
 0x1ed   : > { %v1874_v51 = vpop.permute.xlu1 %1873 }
 0x1ee   : > { %1953 = vst.msk [vmem:[#allocation3 + $0x44] sm:$0xf] %vm1935_vm9, %v1874_v51  ;;  %v2130_v46 = vpop.permute.xlu0 %2129 }
 0x1ef   : > { %2408 = vrot.lane.b32.xlu1 %v4144_v47, %s4422_s14  ;;  %2210 = vst.msk [vmem:[#allocation3 + $0x40] sm:$0xf] %vm2193_vm10, %v2130_v46 }
 0x1f0   : > { %2663 = vrot.lane.b32.xlu0 %v4175_v49, %s4423_s22 }
 0x1f1   : > { %v1878_v55 = vpop.permute.xlu1 %1877 }
 0x1f2   : > { %1955 = vst.msk [vmem:[#allocation3 + $0x4c] sm:$0xf] %vm1935_vm9, %v1878_v55  ;;  %v2134_v60 = vpop.permute.xlu0 %2133 }
 0x1f3   : > { %2661 = vrot.lane.b32.xlu1 %v4080_v29, %s4423_s22  ;;  %2212 = vst.msk [vmem:[#allocation3 + $0x48] sm:$0xf] %vm2193_vm10, %v2134_v60  ;;  %v2257_v29 = vld [vmem:[#allocation2 + $0x1a1] sm:$0xff] }
 0x1f4   : > { %1381 = vrot.lane.b32.xlu0 %v4111_v40, %s4418_s6  ;;  %v4148_v24 = vpack.c.bf16 %v2257_v29, %v2257_v29 }
 0x1f5   : > { %v2132_v62 = vpop.permute.xlu1 %2131 }
 0x1f6   : > { %2211 = vst.msk [vmem:[#allocation3 + $0x44] sm:$0xf] %vm2193_vm10, %v2132_v62  ;;  %v2387_v0 = vpop.permute.xlu0 %2386 }
 0x1f7   : > { %2665 = vrot.lane.b32.xlu1 %v4176_v61, %s4423_s22  ;;  %2467 = vst.msk [vmem:[#allocation3 + $0x40] sm:$0xf] %vm2450_vm11, %v2387_v0 }
 0x1f8   : > { %1385 = vrot.lane.b32.xlu0 %v4019_v44, %s4418_s6 }
 0x1f9   : > { %v2136_v50 = vpop.permute.xlu1 %2135 }
 0x1fa   : > { %2213 = vst.msk [vmem:[#allocation3 + $0x4c] sm:$0xf] %vm2193_vm10, %v2136_v50  ;;  %v2391_v4 = vpop.permute.xlu0 %2390 }
 0x1fb   : > { %1383 = vrot.lane.b32.xlu1 %v4112_v31, %s4418_s6  ;;  %2469 = vst.msk [vmem:[#allocation3 + $0x48] sm:$0xf] %vm2450_vm11, %v2391_v4 }
 0x1fc   : > { %1638 = vrot.lane.b32.xlu0 %v4143_v41, %s4419_s7 }
 0x1fd   : > { %v2389_v6 = vpop.permute.xlu1 %2388 }
 0x1fe   : > { %2468 = vst.msk [vmem:[#allocation3 + $0x44] sm:$0xf] %vm2450_vm11, %v2389_v6  ;;  %v2644_v23 = vpop.permute.xlu0 %2643 }
 0x1ff   : > { %1387 = vrot.lane.b32.xlu1 %v4020_v5, %s4418_s6  ;;  %2724 = vst.msk [vmem:[#allocation3 + $0x40] sm:$0xf] %vm2707_vm12, %v2644_v23  ;;  %s5336_s6 = scalar_lea.vmem %s5538_s4, %s3891_s21  ;;  %s3529_s21 = sshll.u32 %s5542_s19, 1 }
 0x200   : > { %1642 = vrot.lane.b32.xlu0 %v4051_v27, %s4419_s7 }
 0x201   : > { %v2393_v9 = vpop.permute.xlu1 %2392 }
 0x202   : > { %2470 = vst.msk [vmem:[#allocation3 + $0x4c] sm:$0xf] %vm2450_vm11, %v2393_v9  ;;  %v2648_v26 = vpop.permute.xlu0 %2647 }
 0x203   : > { %1640 = vrot.lane.b32.xlu1 %v4144_v47, %s4419_s7  ;;  %2726 = vst.msk [vmem:[#allocation3 + $0x48] sm:$0xf] %vm2707_vm12, %v2648_v26 }
 0x204   : > { %1895 = vrot.lane.b32.xlu0 %v4175_v49, %s4420_s8 }
 0x205   : > { %v2646_v12 = vpop.permute.xlu1 %2645 }
 0x206   : > { %2725 = vst.msk [vmem:[#allocation3 + $0x44] sm:$0xf] %vm2707_vm12, %v2646_v12  ;;  %v1366_v38 = vpop.permute.xlu0 %1365 }
 0x207   : > { %1644 = vrot.lane.b32.xlu1 %v4052_v36, %s4419_s7  ;;  %1442 = vst.msk [vmem:[#allocation3 + $0x50] sm:$0xf] %vm1421_vm7, %v1366_v38 }
 0x208   : > { %1899 = vrot.lane.b32.xlu0 %v4083_v10, %s4420_s8 }
 0x209   : > { %v2650_v37 = vpop.permute.xlu1 %2649 }
 0x20a   : > { %2727 = vst.msk [vmem:[#allocation3 + $0x4c] sm:$0xf] %vm2707_vm12, %v2650_v37  ;;  %v1370_v8 = vpop.permute.xlu0 %1369 }
 0x20b   : > { %1897 = vrot.lane.b32.xlu1 %v4176_v61, %s4420_s8  ;;  %1444 = vst.msk [vmem:[#allocation3 + $0x58] sm:$0xf] %vm1421_vm7, %v1370_v8 }
 0x20c   : > { %2153 = vrot.lane.b32.xlu0 %v4019_v44, %s4421_s9 }
 0x20d   : > { %v1368_v39 = vpop.permute.xlu1 %1367  ;;  %v4397_v54 = vld [vmem:[#allocation3 + $0x40] sm:$0xff]  }
 0x20e   : > { %1443 = vst.msk [vmem:[#allocation3 + $0x54] sm:$0xf] %vm1421_vm7, %v1368_v39  ;;  %v1623_v56 = vpop.permute.xlu0 %1622  ;;  %4339 = vmatprep.mubr.msk.bf16.mxu1 %vm2888_vm13, %v4397_v54 }
 0x20f   : > { %1901 = vrot.lane.b32.xlu1 %v4084_v13, %s4420_s8  ;;  %1699 = vst.msk [vmem:[#allocation3 + $0x50] sm:$0xf] %vm1678_vm8, %v1623_v56 }
 0x210   : > { %2157 = vrot.lane.b32.xlu0 %v4115_v14, %s4421_s9 }
 0x211   : > { %v1372_v15 = vpop.permute.xlu1 %1371  ;;  %v4398_v17 = vld [vmem:[#allocation3 + $0x48] sm:$0xff]  }
 0x212   : > { %1445 = vst.msk [vmem:[#allocation3 + $0x5c] sm:$0xf] %vm1421_vm7, %v1372_v15  ;;  %v1627_v52 = vpop.permute.xlu0 %1626  ;;  %4340 = vmatmul.mubr.msk.bf16.vlgmr.msra.gmra.mxu1 %vm2888_vm13, %v4398_v17 }
 0x213   : > { %2155 = vrot.lane.b32.xlu1 %v4020_v5, %s4421_s9  ;;  %1701 = vst.msk [vmem:[#allocation3 + $0x58] sm:$0xf] %vm1678_vm8, %v1627_v52 }
 0x214   : > { %2410 = vrot.lane.b32.xlu0 %v4051_v27, %s4422_s14 }
 0x215   : > { %v1625_v18 = vpop.permute.xlu1 %1624 }
 0x216   : > { %1700 = vst.msk [vmem:[#allocation3 + $0x54] sm:$0xf] %vm1678_vm8, %v1625_v18  ;;  %v1880_v59 = vpop.permute.xlu0 %1879 }
 0x217   : > { %2159 = vrot.lane.b32.xlu1 %v4116_v16, %s4421_s9  ;;  %1956 = vst.msk [vmem:[#allocation3 + $0x50] sm:$0xf] %vm1935_vm9, %v1880_v59  ;;  %s235_s9 = scalar_lea.vmem %s5539_s5, %s3529_s21 }
 0x218   : > { %2414 = vrot.lane.b32.xlu0 %v4147_v57, %s4422_s14 }
 0x219   : > { %v1629_v40 = vpop.permute.xlu1 %1628 }
 0x21a   : > { %1702 = vst.msk [vmem:[#allocation3 + $0x5c] sm:$0xf] %vm1678_vm8, %v1629_v40  ;;  %v1884_v63 = vpop.permute.xlu0 %1883 }
 0x21b   : > { %2412 = vrot.lane.b32.xlu1 %v4052_v36, %s4422_s14  ;;  %1958 = vst.msk [vmem:[#allocation3 + $0x58] sm:$0xf] %vm1935_vm9, %v1884_v63 }
 0x21c   : > { %2667 = vrot.lane.b32.xlu0 %v4083_v10, %s4423_s22 }
 0x21d   : > { %v1882_v21 = vpop.permute.xlu1 %1881 }
 0x21e   : > { %1957 = vst.msk [vmem:[#allocation3 + $0x54] sm:$0xf] %vm1935_vm9, %v1882_v21  ;;  %v2138_v30 = vpop.permute.xlu0 %2137 }
 0x21f   : > { %2416 = vrot.lane.b32.xlu1 %v4148_v24, %s4422_s14  ;;  %2214 = vst.msk [vmem:[#allocation3 + $0x50] sm:$0xf] %vm2193_vm10, %v2138_v30 }
 0x220   : > { %2671 = vrot.lane.b32.xlu0 %v4179_v34, %s4423_s22 }
 0x221   : > { %v1886_v31 = vpop.permute.xlu1 %1885 }
 0x222   : > { %1959 = vst.msk [vmem:[#allocation3 + $0x5c] sm:$0xf] %vm1935_vm9, %v1886_v31  ;;  %v2142_v41 = vpop.permute.xlu0 %2141 }
 0x223   : > { %2669 = vrot.lane.b32.xlu1 %v4084_v13, %s4423_s22  ;;  %2216 = vst.msk [vmem:[#allocation3 + $0x58] sm:$0xf] %vm2193_vm10, %v2142_v41 }
 0x225   : > { %v2140_v1 = vpop.permute.xlu1 %2139 }
 0x226   : > { %2215 = vst.msk [vmem:[#allocation3 + $0x54] sm:$0xf] %vm2193_vm10, %v2140_v1  ;;  %v2395_v35 = vpop.permute.xlu0 %2394 }
 0x227   : > { %2673 = vrot.lane.b32.xlu1 %v4180_v32, %s4423_s22  ;;  %2471 = vst.msk [vmem:[#allocation3 + $0x50] sm:$0xf] %vm2450_vm11, %v2395_v35 }
 0x229   : > { %v2144_v33 = vpop.permute.xlu1 %2143 }
 0x22a   : > { %2217 = vst.msk [vmem:[#allocation3 + $0x5c] sm:$0xf] %vm2193_vm10, %v2144_v33  ;;  %v2399_v42 = vpop.permute.xlu0 %2398 }
 0x22b   : > { %2473 = vst.msk [vmem:[#allocation3 + $0x58] sm:$0xf] %vm2450_vm11, %v2399_v42 }
 0x22d   : > { %v2397_v43 = vpop.permute.xlu1 %2396 }
 0x22e   : > { %2472 = vst.msk [vmem:[#allocation3 + $0x54] sm:$0xf] %vm2450_vm11, %v2397_v43  ;;  %v2652_v45 = vpop.permute.xlu0 %2651  ;;  %v4325_v47 = vpop.f32.mrf.mxu0 }
 0x22f   : > { %2728 = vst.msk [vmem:[#allocation3 + $0x50] sm:$0xf] %vm2707_vm12, %v2652_v45  ;;  %v4183_v49 = vpack.c.bf16 %v4325_v47, %v4325_v47  ;;  %v3334_v44 = vmul.f32 %v4325_v47, %v4325_v47  ;;  %v3265_v6 = vsel %vm412_vm0, %v4325_v47, 0.0 }
 0x230   : > { %v2975_v46 = vpop.f32.mrf.mxu0 }
 0x231   : > { %v2401_v51 = vpop.permute.xlu1 %2400  ;;  %3232 = vst.msk [vmem:[%s5336_s6 + $0x8] sm:$0xf] %vm650_vm3, %v4183_v49  ;;  %v4181_v53 = vpack.c.bf16 %v2975_v46, %v2975_v46  ;;  %v3332_v60 = vmul.f32 %v2975_v46, %v2975_v46  ;;  %v3262_v2 = vsel %vm412_vm0, %v2975_v46, 0.0  ;;  %v3367_v10 = vsel %vm412_vm0, %v3334_v44, 0.0 }
 0x232   : > { %2474 = vst.msk [vmem:[#allocation3 + $0x5c] sm:$0xf] %vm2450_vm11, %v2401_v51  ;;  %v2656_v55 = vpop.permute.xlu0 %2655  ;;  %v4326_v58 = vpop.f32.mrf.mxu0 }
 0x233   : > { %2730 = vst.msk [vmem:[#allocation3 + $0x58] sm:$0xf] %vm2707_vm12, %v2656_v55  ;;  %v4184_v61 = vpack.c.bf16 %v4326_v58, %v4326_v58  ;;  %v3364_v23 = vsel %vm412_vm0, %v3332_v60, 0.0  ;;  %v3335_v7 = vmul.f32 %v4326_v58, %v4326_v58  ;;  %v3267_v12 = vsel %vm412_vm0, %v4326_v58, 0.0 }
 0x234   : > { %3230 = vst.msk [vmem:[%s5336_s6] sm:$0xf] %vm650_vm3, %v4181_v53  ;;  %v2978_v0 = vpop.f32.mrf.mxu0 }
 0x235   : > { %v2654_v62 = vpop.permute.xlu1 %2653  ;;  %3233 = vst.msk [vmem:[%s5336_s6 + $0xc] sm:$0xf] %vm650_vm3, %v4184_v61  ;;  %v4182_v50 = vpack.c.bf16 %v2978_v0, %v2978_v0  ;;  %v3263_v22 = vsel %vm412_vm0, %v2978_v0, 0.0  ;;  %v3333_v4 = vmul.f32 %v2978_v0, %v2978_v0  ;;  %v3369_v11 = vsel %vm412_vm0, %v3335_v7, 0.0 }
 0x236   : > { %2729 = vst.msk [vmem:[#allocation3 + $0x54] sm:$0xf] %vm2707_vm12, %v2654_v62  ;;  %v1374_v5 = vpop.permute.xlu0 %1373  ;;  %v3264_v27 = vadd.f32 %v3263_v22, %v3262_v2 }
 0x237   : > { %1446 = vst.msk [vmem:[#allocation3 + $0x60] sm:$0xf] %vm1421_vm7, %v1374_v5  ;;  %v3365_v9 = vsel %vm412_vm0, %v3333_v4, 0.0 }
 0x238   : > { %3231 = vst.msk [vmem:[%s5336_s6 + $0x4] sm:$0xf] %vm650_vm3, %v4182_v50  ;;  %v3266_v28 = vadd.f32 %v3265_v6, %v3264_v27  ;;  %v3366_v26 = vadd.f32 %v3365_v9, %v3364_v23 }
 0x239   : > { %v2658_v36 = vpop.permute.xlu1 %2657 }
 0x23a   : > { %2731 = vst.msk [vmem:[#allocation3 + $0x5c] sm:$0xf] %vm2707_vm12, %v2658_v36  ;;  %v1378_v38 = vpop.permute.xlu0 %1377  ;;  %v3368_v48 = vadd.f32 %v3367_v10, %v3366_v26  ;;  %v3268_v37 = vadd.f32 %v3267_v12, %v3266_v28 }
 0x23b   : > { %1448 = vst.msk [vmem:[#allocation3 + $0x68] sm:$0xf] %vm1421_vm7, %v1378_v38 }
 0x23c   : > { %v3370_v14 = vadd.f32 %v3369_v11, %v3368_v48 }
 0x23d   : > { %v1376_v8 = vpop.permute.xlu1 %1375  ;;  %v4399_v13 = vld [vmem:[#allocation3 + $0x50] sm:$0xff]  }
 0x23e   : > { %1447 = vst.msk [vmem:[#allocation3 + $0x64] sm:$0xf] %vm1421_vm7, %v1376_v8  ;;  %v1631_v39 = vpop.permute.xlu0 %1630  ;;  %4343 = vmatprep.mubr.msk.bf16.mxu1 %vm2888_vm13, %v4399_v13 }
 0x23f   : > { %1703 = vst.msk [vmem:[#allocation3 + $0x60] sm:$0xf] %vm1678_vm8, %v1631_v39 }
 0x241   : > { %v1380_v54 = vpop.permute.xlu1 %1379  ;;  %v4400_v56 = vld [vmem:[#allocation3 + $0x58] sm:$0xff]  }
 0x242   : > { %1449 = vst.msk [vmem:[#allocation3 + $0x6c] sm:$0xf] %vm1421_vm7, %v1380_v54  ;;  %v1635_v20 = vpop.permute.xlu0 %1634  ;;  %4344 = vmatmul.mubr.msk.bf16.gmra.mxu1 %vm2888_vm13, %v4400_v56 }
 0x243   : > { %1705 = vst.msk [vmem:[#allocation3 + $0x68] sm:$0xf] %vm1678_vm8, %v1635_v20 }
 0x245   : > { %v1633_v15 = vpop.permute.xlu1 %1632 }
 0x246   : > { %1704 = vst.msk [vmem:[#allocation3 + $0x64] sm:$0xf] %vm1678_vm8, %v1633_v15  ;;  %v1888_v17 = vpop.permute.xlu0 %1887 }
 0x247   : > { %1960 = vst.msk [vmem:[#allocation3 + $0x60] sm:$0xf] %vm1935_vm9, %v1888_v17 }
 0x249   : > { %v1637_v3 = vpop.permute.xlu1 %1636 }
 0x24a   : > { %1706 = vst.msk [vmem:[#allocation3 + $0x6c] sm:$0xf] %vm1678_vm8, %v1637_v3  ;;  %v1892_v52 = vpop.permute.xlu0 %1891 }
 0x24b   : > { %1962 = vst.msk [vmem:[#allocation3 + $0x68] sm:$0xf] %vm1935_vm9, %v1892_v52 }
 0x24d   : > { %v1890_v16 = vpop.permute.xlu1 %1889 }
 0x24e   : > { %1961 = vst.msk [vmem:[#allocation3 + $0x64] sm:$0xf] %vm1935_vm9, %v1890_v16  ;;  %v2146_v57 = vpop.permute.xlu0 %2145 }
 0x24f   : > { %2218 = vst.msk [vmem:[#allocation3 + $0x60] sm:$0xf] %vm2193_vm10, %v2146_v57 }
 0x251   : > { %v1894_v18 = vpop.permute.xlu1 %1893 }
 0x252   : > { %1963 = vst.msk [vmem:[#allocation3 + $0x6c] sm:$0xf] %vm1935_vm9, %v1894_v18  ;;  %v2150_v59 = vpop.permute.xlu0 %2149 }
 0x253   : > { %2220 = vst.msk [vmem:[#allocation3 + $0x68] sm:$0xf] %vm2193_vm10, %v2150_v59 }
 0x255   : > { %v2148_v29 = vpop.permute.xlu1 %2147 }
 0x256   : > { %2219 = vst.msk [vmem:[#allocation3 + $0x64] sm:$0xf] %vm2193_vm10, %v2148_v29  ;;  %v2403_v40 = vpop.permute.xlu0 %2402  ;;  %v4329_v19 = vpop.f32.mrf.mxu0 }
 0x257   : > { %2475 = vst.msk [vmem:[#allocation3 + $0x60] sm:$0xf] %vm2450_vm11, %v2403_v40  ;;  %v4187_v63 = vpack.c.bf16 %v4329_v19, %v4329_v19  ;;  %v3338_v45 = vmul.f32 %v4329_v19, %v4329_v19  ;;  %v3273_v55 = vsel %vm412_vm0, %v4329_v19, 0.0 }
 0x258   : > { %v2991_v34 = vpop.f32.mrf.mxu0 }
 0x259   : > { %v2152_v24 = vpop.permute.xlu1 %2151  ;;  %3236 = vst.msk [vmem:[%s5336_s6 + $0x18] sm:$0xf] %vm650_vm3, %v4187_v63  ;;  %v4185_v21 = vpack.c.bf16 %v2991_v34, %v2991_v34  ;;  %v3269_v30 = vsel %vm412_vm0, %v2991_v34, 0.0  ;;  %v3336_v25 = vmul.f32 %v2991_v34, %v2991_v34  ;;  %v3375_v0 = vsel %vm412_vm0, %v3338_v45, 0.0 }
 0x25a   : > { %2221 = vst.msk [vmem:[#allocation3 + $0x6c] sm:$0xf] %vm2193_vm10, %v2152_v24  ;;  %v2407_v31 = vpop.permute.xlu0 %2406  ;;  %v3270_v41 = vadd.f32 %v3269_v30, %v3268_v37  ;;  %v4330_v32 = vpop.f32.mrf.mxu0 }
 0x25b   : > { %2477 = vst.msk [vmem:[#allocation3 + $0x68] sm:$0xf] %vm2450_vm11, %v2407_v31  ;;  %v3371_v1 = vsel %vm412_vm0, %v3336_v25, 0.0  ;;  %v4188_v35 = vpack.c.bf16 %v4330_v32, %v4330_v32  ;;  %v3339_v58 = vmul.f32 %v4330_v32, %v4330_v32  ;;  %v3275_v2 = vsel %vm412_vm0, %v4330_v32, 0.0 }
 0x25c   : > { %3234 = vst.msk [vmem:[%s5336_s6 + $0x10] sm:$0xf] %vm650_vm3, %v4185_v21  ;;  %v3372_v33 = vadd.f32 %v3371_v1, %v3370_v14  ;;  %v2994_v43 = vpop.f32.mrf.mxu0 }
 0x25d   : > { %v2405_v42 = vpop.permute.xlu1 %2404  ;;  %3237 = vst.msk [vmem:[%s5336_s6 + $0x1c] sm:$0xf] %vm650_vm3, %v4188_v35  ;;  %v4186_v47 = vpack.c.bf16 %v2994_v43, %v2994_v43  ;;  %v3271_v49 = vsel %vm412_vm0, %v2994_v43, 0.0  ;;  %v3337_v51 = vmul.f32 %v2994_v43, %v2994_v43  ;;  %v3377_v5 = vsel %vm412_vm0, %v3339_v58, 0.0 }
 0x25e   : > { %2476 = vst.msk [vmem:[#allocation3 + $0x64] sm:$0xf] %vm2450_vm11, %v2405_v42  ;;  %v2660_v46 = vpop.permute.xlu0 %2659  ;;  %v3272_v53 = vadd.f32 %v3271_v49, %v3270_v41 }
 0x25f   : > { %2732 = vst.msk [vmem:[#allocation3 + $0x60] sm:$0xf] %vm2707_vm12, %v2660_v46  ;;  %v3373_v60 = vsel %vm412_vm0, %v3337_v51, 0.0 }
 0x260   : > { %3235 = vst.msk [vmem:[%s5336_s6 + $0x14] sm:$0xf] %vm650_vm3, %v4186_v47  ;;  %v3274_v61 = vadd.f32 %v3273_v55, %v3272_v53  ;;  %v3374_v44 = vadd.f32 %v3373_v60, %v3372_v33 }
 0x261   : > { %v2409_v62 = vpop.permute.xlu1 %2408 }
 0x262   : > { %2478 = vst.msk [vmem:[#allocation3 + $0x6c] sm:$0xf] %vm2450_vm11, %v2409_v62  ;;  %v2664_v50 = vpop.permute.xlu0 %2663  ;;  %v3376_v22 = vadd.f32 %v3375_v0, %v3374_v44  ;;  %v3276_v4 = vadd.f32 %v3275_v2, %v3274_v61 }
 0x263   : > { %2734 = vst.msk [vmem:[#allocation3 + $0x68] sm:$0xf] %vm2707_vm12, %v2664_v50 }
 0x264   : > { %v3378_v6 = vadd.f32 %v3377_v5, %v3376_v22 }
 0x265   : > { %v2662_v27 = vpop.permute.xlu1 %2661 }
 0x266   : > { %2733 = vst.msk [vmem:[#allocation3 + $0x64] sm:$0xf] %vm2707_vm12, %v2662_v27  ;;  %v1382_v23 = vpop.permute.xlu0 %1381 }
 0x267   : > { %1450 = vst.msk [vmem:[#allocation3 + $0x70] sm:$0xf] %vm1421_vm7, %v1382_v23 }
 0x269   : > { %v2666_v7 = vpop.permute.xlu1 %2665 }
 0x26a   : > { %2735 = vst.msk [vmem:[#allocation3 + $0x6c] sm:$0xf] %vm2707_vm12, %v2666_v7  ;;  %v1386_v9 = vpop.permute.xlu0 %1385 }
 0x26b   : > { %1452 = vst.msk [vmem:[#allocation3 + $0x78] sm:$0xf] %vm1421_vm7, %v1386_v9 }
 0x26d   : > { %v1384_v28 = vpop.permute.xlu1 %1383  ;;  %v4401_v26 = vld [vmem:[#allocation3 + $0x60] sm:$0xff]  }
 0x26e   : > { %1451 = vst.msk [vmem:[#allocation3 + $0x74] sm:$0xf] %vm1421_vm7, %v1384_v28  ;;  %v1639_v36 = vpop.permute.xlu0 %1638  ;;  %4347 = vmatprep.mubr.msk.bf16.mxu1 %vm2888_vm13, %v4401_v26 }
 0x26f   : > { %1707 = vst.msk [vmem:[#allocation3 + $0x70] sm:$0xf] %vm1678_vm8, %v1639_v36 }
 0x271   : > { %v1388_v10 = vpop.permute.xlu1 %1387  ;;  %v4402_v12 = vld [vmem:[#allocation3 + $0x68] sm:$0xff]  }
 0x272   : > { %1453 = vst.msk [vmem:[#allocation3 + $0x7c] sm:$0xf] %vm1421_vm7, %v1388_v10  ;;  %v1643_v38 = vpop.permute.xlu0 %1642  ;;  %4348 = vmatmul.mubr.msk.bf16.gmra.mxu1 %vm2888_vm13, %v4402_v12 }
 0x273   : > { %1709 = vst.msk [vmem:[#allocation3 + $0x78] sm:$0xf] %vm1678_vm8, %v1643_v38 }
 0x275   : > { %v1641_v48 = vpop.permute.xlu1 %1640 }
 0x276   : > { %1708 = vst.msk [vmem:[#allocation3 + $0x74] sm:$0xf] %vm1678_vm8, %v1641_v48  ;;  %v1896_v37 = vpop.permute.xlu0 %1895 }
 0x277   : > { %1964 = vst.msk [vmem:[#allocation3 + $0x70] sm:$0xf] %vm1935_vm9, %v1896_v37 }
 0x279   : > { %v1645_v11 = vpop.permute.xlu1 %1644 }
 0x27a   : > { %1710 = vst.msk [vmem:[#allocation3 + $0x7c] sm:$0xf] %vm1678_vm8, %v1645_v11  ;;  %v1900_v8 = vpop.permute.xlu0 %1899 }
 0x27b   : > { %1966 = vst.msk [vmem:[#allocation3 + $0x78] sm:$0xf] %vm1935_vm9, %v1900_v8 }
 0x27d   : > { %v1898_v13 = vpop.permute.xlu1 %1897 }
 0x27e   : > { %1965 = vst.msk [vmem:[#allocation3 + $0x74] sm:$0xf] %vm1935_vm9, %v1898_v13  ;;  %v2154_v14 = vpop.permute.xlu0 %2153  ;;  %v4333_v39 = vpop.f32.mrf.mxu0 }
 0x27f   : > { %2222 = vst.msk [vmem:[#allocation3 + $0x70] sm:$0xf] %vm2193_vm10, %v2154_v14  ;;  %v4191_v54 = vpack.c.bf16 %v4333_v39, %v4333_v39  ;;  %v3342_v63 = vmul.f32 %v4333_v39, %v4333_v39  ;;  %v3281_v31 = vsel %vm412_vm0, %v4333_v39, 0.0 }
 0x280   : > { %v3007_v20 = vpop.f32.mrf.mxu0 }
 0x281   : > { %v1902_v56 = vpop.permute.xlu1 %1901  ;;  %3240 = vst.msk [vmem:[%s5336_s6 + $0x28] sm:$0xf] %vm650_vm3, %v4191_v54  ;;  %v4189_v15 = vpack.c.bf16 %v3007_v20, %v3007_v20  ;;  %v3277_v17 = vsel %vm412_vm0, %v3007_v20, 0.0  ;;  %v3340_v3 = vmul.f32 %v3007_v20, %v3007_v20  ;;  %v3383_v42 = vsel %vm412_vm0, %v3342_v63, 0.0 }
 0x282   : > { %1967 = vst.msk [vmem:[#allocation3 + $0x7c] sm:$0xf] %vm1935_vm9, %v1902_v56  ;;  %v2158_v52 = vpop.permute.xlu0 %2157  ;;  %v3278_v16 = vadd.f32 %v3277_v17, %v3276_v4  ;;  %v4334_v57 = vpop.f32.mrf.mxu0 }
 0x283   : > { %2224 = vst.msk [vmem:[#allocation3 + $0x78] sm:$0xf] %vm2193_vm10, %v2158_v52  ;;  %v3379_v18 = vsel %vm412_vm0, %v3340_v3, 0.0  ;;  %v4192_v59 = vpack.c.bf16 %v4334_v57, %v4334_v57  ;;  %v3343_v41 = vmul.f32 %v4334_v57, %v4334_v57  ;;  %v3283_v43 = vsel %vm412_vm0, %v4334_v57, 0.0 }
 0x284   : > { %3238 = vst.msk [vmem:[%s5336_s6 + $0x20] sm:$0xf] %vm650_vm3, %v4189_v15  ;;  %v3380_v29 = vadd.f32 %v3379_v18, %v3378_v6  ;;  %v3010_v19 = vpop.f32.mrf.mxu0 }
 0x285   : > { %v2156_v40 = vpop.permute.xlu1 %2155  ;;  %3241 = vst.msk [vmem:[%s5336_s6 + $0x2c] sm:$0xf] %vm650_vm3, %v4192_v59  ;;  %v4190_v24 = vpack.c.bf16 %v3010_v19, %v3010_v19  ;;  %v3279_v34 = vsel %vm412_vm0, %v3010_v19, 0.0  ;;  %v3341_v21 = vmul.f32 %v3010_v19, %v3010_v19  ;;  %v3385_v51 = vsel %vm412_vm0, %v3343_v41, 0.0 }
 0x286   : > { %2223 = vst.msk [vmem:[#allocation3 + $0x74] sm:$0xf] %vm2193_vm10, %v2156_v40  ;;  %v2411_v30 = vpop.permute.xlu0 %2410  ;;  %v3280_v25 = vadd.f32 %v3279_v34, %v3278_v16 }
 0x287   : > { %2479 = vst.msk [vmem:[#allocation3 + $0x70] sm:$0xf] %vm2450_vm11, %v2411_v30  ;;  %v3381_v32 = vsel %vm412_vm0, %v3341_v21, 0.0 }
 0x288   : > { %3239 = vst.msk [vmem:[%s5336_s6 + $0x24] sm:$0xf] %vm650_vm3, %v4190_v24  ;;  %v3282_v1 = vadd.f32 %v3281_v31, %v3280_v25  ;;  %v3382_v35 = vadd.f32 %v3381_v32, %v3380_v29 }
 0x289   : > { %v2160_v33 = vpop.permute.xlu1 %2159 }
 0x28a   : > { %2225 = vst.msk [vmem:[#allocation3 + $0x7c] sm:$0xf] %vm2193_vm10, %v2160_v33  ;;  %v2415_v45 = vpop.permute.xlu0 %2414  ;;  %v3384_v47 = vadd.f32 %v3383_v42, %v3382_v35  ;;  %v3284_v49 = vadd.f32 %v3283_v43, %v3282_v1 }
 0x28b   : > { %2481 = vst.msk [vmem:[#allocation3 + $0x78] sm:$0xf] %vm2450_vm11, %v2415_v45 }
 0x28c   : > { %v3386_v53 = vadd.f32 %v3385_v51, %v3384_v47 }
 0x28d   : > { %v2413_v46 = vpop.permute.xlu1 %2412 }
 0x28e   : > { %2480 = vst.msk [vmem:[#allocation3 + $0x74] sm:$0xf] %vm2450_vm11, %v2413_v46  ;;  %v2668_v55 = vpop.permute.xlu0 %2667 }
 0x28f   : > { %2736 = vst.msk [vmem:[#allocation3 + $0x70] sm:$0xf] %vm2707_vm12, %v2668_v55 }
 0x291   : > { %v2417_v58 = vpop.permute.xlu1 %2416 }
 0x292   : > { %2482 = vst.msk [vmem:[#allocation3 + $0x7c] sm:$0xf] %vm2450_vm11, %v2417_v58  ;;  %v2672_v60 = vpop.permute.xlu0 %2671 }
 0x293   : > { %2738 = vst.msk [vmem:[#allocation3 + $0x78] sm:$0xf] %vm2707_vm12, %v2672_v60 }
 0x295   : > { %v2670_v61 = vpop.permute.xlu1 %2669 }
 0x296   : > { %2737 = vst.msk [vmem:[#allocation3 + $0x74] sm:$0xf] %vm2707_vm12, %v2670_v61 }
 0x299   : > { %v2674_v44 = vpop.permute.xlu1 %2673 }
 0x29a   : > { %2739 = vst.msk [vmem:[#allocation3 + $0x7c] sm:$0xf] %vm2707_vm12, %v2674_v44 }
 0x29d   : > { %v4403_v62 = vld [vmem:[#allocation3 + $0x70] sm:$0xff]  }
 0x29e   : > { %4351 = vmatprep.mubr.msk.bf16.mxu1 %vm2888_vm13, %v4403_v62 }
 0x2a1   : > { %v4404_v0 = vld [vmem:[#allocation3 + $0x78] sm:$0xff]  }
 0x2a2   : > { %4352 = vmatmul.mubr.msk.bf16.gmra.mxu1 %vm2888_vm13, %v4404_v0 }
 0x2a6   : > { %v4337_v2 = vpop.f32.mrf.mxu0 }
 0x2a7   : > { %v4195_v50 = vpack.c.bf16 %v4337_v2, %v4337_v2  ;;  %v3346_v36 = vmul.f32 %v4337_v2, %v4337_v2  ;;  %v3289_v37 = vsel %vm412_vm0, %v4337_v2, 0.0 }
 0x2a8   : > { %v3023_v22 = vpop.f32.mrf.mxu0 }
 0x2a9   : > { %3244 = vst.msk [vmem:[%s5336_s6 + $0x38] sm:$0xf] %vm650_vm3, %v4195_v50  ;;  %v4193_v4 = vpack.c.bf16 %v3023_v22, %v3023_v22  ;;  %v3285_v5 = vsel %vm412_vm0, %v3023_v22, 0.0  ;;  %v3344_v27 = vmul.f32 %v3023_v22, %v3023_v22  ;;  %v3391_v39 = vsel %vm412_vm0, %v3346_v36, 0.0 }
 0x2aa   : > { %v3286_v6 = vadd.f32 %v3285_v5, %v3284_v49  ;;  %v4338_v23 = vpop.f32.mrf.mxu0 }
 0x2ab   : > { %3242 = vst.msk [vmem:[%s5336_s6 + $0x30] sm:$0xf] %vm650_vm3, %v4193_v4  ;;  %v3387_v7 = vsel %vm412_vm0, %v3344_v27, 0.0  ;;  %v4196_v9 = vpack.c.bf16 %v4338_v23, %v4338_v23  ;;  %v3347_v11 = vmul.f32 %v4338_v23, %v4338_v23  ;;  %v3291_v54 = vsel %vm412_vm0, %v4338_v23, 0.0 }
 0x2ac   : > { %v3388_v28 = vadd.f32 %v3387_v7, %v3386_v53  ;;  %v3026_v26 = vpop.f32.mrf.mxu0 }
 0x2ad   : > { %3245 = vst.msk [vmem:[%s5336_s6 + $0x3c] sm:$0xf] %vm650_vm3, %v4196_v9  ;;  %v4194_v10 = vpack.c.bf16 %v3026_v26, %v3026_v26  ;;  %v3287_v12 = vsel %vm412_vm0, %v3026_v26, 0.0  ;;  %v3345_v38 = vmul.f32 %v3026_v26, %v3026_v26  ;;  %v3393_v15 = vsel %vm412_vm0, %v3347_v11, 0.0 }
 0x2ae   : > { %v3288_v48 = vadd.f32 %v3287_v12, %v3286_v6 }
 0x2af   : > { %3243 = vst.msk [vmem:[%s5336_s6 + $0x34] sm:$0xf] %vm650_vm3, %v4194_v10  ;;  %v3389_v8 = vsel %vm412_vm0, %v3345_v38, 0.0 }
 0x2b0   : > { %v3290_v13 = vadd.f32 %v3289_v37, %v3288_v48  ;;  %v3390_v14 = vadd.f32 %v3389_v8, %v3388_v28 }
 0x2b2   : > { %v3392_v56 = vadd.f32 %v3391_v39, %v3390_v14  ;;  %v3292_v20 = vadd.f32 %v3291_v54, %v3290_v13 }
 0x2b4   : > { %v3394_v17 = vadd.f32 %v3393_v15, %v3392_v56 }
 0x2d2   : > { %v4341_v3 = vpop.f32.mrf.mxu1 }
 0x2d3   : > { %v4199_v52 = vpack.c.bf16 %v4341_v3, %v4341_v3  ;;  %v3350_v21 = vmul.f32 %v4341_v3, %v4341_v3  ;;  %v3297_v32 = vsel %vm412_vm0, %v4341_v3, 0.0 }
 0x2d4   : > { %v3039_v16 = vpop.f32.mrf.mxu1 }
 0x2d5   : > { %3248 = vst.msk [vmem:[%s5336_s6 + $0x48] sm:$0xf] %vm650_vm3, %v4199_v52  ;;  %v4197_v57 = vpack.c.bf16 %v3039_v16, %v3039_v16  ;;  %v3293_v18 = vsel %vm412_vm0, %v3039_v16, 0.0  ;;  %v3348_v59 = vmul.f32 %v3039_v16, %v3039_v16  ;;  %v3399_v43 = vsel %vm412_vm0, %v3350_v21, 0.0 }
 0x2d6   : > { %v3294_v29 = vadd.f32 %v3293_v18, %v3292_v20  ;;  %v4342_v40 = vpop.f32.mrf.mxu1 }
 0x2d7   : > { %3246 = vst.msk [vmem:[%s5336_s6 + $0x40] sm:$0xf] %vm650_vm3, %v4197_v57  ;;  %v3395_v19 = vsel %vm412_vm0, %v3348_v59, 0.0  ;;  %v4200_v63 = vpack.c.bf16 %v4342_v40, %v4342_v40  ;;  %v3351_v1 = vmul.f32 %v4342_v40, %v4342_v40  ;;  %v3299_v45 = vsel %vm412_vm0, %v4342_v40, 0.0 }
 0x2d8   : > { %v3396_v24 = vadd.f32 %v3395_v19, %v3394_v17  ;;  %v3042_v34 = vpop.f32.mrf.mxu1 }
 0x2d9   : > { %3249 = vst.msk [vmem:[%s5336_s6 + $0x4c] sm:$0xf] %vm650_vm3, %v4200_v63  ;;  %v4198_v30 = vpack.c.bf16 %v3042_v34, %v3042_v34  ;;  %v3295_v25 = vsel %vm412_vm0, %v3042_v34, 0.0  ;;  %v3349_v31 = vmul.f32 %v3042_v34, %v3042_v34  ;;  %v3401_v51 = vsel %vm412_vm0, %v3351_v1, 0.0 }
 0x2da   : > { %v3296_v41 = vadd.f32 %v3295_v25, %v3294_v29 }
 0x2db   : > { %3247 = vst.msk [vmem:[%s5336_s6 + $0x44] sm:$0xf] %vm650_vm3, %v4198_v30  ;;  %v3397_v35 = vsel %vm412_vm0, %v3349_v31, 0.0 }
 0x2dc   : > { %v3298_v33 = vadd.f32 %v3297_v32, %v3296_v41  ;;  %v3398_v42 = vadd.f32 %v3397_v35, %v3396_v24 }
 0x2de   : > { %v3400_v47 = vadd.f32 %v3399_v43, %v3398_v42  ;;  %v3300_v49 = vadd.f32 %v3299_v45, %v3298_v33 }
 0x2e0   : > { %v3402_v46 = vadd.f32 %v3401_v51, %v3400_v47 }
 0x302   : > { %v4345_v53 = vpop.f32.mrf.mxu1 }
 0x303   : > { %v4203_v55 = vpack.c.bf16 %v4345_v53, %v4345_v53  ;;  %v3354_v5 = vmul.f32 %v4345_v53, %v4345_v53  ;;  %v3305_v9 = vsel %vm412_vm0, %v4345_v53, 0.0 }
 0x304   : > { %v3055_v58 = vpop.f32.mrf.mxu1 }
 0x305   : > { %3252 = vst.msk [vmem:[%s5336_s6 + $0x58] sm:$0xf] %vm650_vm3, %v4203_v55  ;;  %v4201_v60 = vpack.c.bf16 %v3055_v58, %v3055_v58  ;;  %v3301_v61 = vsel %vm412_vm0, %v3055_v58, 0.0  ;;  %v3352_v44 = vmul.f32 %v3055_v58, %v3055_v58  ;;  %v3407_v12 = vsel %vm412_vm0, %v3354_v5, 0.0 }
 0x306   : > { %v3302_v62 = vadd.f32 %v3301_v61, %v3300_v49  ;;  %v4346_v0 = vpop.f32.mrf.mxu1 }
 0x307   : > { %3250 = vst.msk [vmem:[%s5336_s6 + $0x50] sm:$0xf] %vm650_vm3, %v4201_v60  ;;  %v3403_v2 = vsel %vm412_vm0, %v3352_v44, 0.0  ;;  %v4204_v50 = vpack.c.bf16 %v4346_v0, %v4346_v0  ;;  %v3355_v28 = vmul.f32 %v4346_v0, %v4346_v0  ;;  %v3307_v38 = vsel %vm412_vm0, %v4346_v0, 0.0 }
 0x308   : > { %v3404_v22 = vadd.f32 %v3403_v2, %v3402_v46  ;;  %v3058_v4 = vpop.f32.mrf.mxu1 }
 0x309   : > { %3253 = vst.msk [vmem:[%s5336_s6 + $0x5c] sm:$0xf] %vm650_vm3, %v4204_v50  ;;  %v4202_v27 = vpack.c.bf16 %v3058_v4, %v3058_v4  ;;  %v3303_v6 = vsel %vm412_vm0, %v3058_v4, 0.0  ;;  %v3353_v23 = vmul.f32 %v3058_v4, %v3058_v4  ;;  %v3409_v11 = vsel %vm412_vm0, %v3355_v28, 0.0 }
 0x30a   : > { %v3304_v7 = vadd.f32 %v3303_v6, %v3302_v62 }
 0x30b   : > { %3251 = vst.msk [vmem:[%s5336_s6 + $0x54] sm:$0xf] %vm650_vm3, %v4202_v27  ;;  %v3405_v26 = vsel %vm412_vm0, %v3353_v23, 0.0 }
 0x30c   : > { %v3306_v36 = vadd.f32 %v3305_v9, %v3304_v7  ;;  %v3406_v10 = vadd.f32 %v3405_v26, %v3404_v22 }
 0x30e   : > { %v3408_v48 = vadd.f32 %v3407_v12, %v3406_v10  ;;  %v3308_v37 = vadd.f32 %v3307_v38, %v3306_v36 }
 0x310   : > { %v3410_v8 = vadd.f32 %v3409_v11, %v3408_v48 }
 0x332   : > { %v4349_v13 = vpop.f32.mrf.mxu1 }
 0x333   : > { %v4207_v14 = vpack.c.bf16 %v4349_v13, %v4349_v13  ;;  %v3358_v63 = vmul.f32 %v4349_v13, %v4349_v13  ;;  %v3313_v34 = vsel %vm412_vm0, %v4349_v13, 0.0 }
 0x334   : > { %v3071_v39 = vpop.f32.mrf.mxu1 }
 0x335   : > { %3256 = vst.msk [vmem:[%s5336_s6 + $0x68] sm:$0xf] %vm650_vm3, %v4207_v14  ;;  %v4205_v54 = vpack.c.bf16 %v3071_v39, %v3071_v39  ;;  %v3356_v3 = vmul.f32 %v3071_v39, %v3071_v39  ;;  %v3309_v52 = vsel %vm412_vm0, %v3071_v39, 0.0  ;;  %v3415_v25 = vsel %vm412_vm0, %v3358_v63, 0.0 }
 0x336   : > { %v4350_v56 = vpop.f32.mrf.mxu1  ;;  %v3310_v59 = vadd.f32 %v3309_v52, %v3308_v37 }
 0x337   : > { %3254 = vst.msk [vmem:[%s5336_s6 + $0x60] sm:$0xf] %vm650_vm3, %v4205_v54  ;;  %v4208_v20 = vpack.c.bf16 %v4350_v56, %v4350_v56  ;;  %v3411_v57 = vsel %vm412_vm0, %v3356_v3, 0.0  ;;  %v3359_v31 = vmul.f32 %v4350_v56, %v4350_v56  ;;  %v3315_v35 = vsel %vm412_vm0, %v4350_v56, 0.0 }
 0x338   : > { %v3074_v15 = vpop.f32.mrf.mxu1  ;;  %v3412_v40 = vadd.f32 %v3411_v57, %v3410_v8 }
 0x339   : > { %3257 = vst.msk [vmem:[%s5336_s6 + $0x6c] sm:$0xf] %vm650_vm3, %v4208_v20  ;;  %v4206_v17 = vpack.c.bf16 %v3074_v15, %v3074_v15  ;;  %v3357_v16 = vmul.f32 %v3074_v15, %v3074_v15  ;;  %v3311_v18 = vsel %vm412_vm0, %v3074_v15, 0.0  ;;  %v3417_v49 = vsel %vm412_vm0, %v3359_v31, 0.0 }
 0x33a   : > { %v3312_v19 = vadd.f32 %v3311_v18, %v3310_v59 }
 0x33b   : > { %3255 = vst.msk [vmem:[%s5336_s6 + $0x64] sm:$0xf] %vm650_vm3, %v4206_v17  ;;  %v3413_v29 = vsel %vm412_vm0, %v3357_v16, 0.0 }
 0x33c   : > { %v3414_v24 = vadd.f32 %v3413_v29, %v3412_v40  ;;  %v3314_v21 = vadd.f32 %v3313_v34, %v3312_v19 }
 0x33e   : > { %v3416_v32 = vadd.f32 %v3415_v25, %v3414_v24  ;;  %v3316_v45 = vadd.f32 %v3315_v35, %v3314_v21 }
 0x340   : > { %v3418_v55 = vadd.f32 %v3417_v49, %v3416_v32 }
 0x362   : > { %v4353_v30 = vpop.f32.mrf.mxu1 }
 0x363   : > { %v4211_v41 = vpack.c.bf16 %v4353_v30, %v4353_v30  ;;  %v3362_v60 = vmul.f32 %v4353_v30, %v4353_v30  ;;  %v3321_v50 = vsel %vm412_vm0, %v4353_v30, 0.0 }
 0x364   : > { %v3087_v1 = vpop.f32.mrf.mxu1 }
 0x365   : > { %3260 = vst.msk [vmem:[%s5336_s6 + $0x78] sm:$0xf] %vm650_vm3, %v4211_v41  ;;  %v4209_v33 = vpack.c.bf16 %v3087_v1, %v3087_v1  ;;  %v3317_v42 = vsel %vm412_vm0, %v3087_v1, 0.0  ;;  %v3360_v43 = vmul.f32 %v3087_v1, %v3087_v1  ;;  %v3423_v6 = vsel %vm412_vm0, %v3362_v60, 0.0 }
 0x366   : > { %v4354_v47 = vpop.f32.mrf.mxu1  ;;  %v3318_v53 = vadd.f32 %v3317_v42, %v3316_v45 }
 0x367   : > { %3258 = vst.msk [vmem:[%s5336_s6 + $0x70] sm:$0xf] %vm650_vm3, %v4209_v33  ;;  %v3419_v51 = vsel %vm412_vm0, %v3360_v43, 0.0  ;;  %v4212_v46 = vpack.c.bf16 %v4354_v47, %v4354_v47  ;;  %v3363_v22 = vmul.f32 %v4354_v47, %v4354_v47  ;;  %v3323_v23 = vsel %vm412_vm0, %v4354_v47, 0.0 }
 0x368   : > { %v3090_v58 = vpop.f32.mrf.mxu1  ;;  %v3420_v0 = vadd.f32 %v3419_v51, %v3418_v55 }
 0x369   : > { %3261 = vst.msk [vmem:[%s5336_s6 + $0x7c] sm:$0xf] %vm650_vm3, %v4212_v46  ;;  %v4210_v61 = vpack.c.bf16 %v3090_v58, %v3090_v58  ;;  %v3319_v44 = vsel %vm412_vm0, %v3090_v58, 0.0  ;;  %v3361_v62 = vmul.f32 %v3090_v58, %v3090_v58  ;;  %v3425_v28 = vsel %vm412_vm0, %v3363_v22, 0.0 }
 0x36a   : > { %v3320_v2 = vadd.f32 %v3319_v44, %v3318_v53 }
 0x36b   : > { %3259 = vst.msk [vmem:[%s5336_s6 + $0x74] sm:$0xf] %vm650_vm3, %v4210_v61  ;;  %v3421_v4 = vsel %vm412_vm0, %v3361_v62, 0.0 }
 0x36c   : > { %v3322_v5 = vadd.f32 %v3321_v50, %v3320_v2  ;;  %v3422_v27 = vadd.f32 %v3421_v4, %v3420_v0 }
 0x36e   : > { %v3324_v7 = vadd.f32 %v3323_v23, %v3322_v5  ;;  %v3424_v9 = vadd.f32 %v3423_v6, %v3422_v27 }
 0x370   : > { %v3325_v26 = vrot.slane %v3324_v7, 4  ;;  %v3426_v36 = vadd.f32 %v3425_v28, %v3424_v9 }
 0x372   : > { %v3326_v10 = vadd.f32 %v3325_v26, %v3324_v7  ;;  %v3427_v12 = vrot.slane %v3426_v36, 4 }
 0x374   : > { %v3327_v38 = vrot.slane %v3326_v10, 2  ;;  %v3428_v48 = vadd.f32 %v3427_v12, %v3426_v36 }
 0x376   : > { %v3328_v37 = vadd.f32 %v3327_v38, %v3326_v10  ;;  %v3429_v11 = vrot.slane %v3428_v48, 2 }
 0x378   : > { %v3329_v8 = vrot.slane %v3328_v37, 1  ;;  %v3430_v13 = vadd.f32 %v3429_v11, %v3428_v48 }
 0x37a   : > { %v3330_v14 = vadd.f32 %v3329_v8, %v3328_v37  ;;  %v3431_v39 = vrot.slane %v3430_v13, 1 }
 0x37c   : > { %3331 = vst.msk [vmem:[%s235_s9] sm:$0x1] %vm453_vm1, %v3330_v14  ;;  %v3432_v54 = vadd.f32 %v3431_v39, %v3430_v13 }
 0x37e   : > { %3433 = vst.msk [vmem:[%s235_s9 + $0x1] sm:$0x1] %vm453_vm1, %v3432_v54 }
 0x37f PF: > { %s16_s18 = sadd.s32 1, %s4413_s18  }
 0x380   : > { %p13_p4 = scmp.ge.s32.totalorder %s16_s18, 4  }
 0x382   :  { %15 = sbr.rel (!%p13_p4) target bundleno = 1 (0x1), region = 81 }

// kernel: resblock_forward_nchw.3
= control target key start
LH: loop header
LB: loop body
LE: loop exit
PB: predicated region body
PF: predicated region fallthrough
CT: control target
= control target key end

     0   :  { %s4571_s18 = smov 0   ;;  %s5773_s0 = inlined_call_operand.vmem [shape: f32[2,16,16,4], index: 0, kind: input, shape index: {}]   ;;  %s5774_s1 = inlined_call_operand.vmem [shape: bf16[36,16], index: 1, kind: input, shape index: {}]   ;;  %s5775_s2 = inlined_call_operand.vmem [shape: bf16[2,16,16,8], index: 2, kind: output, shape index: {0}]   ;;  %s5776_s3 = inlined_call_operand.vmem [shape: bf16[2,16,16,8], index: 3, kind: output, shape index: {1}]   ;;  %s5777_s4 = inlined_call_operand.vmem [shape: f32[2,2,8], index: 4, kind: output, shape index: {2}]   ;;  %s5778_s5 = inlined_call_operand.vmem [shape: f32[2,2,8], index: 5, kind: output, shape index: {3}]  }
   0x1 LB: > { %s3728_s19 = sadd.s32 4294967295, %s4529_s18   ;;  %p3732_p0 = scmp.ge.s32.totalorder %s4529_s18, 1  ;;  %s4529_s18 = sphi %s4571_s18, %s16_s18  }
   0x2   : > { %p194_p1 = scmp.lt.s32.totalorder %s4529_s18, 3 }
   0x4   : > { %p195_p2 = pnand %p3732_p0, %p194_p1 }
   0x5   : > { %p4581_p3 = scmp.lt.s32.totalorder (!%p195_p2), %s3728_s19, 1  ;;  %s4532_s25 = smov (!%p195_p2), 4  }
   0x6   : > { %198 = sbr.rel (%p195_p2) target bundleno = 1010 (0x3f2), region = 28  ;;  %s4533_s26 = smov (!%p195_p2), 8  }
   0x7   : > { %s4534_s27 = smov (!%p195_p2), 12   ;;  %s4535_s28 = smov (!%p195_p2), 16  }
   0x8   : > { %s4536_s29 = smov (!%p195_p2), 20   ;;  %s4537_s30 = smov (!%p195_p2), 24  }
   0x9   : > { %s4538_s8 = smov (!%p195_p2), 28   ;;  %s4539_s13 = smov (!%p195_p2), 32  }
   0xa   : > { %s4540_s20 = smov (!%p195_p2), 120  }
   0xb   : > { %vm292_vm0 = vcmask 31744   ;;  %vm333_vm1 = vcmask 24576   ;;  %vm327_vm2 = vcmask 25600   ;;  %v4531_v0 = vmov 0.0   ;;  %s5781_s19 = smov (!%p4581_p3, %s3728_s19), 1 }
   0xc   : > { %325 = vst.msk [vmem:[#allocation2] sm:$0xff] %vm292_vm0, %v4531_v0  ;;  %326 = vst.msk [vmem:[#allocation2 + $0x8] sm:$0xff] %vm292_vm0, %v4531_v0  ;;  %s4098_s21 = sshll.u32 %s5781_s19, 8  ;;  %vm530_vm3 = vcmask 27648   ;;  %vm787_vm4 = vcmask 60448   ;;  %vm1044_vm5 = vcmask 93248  }
   0xd   : > { %330 = vst.msk [vmem:[#allocation2 + $0x198] sm:$0xff] %vm292_vm0, %v4531_v0  ;;  %331 = vst.msk [vmem:[#allocation2 + $0x1a0] sm:$0xff] %vm292_vm0, %v4531_v0  ;;  %s4637_s24 = scalar_lea.vmem %s5773_s0, %s4098_s21  ;;  %vm2801_vm6 = vcmask 1041408   ;;  %vm1301_vm7 = vcmask 126048   ;;  %vm1558_vm8 = vcmask 158848   ;;  %vm1815_vm9 = vcmask 191648  }
   0xe   : > { %335 = vst.msk [vmem:[#allocation2 + $0x18] sm:$0x1] %vm333_vm1, %v4531_v0  ;;  %336 = vst.msk [vmem:[#allocation2 + $0x30] sm:$0x1] %vm333_vm1, %v4531_v0  ;;  %v259_v1 = vld [vmem:[%s4637_s24] sm:$0xff]  ;;  %v261_v2 = vld [vmem:[%s4637_s24 + $0x10] sm:$0xff] }
   0xf   : > { %337 = vst.msk [vmem:[#allocation2 + $0x48] sm:$0x1] %vm333_vm1, %v4531_v0  ;;  %338 = vst.msk [vmem:[#allocation2 + $0x60] sm:$0x1] %vm333_vm1, %v4531_v0  ;;  %v260_v3 = vld [vmem:[%s4637_s24 + $0x8] sm:$0xff]  ;;  %v263_v4 = vld [vmem:[%s4637_s24 + $0x20] sm:$0xff] }
  0x10   : > { %339 = vst.msk [vmem:[#allocation2 + $0x78] sm:$0x1] %vm333_vm1, %v4531_v0  ;;  %340 = vst.msk [vmem:[#allocation2 + $0x90] sm:$0x1] %vm333_vm1, %v4531_v0  ;;  %v262_v5 = vld [vmem:[%s4637_s24 + $0x18] sm:$0xff]  ;;  %v265_v6 = vld [vmem:[%s4637_s24 + $0x30] sm:$0xff] }
  0x11   : > { %341 = vst.msk [vmem:[#allocation2 + $0xa8] sm:$0x1] %vm333_vm1, %v4531_v0  ;;  %342 = vst.msk [vmem:[#allocation2 + $0xc0] sm:$0x1] %vm333_vm1, %v4531_v0  ;;  %v264_v9 = vld [vmem:[%s4637_s24 + $0x28] sm:$0xff]  ;;  %v267_v11 = vld [vmem:[%s4637_s24 + $0x40] sm:$0xff] }
  0x12   : > { %343 = vst.msk [vmem:[#allocation2 + $0xd8] sm:$0x1] %vm333_vm1, %v4531_v0  ;;  %344 = vst.msk [vmem:[#allocation2 + $0xf0] sm:$0x1] %vm333_vm1, %v4531_v0  ;;  %v266_v12 = vld [vmem:[%s4637_s24 + $0x38] sm:$0xff]  ;;  %v269_v13 = vld [vmem:[%s4637_s24 + $0x50] sm:$0xff] }
  0x13   : > { %345 = vst.msk [vmem:[#allocation2 + $0x108] sm:$0x1] %vm333_vm1, %v4531_v0  ;;  %346 = vst.msk [vmem:[#allocation2 + $0x120] sm:$0x1] %vm333_vm1, %v4531_v0  ;;  %v563_v7 = vld [vmem:[#allocation2 + $0x1] sm:$0xff]  ;;  %v270_v16 = vld [vmem:[%s4637_s24 + $0x58] sm:$0xff] }
  0x14   : > { %347 = vst.msk [vmem:[#allocation2 + $0x138] sm:$0x1] %vm333_vm1, %v4531_v0  ;;  %348 = vst.msk [vmem:[#allocation2 + $0x150] sm:$0x1] %vm333_vm1, %v4531_v0  ;;  %v4133_v10 = vpack.c.bf16 %v563_v7, %v563_v7  ;;  %v268_v14 = vld [vmem:[%s4637_s24 + $0x48] sm:$0xff]  ;;  %v271_v15 = vld [vmem:[%s4637_s24 + $0x60] sm:$0xff] }
  0x15   : > { %349 = vst.msk [vmem:[#allocation2 + $0x168] sm:$0x1] %vm333_vm1, %v4531_v0  ;;  %350 = vst.msk [vmem:[#allocation2 + $0x180] sm:$0x1] %vm333_vm1, %v4531_v0  ;;  %v273_v18 = vld [vmem:[%s4637_s24 + $0x70] sm:$0xff]  ;;  %v272_v19 = vld [vmem:[%s4637_s24 + $0x68] sm:$0xff] }
  0x16   : > { %353 = vst.msk [vmem:[#allocation2 + $0x29] sm:$0x1] %vm333_vm1, %v4531_v0  ;;  %354 = vst.msk [vmem:[#allocation2 + $0x41] sm:$0x1] %vm333_vm1, %v4531_v0  ;;  %691 = vrot.lane.b32.xlu0 %v4133_v10, %s4532_s25  ;;  %v275_v20 = vld [vmem:[%s4637_s24 + $0x80] sm:$0xff]  ;;  %v274_v21 = vld [vmem:[%s4637_s24 + $0x78] sm:$0xff] }
  0x17   : > { %355 = vst.msk [vmem:[#allocation2 + $0x59] sm:$0x1] %vm333_vm1, %v4531_v0  ;;  %356 = vst.msk [vmem:[#allocation2 + $0x71] sm:$0x1] %vm333_vm1, %v4531_v0  ;;  %v277_v22 = vld [vmem:[%s4637_s24 + $0x90] sm:$0xff]  ;;  %v276_v23 = vld [vmem:[%s4637_s24 + $0x88] sm:$0xff] }
  0x18   : > { %357 = vst.msk [vmem:[#allocation2 + $0x89] sm:$0x1] %vm333_vm1, %v4531_v0  ;;  %358 = vst.msk [vmem:[#allocation2 + $0xa1] sm:$0x1] %vm333_vm1, %v4531_v0  ;;  %v279_v24 = vld [vmem:[%s4637_s24 + $0xa0] sm:$0xff]  ;;  %v278_v25 = vld [vmem:[%s4637_s24 + $0x98] sm:$0xff] }
  0x19   : > { %359 = vst.msk [vmem:[#allocation2 + $0xb9] sm:$0x1] %vm333_vm1, %v4531_v0  ;;  %360 = vst.msk [vmem:[#allocation2 + $0xd1] sm:$0x1] %vm333_vm1, %v4531_v0  ;;  %v281_v26 = vld [vmem:[%s4637_s24 + $0xb0] sm:$0xff]  ;;  %v280_v33 = vld [vmem:[%s4637_s24 + $0xa8] sm:$0xff] }
  0x1a   : > { %361 = vst.msk [vmem:[#allocation2 + $0xe9] sm:$0x1] %vm333_vm1, %v4531_v0  ;;  %362 = vst.msk [vmem:[#allocation2 + $0x101] sm:$0x1] %vm333_vm1, %v4531_v0  ;;  %v283_v34 = vld [vmem:[%s4637_s24 + $0xc0] sm:$0xff]  ;;  %v282_v41 = vld [vmem:[%s4637_s24 + $0xb8] sm:$0xff] }
  0x1b   : > { %363 = vst.msk [vmem:[#allocation2 + $0x119] sm:$0x1] %vm333_vm1, %v4531_v0  ;;  %364 = vst.msk [vmem:[#allocation2 + $0x131] sm:$0x1] %vm333_vm1, %v4531_v0  ;;  %v285_v42 = vld [vmem:[%s4637_s24 + $0xd0] sm:$0xff]  ;;  %v284_v43 = vld [vmem:[%s4637_s24 + $0xc8] sm:$0xff] }
  0x1c   : > { %365 = vst.msk [vmem:[#allocation2 + $0x149] sm:$0x1] %vm333_vm1, %v4531_v0  ;;  %366 = vst.msk [vmem:[#allocation2 + $0x161] sm:$0x1] %vm333_vm1, %v4531_v0  ;;  %v287_v45 = vld [vmem:[%s4637_s24 + $0xe0] sm:$0xff]  ;;  %v286_v46 = vld [vmem:[%s4637_s24 + $0xd8] sm:$0xff] }
  0x1d   : > { %367 = vst.msk [vmem:[#allocation2 + $0x179] sm:$0x1] %vm333_vm1, %v4531_v0  ;;  %368 = vst.msk [vmem:[#allocation2 + $0x191] sm:$0x1] %vm333_vm1, %v4531_v0  ;;  %v288_v48 = vld [vmem:[%s4637_s24 + $0xe8] sm:$0xff]  ;;  %vm2073_vm10 = vcmask 224448  }
  0x1e   : > { %328 = vst.msk [vmem:[#allocation2 + $0x10] sm:$0x3] %vm327_vm2, %v4531_v0  ;;  %332 = vst.msk [vmem:[#allocation2 + $0x1a8] sm:$0x3] %vm327_vm2, %v4531_v0  ;;  %v371_v63 = vld [vmem:[#allocation2 + $0x8] sm:$0xff]  ;;  %vm2330_vm11 = vcmask 257248  }
  0x1f   : > { %334 = vst.msk [vmem:[#allocation2] sm:$0x1] %vm333_vm1, %v4531_v0  ;;  %351 = vst.msk [vmem:[#allocation2 + $0x198] sm:$0x1] %vm333_vm1, %v4531_v0  ;;  %vm2587_vm12 = vcmask 290048   ;;  %vm2752_vm13 = vcmask 293888  }
  0x20   : > { %352 = vst.msk [vmem:[#allocation2 + $0x11] sm:$0x1] %vm333_vm1, %v4531_v0  ;;  %369 = vst.msk [vmem:[#allocation2 + $0x1a9] sm:$0x1] %vm333_vm1, %v4531_v0  ;;  %s4099_s14 = sshll.u32 %s5781_s19, 7  ;;  %vm3094_vm14 = vcmask 60416  }
  0x21   : > { %293 = vst.msk [vmem:[#allocation2 + $0x19] sm:$0xff] %vm292_vm0, %v259_v1  ;;  %295 = vst.msk [vmem:[#allocation2 + $0x31] sm:$0xff] %vm292_vm0, %v261_v2  ;;  %v4102_v2 = vpack.c.bf16 %v371_v63, %v371_v63  ;;  %s5401_s17 = scalar_lea.vmem %s5775_s2, %s4099_s14  ;;  %vm3255_vm15 = vcmask 64512   ;;  %s5547_s23 = scalar_lea.vmem %s5776_s3, %s4099_s14  ;;  %vm3325_vm1 = vcmask 57344  }
  0x22   : > { %294 = vst.msk [vmem:[#allocation2 + $0x21] sm:$0xff] %vm292_vm0, %v260_v3  ;;  %297 = vst.msk [vmem:[#allocation2 + $0x49] sm:$0xff] %vm292_vm0, %v263_v4 }
  0x23   : > { %296 = vst.msk [vmem:[#allocation2 + $0x39] sm:$0xff] %vm292_vm0, %v262_v5  ;;  %299 = vst.msk [vmem:[#allocation2 + $0x61] sm:$0xff] %vm292_vm0, %v265_v6 }
  0x24   : > { %298 = vst.msk [vmem:[#allocation2 + $0x51] sm:$0xff] %vm292_vm0, %v264_v9  ;;  %301 = vst.msk [vmem:[#allocation2 + $0x79] sm:$0xff] %vm292_vm0, %v267_v11 }
  0x25   : > { %v564_v8 = vld [vmem:[#allocation2 + $0x9] sm:$0xff]  ;;  %300 = vst.msk [vmem:[#allocation2 + $0x69] sm:$0xff] %vm292_vm0, %v266_v12  ;;  %303 = vst.msk [vmem:[#allocation2 + $0x91] sm:$0xff] %vm292_vm0, %v269_v13 }
  0x26   : > { %v4134_v17 = vpack.c.bf16 %v564_v8, %v564_v8  ;;  %302 = vst.msk [vmem:[#allocation2 + $0x81] sm:$0xff] %vm292_vm0, %v268_v14  ;;  %305 = vst.msk [vmem:[#allocation2 + $0xa9] sm:$0xff] %vm292_vm0, %v271_v15  ;;  %v370_v60 = vld [vmem:[#allocation2] sm:$0xff] }
  0x27   : > { %304 = vst.msk [vmem:[#allocation2 + $0x99] sm:$0xff] %vm292_vm0, %v270_v16  ;;  %307 = vst.msk [vmem:[#allocation2 + $0xc1] sm:$0xff] %vm292_vm0, %v273_v18  ;;  %v4101_v62 = vpack.c.bf16 %v370_v60, %v370_v60 }
  0x28   : > { %306 = vst.msk [vmem:[#allocation2 + $0xb1] sm:$0xff] %vm292_vm0, %v272_v19  ;;  %309 = vst.msk [vmem:[#allocation2 + $0xd9] sm:$0xff] %vm292_vm0, %v275_v20  ;;  %v565_v27 = vld [vmem:[#allocation2 + $0x19] sm:$0xff]  ;;  %v567_v28 = vld [vmem:[#allocation2 + $0x31] sm:$0xff]  ;;  %693 = vrot.lane.b32.xlu0 %v4134_v17, %s4532_s25 }
  0x29   : > { %308 = vst.msk [vmem:[#allocation2 + $0xc9] sm:$0xff] %vm292_vm0, %v274_v21  ;;  %311 = vst.msk [vmem:[#allocation2 + $0xf1] sm:$0xff] %vm292_vm0, %v277_v22  ;;  %v566_v29 = vld [vmem:[#allocation2 + $0x21] sm:$0xff]  ;;  %v4685_v30 = vpack.c.bf16 %v565_v27, %v565_v27  ;;  %v4687_v31 = vpack.c.bf16 %v567_v28, %v567_v28  ;;  %v569_v32 = vld [vmem:[#allocation2 + $0x49] sm:$0xff] }
  0x2a   : > { %310 = vst.msk [vmem:[#allocation2 + $0xe1] sm:$0xff] %vm292_vm0, %v276_v23  ;;  %313 = vst.msk [vmem:[#allocation2 + $0x109] sm:$0xff] %vm292_vm0, %v279_v24  ;;  %v4693_v35 = vpack.c.bf16 %v566_v29, %v566_v29  ;;  %v568_v36 = vld [vmem:[#allocation2 + $0x39] sm:$0xff]  ;;  %v4139_v37 = vpack.c.bf16 %v569_v32, %v569_v32  ;;  %v571_v38 = vld [vmem:[#allocation2 + $0x61] sm:$0xff] }
  0x2b   : > { %312 = vst.msk [vmem:[#allocation2 + $0xf9] sm:$0xff] %vm292_vm0, %v278_v25  ;;  %315 = vst.msk [vmem:[#allocation2 + $0x121] sm:$0xff] %vm292_vm0, %v281_v26  ;;  %695 = vrot.lane.b32.xlu1 %v4685_v30, %s4532_s25  ;;  %v4701_v39 = vpack.c.bf16 %v568_v36, %v568_v36  ;;  %v570_v40 = vld [vmem:[#allocation2 + $0x51] sm:$0xff]  ;;  %v4141_v44 = vpack.c.bf16 %v571_v38, %v571_v38  ;;  %v573_v47 = vld [vmem:[#allocation2 + $0x79] sm:$0xff] }
  0x2c   : > { %314 = vst.msk [vmem:[#allocation2 + $0x111] sm:$0xff] %vm292_vm0, %v280_v33  ;;  %317 = vst.msk [vmem:[#allocation2 + $0x139] sm:$0xff] %vm292_vm0, %v283_v34  ;;  %699 = vrot.lane.b32.xlu0 %v4687_v31, %s4532_s25  ;;  %v4140_v49 = vpack.c.bf16 %v570_v40, %v570_v40  ;;  %v572_v50 = vld [vmem:[#allocation2 + $0x69] sm:$0xff]  ;;  %v4143_v51 = vpack.c.bf16 %v573_v47, %v573_v47  ;;  %v575_v52 = vld [vmem:[#allocation2 + $0x91] sm:$0xff] }
  0x2d   : > { %316 = vst.msk [vmem:[#allocation2 + $0x129] sm:$0xff] %vm292_vm0, %v282_v41  ;;  %319 = vst.msk [vmem:[#allocation2 + $0x151] sm:$0xff] %vm292_vm0, %v285_v42  ;;  %v4142_v53 = vpack.c.bf16 %v572_v50, %v572_v50  ;;  %v574_v54 = vld [vmem:[#allocation2 + $0x81] sm:$0xff]  ;;  %v4145_v55 = vpack.c.bf16 %v575_v52, %v575_v52  ;;  %v577_v56 = vld [vmem:[#allocation2 + $0xa9] sm:$0xff] }
  0x2e   : > { %318 = vst.msk [vmem:[#allocation2 + $0x141] sm:$0xff] %vm292_vm0, %v284_v43  ;;  %321 = vst.msk [vmem:[#allocation2 + $0x169] sm:$0xff] %vm292_vm0, %v287_v45  ;;  %v4144_v57 = vpack.c.bf16 %v574_v54, %v574_v54  ;;  %v576_v58 = vld [vmem:[#allocation2 + $0x99] sm:$0xff]  ;;  %v4147_v59 = vpack.c.bf16 %v577_v56, %v577_v56  ;;  %v579_v61 = vld [vmem:[#allocation2 + $0xc1] sm:$0xff] }
  0x2f   : > { %697 = vrot.lane.b32.xlu1 %v4693_v35, %s4532_s25  ;;  %320 = vst.msk [vmem:[#allocation2 + $0x159] sm:$0xff] %vm292_vm0, %v286_v46  ;;  %322 = vst.msk [vmem:[#allocation2 + $0x171] sm:$0xff] %vm292_vm0, %v288_v48  ;;  %v372_v0 = vld [vmem:[#allocation2 + $0x18] sm:$0xff]  ;;  %v4146_v1 = vpack.c.bf16 %v576_v58, %v576_v58  ;;  %v374_v4 = vld [vmem:[#allocation2 + $0x30] sm:$0xff]  ;;  %v4149_v10 = vpack.c.bf16 %v579_v61, %v579_v61 }
  0x30   : > { %703 = vrot.lane.b32.xlu0 %v4139_v37, %s4532_s25  ;;  %v4724_v3 = vpack.c.bf16 %v372_v0, %v372_v0  ;;  %v373_v5 = vld [vmem:[#allocation2 + $0x20] sm:$0xff]  ;;  %v578_v6 = vld [vmem:[#allocation2 + $0xb1] sm:$0xff]  ;;  %531 = vst.msk [vmem:[#allocation3] sm:$0xf] %vm530_vm3, %v4101_v62  ;;  %v4727_v7 = vpack.c.bf16 %v374_v4, %v374_v4  ;;  %v376_v9 = vld [vmem:[#allocation2 + $0x48] sm:$0xff] }
  0x31   : > { %v4729_v8 = vpack.c.bf16 %v373_v5, %v373_v5  ;;  %v4732_v11 = vld [vmem:[#allocation2 + $0xd9] sm:$0xff]  ;;  %532 = vst.msk [vmem:[#allocation3 + $0x4] sm:$0xf] %vm530_vm3, %v4102_v2  ;;  %v4737_v12 = vpack.c.bf16 %v376_v9, %v376_v9  ;;  %v4739_v15 = vld [vmem:[#allocation2 + $0xc9] sm:$0xff]  ;;  %v4148_v21 = vpack.c.bf16 %v578_v6, %v578_v6  ;;  %v583_v28 = vld [vmem:[#allocation2 + $0xf1] sm:$0xff] }
  0x32   : > { %533 = vst.msk [vmem:[#allocation3 + $0x8] sm:$0xf] %vm530_vm3, %v4724_v3  ;;  %v375_v13 = vld [vmem:[#allocation2 + $0x38] sm:$0xff]  ;;  %v378_v14 = vld [vmem:[#allocation2 + $0x60] sm:$0xff]  ;;  %535 = vst.msk [vmem:[#allocation3 + $0x10] sm:$0xf] %vm530_vm3, %v4727_v7  ;;  %v4151_v38 = vpack.c.bf16 %v4732_v11, %v4732_v11  ;;  %v4150_v52 = vpack.c.bf16 %v4739_v15, %v4739_v15  ;;  %v4153_v61 = vpack.c.bf16 %v583_v28, %v583_v28 }
  0x33   : > { %701 = vrot.lane.b32.xlu1 %v4701_v39, %s4532_s25  ;;  %534 = vst.msk [vmem:[#allocation3 + $0xc] sm:$0xf] %vm530_vm3, %v4729_v8  ;;  %v4745_v16 = vpack.c.bf16 %v375_v13, %v375_v13  ;;  %v4747_v17 = vpack.c.bf16 %v378_v14, %v378_v14  ;;  %v377_v18 = vld [vmem:[#allocation2 + $0x50] sm:$0xff]  ;;  %v380_v19 = vld [vmem:[#allocation2 + $0x78] sm:$0xff]  ;;  %v379_v20 = vld [vmem:[#allocation2 + $0x68] sm:$0xff] }
  0x34   : > { %707 = vrot.lane.b32.xlu0 %v4141_v44, %s4532_s25  ;;  %537 = vst.msk [vmem:[#allocation3 + $0x18] sm:$0xf] %vm530_vm3, %v4737_v12  ;;  %v4752_v22 = vpack.c.bf16 %v377_v18, %v377_v18  ;;  %v4754_v23 = vpack.c.bf16 %v380_v19, %v380_v19  ;;  %v4756_v24 = vpack.c.bf16 %v379_v20, %v379_v20  ;;  %v382_v25 = vld [vmem:[#allocation2 + $0x90] sm:$0xff]  ;;  %v381_v26 = vld [vmem:[#allocation2 + $0x80] sm:$0xff]  ;;  %v384_v27 = vld [vmem:[#allocation2 + $0xa8] sm:$0xff] }
  0x35   : > { %536 = vst.msk [vmem:[#allocation3 + $0x14] sm:$0xf] %vm530_vm3, %v4745_v16  ;;  %539 = vst.msk [vmem:[#allocation3 + $0x20] sm:$0xf] %vm530_vm3, %v4747_v17  ;;  %v4762_v29 = vpack.c.bf16 %v382_v25, %v382_v25  ;;  %v4764_v32 = vpack.c.bf16 %v381_v26, %v381_v26  ;;  %v4766_v33 = vpack.c.bf16 %v384_v27, %v384_v27  ;;  %v383_v34 = vld [vmem:[#allocation2 + $0x98] sm:$0xff]  ;;  %v386_v36 = vld [vmem:[#allocation2 + $0xc0] sm:$0xff] }
  0x36   : > { %v385_v37 = vld [vmem:[#allocation2 + $0xb0] sm:$0xff]  ;;  %538 = vst.msk [vmem:[#allocation3 + $0x1c] sm:$0xf] %vm530_vm3, %v4752_v22  ;;  %541 = vst.msk [vmem:[#allocation3 + $0x28] sm:$0xf] %vm530_vm3, %v4754_v23  ;;  %v4777_v40 = vpack.c.bf16 %v383_v34, %v383_v34  ;;  %v4779_v41 = vpack.c.bf16 %v386_v36, %v386_v36  ;;  %v388_v43 = vld [vmem:[#allocation2 + $0xd8] sm:$0xff] }
  0x37   : > { %705 = vrot.lane.b32.xlu1 %v4140_v49, %s4532_s25  ;;  %540 = vst.msk [vmem:[#allocation3 + $0x24] sm:$0xf] %vm530_vm3, %v4756_v24  ;;  %v4781_v42 = vpack.c.bf16 %v385_v37, %v385_v37  ;;  %v387_v44 = vld [vmem:[#allocation2 + $0xc8] sm:$0xff]  ;;  %v390_v45 = vld [vmem:[#allocation2 + $0xf0] sm:$0xff]  ;;  %543 = vst.msk [vmem:[#allocation3 + $0x30] sm:$0xf] %vm530_vm3, %v4762_v29  ;;  %v4789_v46 = vpack.c.bf16 %v388_v43, %v388_v43 }
  0x38   : > { %711 = vrot.lane.b32.xlu0 %v4143_v51, %s4532_s25  ;;  %542 = vst.msk [vmem:[#allocation3 + $0x2c] sm:$0xf] %vm530_vm3, %v4764_v32  ;;  %545 = vst.msk [vmem:[#allocation3 + $0x38] sm:$0xf] %vm530_vm3, %v4766_v33  ;;  %v4791_v47 = vpack.c.bf16 %v387_v44, %v387_v44  ;;  %v4793_v48 = vpack.c.bf16 %v390_v45, %v390_v45  ;;  %v389_v49 = vld [vmem:[#allocation2 + $0xe0] sm:$0xff]  ;;  %v392_v50 = vld [vmem:[#allocation2 + $0x108] sm:$0xff] }
  0x39   : > { %v391_v51 = vld [vmem:[#allocation2 + $0xf8] sm:$0xff]  ;;  %544 = vst.msk [vmem:[#allocation3 + $0x34] sm:$0xf] %vm530_vm3, %v4777_v40  ;;  %547 = vst.msk [vmem:[#allocation3 + $0x40] sm:$0xf] %vm530_vm3, %v4779_v41  ;;  %v4806_v54 = vpack.c.bf16 %v392_v50, %v392_v50  ;;  %v394_v56 = vld [vmem:[#allocation2 + $0x120] sm:$0xff] }
  0x3a   : > { %546 = vst.msk [vmem:[#allocation3 + $0x3c] sm:$0xf] %vm530_vm3, %v4781_v42  ;;  %v582_v58 = vld [vmem:[#allocation2 + $0xe1] sm:$0xff]  ;;  %549 = vst.msk [vmem:[#allocation3 + $0x48] sm:$0xf] %vm530_vm3, %v4789_v46  ;;  %v585_v62 = vld [vmem:[#allocation2 + $0x109] sm:$0xff] }
  0x3b   : > { %709 = vrot.lane.b32.xlu1 %v4142_v53, %s4532_s25  ;;  %v4804_v53 = vpack.c.bf16 %v389_v49, %v389_v49  ;;  %548 = vst.msk [vmem:[#allocation3 + $0x44] sm:$0xf] %vm530_vm3, %v4791_v47  ;;  %551 = vst.msk [vmem:[#allocation3 + $0x50] sm:$0xf] %vm530_vm3, %v4793_v48  ;;  %v395_v63 = vld [vmem:[#allocation2 + $0x128] sm:$0xff]  ;;  %v4152_v0 = vpack.c.bf16 %v582_v58, %v582_v58  ;;  %v584_v4 = vld [vmem:[#allocation2 + $0xf9] sm:$0xff]  ;;  %v4155_v6 = vpack.c.bf16 %v585_v62, %v585_v62 }
  0x3c   : > { %715 = vrot.lane.b32.xlu0 %v4145_v55, %s4532_s25  ;;  %v4808_v55 = vpack.c.bf16 %v391_v51, %v391_v51  ;;  %553 = vst.msk [vmem:[#allocation3 + $0x58] sm:$0xf] %vm530_vm3, %v4806_v54  ;;  %v4126_v2 = vpack.c.bf16 %v395_v63, %v395_v63  ;;  %v587_v9 = vld [vmem:[#allocation2 + $0x121] sm:$0xff]  ;;  %v4154_v11 = vpack.c.bf16 %v584_v4, %v584_v4  ;;  %v398_v13 = vld [vmem:[#allocation2 + $0x150] sm:$0xff]  ;;  %v589_v20 = vld [vmem:[#allocation2 + $0x139] sm:$0xff] }
  0x3d   : > { %550 = vst.msk [vmem:[#allocation3 + $0x4c] sm:$0xf] %vm530_vm3, %v4804_v53  ;;  %v586_v15 = vld [vmem:[#allocation2 + $0x111] sm:$0xff]  ;;  %v4129_v18 = vpack.c.bf16 %v398_v13, %v398_v13  ;;  %v4157_v19 = vpack.c.bf16 %v587_v9, %v587_v9  ;;  %v400_v26 = vld [vmem:[#allocation2 + $0x168] sm:$0xff]  ;;  %v4159_v36 = vpack.c.bf16 %v589_v20, %v589_v20  ;;  %v822_v63 = vld [vmem:[#allocation2 + $0x1a] sm:$0xff] }
  0x3e   : > { %552 = vst.msk [vmem:[#allocation3 + $0x54] sm:$0xf] %vm530_vm3, %v4808_v55  ;;  %556 = vst.msk [vmem:[#allocation3 + $0x64] sm:$0xf] %vm530_vm3, %v4126_v2  ;;  %v4156_v25 = vpack.c.bf16 %v586_v15, %v586_v15  ;;  %v588_v28 = vld [vmem:[#allocation2 + $0x129] sm:$0xff]  ;;  %v4131_v34 = vpack.c.bf16 %v400_v26, %v400_v26  ;;  %v591_v37 = vld [vmem:[#allocation2 + $0x151] sm:$0xff]  ;;  %v4852_v2 = vpack.c.bf16 %v822_v63, %v822_v63 }
  0x3f   : > { %713 = vrot.lane.b32.xlu1 %v4144_v57, %s4532_s25  ;;  %v393_v57 = vld [vmem:[#allocation2 + $0x110] sm:$0xff]  ;;  %559 = vst.msk [vmem:[#allocation3 + $0x70] sm:$0xf] %vm530_vm3, %v4129_v18  ;;  %v4158_v43 = vpack.c.bf16 %v588_v28, %v588_v28  ;;  %v590_v45 = vld [vmem:[#allocation2 + $0x141] sm:$0xff]  ;;  %v4161_v49 = vpack.c.bf16 %v591_v37, %v591_v37 }
  0x40   : > { %719 = vrot.lane.b32.xlu0 %v4147_v59, %s4532_s25  ;;  %v4816_v59 = vpack.c.bf16 %v394_v56, %v394_v56  ;;  %v4818_v60 = vpack.c.bf16 %v393_v57, %v393_v57  ;;  %561 = vst.msk [vmem:[#allocation3 + $0x78] sm:$0xf] %vm530_vm3, %v4131_v34  ;;  %v593_v50 = vld [vmem:[#allocation2 + $0x169] sm:$0xff]  ;;  %v4160_v51 = vpack.c.bf16 %v590_v45, %v590_v45  ;;  %v824_v4 = vld [vmem:[#allocation2 + $0x32] sm:$0xff]  ;;  %v825_v13 = vld [vmem:[#allocation2 + $0x3a] sm:$0xff] }
  0x41   : > { %v4163_v56 = vpack.c.bf16 %v593_v50, %v593_v50  ;;  %v820_v57 = vld [vmem:[#allocation2 + $0x2] sm:$0xff]  ;;  %v4857_v9 = vpack.c.bf16 %v824_v4, %v824_v4  ;;  %v4868_v18 = vpack.c.bf16 %v825_v13, %v825_v13  ;;  %v829_v26 = vld [vmem:[#allocation2 + $0x6a] sm:$0xff]  ;;  %v832_v28 = vld [vmem:[#allocation2 + $0x92] sm:$0xff] }
  0x42   : > { %555 = vst.msk [vmem:[#allocation3 + $0x60] sm:$0xf] %vm530_vm3, %v4816_v59  ;;  %554 = vst.msk [vmem:[#allocation3 + $0x5c] sm:$0xf] %vm530_vm3, %v4818_v60  ;;  %v4165_v62 = vpack.c.bf16 %v820_v57, %v820_v57  ;;  %v828_v15 = vld [vmem:[#allocation2 + $0x62] sm:$0xff]  ;;  %v4884_v34 = vpack.c.bf16 %v829_v26, %v829_v26  ;;  %v4177_v37 = vpack.c.bf16 %v832_v28, %v832_v28  ;;  %v842_v4 = vld [vmem:[#allocation2 + $0x10a] sm:$0xff] }
  0x43   : > { %717 = vrot.lane.b32.xlu1 %v4146_v1, %s4532_s25  ;;  %v396_v1 = vld [vmem:[#allocation2 + $0x138] sm:$0xff]  ;;  %v4872_v20 = vpack.c.bf16 %v828_v15, %v828_v15  ;;  %v844_v13 = vld [vmem:[#allocation2 + $0x122] sm:$0xff] }
  0x44   : > { %723 = vrot.lane.b32.xlu0 %v4149_v10, %s4532_s25  ;;  %v4127_v5 = vpack.c.bf16 %v396_v1, %v396_v1  ;;  %v397_v10 = vld [vmem:[#allocation2 + $0x140] sm:$0xff]  ;;  %v821_v1 = vld [vmem:[#allocation2 + $0xa] sm:$0xff] }
  0x45   : > { %v4128_v14 = vpack.c.bf16 %v397_v10, %v397_v10  ;;  %v826_v10 = vld [vmem:[#allocation2 + $0x4a] sm:$0xff]  ;;  %v846_v26 = vld [vmem:[#allocation2 + $0x13a] sm:$0xff] }
  0x46   : > { %557 = vst.msk [vmem:[#allocation3 + $0x68] sm:$0xf] %vm530_vm3, %v4127_v5  ;;  %v4166_v5 = vpack.c.bf16 %v821_v1, %v821_v1 }
  0x47   : > { %721 = vrot.lane.b32.xlu1 %v4148_v21, %s4532_s25  ;;  %558 = vst.msk [vmem:[#allocation3 + $0x6c] sm:$0xf] %vm530_vm3, %v4128_v14  ;;  %v399_v21 = vld [vmem:[#allocation2 + $0x158] sm:$0xff]  ;;  %v4864_v14 = vpack.c.bf16 %v826_v10, %v826_v10  ;;  %v4187_v10 = vpack.c.bf16 %v842_v4, %v842_v4 }
  0x48   : > { %727 = vrot.lane.b32.xlu0 %v4151_v38, %s4532_s25  ;;  %v4130_v27 = vpack.c.bf16 %v399_v21, %v399_v21  ;;  %v401_v38 = vld [vmem:[#allocation2 + $0x170] sm:$0xff]  ;;  %v830_v21 = vld [vmem:[#allocation2 + $0x7a] sm:$0xff] }
  0x49   : > { %v4132_v44 = vpack.c.bf16 %v401_v38, %v401_v38  ;;  %v834_v38 = vld [vmem:[#allocation2 + $0xaa] sm:$0xff] }
  0x4a   : > { %560 = vst.msk [vmem:[#allocation3 + $0x74] sm:$0xf] %vm530_vm3, %v4130_v27  ;;  %v4880_v27 = vpack.c.bf16 %v830_v21, %v830_v21  ;;  %v4179_v45 = vpack.c.bf16 %v834_v38, %v834_v38  ;;  %v4189_v21 = vpack.c.bf16 %v844_v13, %v844_v13  ;;  %v848_v38 = vld [vmem:[#allocation2 + $0x152] sm:$0xff] }
  0x4b   : > { %725 = vrot.lane.b32.xlu1 %v4150_v52, %s4532_s25  ;;  %562 = vst.msk [vmem:[#allocation3 + $0x7c] sm:$0xf] %vm530_vm3, %v4132_v44  ;;  %v592_v52 = vld [vmem:[#allocation2 + $0x159] sm:$0xff] }
  0x4c   : > { %731 = vrot.lane.b32.xlu0 %v4153_v61, %s4532_s25  ;;  %v4162_v58 = vpack.c.bf16 %v592_v52, %v592_v52  ;;  %v594_v61 = vld [vmem:[#allocation2 + $0x171] sm:$0xff]  ;;  %v833_v44 = vld [vmem:[#allocation2 + $0x9a] sm:$0xff] }
  0x4d   : > { %v4178_v50 = vpack.c.bf16 %v833_v44, %v833_v44 }
  0x4f   : > { %729 = vrot.lane.b32.xlu1 %v4152_v0, %s4532_s25  ;;  %v4164_v0 = vpack.c.bf16 %v594_v61, %v594_v61 }
  0x50   : > { %735 = vrot.lane.b32.xlu0 %v4155_v6, %s4532_s25  ;;  %v823_v6 = vld [vmem:[#allocation2 + $0x22] sm:$0xff] }
  0x53   : > { %733 = vrot.lane.b32.xlu1 %v4154_v11, %s4532_s25  ;;  %v4860_v11 = vpack.c.bf16 %v823_v6, %v823_v6  ;;  %v841_v6 = vld [vmem:[#allocation2 + $0xfa] sm:$0xff] }
  0x54   : > { %739 = vrot.lane.b32.xlu0 %v4157_v19, %s4532_s25  ;;  %v827_v19 = vld [vmem:[#allocation2 + $0x52] sm:$0xff]  ;;  %v4186_v15 = vpack.c.bf16 %v841_v6, %v841_v6 }
  0x57   : > { %737 = vrot.lane.b32.xlu1 %v4156_v25, %s4532_s25  ;;  %v4876_v25 = vpack.c.bf16 %v827_v19, %v827_v19  ;;  %v843_v19 = vld [vmem:[#allocation2 + $0x112] sm:$0xff] }
  0x58   : > { %743 = vrot.lane.b32.xlu0 %v4159_v36, %s4532_s25  ;;  %v831_v36 = vld [vmem:[#allocation2 + $0x82] sm:$0xff]  ;;  %v4188_v28 = vpack.c.bf16 %v843_v19, %v843_v19 }
  0x5b   : > { %741 = vrot.lane.b32.xlu1 %v4158_v43, %s4532_s25  ;;  %v4890_v43 = vpack.c.bf16 %v831_v36, %v831_v36  ;;  %v845_v36 = vld [vmem:[#allocation2 + $0x12a] sm:$0xff] }
  0x5c   : > { %747 = vrot.lane.b32.xlu0 %v4161_v49, %s4532_s25  ;;  %v836_v49 = vld [vmem:[#allocation2 + $0xc2] sm:$0xff] }
  0x5d   : > { %v4181_v52 = vpack.c.bf16 %v836_v49, %v836_v49  ;;  %v847_v49 = vld [vmem:[#allocation2 + $0x142] sm:$0xff] }
  0x5f   : > { %745 = vrot.lane.b32.xlu1 %v4160_v51, %s4532_s25  ;;  %v835_v51 = vld [vmem:[#allocation2 + $0xb2] sm:$0xff] }
  0x60   : > { %751 = vrot.lane.b32.xlu0 %v4163_v56, %s4532_s25  ;;  %v838_v56 = vld [vmem:[#allocation2 + $0xda] sm:$0xff]  ;;  %v4180_v57 = vpack.c.bf16 %v835_v51, %v835_v51  ;;  %v850_v51 = vld [vmem:[#allocation2 + $0x16a] sm:$0xff] }
  0x61   : > { %v4183_v61 = vpack.c.bf16 %v838_v56, %v838_v56  ;;  %v4192_v56 = vpack.c.bf16 %v847_v49, %v847_v49 }
  0x63   : > { %749 = vrot.lane.b32.xlu1 %v4162_v58, %s4532_s25  ;;  %v837_v58 = vld [vmem:[#allocation2 + $0xca] sm:$0xff] }
  0x64   : > { %948 = vrot.lane.b32.xlu0 %v4165_v62, %s4533_s26  ;;  %v840_v62 = vld [vmem:[#allocation2 + $0xf2] sm:$0xff]  ;;  %v4182_v63 = vpack.c.bf16 %v837_v58, %v837_v58 }
  0x65   : > { %v4185_v1 = vpack.c.bf16 %v840_v62, %v840_v62 }
  0x67   : > { %753 = vrot.lane.b32.xlu1 %v4164_v0, %s4532_s25  ;;  %v839_v0 = vld [vmem:[#allocation2 + $0xe2] sm:$0xff] }
  0x68   : > { %952 = vrot.lane.b32.xlu0 %v4852_v2, %s4533_s26 }
  0x6b   : > { %950 = vrot.lane.b32.xlu1 %v4166_v5, %s4533_s26  ;;  %v4184_v5 = vpack.c.bf16 %v839_v0, %v839_v0  ;;  %v851_v0 = vld [vmem:[#allocation2 + $0x172] sm:$0xff] }
  0x6c   : > { %956 = vrot.lane.b32.xlu0 %v4857_v9, %s4533_s26 }
  0x6f   : > { %954 = vrot.lane.b32.xlu1 %v4860_v11, %s4533_s26 }
  0x70   : > { %960 = vrot.lane.b32.xlu0 %v4864_v14, %s4533_s26 }
  0x73   : > { %958 = vrot.lane.b32.xlu1 %v4868_v18, %s4533_s26 }
  0x74   : > { %964 = vrot.lane.b32.xlu0 %v4872_v20, %s4533_s26 }
  0x77   : > { %962 = vrot.lane.b32.xlu1 %v4876_v25, %s4533_s26 }
  0x78   : > { %968 = vrot.lane.b32.xlu0 %v4880_v27, %s4533_s26 }
  0x7b   : > { %966 = vrot.lane.b32.xlu1 %v4884_v34, %s4533_s26 }
  0x7c   : > { %972 = vrot.lane.b32.xlu0 %v4177_v37, %s4533_s26  ;;  %v4191_v37 = vpack.c.bf16 %v846_v26, %v846_v26 }
  0x7f   : > { %970 = vrot.lane.b32.xlu1 %v4890_v43, %s4533_s26 }
  0x80   : > { %976 = vrot.lane.b32.xlu0 %v4179_v45, %s4533_s26  ;;  %v4190_v45 = vpack.c.bf16 %v845_v36, %v845_v36 }
  0x83   : > { %974 = vrot.lane.b32.xlu1 %v4178_v50, %s4533_s26  ;;  %v4193_v50 = vpack.c.bf16 %v848_v38, %v848_v38 }
  0x84   : > { %980 = vrot.lane.b32.xlu0 %v4181_v52, %s4533_s26 }
  0x87   : > { %978 = vrot.lane.b32.xlu1 %v4180_v57, %s4533_s26  ;;  %v849_v57 = vld [vmem:[#allocation2 + $0x15a] sm:$0xff] }
  0x88   : > { %984 = vrot.lane.b32.xlu0 %v4183_v61, %s4533_s26  ;;  %v692_v44 = vpop.permute.xlu0 %691  ;;  %v4195_v61 = vpack.c.bf16 %v850_v51, %v850_v51 }
  0x89   : > { %788 = vst.msk [vmem:[#allocation3] sm:$0xf] %vm787_vm4, %v692_v44 }
  0x8b   : > { %982 = vrot.lane.b32.xlu1 %v4182_v63, %s4533_s26  ;;  %v4194_v63 = vpack.c.bf16 %v849_v57, %v849_v57 }
  0x8c   : > { %988 = vrot.lane.b32.xlu0 %v4185_v1, %s4533_s26 }
  0x8f   : > { %986 = vrot.lane.b32.xlu1 %v4184_v5, %s4533_s26  ;;  %v4196_v5 = vpack.c.bf16 %v851_v0, %v851_v0 }
  0x90   : > { %992 = vrot.lane.b32.xlu0 %v4187_v10, %s4533_s26 }
  0x93   : > { %990 = vrot.lane.b32.xlu1 %v4186_v15, %s4533_s26 }
  0x94   : > { %996 = vrot.lane.b32.xlu0 %v4189_v21, %s4533_s26 }
  0x97   : > { %994 = vrot.lane.b32.xlu1 %v4188_v28, %s4533_s26 }
  0x98   : > { %1000 = vrot.lane.b32.xlu0 %v4191_v37, %s4533_s26 }
  0x9a   : > { %v694_v52 = vpop.permute.xlu0 %693 }
  0x9b   : > { %998 = vrot.lane.b32.xlu1 %v4190_v45, %s4533_s26  ;;  %789 = vst.msk [vmem:[#allocation3 + $0x4] sm:$0xf] %vm787_vm4, %v694_v52 }
  0x9c   : > { %1004 = vrot.lane.b32.xlu0 %v4193_v50, %s4533_s26 }
  0x9d   : > { %v696_v58 = vpop.permute.xlu1 %695 }
  0x9e   : > { %790 = vst.msk [vmem:[#allocation3 + $0x8] sm:$0xf] %vm787_vm4, %v696_v58  ;;  %v700_v62 = vpop.permute.xlu0 %699 }
  0x9f   : > { %1002 = vrot.lane.b32.xlu1 %v4192_v56, %s4533_s26  ;;  %792 = vst.msk [vmem:[#allocation3 + $0x10] sm:$0xf] %vm787_vm4, %v700_v62 }
  0xa0   : > { %1008 = vrot.lane.b32.xlu0 %v4195_v61, %s4533_s26 }
  0xa1   : > { %v698_v1 = vpop.permute.xlu1 %697 }
  0xa2   : > { %791 = vst.msk [vmem:[#allocation3 + $0xc] sm:$0xf] %vm787_vm4, %v698_v1  ;;  %v704_v4 = vpop.permute.xlu0 %703 }
  0xa3   : > { %1006 = vrot.lane.b32.xlu1 %v4194_v63, %s4533_s26  ;;  %794 = vst.msk [vmem:[#allocation3 + $0x18] sm:$0xf] %vm787_vm4, %v704_v4  ;;  %v2106_v63 = vld [vmem:[#allocation2 + $0x31] sm:$0xff]  ;;  %v4504_v4 = vld [vmem:[%s5774_s1 + $0x10] ss:$0 sps:$4 sm:$0x33]  }
  0xa4   : > { %1205 = vrot.lane.b32.xlu0 %v4724_v3, %s4534_s27  ;;  %4484 = vmatprep.subr.msk.bf16.mxu0 %vm2801_vm6, %v4504_v4 }
  0xa5   : > { %v702_v6 = vpop.permute.xlu1 %701  ;;  %4485 = vmatprep.subr.msk.bf16.mxu1 %vm2801_vm6, %v4504_v4 }
  0xa6   : > { %793 = vst.msk [vmem:[#allocation3 + $0x14] sm:$0xf] %vm787_vm4, %v702_v6  ;;  %v708_v10 = vpop.permute.xlu0 %707  ;;  %v2803_v6 = vsel %vm2801_vm6, %v4504_v4, 0  ;;  %v1602_v4 = vld [vmem:[#allocation2 + $0x9a] sm:$0xff] }
  0xa7   : > { %1010 = vrot.lane.b32.xlu1 %v4196_v5, %s4533_s26  ;;  %796 = vst.msk [vmem:[#allocation3 + $0x20] sm:$0xf] %vm787_vm4, %v708_v10  ;;  %v4325_v5 = vpack.c.bf16 %v2106_v63, %v2106_v63  ;;  %v2108_v10 = vld [vmem:[#allocation2 + $0x49] sm:$0xff]  ;;  %4441 = vmatpush3.bf16.msra.mxu0 %v2803_v6 }
  0xa8   : > { %1209 = vrot.lane.b32.xlu0 %v4727_v7, %s4534_s27  ;;  %4481 = vmatpush3.bf16.msra.mxu1 %v2803_v6 }
  0xa9   : > { %v706_v13 = vpop.permute.xlu1 %705 }
  0xaa   : > { %795 = vst.msk [vmem:[#allocation3 + $0x1c] sm:$0xf] %vm787_vm4, %v706_v13  ;;  %v712_v15 = vpop.permute.xlu0 %711 }
  0xab   : > { %1207 = vrot.lane.b32.xlu1 %v4729_v8, %s4534_s27  ;;  %798 = vst.msk [vmem:[#allocation3 + $0x28] sm:$0xf] %vm787_vm4, %v712_v15  ;;  %v4505_v15 = vld [vmem:[%s5774_s1 + $0x8] sm:$0xff]  }
  0xac   : > { %1213 = vrot.lane.b32.xlu0 %v4737_v12, %s4534_s27  ;;  %4442 = vmatprep.subr.bf16.mxu0 %v4505_v15 }
  0xad   : > { %v710_v3 = vpop.permute.xlu1 %709  ;;  %4443 = vmatpush3.bf16.msra.mxu0 %v4505_v15  ;;  %4479 = vmatprep.subr.bf16.mxu1 %v4505_v15 }
  0xae   : > { %797 = vst.msk [vmem:[#allocation3 + $0x24] sm:$0xf] %vm787_vm4, %v710_v3  ;;  %v716_v19 = vpop.permute.xlu0 %715  ;;  %v4327_v3 = vpack.c.bf16 %v2108_v10, %v2108_v10  ;;  %4482 = vmatpush3.bf16.msra.mxu1 %v4505_v15  ;;  %v4272_v10 = vpack.c.bf16 %v1602_v4, %v1602_v4 }
  0xaf   : > { %1211 = vrot.lane.b32.xlu1 %v4745_v16, %s4534_s27  ;;  %800 = vst.msk [vmem:[#allocation3 + $0x30] sm:$0xf] %vm787_vm4, %v716_v19 }
  0xb0   : > { %1217 = vrot.lane.b32.xlu0 %v4747_v17, %s4534_s27 }
  0xb1   : > { %v714_v21 = vpop.permute.xlu1 %713 }
  0xb2   : > { %799 = vst.msk [vmem:[#allocation3 + $0x2c] sm:$0xf] %vm787_vm4, %v714_v21  ;;  %v720_v8 = vpop.permute.xlu0 %719  ;;  %v4506_v21 = vld [vmem:[%s5774_s1] sm:$0xff]  }
  0xb3   : > { %1215 = vrot.lane.b32.xlu1 %v4752_v22, %s4534_s27  ;;  %802 = vst.msk [vmem:[#allocation3 + $0x38] sm:$0xf] %vm787_vm4, %v720_v8  ;;  %4444 = vmatprep.subr.bf16.mxu0 %v4506_v21 }
  0xb4   : > { %1221 = vrot.lane.b32.xlu0 %v4754_v23, %s4534_s27  ;;  %4445 = vmatpush3.bf16.msra.mxu0 %v4506_v21 }
  0xb5   : > { %v718_v26 = vpop.permute.xlu1 %717  ;;  %4480 = vmatprep.subr.bf16.mxu1 %v4506_v21 }
  0xb6   : > { %801 = vst.msk [vmem:[#allocation3 + $0x34] sm:$0xf] %vm787_vm4, %v718_v26  ;;  %v724_v28 = vpop.permute.xlu0 %723  ;;  %4483 = vmatpush3.bf16.msra.mxu1 %v4506_v21 }
  0xb7   : > { %1219 = vrot.lane.b32.xlu1 %v4756_v24, %s4534_s27  ;;  %804 = vst.msk [vmem:[#allocation3 + $0x40] sm:$0xf] %vm787_vm4, %v724_v28 }
  0xb8   : > { %1225 = vrot.lane.b32.xlu0 %v4762_v29, %s4534_s27 }
  0xb9   : > { %v722_v36 = vpop.permute.xlu1 %721 }
  0xba   : > { %803 = vst.msk [vmem:[#allocation3 + $0x3c] sm:$0xf] %vm787_vm4, %v722_v36  ;;  %v728_v37 = vpop.permute.xlu0 %727 }
  0xbb   : > { %1223 = vrot.lane.b32.xlu1 %v4764_v32, %s4534_s27  ;;  %806 = vst.msk [vmem:[#allocation3 + $0x48] sm:$0xf] %vm787_vm4, %v728_v37  ;;  %v1341_v37 = vld [vmem:[#allocation2 + $0x69] sm:$0xff] }
  0xbc   : > { %1229 = vrot.lane.b32.xlu0 %v4766_v33, %s4534_s27 }
  0xbd   : > { %v726_v38 = vpop.permute.xlu1 %725 }
  0xbe   : > { %805 = vst.msk [vmem:[#allocation3 + $0x44] sm:$0xf] %vm787_vm4, %v726_v38  ;;  %v732_v44 = vpop.permute.xlu0 %731  ;;  %v1340_v38 = vld [vmem:[#allocation2 + $0x61] sm:$0xff] }
  0xbf   : > { %1227 = vrot.lane.b32.xlu1 %v4777_v40, %s4534_s27  ;;  %808 = vst.msk [vmem:[#allocation3 + $0x50] sm:$0xf] %vm787_vm4, %v732_v44 }
  0xc0   : > { %1233 = vrot.lane.b32.xlu0 %v4779_v41, %s4534_s27 }
  0xc1   : > { %v730_v45 = vpop.permute.xlu1 %729 }
  0xc2   : > { %807 = vst.msk [vmem:[#allocation3 + $0x4c] sm:$0xf] %vm787_vm4, %v730_v45  ;;  %v736_v49 = vpop.permute.xlu0 %735 }
  0xc3   : > { %1231 = vrot.lane.b32.xlu1 %v4781_v42, %s4534_s27  ;;  %810 = vst.msk [vmem:[#allocation3 + $0x58] sm:$0xf] %vm787_vm4, %v736_v49  ;;  %v4235_v49 = vpack.c.bf16 %v1340_v38, %v1340_v38  ;;  %v2373_v38 = vld [vmem:[#allocation2 + $0xaa] sm:$0xff] }
  0xc4   : > { %1237 = vrot.lane.b32.xlu0 %v4789_v46, %s4534_s27 }
  0xc5   : > { %v734_v50 = vpop.permute.xlu1 %733 }
  0xc6   : > { %809 = vst.msk [vmem:[#allocation3 + $0x54] sm:$0xf] %vm787_vm4, %v734_v50  ;;  %v740_v51 = vpop.permute.xlu0 %739 }
  0xc7   : > { %1235 = vrot.lane.b32.xlu1 %v4791_v47, %s4534_s27  ;;  %812 = vst.msk [vmem:[#allocation3 + $0x60] sm:$0xf] %vm787_vm4, %v740_v51 }
  0xc8   : > { %1241 = vrot.lane.b32.xlu0 %v4793_v48, %s4534_s27 }
  0xc9   : > { %v738_v52 = vpop.permute.xlu1 %737 }
  0xca   : > { %811 = vst.msk [vmem:[#allocation3 + $0x5c] sm:$0xf] %vm787_vm4, %v738_v52  ;;  %v744_v56 = vpop.permute.xlu0 %743 }
  0xcb   : > { %1239 = vrot.lane.b32.xlu1 %v4804_v53, %s4534_s27  ;;  %814 = vst.msk [vmem:[#allocation3 + $0x68] sm:$0xf] %vm787_vm4, %v744_v56 }
  0xcc   : > { %1245 = vrot.lane.b32.xlu0 %v4806_v54, %s4534_s27 }
  0xcd   : > { %v742_v57 = vpop.permute.xlu1 %741 }
  0xce   : > { %813 = vst.msk [vmem:[#allocation3 + $0x64] sm:$0xf] %vm787_vm4, %v742_v57  ;;  %v748_v58 = vpop.permute.xlu0 %747 }
  0xcf   : > { %1243 = vrot.lane.b32.xlu1 %v4808_v55, %s4534_s27  ;;  %816 = vst.msk [vmem:[#allocation3 + $0x70] sm:$0xf] %vm787_vm4, %v748_v58 }
  0xd0   : > { %1249 = vrot.lane.b32.xlu0 %v4816_v59, %s4534_s27 }
  0xd1   : > { %v746_v48 = vpop.permute.xlu1 %745 }
  0xd2   : > { %815 = vst.msk [vmem:[#allocation3 + $0x6c] sm:$0xf] %vm787_vm4, %v746_v48  ;;  %v752_v61 = vpop.permute.xlu0 %751 }
  0xd3   : > { %1247 = vrot.lane.b32.xlu1 %v4818_v60, %s4534_s27  ;;  %818 = vst.msk [vmem:[#allocation3 + $0x78] sm:$0xf] %vm787_vm4, %v752_v61  ;;  %v2113_v61 = vld [vmem:[#allocation2 + $0x81] sm:$0xff] }
  0xd4   : > { %1464 = vrot.lane.b32.xlu0 %v4693_v35, %s4535_s28 }
  0xd5   : > { %v750_v54 = vpop.permute.xlu1 %749 }
  0xd6   : > { %817 = vst.msk [vmem:[#allocation3 + $0x74] sm:$0xf] %vm787_vm4, %v750_v54  ;;  %v949_v55 = vpop.permute.xlu0 %948 }
  0xd7   : > { %1462 = vrot.lane.b32.xlu1 %v4685_v30, %s4535_s28  ;;  %1045 = vst.msk [vmem:[#allocation3] sm:$0xf] %vm1044_vm5, %v949_v55 }
  0xd8   : > { %1468 = vrot.lane.b32.xlu0 %v4701_v39, %s4535_s28 }
  0xd9   : > { %v754_v59 = vpop.permute.xlu1 %753 }
  0xda   : > { %819 = vst.msk [vmem:[#allocation3 + $0x7c] sm:$0xf] %vm787_vm4, %v754_v59  ;;  %v953_v60 = vpop.permute.xlu0 %952 }
  0xdb   : > { %1466 = vrot.lane.b32.xlu1 %v4687_v31, %s4535_s28  ;;  %1047 = vst.msk [vmem:[#allocation3 + $0x8] sm:$0xf] %vm1044_vm5, %v953_v60 }
  0xdc   : > { %1721 = vrot.lane.b32.xlu0 %v4860_v11, %s4536_s29 }
  0xdd   : > { %v951_v35 = vpop.permute.xlu1 %950 }
  0xde   : > { %1046 = vst.msk [vmem:[#allocation3 + $0x4] sm:$0xf] %vm1044_vm5, %v951_v35  ;;  %v957_v30 = vpop.permute.xlu0 %956 }
  0xdf   : > { %1719 = vrot.lane.b32.xlu1 %v4852_v2, %s4536_s29  ;;  %1049 = vst.msk [vmem:[#allocation3 + $0x10] sm:$0xf] %vm1044_vm5, %v957_v30  ;;  %v2107_v2 = vld [vmem:[#allocation2 + $0x39] sm:$0xff] }
  0xe0   : > { %1725 = vrot.lane.b32.xlu0 %v4868_v18, %s4536_s29  ;;  %v4326_v1 = vpack.c.bf16 %v2107_v2, %v2107_v2 }
  0xe1   : > { %v955_v39 = vpop.permute.xlu1 %954 }
  0xe2   : > { %1048 = vst.msk [vmem:[#allocation3 + $0xc] sm:$0xf] %vm1044_vm5, %v955_v39  ;;  %v961_v31 = vpop.permute.xlu0 %960 }
  0xe3   : > { %1723 = vrot.lane.b32.xlu1 %v4857_v9, %s4536_s29  ;;  %1051 = vst.msk [vmem:[#allocation3 + $0x18] sm:$0xf] %vm1044_vm5, %v961_v31  ;;  %v1345_v31 = vld [vmem:[#allocation2 + $0x99] sm:$0xff] }
  0xe4   : > { %1979 = vrot.lane.b32.xlu0 %v4745_v16, %s4537_s30  ;;  %v2109_v16 = vld [vmem:[#allocation2 + $0x51] sm:$0xff] }
  0xe5   : > { %v959_v11 = vpop.permute.xlu1 %958  ;;  %v4328_v13 = vpack.c.bf16 %v2109_v16, %v2109_v16 }
  0xe6   : > { %1050 = vst.msk [vmem:[#allocation3 + $0x14] sm:$0xf] %vm1044_vm5, %v959_v11  ;;  %v965_v62 = vpop.permute.xlu0 %964 }
  0xe7   : > { %1977 = vrot.lane.b32.xlu1 %v4727_v7, %s4537_s30  ;;  %1053 = vst.msk [vmem:[#allocation3 + $0x20] sm:$0xf] %vm1044_vm5, %v965_v62  ;;  %v1600_v62 = vld [vmem:[#allocation2 + $0x82] sm:$0xff] }
  0xe8   : > { %1983 = vrot.lane.b32.xlu0 %v4752_v22, %s4537_s30 }
  0xe9   : > { %v963_v0 = vpop.permute.xlu1 %962 }
  0xea   : > { %1052 = vst.msk [vmem:[#allocation3 + $0x1c] sm:$0xf] %vm1044_vm5, %v963_v0  ;;  %v969_v7 = vpop.permute.xlu0 %968  ;;  %v1599_v0 = vld [vmem:[#allocation2 + $0x7a] sm:$0xff] }
  0xeb   : > { %1981 = vrot.lane.b32.xlu1 %v4737_v12, %s4537_s30  ;;  %1055 = vst.msk [vmem:[#allocation3 + $0x28] sm:$0xf] %vm1044_vm5, %v969_v7  ;;  %v4269_v7 = vpack.c.bf16 %v1599_v0, %v1599_v0 }
  0xec   : > { %2236 = vrot.lane.b32.xlu0 %v4326_v1, %s4538_s8 }
  0xed   : > { %v967_v22 = vpop.permute.xlu1 %966 }
  0xee   : > { %1054 = vst.msk [vmem:[#allocation3 + $0x24] sm:$0xf] %vm1044_vm5, %v967_v22  ;;  %v973_v12 = vpop.permute.xlu0 %972 }
  0xef   : > { %2234 = vrot.lane.b32.xlu1 %v4325_v5, %s4538_s8  ;;  %1057 = vst.msk [vmem:[#allocation3 + $0x30] sm:$0xf] %vm1044_vm5, %v973_v12  ;;  %v1601_v5 = vld [vmem:[#allocation2 + $0x92] sm:$0xff] }
  0xf0   : > { %2240 = vrot.lane.b32.xlu0 %v4328_v13, %s4538_s8 }
  0xf1   : > { %v971_v19 = vpop.permute.xlu1 %970 }
  0xf2   : > { %1056 = vst.msk [vmem:[#allocation3 + $0x2c] sm:$0xf] %vm1044_vm5, %v971_v19  ;;  %v977_v8 = vpop.permute.xlu0 %976 }
  0xf3   : > { %2238 = vrot.lane.b32.xlu1 %v4327_v3, %s4538_s8  ;;  %1059 = vst.msk [vmem:[#allocation3 + $0x38] sm:$0xf] %vm1044_vm5, %v977_v8  ;;  %v2117_v8 = vld [vmem:[#allocation2 + $0xb1] sm:$0xff] }
  0xf4   : > { %2493 = vrot.lane.b32.xlu0 %v4868_v18, %s4539_s13 }
  0xf5   : > { %v975_v26 = vpop.permute.xlu1 %974 }
  0xf6   : > { %1058 = vst.msk [vmem:[#allocation3 + $0x34] sm:$0xf] %vm1044_vm5, %v975_v26  ;;  %v981_v28 = vpop.permute.xlu0 %980 }
  0xf7   : > { %2491 = vrot.lane.b32.xlu1 %v4857_v9, %s4539_s13  ;;  %1061 = vst.msk [vmem:[#allocation3 + $0x40] sm:$0xf] %vm1044_vm5, %v981_v28  ;;  %v4236_v9 = vpack.c.bf16 %v1341_v37, %v1341_v37 }
  0xf8   : > { %2497 = vrot.lane.b32.xlu0 %v4876_v25, %s4539_s13 }
  0xf9   : > { %v979_v36 = vpop.permute.xlu1 %978 }
  0xfa   : > { %1060 = vst.msk [vmem:[#allocation3 + $0x3c] sm:$0xf] %vm1044_vm5, %v979_v36  ;;  %v985_v18 = vpop.permute.xlu0 %984 }
  0xfb   : > { %2495 = vrot.lane.b32.xlu1 %v4864_v14, %s4539_s13  ;;  %1063 = vst.msk [vmem:[#allocation3 + $0x48] sm:$0xf] %vm1044_vm5, %v985_v18 }
  0xfc   : > { %1472 = vrot.lane.b32.xlu0 %v4328_v13, %s4535_s28  ;;  %v4271_v13 = vpack.c.bf16 %v1601_v5, %v1601_v5 }
  0xfd   : > { %v983_v44 = vpop.permute.xlu1 %982 }
  0xfe   : > { %1062 = vst.msk [vmem:[#allocation3 + $0x44] sm:$0xf] %vm1044_vm5, %v983_v44  ;;  %v989_v45 = vpop.permute.xlu0 %988 }
  0xff   : > { %1470 = vrot.lane.b32.xlu1 %v4327_v3, %s4535_s28  ;;  %1065 = vst.msk [vmem:[#allocation3 + $0x50] sm:$0xf] %vm1044_vm5, %v989_v45 }
 0x100   : > { %1476 = vrot.lane.b32.xlu0 %v4236_v9, %s4535_s28 }
 0x101   : > { %v987_v50 = vpop.permute.xlu1 %986 }
 0x102   : > { %1064 = vst.msk [vmem:[#allocation3 + $0x4c] sm:$0xf] %vm1044_vm5, %v987_v50  ;;  %v993_v51 = vpop.permute.xlu0 %992 }
 0x103   : > { %1474 = vrot.lane.b32.xlu1 %v4235_v49, %s4535_s28  ;;  %1067 = vst.msk [vmem:[#allocation3 + $0x58] sm:$0xf] %vm1044_vm5, %v993_v51  ;;  %v1349_v51 = vld [vmem:[#allocation2 + $0xc9] sm:$0xff] }
 0x104   : > { %1729 = vrot.lane.b32.xlu0 %v4876_v25, %s4536_s29 }
 0x105   : > { %v991_v52 = vpop.permute.xlu1 %990 }
 0x106   : > { %1066 = vst.msk [vmem:[#allocation3 + $0x54] sm:$0xf] %vm1044_vm5, %v991_v52  ;;  %v997_v56 = vpop.permute.xlu0 %996 }
 0x107   : > { %1727 = vrot.lane.b32.xlu1 %v4864_v14, %s4536_s29  ;;  %1069 = vst.msk [vmem:[#allocation3 + $0x60] sm:$0xf] %vm1044_vm5, %v997_v56  ;;  %v1348_v56 = vld [vmem:[#allocation2 + $0xc1] sm:$0xff] }
 0x108   : > { %1733 = vrot.lane.b32.xlu0 %v4884_v34, %s4536_s29 }
 0x109   : > { %v995_v57 = vpop.permute.xlu1 %994 }
 0x10a   : > { %1068 = vst.msk [vmem:[#allocation3 + $0x5c] sm:$0xf] %vm1044_vm5, %v995_v57  ;;  %v1001_v58 = vpop.permute.xlu0 %1000 }
 0x10b   : > { %1731 = vrot.lane.b32.xlu1 %v4872_v20, %s4536_s29  ;;  %1071 = vst.msk [vmem:[#allocation3 + $0x68] sm:$0xf] %vm1044_vm5, %v1001_v58  ;;  %v4244_v58 = vpack.c.bf16 %v1349_v51, %v1349_v51 }
 0x10c   : > { %1987 = vrot.lane.b32.xlu0 %v4756_v24, %s4537_s30  ;;  %v2112_v24 = vld [vmem:[#allocation2 + $0x79] sm:$0xff] }
 0x10d   : > { %v999_v25 = vpop.permute.xlu1 %998  ;;  %v4331_v59 = vpack.c.bf16 %v2112_v24, %v2112_v24  ;;  %v1605_v24 = vld [vmem:[#allocation2 + $0xc2] sm:$0xff] }
 0x10e   : > { %1070 = vst.msk [vmem:[#allocation3 + $0x64] sm:$0xf] %vm1044_vm5, %v999_v25  ;;  %v1005_v14 = vpop.permute.xlu0 %1004 }
 0x10f   : > { %1985 = vrot.lane.b32.xlu1 %v4747_v17, %s4537_s30  ;;  %1073 = vst.msk [vmem:[#allocation3 + $0x70] sm:$0xf] %vm1044_vm5, %v1005_v14  ;;  %v4332_v17 = vpack.c.bf16 %v2113_v61, %v2113_v61  ;;  %v4243_v14 = vpack.c.bf16 %v1348_v56, %v1348_v56  ;;  %v1606_v61 = vld [vmem:[#allocation2 + $0xca] sm:$0xff] }
 0x110   : > { %1991 = vrot.lane.b32.xlu0 %v4764_v32, %s4537_s30 }
 0x111   : > { %v1003_v48 = vpop.permute.xlu1 %1002 }
 0x112   : > { %1072 = vst.msk [vmem:[#allocation3 + $0x6c] sm:$0xf] %vm1044_vm5, %v1003_v48  ;;  %v1009_v54 = vpop.permute.xlu0 %1008 }
 0x113   : > { %1989 = vrot.lane.b32.xlu1 %v4754_v23, %s4537_s30  ;;  %1075 = vst.msk [vmem:[#allocation3 + $0x78] sm:$0xf] %vm1044_vm5, %v1009_v54 }
 0x114   : > { %2244 = vrot.lane.b32.xlu0 %v4236_v9, %s4538_s8 }
 0x115   : > { %v1007_v55 = vpop.permute.xlu1 %1006 }
 0x116   : > { %1074 = vst.msk [vmem:[#allocation3 + $0x74] sm:$0xf] %vm1044_vm5, %v1007_v55  ;;  %v1206_v32 = vpop.permute.xlu0 %1205 }
 0x117   : > { %2242 = vrot.lane.b32.xlu1 %v4235_v49, %s4538_s8  ;;  %1302 = vst.msk [vmem:[#allocation3] sm:$0xf] %vm1301_vm7, %v1206_v32  ;;  %v4367_v49 = vpack.c.bf16 %v2373_v38, %v2373_v38 }
 0x118   : > { %2248 = vrot.lane.b32.xlu0 %v4332_v17, %s4538_s8 }
 0x119   : > { %v1011_v60 = vpop.permute.xlu1 %1010 }
 0x11a   : > { %1076 = vst.msk [vmem:[#allocation3 + $0x7c] sm:$0xf] %vm1044_vm5, %v1011_v60  ;;  %v1210_v23 = vpop.permute.xlu0 %1209 }
 0x11b   : > { %2246 = vrot.lane.b32.xlu1 %v4331_v59, %s4538_s8  ;;  %1304 = vst.msk [vmem:[#allocation3 + $0x8] sm:$0xf] %vm1301_vm7, %v1210_v23 }
 0x11c   : > { %2501 = vrot.lane.b32.xlu0 %v4884_v34, %s4539_s13  ;;  %v1344_v34 = vld [vmem:[#allocation2 + $0x91] sm:$0xff] }
 0x11d   : > { %v1208_v35 = vpop.permute.xlu1 %1207  ;;  %v4239_v63 = vpack.c.bf16 %v1344_v34, %v1344_v34 }
 0x11e   : > { %1303 = vst.msk [vmem:[#allocation3 + $0x4] sm:$0xf] %vm1301_vm7, %v1208_v35  ;;  %v1214_v30 = vpop.permute.xlu0 %1213 }
 0x11f   : > { %2499 = vrot.lane.b32.xlu1 %v4872_v20, %s4539_s13  ;;  %1306 = vst.msk [vmem:[#allocation3 + $0x10] sm:$0xf] %vm1301_vm7, %v1214_v30  ;;  %v4240_v20 = vpack.c.bf16 %v1345_v31, %v1345_v31  ;;  %v2121_v31 = vld [vmem:[#allocation2 + $0xe1] sm:$0xff] }
 0x120   : > { %2505 = vrot.lane.b32.xlu0 %v4890_v43, %s4539_s13 }
 0x121   : > { %v1212_v39 = vpop.permute.xlu1 %1211 }
 0x122   : > { %1305 = vst.msk [vmem:[#allocation3 + $0xc] sm:$0xf] %vm1301_vm7, %v1212_v39  ;;  %v1218_v11 = vpop.permute.xlu0 %1217 }
 0x123   : > { %2503 = vrot.lane.b32.xlu1 %v4880_v27, %s4539_s13  ;;  %1308 = vst.msk [vmem:[#allocation3 + $0x18] sm:$0xf] %vm1301_vm7, %v1218_v11  ;;  %v4270_v27 = vpack.c.bf16 %v1600_v62, %v1600_v62  ;;  %v2120_v11 = vld [vmem:[#allocation2 + $0xd9] sm:$0xff] }
 0x124   : > { %1480 = vrot.lane.b32.xlu0 %v4332_v17, %s4535_s28  ;;  %v4276_v17 = vpack.c.bf16 %v1606_v61, %v1606_v61 }
 0x125   : > { %v1216_v2 = vpop.permute.xlu1 %1215 }
 0x126   : > { %1307 = vst.msk [vmem:[#allocation3 + $0x14] sm:$0xf] %vm1301_vm7, %v1216_v2  ;;  %v1222_v43 = vpop.permute.xlu0 %1221  ;;  %v4339_v2 = vpack.c.bf16 %v2120_v11, %v2120_v11  ;;  %v1356_v11 = vld [vmem:[#allocation2 + $0x121] sm:$0xff] }
 0x127   : > { %1478 = vrot.lane.b32.xlu1 %v4331_v59, %s4535_s28  ;;  %1310 = vst.msk [vmem:[#allocation3 + $0x20] sm:$0xf] %vm1301_vm7, %v1222_v43  ;;  %v4275_v59 = vpack.c.bf16 %v1605_v24, %v1605_v24  ;;  %v2377_v43 = vld [vmem:[#allocation2 + $0xda] sm:$0xff] }
 0x128   : > { %1484 = vrot.lane.b32.xlu0 %v4240_v20, %s4535_s28 }
 0x129   : > { %v1220_v1 = vpop.permute.xlu1 %1219 }
 0x12a   : > { %1309 = vst.msk [vmem:[#allocation3 + $0x1c] sm:$0xf] %vm1301_vm7, %v1220_v1  ;;  %v1226_v16 = vpop.permute.xlu0 %1225 }
 0x12b   : > { %1482 = vrot.lane.b32.xlu1 %v4239_v63, %s4535_s28  ;;  %1312 = vst.msk [vmem:[#allocation3 + $0x28] sm:$0xf] %vm1301_vm7, %v1226_v16 }
 0x12c   : > { %1737 = vrot.lane.b32.xlu0 %v4270_v27, %s4536_s29  ;;  %v4371_v27 = vpack.c.bf16 %v2377_v43, %v2377_v43 }
 0x12d   : > { %v1224_v6 = vpop.permute.xlu1 %1223 }
 0x12e   : > { %1311 = vst.msk [vmem:[#allocation3 + $0x24] sm:$0xf] %vm1301_vm7, %v1224_v6  ;;  %v1230_v22 = vpop.permute.xlu0 %1229  ;;  %v1352_v6 = vld [vmem:[#allocation2 + $0xf1] sm:$0xff] }
 0x12f   : > { %1735 = vrot.lane.b32.xlu1 %v4269_v7, %s4536_s29  ;;  %1314 = vst.msk [vmem:[#allocation3 + $0x30] sm:$0xf] %vm1301_vm7, %v1230_v22  ;;  %v1353_v7 = vld [vmem:[#allocation2 + $0xf9] sm:$0xff] }
 0x130   : > { %1741 = vrot.lane.b32.xlu0 %v4272_v10, %s4536_s29 }
 0x131   : > { %v1228_v15 = vpop.permute.xlu1 %1227 }
 0x132   : > { %1313 = vst.msk [vmem:[#allocation3 + $0x2c] sm:$0xf] %vm1301_vm7, %v1228_v15  ;;  %v1234_v12 = vpop.permute.xlu0 %1233  ;;  %v4248_v15 = vpack.c.bf16 %v1353_v7, %v1353_v7 }
 0x133   : > { %1739 = vrot.lane.b32.xlu1 %v4271_v13, %s4536_s29  ;;  %1316 = vst.msk [vmem:[#allocation3 + $0x38] sm:$0xf] %vm1301_vm7, %v1234_v12  ;;  %v290_v12 = vld [vmem:[%s4637_s24 + $0xf8] sm:$0xff] }
 0x134   : > { %1995 = vrot.lane.b32.xlu0 %v4777_v40, %s4537_s30  ;;  %v2116_v40 = vld [vmem:[#allocation2 + $0xa9] sm:$0xff]  ;;  %324 = vst.msk [vmem:[#allocation2 + $0x189] sm:$0xff] %vm292_vm0, %v290_v12 }
 0x135   : > { %v1232_v3 = vpop.permute.xlu1 %1231 }
 0x136   : > { %1315 = vst.msk [vmem:[#allocation3 + $0x34] sm:$0xf] %vm1301_vm7, %v1232_v3  ;;  %v1238_v19 = vpop.permute.xlu0 %1237 }
 0x137   : > { %1993 = vrot.lane.b32.xlu1 %v4762_v29, %s4537_s30  ;;  %1318 = vst.msk [vmem:[#allocation3 + $0x40] sm:$0xf] %vm1301_vm7, %v1238_v19  ;;  %v4336_v29 = vpack.c.bf16 %v2117_v8, %v2117_v8  ;;  %v4247_v19 = vpack.c.bf16 %v1352_v6, %v1352_v6  ;;  %v1610_v8 = vld [vmem:[#allocation2 + $0xfa] sm:$0xff] }
 0x138   : > { %1999 = vrot.lane.b32.xlu0 %v4781_v42, %s4537_s30  ;;  %v4335_v42 = vpack.c.bf16 %v2116_v40, %v2116_v40  ;;  %v1609_v40 = vld [vmem:[#allocation2 + $0xf2] sm:$0xff] }
 0x139   : > { %v1236_v21 = vpop.permute.xlu1 %1235 }
 0x13a   : > { %1317 = vst.msk [vmem:[#allocation3 + $0x3c] sm:$0xf] %vm1301_vm7, %v1236_v21  ;;  %v1242_v26 = vpop.permute.xlu0 %1241 }
 0x13b   : > { %1997 = vrot.lane.b32.xlu1 %v4766_v33, %s4537_s30  ;;  %1320 = vst.msk [vmem:[#allocation3 + $0x48] sm:$0xf] %vm1301_vm7, %v1242_v26  ;;  %v2374_v33 = vld [vmem:[#allocation2 + $0xb2] sm:$0xff] }
 0x13c   : > { %2252 = vrot.lane.b32.xlu0 %v4240_v20, %s4538_s8  ;;  %v4368_v9 = vpack.c.bf16 %v2374_v33, %v2374_v33  ;;  %v1865_v33 = vld [vmem:[#allocation2 + $0xf0] sm:$0xff] }
 0x13d   : > { %v1240_v28 = vpop.permute.xlu1 %1239 }
 0x13e   : > { %1319 = vst.msk [vmem:[#allocation3 + $0x44] sm:$0xf] %vm1301_vm7, %v1240_v28  ;;  %v1246_v36 = vpop.permute.xlu0 %1245 }
 0x13f   : > { %2250 = vrot.lane.b32.xlu1 %v4239_v63, %s4538_s8  ;;  %1322 = vst.msk [vmem:[#allocation3 + $0x50] sm:$0xf] %vm1301_vm7, %v1246_v36  ;;  %v1866_v36 = vld [vmem:[#allocation2 + $0xf8] sm:$0xff] }
 0x140   : > { %2256 = vrot.lane.b32.xlu0 %v4336_v29, %s4538_s8  ;;  %v4310_v38 = vpack.c.bf16 %v1866_v36, %v1866_v36 }
 0x141   : > { %v1244_v37 = vpop.permute.xlu1 %1243 }
 0x142   : > { %1321 = vst.msk [vmem:[#allocation3 + $0x4c] sm:$0xf] %vm1301_vm7, %v1244_v37  ;;  %v1250_v18 = vpop.permute.xlu0 %1249  ;;  %v4279_v37 = vpack.c.bf16 %v1609_v40, %v1609_v40 }
 0x143   : > { %2254 = vrot.lane.b32.xlu1 %v4335_v42, %s4538_s8  ;;  %1324 = vst.msk [vmem:[#allocation3 + $0x58] sm:$0xf] %vm1301_vm7, %v1250_v18 }
 0x144   : > { %2509 = vrot.lane.b32.xlu0 %v4272_v10, %s4539_s13  ;;  %v289_v10 = vld [vmem:[%s4637_s24 + $0xf0] sm:$0xff]  ;;  %s3739_s24 = sshll.u32 %s5781_s19, 1 }
 0x145   : > { %v1248_v44 = vpop.permute.xlu1 %1247  ;;  %323 = vst.msk [vmem:[#allocation2 + $0x181] sm:$0xff] %vm292_vm0, %v289_v10  ;;  %vm3429_vm0 = vcmask 130112  }
 0x146   : > { %1323 = vst.msk [vmem:[#allocation3 + $0x54] sm:$0xf] %vm1301_vm7, %v1248_v44  ;;  %v1465_v45 = vpop.permute.xlu0 %1464  ;;  %v1868_v44 = vld [vmem:[#allocation2 + $0x110] sm:$0xff] }
 0x147   : > { %2507 = vrot.lane.b32.xlu1 %v4271_v13, %s4539_s13  ;;  %1560 = vst.msk [vmem:[#allocation3 + $0x4] sm:$0xf] %vm1558_vm8, %v1465_v45  ;;  %v4309_v45 = vpack.c.bf16 %v1865_v33, %v1865_v33  ;;  %v4312_v51 = vpack.c.bf16 %v1868_v44, %v1868_v44 }
 0x148   : > { %2513 = vrot.lane.b32.xlu0 %v4368_v9, %s4539_s13 }
 0x149   : > { %v1463_v50 = vpop.permute.xlu1 %1462 }
 0x14a   : > { %1559 = vst.msk [vmem:[#allocation3] sm:$0xf] %vm1558_vm8, %v1463_v50  ;;  %v1469_v52 = vpop.permute.xlu0 %1468 }
 0x14b   : > { %2511 = vrot.lane.b32.xlu1 %v4367_v49, %s4539_s13  ;;  %1562 = vst.msk [vmem:[#allocation3 + $0xc] sm:$0xf] %vm1558_vm8, %v1469_v52 }
 0x14c   : > { %1488 = vrot.lane.b32.xlu0 %v4336_v29, %s4535_s28  ;;  %v4280_v29 = vpack.c.bf16 %v1610_v8, %v1610_v8 }
 0x14d   : > { %v1467_v57 = vpop.permute.xlu1 %1466 }
 0x14e   : > { %1561 = vst.msk [vmem:[#allocation3 + $0x8] sm:$0xf] %vm1558_vm8, %v1467_v57  ;;  %v1722_v25 = vpop.permute.xlu0 %1721 }
 0x14f   : > { %1486 = vrot.lane.b32.xlu1 %v4335_v42, %s4535_s28  ;;  %1817 = vst.msk [vmem:[#allocation3 + $0x4] sm:$0xf] %vm1815_vm9, %v1722_v25 }
 0x150   : > { %1492 = vrot.lane.b32.xlu0 %v4244_v58, %s4535_s28 }
 0x151   : > { %v1720_v48 = vpop.permute.xlu1 %1719 }
 0x152   : > { %1816 = vst.msk [vmem:[#allocation3] sm:$0xf] %vm1815_vm9, %v1720_v48  ;;  %v1726_v54 = vpop.permute.xlu0 %1725 }
 0x153   : > { %1490 = vrot.lane.b32.xlu1 %v4243_v14, %s4535_s28  ;;  %1819 = vst.msk [vmem:[#allocation3 + $0xc] sm:$0xf] %vm1815_vm9, %v1726_v54 }
 0x154   : > { %1745 = vrot.lane.b32.xlu0 %v4368_v9, %s4536_s29 }
 0x155   : > { %v1724_v55 = vpop.permute.xlu1 %1723 }
 0x156   : > { %1818 = vst.msk [vmem:[#allocation3 + $0x8] sm:$0xf] %vm1815_vm9, %v1724_v55  ;;  %v1980_v32 = vpop.permute.xlu0 %1979 }
 0x157   : > { %1743 = vrot.lane.b32.xlu1 %v4367_v49, %s4536_s29  ;;  %2075 = vst.msk [vmem:[#allocation3 + $0x4] sm:$0xf] %vm2073_vm10, %v1980_v32  ;;  %v1867_v49 = vld [vmem:[#allocation2 + $0x108] sm:$0xff] }
 0x158   : > { %1749 = vrot.lane.b32.xlu0 %v4276_v17, %s4536_s29  ;;  %v4311_v56 = vpack.c.bf16 %v1867_v49, %v1867_v49 }
 0x159   : > { %v1978_v60 = vpop.permute.xlu1 %1977 }
 0x15a   : > { %2074 = vst.msk [vmem:[#allocation3] sm:$0xf] %vm2073_vm10, %v1978_v60  ;;  %v1984_v23 = vpop.permute.xlu0 %1983 }
 0x15b   : > { %1747 = vrot.lane.b32.xlu1 %v4275_v59, %s4536_s29  ;;  %2077 = vst.msk [vmem:[#allocation3 + $0xc] sm:$0xf] %vm2073_vm10, %v1984_v23 }
 0x15c   : > { %2003 = vrot.lane.b32.xlu0 %v4791_v47, %s4537_s30 }
 0x15d   : > { %v1982_v35 = vpop.permute.xlu1 %1981 }
 0x15e   : > { %2076 = vst.msk [vmem:[#allocation3 + $0x8] sm:$0xf] %vm2073_vm10, %v1982_v35  ;;  %v2237_v30 = vpop.permute.xlu0 %2236 }
 0x15f   : > { %2001 = vrot.lane.b32.xlu1 %v4779_v41, %s4537_s30  ;;  %2332 = vst.msk [vmem:[#allocation3 + $0x4] sm:$0xf] %vm2330_vm11, %v2237_v30  ;;  %v4340_v41 = vpack.c.bf16 %v2121_v31, %v2121_v31 }
 0x160   : > { %2007 = vrot.lane.b32.xlu0 %v4804_v53, %s4537_s30 }
 0x161   : > { %v2235_v39 = vpop.permute.xlu1 %2234 }
 0x162   : > { %2331 = vst.msk [vmem:[#allocation3] sm:$0xf] %vm2330_vm11, %v2235_v39  ;;  %v2241_v47 = vpop.permute.xlu0 %2240  ;;  %v1100_v39 = vld [vmem:[#allocation2 + $0x128] sm:$0xff] }
 0x163   : > { %2005 = vrot.lane.b32.xlu1 %v4789_v46, %s4537_s30  ;;  %2334 = vst.msk [vmem:[#allocation3 + $0xc] sm:$0xf] %vm2330_vm11, %v2241_v47  ;;  %v2378_v46 = vld [vmem:[#allocation2 + $0xe2] sm:$0xff] }
 0x164   : > { %2260 = vrot.lane.b32.xlu0 %v4244_v58, %s4538_s8  ;;  %v4372_v0 = vpack.c.bf16 %v2378_v46, %v2378_v46  ;;  %v2125_v58 = vld [vmem:[#allocation2 + $0x111] sm:$0xff] }
 0x165   : > { %v2239_v34 = vpop.permute.xlu1 %2238  ;;  %v4344_v61 = vpack.c.bf16 %v2125_v58, %v2125_v58 }
 0x166   : > { %2333 = vst.msk [vmem:[#allocation3 + $0x8] sm:$0xf] %vm2330_vm11, %v2239_v34  ;;  %v2494_v53 = vpop.permute.xlu0 %2493 }
 0x167   : > { %2258 = vrot.lane.b32.xlu1 %v4243_v14, %s4538_s8  ;;  %2589 = vst.msk [vmem:[#allocation3 + $0x4] sm:$0xf] %vm2587_vm12, %v2494_v53  ;;  %v2124_v14 = vld [vmem:[#allocation2 + $0x109] sm:$0xff] }
 0x168   : > { %2264 = vrot.lane.b32.xlu0 %v4340_v41, %s4538_s8  ;;  %v4343_v24 = vpack.c.bf16 %v2124_v14, %v2124_v14 }
 0x169   : > { %v2492_v20 = vpop.permute.xlu1 %2491 }
 0x16a   : > { %2588 = vst.msk [vmem:[#allocation3] sm:$0xf] %vm2587_vm12, %v2492_v20  ;;  %v2498_v62 = vpop.permute.xlu0 %2497  ;;  %v4251_v20 = vpack.c.bf16 %v1356_v11, %v1356_v11 }
 0x16b   : > { %2262 = vrot.lane.b32.xlu1 %v4339_v2, %s4538_s8  ;;  %2591 = vst.msk [vmem:[#allocation3 + $0xc] sm:$0xf] %vm2587_vm12, %v2498_v62  ;;  %v1357_v62 = vld [vmem:[#allocation2 + $0x129] sm:$0xff] }
 0x16c   : > { %2517 = vrot.lane.b32.xlu0 %v4276_v17, %s4539_s13  ;;  %v2382_v17 = vld [vmem:[#allocation2 + $0x112] sm:$0xff] }
 0x16d   : > { %v2496_v63 = vpop.permute.xlu1 %2495  ;;  %v4376_v23 = vpack.c.bf16 %v2382_v17, %v2382_v17 }
 0x16e   : > { %2590 = vst.msk [vmem:[#allocation3 + $0x8] sm:$0xf] %vm2587_vm12, %v2496_v63  ;;  %v1473_v1 = vpop.permute.xlu0 %1472  ;;  %v1613_v63 = vld [vmem:[#allocation2 + $0x122] sm:$0xff] }
 0x16f   : > { %2515 = vrot.lane.b32.xlu1 %v4275_v59, %s4539_s13  ;;  %1564 = vst.msk [vmem:[#allocation3 + $0x14] sm:$0xf] %vm1558_vm8, %v1473_v1  ;;  %v2381_v59 = vld [vmem:[#allocation2 + $0x10a] sm:$0xff]  ;;  %v4252_v1 = vpack.c.bf16 %v1357_v62, %v1357_v62 }
 0x170   : > { %2521 = vrot.lane.b32.xlu0 %v4372_v0, %s4539_s13  ;;  %v4375_v30 = vpack.c.bf16 %v2381_v59, %v2381_v59 }
 0x171   : > { %v1471_v4 = vpop.permute.xlu1 %1470  ;;  %v4507_v16 = vld [vmem:[#allocation3] sm:$0xff]  }
 0x172   : > { %1563 = vst.msk [vmem:[#allocation3 + $0x10] sm:$0xf] %vm1558_vm8, %v1471_v4  ;;  %4446 = vmatprep.mubr.msk.bf16.mxu0 %vm2752_vm13, %v4507_v16  ;;  %v1477_v5 = vpop.permute.xlu0 %1476  ;;  %v4283_v4 = vpack.c.bf16 %v1613_v63, %v1613_v63  ;;  %v1869_v16 = vld [vmem:[#allocation2 + $0x120] sm:$0xff] }
 0x173   : > { %2519 = vrot.lane.b32.xlu1 %v4371_v27, %s4539_s13  ;;  %1566 = vst.msk [vmem:[#allocation3 + $0x1c] sm:$0xf] %vm1558_vm8, %v1477_v5  ;;  %v1614_v5 = vld [vmem:[#allocation2 + $0x12a] sm:$0xff]  ;;  %v4313_v10 = vpack.c.bf16 %v1869_v16, %v1869_v16 }
 0x174   : > { %1496 = vrot.lane.b32.xlu0 %v4340_v41, %s4535_s28  ;;  %v4220_v41 = vpack.c.bf16 %v1100_v39, %v1100_v39  ;;  %v1617_v39 = vld [vmem:[#allocation2 + $0x152] sm:$0xff] }
 0x175   : > { %v1475_v22 = vpop.permute.xlu1 %1474  ;;  %v4508_v13 = vld [vmem:[#allocation3 + $0x8] sm:$0xff]  }
 0x176   : > { %1565 = vst.msk [vmem:[#allocation3 + $0x18] sm:$0xf] %vm1558_vm8, %v1475_v22  ;;  %4447 = vmatmul.mubr.msk.bf16.vlgmr.msra.gmra.mxu0 %vm2752_vm13, %v4508_v13  ;;  %v1730_v3 = vpop.permute.xlu0 %1729  ;;  %v1871_v22 = vld [vmem:[#allocation2 + $0x138] sm:$0xff] }
 0x177   : > { %1494 = vrot.lane.b32.xlu1 %v4339_v2, %s4535_s28  ;;  %1821 = vst.msk [vmem:[#allocation3 + $0x14] sm:$0xf] %vm1815_vm9, %v1730_v3  ;;  %v4315_v3 = vpack.c.bf16 %v1871_v22, %v1871_v22  ;;  %v2133_v22 = vld [vmem:[#allocation2 + $0x171] sm:$0xff] }
 0x178   : > { %1500 = vrot.lane.b32.xlu0 %v4248_v15, %s4535_s28 }
 0x179   : > { %v1728_v21 = vpop.permute.xlu1 %1727 }
 0x17a   : > { %1820 = vst.msk [vmem:[#allocation3 + $0x10] sm:$0xf] %vm1815_vm9, %v1728_v21  ;;  %v1734_v26 = vpop.permute.xlu0 %1733  ;;  %v1872_v21 = vld [vmem:[#allocation2 + $0x140] sm:$0xff] }
 0x17b   : > { %1498 = vrot.lane.b32.xlu1 %v4247_v19, %s4535_s28  ;;  %1823 = vst.msk [vmem:[#allocation3 + $0x1c] sm:$0xf] %vm1815_vm9, %v1734_v26  ;;  %v2128_v26 = vld [vmem:[#allocation2 + $0x139] sm:$0xff] }
 0x17c   : > { %1753 = vrot.lane.b32.xlu0 %v4372_v0, %s4536_s29  ;;  %v4347_v36 = vpack.c.bf16 %v2128_v26, %v2128_v26 }
 0x17d   : > { %v1732_v28 = vpop.permute.xlu1 %1731 }
 0x17e   : > { %1822 = vst.msk [vmem:[#allocation3 + $0x18] sm:$0xf] %vm1815_vm9, %v1732_v28  ;;  %v1988_v42 = vpop.permute.xlu0 %1987  ;;  %v4316_v28 = vpack.c.bf16 %v1872_v21, %v1872_v21 }
 0x17f   : > { %1751 = vrot.lane.b32.xlu1 %v4371_v27, %s4536_s29  ;;  %2079 = vst.msk [vmem:[#allocation3 + $0x14] sm:$0xf] %vm2073_vm10, %v1988_v42 }
 0x180   : > { %1757 = vrot.lane.b32.xlu0 %v4280_v29, %s4536_s29 }
 0x181   : > { %v1986_v18 = vpop.permute.xlu1 %1985 }
 0x182   : > { %2078 = vst.msk [vmem:[#allocation3 + $0x10] sm:$0xf] %vm2073_vm10, %v1986_v18  ;;  %v1992_v9 = vpop.permute.xlu0 %1991  ;;  %v2385_v18 = vld [vmem:[#allocation2 + $0x13a] sm:$0xff] }
 0x183   : > { %1755 = vrot.lane.b32.xlu1 %v4279_v37, %s4536_s29  ;;  %2081 = vst.msk [vmem:[#allocation3 + $0x1c] sm:$0xf] %vm2073_vm10, %v1992_v9 }
 0x184   : > { %2011 = vrot.lane.b32.xlu0 %v4310_v38, %s4537_s30 }
 0x185   : > { %v1990_v50 = vpop.permute.xlu1 %1989 }
 0x186   : > { %2080 = vst.msk [vmem:[#allocation3 + $0x18] sm:$0xf] %vm2073_vm10, %v1990_v50  ;;  %v2245_v52 = vpop.permute.xlu0 %2244  ;;  %v2386_v50 = vld [vmem:[#allocation2 + $0x142] sm:$0xff] }
 0x187   : > { %2009 = vrot.lane.b32.xlu1 %v4309_v45, %s4537_s30  ;;  %2336 = vst.msk [vmem:[#allocation3 + $0x14] sm:$0xf] %vm2330_vm11, %v2245_v52  ;;  %v4379_v45 = vpack.c.bf16 %v2385_v18, %v2385_v18  ;;  %v4380_v58 = vpack.c.bf16 %v2386_v50, %v2386_v50 }
 0x188   : > { %2015 = vrot.lane.b32.xlu0 %v4312_v51, %s4537_s30 }
 0x189   : > { %v2243_v57 = vpop.permute.xlu1 %2242 }
 0x18a   : > { %2335 = vst.msk [vmem:[#allocation3 + $0x10] sm:$0xf] %vm2330_vm11, %v2243_v57  ;;  %v2249_v25 = vpop.permute.xlu0 %2248 }
 0x18b   : > { %2013 = vrot.lane.b32.xlu1 %v4311_v56, %s4537_s30  ;;  %2338 = vst.msk [vmem:[#allocation3 + $0x1c] sm:$0xf] %vm2330_vm11, %v2249_v25  ;;  %v1103_v56 = vld [vmem:[#allocation2 + $0x150] sm:$0xff] }
 0x18c   : > { %2268 = vrot.lane.b32.xlu0 %v4248_v15, %s4538_s8  ;;  %v4284_v15 = vpack.c.bf16 %v1614_v5, %v1614_v5 }
 0x18d   : > { %v2247_v48 = vpop.permute.xlu1 %2246 }
 0x18e   : > { %2337 = vst.msk [vmem:[#allocation3 + $0x18] sm:$0xf] %vm2330_vm11, %v2247_v48  ;;  %v2502_v54 = vpop.permute.xlu0 %2501  ;;  %v4223_v48 = vpack.c.bf16 %v1103_v56, %v1103_v56 }
 0x18f   : > { %2266 = vrot.lane.b32.xlu1 %v4247_v19, %s4538_s8  ;;  %2593 = vst.msk [vmem:[#allocation3 + $0x14] sm:$0xf] %vm2587_vm12, %v2502_v54  ;;  %v1104_v54 = vld [vmem:[#allocation2 + $0x158] sm:$0xff] }
 0x190   : > { %2272 = vrot.lane.b32.xlu0 %v4344_v61, %s4538_s8 }
 0x191   : > { %v2500_v55 = vpop.permute.xlu1 %2499 }
 0x192   : > { %2592 = vst.msk [vmem:[#allocation3 + $0x10] sm:$0xf] %vm2587_vm12, %v2500_v55  ;;  %v2506_v32 = vpop.permute.xlu0 %2505  ;;  %v1360_v55 = vld [vmem:[#allocation2 + $0x151] sm:$0xff] }
 0x193   : > { %2270 = vrot.lane.b32.xlu1 %v4343_v24, %s4538_s8  ;;  %2595 = vst.msk [vmem:[#allocation3 + $0x1c] sm:$0xf] %vm2587_vm12, %v2506_v32  ;;  %v4224_v32 = vpack.c.bf16 %v1104_v54, %v1104_v54 }
 0x194   : > { %2525 = vrot.lane.b32.xlu0 %v4280_v29, %s4539_s13 }
 0x195   : > { %v2504_v60 = vpop.permute.xlu1 %2503 }
 0x196   : > { %2594 = vst.msk [vmem:[#allocation3 + $0x18] sm:$0xf] %vm2587_vm12, %v2504_v60  ;;  %v1481_v35 = vpop.permute.xlu0 %1480  ;;  %v4255_v60 = vpack.c.bf16 %v1360_v55, %v1360_v55  ;;  %v1622_v55 = vld [vmem:[#allocation2 + $0x18a] sm:$0xff] }
 0x197   : > { %2523 = vrot.lane.b32.xlu1 %v4279_v37, %s4539_s13  ;;  %1568 = vst.msk [vmem:[#allocation3 + $0x24] sm:$0xf] %vm1558_vm8, %v1481_v35  ;;  %v2129_v37 = vld [vmem:[#allocation2 + $0x141] sm:$0xff]  ;;  %v1361_v35 = vld [vmem:[#allocation2 + $0x159] sm:$0xff] }
 0x198   : > { %2529 = vrot.lane.b32.xlu0 %v4376_v23, %s4539_s13  ;;  %v4348_v44 = vpack.c.bf16 %v2129_v37, %v2129_v37 }
 0x199   : > { %v1479_v31 = vpop.permute.xlu1 %1478  ;;  %v4509_v47 = vld [vmem:[#allocation3 + $0x10] sm:$0xff]  }
 0x19a   : > { %1567 = vst.msk [vmem:[#allocation3 + $0x20] sm:$0xf] %vm1558_vm8, %v1479_v31  ;;  %4450 = vmatprep.mubr.msk.bf16.mxu0 %vm2752_vm13, %v4509_v47  ;;  %v1485_v34 = vpop.permute.xlu0 %1484  ;;  %v4256_v47 = vpack.c.bf16 %v1361_v35, %v1361_v35 }
 0x19b   : > { %2527 = vrot.lane.b32.xlu1 %v4375_v30, %s4539_s13  ;;  %1570 = vst.msk [vmem:[#allocation3 + $0x2c] sm:$0xf] %vm1558_vm8, %v1485_v34  ;;  %v4287_v34 = vpack.c.bf16 %v1617_v39, %v1617_v39  ;;  %v1880_v39 = vld [vmem:[#allocation2 + $0x1a0] sm:$0xff] }
 0x19c   : > { %1502 = vrot.lane.b32.xlu0 %v4343_v24, %s4535_s28 }
 0x19d   : > { %v1483_v53 = vpop.permute.xlu1 %1482  ;;  %v4510_v2 = vld [vmem:[#allocation3 + $0x18] sm:$0xff]  }
 0x19e   : > { %1569 = vst.msk [vmem:[#allocation3 + $0x28] sm:$0xf] %vm1558_vm8, %v1483_v53  ;;  %4451 = vmatmul.mubr.msk.bf16.gmra.mxu0 %vm2752_vm13, %v4510_v2  ;;  %v1738_v46 = vpop.permute.xlu0 %1737  ;;  %v1618_v53 = vld [vmem:[#allocation2 + $0x15a] sm:$0xff] }
 0x19f   : > { %1251 = vrot.lane.b32.xlu1 %v4220_v41, %s4534_s27  ;;  %1825 = vst.msk [vmem:[#allocation3 + $0x24] sm:$0xf] %vm1815_vm9, %v1738_v46  ;;  %v4288_v62 = vpack.c.bf16 %v1618_v53, %v1618_v53 }
 0x1a0   : > { %1506 = vrot.lane.b32.xlu0 %v4251_v20, %s4535_s28 }
 0x1a1   : > { %v1736_v43 = vpop.permute.xlu1 %1735 }
 0x1a2   : > { %1824 = vst.msk [vmem:[#allocation3 + $0x20] sm:$0xf] %vm1815_vm9, %v1736_v43  ;;  %v1742_v0 = vpop.permute.xlu0 %1741 }
 0x1a3   : > { %1504 = vrot.lane.b32.xlu1 %v4344_v61, %s4535_s28  ;;  %1827 = vst.msk [vmem:[#allocation3 + $0x2c] sm:$0xf] %vm1815_vm9, %v1742_v0 }
 0x1a4   : > { %1759 = vrot.lane.b32.xlu0 %v4375_v30, %s4536_s29 }
 0x1a5   : > { %v1740_v27 = vpop.permute.xlu1 %1739 }
 0x1a6   : > { %1826 = vst.msk [vmem:[#allocation3 + $0x28] sm:$0xf] %vm1815_vm9, %v1740_v27  ;;  %v1996_v7 = vpop.permute.xlu0 %1995 }
 0x1a7   : > { %1508 = vrot.lane.b32.xlu1 %v4252_v1, %s4535_s28  ;;  %2083 = vst.msk [vmem:[#allocation3 + $0x24] sm:$0xf] %vm2073_vm10, %v1996_v7 }
 0x1a8   : > { %1763 = vrot.lane.b32.xlu0 %v4283_v4, %s4536_s29 }
 0x1a9   : > { %v1994_v6 = vpop.permute.xlu1 %1993 }
 0x1aa   : > { %2082 = vst.msk [vmem:[#allocation3 + $0x20] sm:$0xf] %vm2073_vm10, %v1994_v6  ;;  %v2000_v13 = vpop.permute.xlu0 %1999 }
 0x1ab   : > { %1761 = vrot.lane.b32.xlu1 %v4376_v23, %s4536_s29  ;;  %2085 = vst.msk [vmem:[#allocation3 + $0x2c] sm:$0xf] %vm2073_vm10, %v2000_v13 }
 0x1ac   : > { %2017 = vrot.lane.b32.xlu0 %v4313_v10, %s4537_s30 }
 0x1ad   : > { %v1998_v12 = vpop.permute.xlu1 %1997 }
 0x1ae   : > { %2084 = vst.msk [vmem:[#allocation3 + $0x28] sm:$0xf] %vm2073_vm10, %v1998_v12  ;;  %v2253_v19 = vpop.permute.xlu0 %2252  ;;  %v2389_v12 = vld [vmem:[#allocation2 + $0x16a] sm:$0xff] }
 0x1af   : > { %1765 = vrot.lane.b32.xlu1 %v4284_v15, %s4536_s29  ;;  %2340 = vst.msk [vmem:[#allocation3 + $0x24] sm:$0xf] %vm2330_vm11, %v2253_v19  ;;  %v4352_v19 = vpack.c.bf16 %v2133_v22, %v2133_v22  ;;  %v4383_v26 = vpack.c.bf16 %v2389_v12, %v2389_v12 }
 0x1b0   : > { %2021 = vrot.lane.b32.xlu0 %v4315_v3, %s4537_s30 }
 0x1b1   : > { %v2251_v8 = vpop.permute.xlu1 %2250 }
 0x1b2   : > { %2339 = vst.msk [vmem:[#allocation3 + $0x20] sm:$0xf] %vm2330_vm11, %v2251_v8  ;;  %v2257_v40 = vpop.permute.xlu0 %2256 }
 0x1b3   : > { %2019 = vrot.lane.b32.xlu1 %v4220_v41, %s4537_s30  ;;  %2342 = vst.msk [vmem:[#allocation3 + $0x2c] sm:$0xf] %vm2330_vm11, %v2257_v40 }
 0x1b4   : > { %2274 = vrot.lane.b32.xlu0 %v4251_v20, %s4538_s8  ;;  %v1875_v20 = vld [vmem:[#allocation2 + $0x168] sm:$0xff] }
 0x1b5   : > { %v2255_v29 = vpop.permute.xlu1 %2254  ;;  %v4319_v63 = vpack.c.bf16 %v1875_v20, %v1875_v20 }
 0x1b6   : > { %2341 = vst.msk [vmem:[#allocation3 + $0x28] sm:$0xf] %vm2330_vm11, %v2255_v29  ;;  %v2510_v42 = vpop.permute.xlu0 %2509 }
 0x1b7   : > { %2023 = vrot.lane.b32.xlu1 %v4316_v28, %s4537_s30  ;;  %2597 = vst.msk [vmem:[#allocation3 + $0x24] sm:$0xf] %vm2587_vm12, %v2510_v42 }
 0x1b8   : > { %2278 = vrot.lane.b32.xlu0 %v4347_v36, %s4538_s8 }
 0x1b9   : > { %v2508_v33 = vpop.permute.xlu1 %2507 }
 0x1ba   : > { %2596 = vst.msk [vmem:[#allocation3 + $0x20] sm:$0xf] %vm2587_vm12, %v2508_v33  ;;  %v2514_v38 = vpop.permute.xlu0 %2513 }
 0x1bb   : > { %2276 = vrot.lane.b32.xlu1 %v4252_v1, %s4538_s8  ;;  %2599 = vst.msk [vmem:[#allocation3 + $0x2c] sm:$0xf] %vm2587_vm12, %v2514_v38  ;;  %v1876_v1 = vld [vmem:[#allocation2 + $0x170] sm:$0xff] }
 0x1bc   : > { %2531 = vrot.lane.b32.xlu0 %v4283_v4, %s4539_s13  ;;  %v2132_v4 = vld [vmem:[#allocation2 + $0x169] sm:$0xff]  ;;  %v4320_v7 = vpack.c.bf16 %v1876_v1, %v1876_v1 }
 0x1bd   : > { %v2512_v9 = vpop.permute.xlu1 %2511  ;;  %v4351_v6 = vpack.c.bf16 %v2132_v4, %v2132_v4 }
 0x1be   : > { %2598 = vst.msk [vmem:[#allocation3 + $0x28] sm:$0xf] %vm2587_vm12, %v2512_v9  ;;  %v1489_v49 = vpop.permute.xlu0 %1488 }
 0x1bf   : > { %2280 = vrot.lane.b32.xlu1 %v4348_v44, %s4538_s8  ;;  %1572 = vst.msk [vmem:[#allocation3 + $0x34] sm:$0xf] %vm1558_vm8, %v1489_v49 }
 0x1c0   : > { %2535 = vrot.lane.b32.xlu0 %v4379_v45, %s4539_s13 }
 0x1c1   : > { %v1487_v51 = vpop.permute.xlu1 %1486  ;;  %v4511_v52 = vld [vmem:[#allocation3 + $0x20] sm:$0xff]  }
 0x1c2   : > { %1571 = vst.msk [vmem:[#allocation3 + $0x30] sm:$0xf] %vm1558_vm8, %v1487_v51  ;;  %4454 = vmatprep.mubr.msk.bf16.mxu0 %vm2752_vm13, %v4511_v52  ;;  %v1493_v57 = vpop.permute.xlu0 %1492 }
 0x1c3   : > { %2533 = vrot.lane.b32.xlu1 %v4284_v15, %s4539_s13  ;;  %1574 = vst.msk [vmem:[#allocation3 + $0x3c] sm:$0xf] %vm1558_vm8, %v1493_v57  ;;  %v1365_v57 = vld [vmem:[#allocation2 + $0x189] sm:$0xff] }
 0x1c4   : > { %1253 = vrot.lane.b32.xlu0 %v4315_v3, %s4534_s27 }
 0x1c5   : > { %v1491_v25 = vpop.permute.xlu1 %1490  ;;  %v4512_v14 = vld [vmem:[#allocation3 + $0x28] sm:$0xff]  }
 0x1c6   : > { %1573 = vst.msk [vmem:[#allocation3 + $0x38] sm:$0xf] %vm1558_vm8, %v1491_v25  ;;  %4455 = vmatmul.mubr.msk.bf16.gmra.mxu0 %vm2752_vm13, %v4512_v14  ;;  %v1746_v61 = vpop.permute.xlu0 %1745  ;;  %v1621_v25 = vld [vmem:[#allocation2 + $0x182] sm:$0xff] }
 0x1c7   : > { %2537 = vrot.lane.b32.xlu1 %v4380_v58, %s4539_s13  ;;  %1829 = vst.msk [vmem:[#allocation3 + $0x34] sm:$0xf] %vm1815_vm9, %v1746_v61  ;;  %v4291_v54 = vpack.c.bf16 %v1621_v25, %v1621_v25 }
 0x1c8   : > { %1257 = vrot.lane.b32.xlu0 %v4223_v48, %s4534_s27 }
 0x1c9   : > { %v1744_v24 = vpop.permute.xlu1 %1743 }
 0x1ca   : > { %1828 = vst.msk [vmem:[#allocation3 + $0x30] sm:$0xf] %vm1815_vm9, %v1744_v24  ;;  %v1750_v17 = vpop.permute.xlu0 %1749 }
 0x1cb   : > { %1255 = vrot.lane.b32.xlu1 %v4316_v28, %s4534_s27  ;;  %1831 = vst.msk [vmem:[#allocation3 + $0x3c] sm:$0xf] %vm1815_vm9, %v1750_v17  ;;  %v2390_v28 = vld [vmem:[#allocation2 + $0x172] sm:$0xff] }
 0x1cc   : > { %1510 = vrot.lane.b32.xlu0 %v4347_v36, %s4535_s28  ;;  %v1107_v36 = vld [vmem:[#allocation2 + $0x180] sm:$0xff]  ;;  %v4384_v37 = vpack.c.bf16 %v2390_v28, %v2390_v28 }
 0x1cd   : > { %v1748_v59 = vpop.permute.xlu1 %1747  ;;  %v4227_v18 = vpack.c.bf16 %v1107_v36, %v1107_v36 }
 0x1ce   : > { %1830 = vst.msk [vmem:[#allocation3 + $0x38] sm:$0xf] %vm1815_vm9, %v1748_v59  ;;  %v2004_v23 = vpop.permute.xlu0 %2003 }
 0x1cf   : > { %1259 = vrot.lane.b32.xlu1 %v4224_v32, %s4534_s27  ;;  %2087 = vst.msk [vmem:[#allocation3 + $0x34] sm:$0xf] %vm2073_vm10, %v2004_v23 }
 0x1d0   : > { %1514 = vrot.lane.b32.xlu0 %v4255_v60, %s4535_s28 }
 0x1d1   : > { %v2002_v30 = vpop.permute.xlu1 %2001 }
 0x1d2   : > { %2086 = vst.msk [vmem:[#allocation3 + $0x30] sm:$0xf] %vm2073_vm10, %v2002_v30  ;;  %v2008_v31 = vpop.permute.xlu0 %2007 }
 0x1d3   : > { %1512 = vrot.lane.b32.xlu1 %v4348_v44, %s4535_s28  ;;  %2089 = vst.msk [vmem:[#allocation3 + $0x3c] sm:$0xf] %vm2073_vm10, %v2008_v31  ;;  %v1108_v44 = vld [vmem:[#allocation2 + $0x188] sm:$0xff] }
 0x1d4   : > { %1767 = vrot.lane.b32.xlu0 %v4379_v45, %s4536_s29  ;;  %v1364_v45 = vld [vmem:[#allocation2 + $0x181] sm:$0xff]  ;;  %v4228_v50 = vpack.c.bf16 %v1108_v44, %v1108_v44 }
 0x1d5   : > { %v2006_v11 = vpop.permute.xlu1 %2005  ;;  %v4259_v52 = vpack.c.bf16 %v1364_v45, %v1364_v45 }
 0x1d6   : > { %2088 = vst.msk [vmem:[#allocation3 + $0x38] sm:$0xf] %vm2073_vm10, %v2006_v11  ;;  %v2261_v41 = vpop.permute.xlu0 %2260  ;;  %v2136_v11 = vld [vmem:[#allocation2 + $0x199] sm:$0xff] }
 0x1d7   : > { %1516 = vrot.lane.b32.xlu1 %v4256_v47, %s4535_s28  ;;  %2344 = vst.msk [vmem:[#allocation3 + $0x34] sm:$0xf] %vm2330_vm11, %v2261_v41  ;;  %v4355_v20 = vpack.c.bf16 %v2136_v11, %v2136_v11 }
 0x1d8   : > { %1771 = vrot.lane.b32.xlu0 %v4287_v34, %s4536_s29 }
 0x1d9   : > { %v2259_v2 = vpop.permute.xlu1 %2258 }
 0x1da   : > { %2343 = vst.msk [vmem:[#allocation3 + $0x30] sm:$0xf] %vm2330_vm11, %v2259_v2  ;;  %v2265_v46 = vpop.permute.xlu0 %2264 }
 0x1db   : > { %1769 = vrot.lane.b32.xlu1 %v4380_v58, %s4536_s29  ;;  %2346 = vst.msk [vmem:[#allocation3 + $0x3c] sm:$0xf] %vm2330_vm11, %v2265_v46 }
 0x1dc   : > { %2025 = vrot.lane.b32.xlu0 %v4223_v48, %s4537_s30  ;;  %v4260_v48 = vpack.c.bf16 %v1365_v57, %v1365_v57 }
 0x1dd   : > { %v2263_v43 = vpop.permute.xlu1 %2262 }
 0x1de   : > { %2345 = vst.msk [vmem:[#allocation3 + $0x38] sm:$0xf] %vm2330_vm11, %v2263_v43  ;;  %v2518_v0 = vpop.permute.xlu0 %2517 }
 0x1df   : > { %1773 = vrot.lane.b32.xlu1 %v4288_v62, %s4536_s29  ;;  %2601 = vst.msk [vmem:[#allocation3 + $0x34] sm:$0xf] %vm2587_vm12, %v2518_v0 }
 0x1e0   : > { %2029 = vrot.lane.b32.xlu0 %v4319_v63, %s4537_s30 }
 0x1e1   : > { %v2516_v27 = vpop.permute.xlu1 %2515 }
 0x1e2   : > { %2600 = vst.msk [vmem:[#allocation3 + $0x30] sm:$0xf] %vm2587_vm12, %v2516_v27  ;;  %v2522_v16 = vpop.permute.xlu0 %2521 }
 0x1e3   : > { %2027 = vrot.lane.b32.xlu1 %v4224_v32, %s4537_s30  ;;  %2603 = vst.msk [vmem:[#allocation3 + $0x3c] sm:$0xf] %vm2587_vm12, %v2522_v16  ;;  %v1879_v32 = vld [vmem:[#allocation2 + $0x198] sm:$0xff] }
 0x1e4   : > { %2282 = vrot.lane.b32.xlu0 %v4255_v60, %s4538_s8  ;;  %v4292_v60 = vpack.c.bf16 %v1622_v55, %v1622_v55  ;;  %v4323_v35 = vpack.c.bf16 %v1879_v32, %v1879_v32 }
 0x1e5   : > { %v2520_v5 = vpop.permute.xlu1 %2519 }
 0x1e6   : > { %2602 = vst.msk [vmem:[#allocation3 + $0x38] sm:$0xf] %vm2587_vm12, %v2520_v5  ;;  %v1497_v10 = vpop.permute.xlu0 %1496 }
 0x1e7   : > { %2031 = vrot.lane.b32.xlu1 %v4320_v7, %s4537_s30  ;;  %1576 = vst.msk [vmem:[#allocation3 + $0x44] sm:$0xf] %vm1558_vm8, %v1497_v10 }
 0x1e8   : > { %2286 = vrot.lane.b32.xlu0 %v4351_v6, %s4538_s8 }
 0x1e9   : > { %v1495_v13 = vpop.permute.xlu1 %1494  ;;  %v4513_v15 = vld [vmem:[#allocation3 + $0x30] sm:$0xff]  }
 0x1ea   : > { %1575 = vst.msk [vmem:[#allocation3 + $0x40] sm:$0xf] %vm1558_vm8, %v1495_v13  ;;  %4458 = vmatprep.mubr.msk.bf16.mxu0 %vm2752_vm13, %v4513_v15  ;;  %v1501_v3 = vpop.permute.xlu0 %1500 }
 0x1eb   : > { %2284 = vrot.lane.b32.xlu1 %v4256_v47, %s4538_s8  ;;  %1578 = vst.msk [vmem:[#allocation3 + $0x4c] sm:$0xf] %vm1558_vm8, %v1501_v3 }
 0x1ec   : > { %2539 = vrot.lane.b32.xlu0 %v4287_v34, %s4539_s13  ;;  %v4324_v34 = vpack.c.bf16 %v1880_v39, %v1880_v39 }
 0x1ed   : > { %v1499_v21 = vpop.permute.xlu1 %1498  ;;  %v4514_v8 = vld [vmem:[#allocation3 + $0x38] sm:$0xff]  }
 0x1ee   : > { %1577 = vst.msk [vmem:[#allocation3 + $0x48] sm:$0xf] %vm1558_vm8, %v1499_v21  ;;  %4459 = vmatmul.mubr.msk.bf16.gmra.mxu0 %vm2752_vm13, %v4514_v8  ;;  %v1754_v40 = vpop.permute.xlu0 %1753 }
 0x1ef   : > { %2288 = vrot.lane.b32.xlu1 %v4352_v19, %s4538_s8  ;;  %1833 = vst.msk [vmem:[#allocation3 + $0x44] sm:$0xf] %vm1815_vm9, %v1754_v40 }
 0x1f0   : > { %2543 = vrot.lane.b32.xlu0 %v4383_v26, %s4539_s13 }
 0x1f1   : > { %v1752_v29 = vpop.permute.xlu1 %1751 }
 0x1f2   : > { %1832 = vst.msk [vmem:[#allocation3 + $0x40] sm:$0xf] %vm1815_vm9, %v1752_v29  ;;  %v1758_v42 = vpop.permute.xlu0 %1757 }
 0x1f3   : > { %2541 = vrot.lane.b32.xlu1 %v4288_v62, %s4539_s13  ;;  %1835 = vst.msk [vmem:[#allocation3 + $0x4c] sm:$0xf] %vm1815_vm9, %v1758_v42  ;;  %v2137_v62 = vld [vmem:[#allocation2 + $0x1a1] sm:$0xff] }
 0x1f4   : > { %1261 = vrot.lane.b32.xlu0 %v4319_v63, %s4534_s27  ;;  %v2393_v63 = vld [vmem:[#allocation2 + $0x19a] sm:$0xff]  ;;  %v4356_v0 = vpack.c.bf16 %v2137_v62, %v2137_v62 }
 0x1f5   : > { %v1756_v33 = vpop.permute.xlu1 %1755  ;;  %v4387_v4 = vpack.c.bf16 %v2393_v63, %v2393_v63 }
 0x1f6   : > { %1834 = vst.msk [vmem:[#allocation3 + $0x48] sm:$0xf] %vm1815_vm9, %v1756_v33  ;;  %v2012_v38 = vpop.permute.xlu0 %2011 }
 0x1f7   : > { %2545 = vrot.lane.b32.xlu1 %v4384_v37, %s4539_s13  ;;  %2091 = vst.msk [vmem:[#allocation3 + $0x44] sm:$0xf] %vm2073_vm10, %v2012_v38 }
 0x1f8   : > { %1265 = vrot.lane.b32.xlu0 %v4227_v18, %s4534_s27 }
 0x1f9   : > { %v2010_v9 = vpop.permute.xlu1 %2009 }
 0x1fa   : > { %2090 = vst.msk [vmem:[#allocation3 + $0x40] sm:$0xf] %vm2073_vm10, %v2010_v9  ;;  %v2016_v49 = vpop.permute.xlu0 %2015 }
 0x1fb   : > { %1263 = vrot.lane.b32.xlu1 %v4320_v7, %s4534_s27  ;;  %2093 = vst.msk [vmem:[#allocation3 + $0x4c] sm:$0xf] %vm2073_vm10, %v2016_v49  ;;  %v2394_v7 = vld [vmem:[#allocation2 + $0x1a2] sm:$0xff] }
 0x1fc   : > { %1518 = vrot.lane.b32.xlu0 %v4351_v6, %s4535_s28  ;;  %v4388_v6 = vpack.c.bf16 %v2394_v7, %v2394_v7 }
 0x1fd   : > { %v2014_v51 = vpop.permute.xlu1 %2013 }
 0x1fe   : > { %2092 = vst.msk [vmem:[#allocation3 + $0x48] sm:$0xf] %vm2073_vm10, %v2014_v51  ;;  %v2269_v56 = vpop.permute.xlu0 %2268 }
 0x1ff   : > { %1267 = vrot.lane.b32.xlu1 %v4228_v50, %s4534_s27  ;;  %2348 = vst.msk [vmem:[#allocation3 + $0x44] sm:$0xf] %vm2330_vm11, %v2269_v56  ;;  %s253_s27 = scalar_lea.vmem %s5777_s4, %s3739_s24 }
 0x200   : > { %1522 = vrot.lane.b32.xlu0 %v4259_v52, %s4535_s28 }
 0x201   : > { %v2267_v58 = vpop.permute.xlu1 %2266 }
 0x202   : > { %2347 = vst.msk [vmem:[#allocation3 + $0x40] sm:$0xf] %vm2330_vm11, %v2267_v58  ;;  %v2273_v14 = vpop.permute.xlu0 %2272 }
 0x203   : > { %1520 = vrot.lane.b32.xlu1 %v4352_v19, %s4535_s28  ;;  %2350 = vst.msk [vmem:[#allocation3 + $0x4c] sm:$0xf] %vm2330_vm11, %v2273_v14 }
 0x204   : > { %1775 = vrot.lane.b32.xlu0 %v4383_v26, %s4536_s29 }
 0x205   : > { %v2271_v61 = vpop.permute.xlu1 %2270 }
 0x206   : > { %2349 = vst.msk [vmem:[#allocation3 + $0x48] sm:$0xf] %vm2330_vm11, %v2271_v61  ;;  %v2526_v24 = vpop.permute.xlu0 %2525 }
 0x207   : > { %1524 = vrot.lane.b32.xlu1 %v4260_v48, %s4535_s28  ;;  %2605 = vst.msk [vmem:[#allocation3 + $0x44] sm:$0xf] %vm2587_vm12, %v2526_v24 }
 0x208   : > { %1779 = vrot.lane.b32.xlu0 %v4291_v54, %s4536_s29 }
 0x209   : > { %v2524_v17 = vpop.permute.xlu1 %2523 }
 0x20a   : > { %2604 = vst.msk [vmem:[#allocation3 + $0x40] sm:$0xf] %vm2587_vm12, %v2524_v17  ;;  %v2530_v59 = vpop.permute.xlu0 %2529 }
 0x20b   : > { %1777 = vrot.lane.b32.xlu1 %v4384_v37, %s4536_s29  ;;  %2607 = vst.msk [vmem:[#allocation3 + $0x4c] sm:$0xf] %vm2587_vm12, %v2530_v59 }
 0x20c   : > { %2033 = vrot.lane.b32.xlu0 %v4227_v18, %s4537_s30 }
 0x20d   : > { %v2528_v23 = vpop.permute.xlu1 %2527 }
 0x20e   : > { %2606 = vst.msk [vmem:[#allocation3 + $0x48] sm:$0xf] %vm2587_vm12, %v2528_v23  ;;  %v1503_v30 = vpop.permute.xlu0 %1502 }
 0x20f   : > { %1781 = vrot.lane.b32.xlu1 %v4292_v60, %s4536_s29  ;;  %1579 = vst.msk [vmem:[#allocation3 + $0x50] sm:$0xf] %vm1558_vm8, %v1503_v30 }
 0x210   : > { %2037 = vrot.lane.b32.xlu0 %v4323_v35, %s4537_s30 }
 0x211   : > { %v1252_v31 = vpop.permute.xlu1 %1251  ;;  %v4515_v47 = vld [vmem:[#allocation3 + $0x40] sm:$0xff]  }
 0x212   : > { %1325 = vst.msk [vmem:[#allocation3 + $0x5c] sm:$0xf] %vm1301_vm7, %v1252_v31  ;;  %4462 = vmatprep.mubr.msk.bf16.mxu1 %vm2752_vm13, %v4515_v47  ;;  %v1507_v41 = vpop.permute.xlu0 %1506 }
 0x213   : > { %2035 = vrot.lane.b32.xlu1 %v4228_v50, %s4537_s30  ;;  %1581 = vst.msk [vmem:[#allocation3 + $0x58] sm:$0xf] %vm1558_vm8, %v1507_v41 }
 0x214   : > { %2290 = vrot.lane.b32.xlu0 %v4259_v52, %s4538_s8 }
 0x215   : > { %v1505_v53 = vpop.permute.xlu1 %1504  ;;  %v4516_v2 = vld [vmem:[#allocation3 + $0x48] sm:$0xff]  }
 0x216   : > { %1580 = vst.msk [vmem:[#allocation3 + $0x54] sm:$0xf] %vm1558_vm8, %v1505_v53  ;;  %4463 = vmatmul.mubr.msk.bf16.vlgmr.msra.gmra.mxu1 %vm2752_vm13, %v4516_v2  ;;  %v1760_v46 = vpop.permute.xlu0 %1759 }
 0x217   : > { %2039 = vrot.lane.b32.xlu1 %v4324_v34, %s4537_s30  ;;  %1836 = vst.msk [vmem:[#allocation3 + $0x50] sm:$0xf] %vm1815_vm9, %v1760_v46  ;;  %s257_s30 = scalar_lea.vmem %s5778_s5, %s3739_s24 }
 0x218   : > { %2294 = vrot.lane.b32.xlu0 %v4355_v20, %s4538_s8 }
 0x219   : > { %v1509_v43 = vpop.permute.xlu1 %1508 }
 0x21a   : > { %1582 = vst.msk [vmem:[#allocation3 + $0x5c] sm:$0xf] %vm1558_vm8, %v1509_v43  ;;  %v1764_v1 = vpop.permute.xlu0 %1763 }
 0x21b   : > { %2292 = vrot.lane.b32.xlu1 %v4260_v48, %s4538_s8  ;;  %1838 = vst.msk [vmem:[#allocation3 + $0x58] sm:$0xf] %vm1815_vm9, %v1764_v1 }
 0x21c   : > { %2547 = vrot.lane.b32.xlu0 %v4291_v54, %s4539_s13 }
 0x21d   : > { %v1762_v27 = vpop.permute.xlu1 %1761 }
 0x21e   : > { %1837 = vst.msk [vmem:[#allocation3 + $0x54] sm:$0xf] %vm1815_vm9, %v1762_v27  ;;  %v2018_v16 = vpop.permute.xlu0 %2017 }
 0x21f   : > { %2296 = vrot.lane.b32.xlu1 %v4356_v0, %s4538_s8  ;;  %2094 = vst.msk [vmem:[#allocation3 + $0x50] sm:$0xf] %vm2073_vm10, %v2018_v16 }
 0x220   : > { %2551 = vrot.lane.b32.xlu0 %v4387_v4, %s4539_s13 }
 0x221   : > { %v1766_v5 = vpop.permute.xlu1 %1765 }
 0x222   : > { %1839 = vst.msk [vmem:[#allocation3 + $0x5c] sm:$0xf] %vm1815_vm9, %v1766_v5  ;;  %v2022_v10 = vpop.permute.xlu0 %2021 }
 0x223   : > { %2549 = vrot.lane.b32.xlu1 %v4292_v60, %s4539_s13  ;;  %2096 = vst.msk [vmem:[#allocation3 + $0x58] sm:$0xf] %vm2073_vm10, %v2022_v10 }
 0x225   : > { %v2020_v22 = vpop.permute.xlu1 %2019 }
 0x226   : > { %2095 = vst.msk [vmem:[#allocation3 + $0x54] sm:$0xf] %vm2073_vm10, %v2020_v22  ;;  %v2275_v13 = vpop.permute.xlu0 %2274 }
 0x227   : > { %2553 = vrot.lane.b32.xlu1 %v4388_v6, %s4539_s13  ;;  %2351 = vst.msk [vmem:[#allocation3 + $0x50] sm:$0xf] %vm2330_vm11, %v2275_v13 }
 0x229   : > { %v2024_v15 = vpop.permute.xlu1 %2023 }
 0x22a   : > { %2097 = vst.msk [vmem:[#allocation3 + $0x5c] sm:$0xf] %vm2073_vm10, %v2024_v15  ;;  %v2279_v12 = vpop.permute.xlu0 %2278 }
 0x22b   : > { %2353 = vst.msk [vmem:[#allocation3 + $0x58] sm:$0xf] %vm2330_vm11, %v2279_v12 }
 0x22d   : > { %v2277_v3 = vpop.permute.xlu1 %2276 }
 0x22e   : > { %2352 = vst.msk [vmem:[#allocation3 + $0x54] sm:$0xf] %vm2330_vm11, %v2277_v3  ;;  %v2532_v19 = vpop.permute.xlu0 %2531 }
 0x22f   : > { %2608 = vst.msk [vmem:[#allocation3 + $0x50] sm:$0xf] %vm2587_vm12, %v2532_v19 }
 0x231   : > { %v2281_v21 = vpop.permute.xlu1 %2280 }
 0x232   : > { %2354 = vst.msk [vmem:[#allocation3 + $0x5c] sm:$0xf] %vm2330_vm11, %v2281_v21  ;;  %v2536_v8 = vpop.permute.xlu0 %2535 }
 0x233   : > { %2610 = vst.msk [vmem:[#allocation3 + $0x58] sm:$0xf] %vm2587_vm12, %v2536_v8 }
 0x235   : > { %v2534_v26 = vpop.permute.xlu1 %2533 }
 0x236   : > { %2609 = vst.msk [vmem:[#allocation3 + $0x54] sm:$0xf] %vm2587_vm12, %v2534_v26  ;;  %v4448_v40 = vpop.f32.mrf.mxu0  ;;  %v1254_v28 = vpop.permute.xlu0 %1253 }
 0x237   : > { %v4391_v29 = vpack.c.bf16 %v4448_v40, %v4448_v40  ;;  %1326 = vst.msk [vmem:[#allocation3 + $0x60] sm:$0xf] %vm1301_vm7, %v1254_v28  ;;  %v3259_v9 = vsel %vm3255_vm15, %v4448_v40, 0.0  ;;  %v3329_v51 = vmul.f32 %v4448_v40, %v4448_v40  ;;  %v3433_v54 = vsel %vm3429_vm0, %v4448_v40, 0.0 }
 0x238   : > { %v2839_v42 = vpop.f32.mrf.mxu0 }
 0x239   : > { %v2538_v36 = vpop.permute.xlu1 %2537  ;;  %3097 = vst.msk [vmem:[%s5401_s17 + $0x8] sm:$0xf] %vm3094_vm14, %v4391_v29  ;;  %v4389_v37 = vpack.c.bf16 %v2839_v42, %v2839_v42  ;;  %v3327_v38 = vmul.f32 %v2839_v42, %v2839_v42  ;;  %v3256_v52 = vsel %vm3255_vm15, %v2839_v42, 0.0  ;;  %v3430_v58 = vsel %vm3429_vm0, %v2839_v42, 0.0 }
 0x23a   : > { %2611 = vst.msk [vmem:[#allocation3 + $0x5c] sm:$0xf] %vm2587_vm12, %v2538_v36  ;;  %v4449_v33 = vpop.f32.mrf.mxu0  ;;  %v1258_v18 = vpop.permute.xlu0 %1257  ;;  %v3362_v34 = vsel %vm3255_vm15, %v3329_v51, 0.0  ;;  %v3507_v41 = vsel %vm3429_vm0, %v3329_v51, 0.0 }
 0x23b   : > { %3095 = vst.msk [vmem:[%s5401_s17] sm:$0xf] %vm3094_vm14, %v4389_v37  ;;  %v4392_v44 = vpack.c.bf16 %v4449_v33, %v4449_v33  ;;  %3127 = vrot.lane.b32.xlu0 %v4389_v37, %s4540_s20  ;;  %v3359_v24 = vsel %vm3255_vm15, %v3327_v38, 0.0  ;;  %v3330_v55 = vmul.f32 %v4449_v33, %v4449_v33  ;;  %v3504_v32 = vsel %vm3429_vm0, %v3327_v38, 0.0 }
 0x23c   : > { %1328 = vst.msk [vmem:[#allocation3 + $0x68] sm:$0xf] %vm1301_vm7, %v1258_v18  ;;  %v2842_v49 = vpop.f32.mrf.mxu0  ;;  %v3261_v39 = vsel %vm3255_vm15, %v4449_v33, 0.0  ;;  %v3435_v53 = vsel %vm3429_vm0, %v4449_v33, 0.0 }
 0x23d   : > { %v1256_v45 = vpop.permute.xlu1 %1255  ;;  %v4517_v50 = vld [vmem:[#allocation3 + $0x50] sm:$0xff]   ;;  %3098 = vst.msk [vmem:[%s5401_s17 + $0xc] sm:$0xf] %vm3094_vm14, %v4392_v44  ;;  %v4390_v56 = vpack.c.bf16 %v2842_v49, %v2842_v49  ;;  %v3257_v57 = vsel %vm3255_vm15, %v2842_v49, 0.0  ;;  %v3328_v14 = vmul.f32 %v2842_v49, %v2842_v49  ;;  %v3431_v48 = vsel %vm3429_vm0, %v2842_v49, 0.0 }
 0x23e   : > { %1327 = vst.msk [vmem:[#allocation3 + $0x64] sm:$0xf] %vm1301_vm7, %v1256_v45  ;;  %v3258_v25 = vadd.f32 %v3257_v57, %v3256_v52  ;;  %4466 = vmatprep.mubr.msk.bf16.mxu1 %vm2752_vm13, %v4517_v50  ;;  %v1511_v61 = vpop.permute.xlu0 %1510  ;;  %v3432_v17 = vadd.f32 %v3431_v48, %v3430_v58  ;;  %v3364_v63 = vsel %vm3255_vm15, %v3330_v55, 0.0  ;;  %v3509_v0 = vsel %vm3429_vm0, %v3330_v55, 0.0 }
 0x23f   : > { %3096 = vst.msk [vmem:[%s5401_s17 + $0x4] sm:$0xf] %vm3094_vm14, %v4390_v56  ;;  %3131 = vrot.lane.b32.xlu0 %v4391_v29, %s4540_s20  ;;  %3129 = vrot.lane.b32.xlu1 %v4390_v56, %s4540_s20  ;;  %v3360_v60 = vsel %vm3255_vm15, %v3328_v14, 0.0  ;;  %v3505_v23 = vsel %vm3429_vm0, %v3328_v14, 0.0 }
 0x240   : > { %1583 = vst.msk [vmem:[#allocation3 + $0x60] sm:$0xf] %vm1558_vm8, %v1511_v61  ;;  %v3260_v59 = vadd.f32 %v3259_v9, %v3258_v25  ;;  %v3361_v31 = vadd.f32 %v3360_v60, %v3359_v24  ;;  %v3434_v47 = vadd.f32 %v3433_v54, %v3432_v17  ;;  %v3506_v11 = vadd.f32 %v3505_v23, %v3504_v32 }
 0x241   : > { %v1260_v35 = vpop.permute.xlu1 %1259  ;;  %v4518_v30 = vld [vmem:[#allocation3 + $0x58] sm:$0xff]  }
 0x242   : > { %1329 = vst.msk [vmem:[#allocation3 + $0x6c] sm:$0xf] %vm1301_vm7, %v1260_v35  ;;  %4467 = vmatmul.mubr.msk.bf16.gmra.mxu1 %vm2752_vm13, %v4518_v30  ;;  %v1515_v2 = vpop.permute.xlu0 %1514  ;;  %v3262_v20 = vadd.f32 %v3261_v39, %v3260_v59  ;;  %v3363_v46 = vadd.f32 %v3362_v34, %v3361_v31  ;;  %v3508_v62 = vadd.f32 %v3507_v41, %v3506_v11 }
 0x243   : > { %3133 = vrot.lane.b32.xlu1 %v4392_v44, %s4540_s20  ;;  %1585 = vst.msk [vmem:[#allocation3 + $0x68] sm:$0xf] %vm1558_vm8, %v1515_v2  ;;  %v3436_v43 = vadd.f32 %v3435_v53, %v3434_v47 }
 0x244   : > { %v3365_v27 = vadd.f32 %v3364_v63, %v3363_v46  ;;  %v3510_v4 = vadd.f32 %v3509_v0, %v3508_v62 }
 0x245   : > { %v1513_v1 = vpop.permute.xlu1 %1512 }
 0x246   : > { %1584 = vst.msk [vmem:[#allocation3 + $0x64] sm:$0xf] %vm1558_vm8, %v1513_v1  ;;  %v1768_v16 = vpop.permute.xlu0 %1767 }
 0x247   : > { %1840 = vst.msk [vmem:[#allocation3 + $0x60] sm:$0xf] %vm1815_vm9, %v1768_v16 }
 0x249   : > { %v1517_v7 = vpop.permute.xlu1 %1516 }
 0x24a   : > { %1586 = vst.msk [vmem:[#allocation3 + $0x6c] sm:$0xf] %vm1558_vm8, %v1517_v7  ;;  %v1772_v5 = vpop.permute.xlu0 %1771 }
 0x24b   : > { %1842 = vst.msk [vmem:[#allocation3 + $0x68] sm:$0xf] %vm1815_vm9, %v1772_v5 }
 0x24d   : > { %v1770_v6 = vpop.permute.xlu1 %1769 }
 0x24e   : > { %1841 = vst.msk [vmem:[#allocation3 + $0x64] sm:$0xf] %vm1815_vm9, %v1770_v6  ;;  %v2026_v10 = vpop.permute.xlu0 %2025 }
 0x24f   : > { %2098 = vst.msk [vmem:[#allocation3 + $0x60] sm:$0xf] %vm2073_vm10, %v2026_v10 }
 0x251   : > { %v1774_v22 = vpop.permute.xlu1 %1773 }
 0x252   : > { %1843 = vst.msk [vmem:[#allocation3 + $0x6c] sm:$0xf] %vm1815_vm9, %v1774_v22  ;;  %v2030_v13 = vpop.permute.xlu0 %2029 }
 0x253   : > { %2100 = vst.msk [vmem:[#allocation3 + $0x68] sm:$0xf] %vm2073_vm10, %v2030_v13 }
 0x255   : > { %v2028_v15 = vpop.permute.xlu1 %2027 }
 0x256   : > { %2099 = vst.msk [vmem:[#allocation3 + $0x64] sm:$0xf] %vm2073_vm10, %v2028_v15  ;;  %v2283_v12 = vpop.permute.xlu0 %2282 }
 0x257   : > { %2355 = vst.msk [vmem:[#allocation3 + $0x60] sm:$0xf] %vm2330_vm11, %v2283_v12 }
 0x259   : > { %v2032_v3 = vpop.permute.xlu1 %2031 }
 0x25a   : > { %2101 = vst.msk [vmem:[#allocation3 + $0x6c] sm:$0xf] %vm2073_vm10, %v2032_v3  ;;  %v2287_v19 = vpop.permute.xlu0 %2286 }
 0x25b   : > { %2357 = vst.msk [vmem:[#allocation3 + $0x68] sm:$0xf] %vm2330_vm11, %v2287_v19 }
 0x25d   : > { %v2285_v21 = vpop.permute.xlu1 %2284 }
 0x25e   : > { %2356 = vst.msk [vmem:[#allocation3 + $0x64] sm:$0xf] %vm2330_vm11, %v2285_v21  ;;  %v4452_v8 = vpop.f32.mrf.mxu0  ;;  %v2540_v26 = vpop.permute.xlu0 %2539 }
 0x25f   : > { %v4395_v40 = vpack.c.bf16 %v4452_v8, %v4452_v8  ;;  %2612 = vst.msk [vmem:[#allocation3 + $0x60] sm:$0xf] %vm2587_vm12, %v2540_v26  ;;  %v3333_v56 = vmul.f32 %v4452_v8, %v4452_v8  ;;  %v3267_v24 = vsel %vm3255_vm15, %v4452_v8, 0.0  ;;  %v3441_v32 = vsel %vm3429_vm0, %v4452_v8, 0.0 }
 0x260   : > { %v2855_v29 = vpop.f32.mrf.mxu0 }
 0x261   : > { %v2289_v28 = vpop.permute.xlu1 %2288  ;;  %3101 = vst.msk [vmem:[%s5401_s17 + $0x18] sm:$0xf] %vm3094_vm14, %v4395_v40  ;;  %v4393_v36 = vpack.c.bf16 %v2855_v29, %v2855_v29  ;;  %v3263_v42 = vsel %vm3255_vm15, %v2855_v29, 0.0  ;;  %v3331_v33 = vmul.f32 %v2855_v29, %v2855_v29  ;;  %v3437_v18 = vsel %vm3429_vm0, %v2855_v29, 0.0 }
 0x262   : > { %2358 = vst.msk [vmem:[#allocation3 + $0x6c] sm:$0xf] %vm2330_vm11, %v2289_v28  ;;  %v3264_v37 = vadd.f32 %v3263_v42, %v3262_v20  ;;  %v4453_v38 = vpop.f32.mrf.mxu0  ;;  %v2544_v44 = vpop.permute.xlu0 %2543  ;;  %v3438_v9 = vadd.f32 %v3437_v18, %v3436_v43  ;;  %v3370_v11 = vsel %vm3255_vm15, %v3333_v56, 0.0  ;;  %v3515_v34 = vsel %vm3429_vm0, %v3333_v56, 0.0 }
 0x263   : > { %3099 = vst.msk [vmem:[%s5401_s17 + $0x10] sm:$0xf] %vm3094_vm14, %v4393_v36  ;;  %v4396_v45 = vpack.c.bf16 %v4453_v38, %v4453_v38  ;;  %3135 = vrot.lane.b32.xlu0 %v4393_v36, %s4540_s20  ;;  %v3366_v49 = vsel %vm3255_vm15, %v3331_v33, 0.0  ;;  %v3511_v50 = vsel %vm3429_vm0, %v3331_v33, 0.0  ;;  %v3334_v59 = vmul.f32 %v4453_v38, %v4453_v38 }
 0x264   : > { %2614 = vst.msk [vmem:[#allocation3 + $0x68] sm:$0xf] %vm2587_vm12, %v2544_v44  ;;  %v2858_v52 = vpop.f32.mrf.mxu0  ;;  %v3367_v57 = vadd.f32 %v3366_v49, %v3365_v27  ;;  %v3512_v58 = vadd.f32 %v3511_v50, %v3510_v4  ;;  %v3269_v41 = vsel %vm3255_vm15, %v4453_v38, 0.0  ;;  %v3443_v53 = vsel %vm3429_vm0, %v4453_v38, 0.0 }
 0x265   : > { %v2542_v51 = vpop.permute.xlu1 %2541  ;;  %3102 = vst.msk [vmem:[%s5401_s17 + $0x1c] sm:$0xf] %vm3094_vm14, %v4396_v45  ;;  %v4394_v25 = vpack.c.bf16 %v2858_v52, %v2858_v52  ;;  %v3265_v14 = vsel %vm3255_vm15, %v2858_v52, 0.0  ;;  %v3332_v48 = vmul.f32 %v2858_v52, %v2858_v52  ;;  %v3439_v61 = vsel %vm3429_vm0, %v2858_v52, 0.0 }
 0x266   : > { %2613 = vst.msk [vmem:[#allocation3 + $0x64] sm:$0xf] %vm2587_vm12, %v2542_v51  ;;  %v1262_v54 = vpop.permute.xlu0 %1261  ;;  %v3266_v55 = vadd.f32 %v3265_v14, %v3264_v37  ;;  %v3440_v17 = vadd.f32 %v3439_v61, %v3438_v9  ;;  %v3372_v63 = vsel %vm3255_vm15, %v3334_v59, 0.0  ;;  %v3517_v0 = vsel %vm3429_vm0, %v3334_v59, 0.0 }
 0x267   : > { %3139 = vrot.lane.b32.xlu0 %v4395_v40, %s4540_s20  ;;  %1330 = vst.msk [vmem:[#allocation3 + $0x70] sm:$0xf] %vm1301_vm7, %v1262_v54  ;;  %v3368_v60 = vsel %vm3255_vm15, %v3332_v48, 0.0  ;;  %v3513_v23 = vsel %vm3429_vm0, %v3332_v48, 0.0  ;;  %3137 = vrot.lane.b32.xlu1 %v4394_v25, %s4540_s20 }
 0x268   : > { %3100 = vst.msk [vmem:[%s5401_s17 + $0x14] sm:$0xf] %vm3094_vm14, %v4394_v25  ;;  %v3268_v30 = vadd.f32 %v3267_v24, %v3266_v55  ;;  %v3369_v39 = vadd.f32 %v3368_v60, %v3367_v57  ;;  %v3442_v31 = vadd.f32 %v3441_v32, %v3440_v17  ;;  %v3514_v47 = vadd.f32 %v3513_v23, %v3512_v58 }
 0x269   : > { %v2546_v35 = vpop.permute.xlu1 %2545 }
 0x26a   : > { %2615 = vst.msk [vmem:[#allocation3 + $0x6c] sm:$0xf] %vm2587_vm12, %v2546_v35  ;;  %v1266_v2 = vpop.permute.xlu0 %1265  ;;  %v3371_v20 = vadd.f32 %v3370_v11, %v3369_v39  ;;  %v3516_v46 = vadd.f32 %v3515_v34, %v3514_v47  ;;  %v3270_v62 = vadd.f32 %v3269_v41, %v3268_v30  ;;  %v3444_v43 = vadd.f32 %v3443_v53, %v3442_v31 }
 0x26b   : > { %1332 = vst.msk [vmem:[#allocation3 + $0x78] sm:$0xf] %vm1301_vm7, %v1266_v2  ;;  %3141 = vrot.lane.b32.xlu1 %v4396_v45, %s4540_s20 }
 0x26c   : > { %v3373_v4 = vadd.f32 %v3372_v63, %v3371_v20  ;;  %v3518_v16 = vadd.f32 %v3517_v0, %v3516_v46 }
 0x26d   : > { %v1264_v1 = vpop.permute.xlu1 %1263  ;;  %v4519_v27 = vld [vmem:[#allocation3 + $0x60] sm:$0xff]  }
 0x26e   : > { %1331 = vst.msk [vmem:[#allocation3 + $0x74] sm:$0xf] %vm1301_vm7, %v1264_v1  ;;  %4470 = vmatprep.mubr.msk.bf16.mxu1 %vm2752_vm13, %v4519_v27  ;;  %v1519_v7 = vpop.permute.xlu0 %1518 }
 0x26f   : > { %1587 = vst.msk [vmem:[#allocation3 + $0x70] sm:$0xf] %vm1558_vm8, %v1519_v7 }
 0x271   : > { %v1268_v5 = vpop.permute.xlu1 %1267  ;;  %v4520_v6 = vld [vmem:[#allocation3 + $0x68] sm:$0xff]  }
 0x272   : > { %1333 = vst.msk [vmem:[#allocation3 + $0x7c] sm:$0xf] %vm1301_vm7, %v1268_v5  ;;  %4471 = vmatmul.mubr.msk.bf16.gmra.mxu1 %vm2752_vm13, %v4520_v6  ;;  %v1523_v10 = vpop.permute.xlu0 %1522 }
 0x273   : > { %1589 = vst.msk [vmem:[#allocation3 + $0x78] sm:$0xf] %vm1558_vm8, %v1523_v10 }
 0x275   : > { %v1521_v22 = vpop.permute.xlu1 %1520 }
 0x276   : > { %1588 = vst.msk [vmem:[#allocation3 + $0x74] sm:$0xf] %vm1558_vm8, %v1521_v22  ;;  %v1776_v13 = vpop.permute.xlu0 %1775 }
 0x277   : > { %1844 = vst.msk [vmem:[#allocation3 + $0x70] sm:$0xf] %vm1815_vm9, %v1776_v13 }
 0x279   : > { %v1525_v15 = vpop.permute.xlu1 %1524 }
 0x27a   : > { %1590 = vst.msk [vmem:[#allocation3 + $0x7c] sm:$0xf] %vm1558_vm8, %v1525_v15  ;;  %v1780_v12 = vpop.permute.xlu0 %1779 }
 0x27b   : > { %1846 = vst.msk [vmem:[#allocation3 + $0x78] sm:$0xf] %vm1815_vm9, %v1780_v12 }
 0x27d   : > { %v1778_v3 = vpop.permute.xlu1 %1777 }
 0x27e   : > { %1845 = vst.msk [vmem:[#allocation3 + $0x74] sm:$0xf] %vm1815_vm9, %v1778_v3  ;;  %v2034_v19 = vpop.permute.xlu0 %2033 }
 0x27f   : > { %2102 = vst.msk [vmem:[#allocation3 + $0x70] sm:$0xf] %vm2073_vm10, %v2034_v19 }
 0x281   : > { %v1782_v21 = vpop.permute.xlu1 %1781 }
 0x282   : > { %1847 = vst.msk [vmem:[#allocation3 + $0x7c] sm:$0xf] %vm1815_vm9, %v1782_v21  ;;  %v2038_v8 = vpop.permute.xlu0 %2037 }
 0x283   : > { %2104 = vst.msk [vmem:[#allocation3 + $0x78] sm:$0xf] %vm2073_vm10, %v2038_v8 }
 0x285   : > { %v2036_v26 = vpop.permute.xlu1 %2035 }
 0x286   : > { %2103 = vst.msk [vmem:[#allocation3 + $0x74] sm:$0xf] %vm2073_vm10, %v2036_v26  ;;  %v4456_v40 = vpop.f32.mrf.mxu0  ;;  %v2291_v28 = vpop.permute.xlu0 %2290 }
 0x287   : > { %v4399_v29 = vpack.c.bf16 %v4456_v40, %v4456_v40  ;;  %2359 = vst.msk [vmem:[#allocation3 + $0x70] sm:$0xf] %vm2330_vm11, %v2291_v28  ;;  %v3337_v58 = vmul.f32 %v4456_v40, %v4456_v40  ;;  %v3275_v17 = vsel %vm3255_vm15, %v4456_v40, 0.0  ;;  %v3449_v60 = vsel %vm3429_vm0, %v4456_v40, 0.0 }
 0x288   : > { %v2871_v42 = vpop.f32.mrf.mxu0 }
 0x289   : > { %v2040_v36 = vpop.permute.xlu1 %2039  ;;  %3105 = vst.msk [vmem:[%s5401_s17 + $0x28] sm:$0xf] %vm3094_vm14, %v4399_v29  ;;  %v4397_v37 = vpack.c.bf16 %v2871_v42, %v2871_v42  ;;  %v3271_v33 = vsel %vm3255_vm15, %v2871_v42, 0.0  ;;  %v3335_v38 = vmul.f32 %v2871_v42, %v2871_v42  ;;  %v3445_v44 = vsel %vm3429_vm0, %v2871_v42, 0.0 }
 0x28a   : > { %2105 = vst.msk [vmem:[#allocation3 + $0x7c] sm:$0xf] %vm2073_vm10, %v2040_v36  ;;  %v3272_v18 = vadd.f32 %v3271_v33, %v3270_v62  ;;  %v4457_v9 = vpop.f32.mrf.mxu0  ;;  %v2295_v45 = vpop.permute.xlu0 %2294  ;;  %v3446_v49 = vadd.f32 %v3445_v44, %v3444_v43  ;;  %v3378_v41 = vsel %vm3255_vm15, %v3337_v58, 0.0  ;;  %v3523_v53 = vsel %vm3429_vm0, %v3337_v58, 0.0 }
 0x28b   : > { %3103 = vst.msk [vmem:[%s5401_s17 + $0x20] sm:$0xf] %vm3094_vm14, %v4397_v37  ;;  %v4400_v50 = vpack.c.bf16 %v4457_v9, %v4457_v9  ;;  %3143 = vrot.lane.b32.xlu0 %v4397_v37, %s4540_s20  ;;  %v3374_v51 = vsel %vm3255_vm15, %v3335_v38, 0.0  ;;  %v3519_v52 = vsel %vm3429_vm0, %v3335_v38, 0.0  ;;  %v3338_v23 = vmul.f32 %v4457_v9, %v4457_v9 }
 0x28c   : > { %2361 = vst.msk [vmem:[#allocation3 + $0x78] sm:$0xf] %vm2330_vm11, %v2295_v45  ;;  %v2874_v57 = vpop.f32.mrf.mxu0  ;;  %v3375_v25 = vadd.f32 %v3374_v51, %v3373_v4  ;;  %v3520_v14 = vadd.f32 %v3519_v52, %v3518_v16  ;;  %v3277_v2 = vsel %vm3255_vm15, %v4457_v9, 0.0  ;;  %v3451_v20 = vsel %vm3429_vm0, %v4457_v9, 0.0 }
 0x28d   : > { %v2293_v56 = vpop.permute.xlu1 %2292  ;;  %3106 = vst.msk [vmem:[%s5401_s17 + $0x2c] sm:$0xf] %vm3094_vm14, %v4400_v50  ;;  %v4398_v48 = vpack.c.bf16 %v2874_v57, %v2874_v57  ;;  %v3273_v61 = vsel %vm3255_vm15, %v2874_v57, 0.0  ;;  %v3336_v54 = vmul.f32 %v2874_v57, %v2874_v57  ;;  %v3447_v24 = vsel %vm3429_vm0, %v2874_v57, 0.0 }
 0x28e   : > { %2360 = vst.msk [vmem:[#allocation3 + $0x74] sm:$0xf] %vm2330_vm11, %v2293_v56  ;;  %v2548_v55 = vpop.permute.xlu0 %2547  ;;  %v3274_v32 = vadd.f32 %v3273_v61, %v3272_v18  ;;  %v3448_v59 = vadd.f32 %v3447_v24, %v3446_v49  ;;  %v3380_v1 = vsel %vm3255_vm15, %v3338_v23, 0.0  ;;  %v3525_v27 = vsel %vm3429_vm0, %v3338_v23, 0.0 }
 0x28f   : > { %3147 = vrot.lane.b32.xlu0 %v4399_v29, %s4540_s20  ;;  %2616 = vst.msk [vmem:[#allocation3 + $0x70] sm:$0xf] %vm2587_vm12, %v2548_v55  ;;  %v3376_v35 = vsel %vm3255_vm15, %v3336_v54, 0.0  ;;  %v3521_v30 = vsel %vm3429_vm0, %v3336_v54, 0.0  ;;  %3145 = vrot.lane.b32.xlu1 %v4398_v48, %s4540_s20 }
 0x290   : > { %3104 = vst.msk [vmem:[%s5401_s17 + $0x24] sm:$0xf] %vm3094_vm14, %v4398_v48  ;;  %v3276_v31 = vadd.f32 %v3275_v17, %v3274_v32  ;;  %v3377_v47 = vadd.f32 %v3376_v35, %v3375_v25  ;;  %v3450_v11 = vadd.f32 %v3449_v60, %v3448_v59  ;;  %v3522_v34 = vadd.f32 %v3521_v30, %v3520_v14 }
 0x291   : > { %v2297_v39 = vpop.permute.xlu1 %2296 }
 0x292   : > { %2362 = vst.msk [vmem:[#allocation3 + $0x7c] sm:$0xf] %vm2330_vm11, %v2297_v39  ;;  %v2552_v46 = vpop.permute.xlu0 %2551  ;;  %v3379_v62 = vadd.f32 %v3378_v41, %v3377_v47  ;;  %v3524_v43 = vadd.f32 %v3523_v53, %v3522_v34  ;;  %v3278_v63 = vadd.f32 %v3277_v2, %v3276_v31  ;;  %v3452_v0 = vadd.f32 %v3451_v20, %v3450_v11 }
 0x293   : > { %2618 = vst.msk [vmem:[#allocation3 + $0x78] sm:$0xf] %vm2587_vm12, %v2552_v46  ;;  %3149 = vrot.lane.b32.xlu1 %v4400_v50, %s4540_s20 }
 0x294   : > { %v3381_v16 = vadd.f32 %v3380_v1, %v3379_v62  ;;  %v3526_v7 = vadd.f32 %v3525_v27, %v3524_v43 }
 0x295   : > { %v2550_v4 = vpop.permute.xlu1 %2549 }
 0x296   : > { %2617 = vst.msk [vmem:[#allocation3 + $0x74] sm:$0xf] %vm2587_vm12, %v2550_v4 }
 0x299   : > { %v2554_v5 = vpop.permute.xlu1 %2553 }
 0x29a   : > { %2619 = vst.msk [vmem:[#allocation3 + $0x7c] sm:$0xf] %vm2587_vm12, %v2554_v5 }
 0x29d   : > { %v4521_v6 = vld [vmem:[#allocation3 + $0x70] sm:$0xff]  }
 0x29e   : > { %4474 = vmatprep.mubr.msk.bf16.mxu1 %vm2752_vm13, %v4521_v6 }
 0x2a1   : > { %v4522_v10 = vld [vmem:[#allocation3 + $0x78] sm:$0xff]  }
 0x2a2   : > { %4475 = vmatmul.mubr.msk.bf16.gmra.mxu1 %vm2752_vm13, %v4522_v10 }
 0x2ad   : > { %v3128_v22 = vpop.permute.xlu0 %3127 }
 0x2ae   : > { %3223 = vst.msk [vmem:[%s5547_s23] sm:$0xf] %vm3094_vm14, %v3128_v22  ;;  %v4460_v13 = vpop.f32.mrf.mxu0 }
 0x2af   : > { %v4403_v15 = vpack.c.bf16 %v4460_v13, %v4460_v13  ;;  %v3341_v38 = vmul.f32 %v4460_v13, %v4460_v13  ;;  %v3283_v56 = vsel %vm3255_vm15, %v4460_v13, 0.0  ;;  %v3457_v57 = vsel %vm3429_vm0, %v4460_v13, 0.0 }
 0x2b0   : > { %v2887_v12 = vpop.f32.mrf.mxu0 }
 0x2b1   : > { %3109 = vst.msk [vmem:[%s5401_s17 + $0x38] sm:$0xf] %vm3094_vm14, %v4403_v15  ;;  %v4401_v3 = vpack.c.bf16 %v2887_v12, %v2887_v12  ;;  %v3279_v19 = vsel %vm3255_vm15, %v2887_v12, 0.0  ;;  %v3132_v21 = vpop.permute.xlu0 %3131  ;;  %v3130_v8 = vpop.permute.xlu1 %3129  ;;  %v3339_v26 = vmul.f32 %v2887_v12, %v2887_v12  ;;  %v3453_v40 = vsel %vm3429_vm0, %v2887_v12, 0.0 }
 0x2b2   : > { %3225 = vst.msk [vmem:[%s5547_s23 + $0x8] sm:$0xf] %vm3094_vm14, %v3132_v21  ;;  %3224 = vst.msk [vmem:[%s5547_s23 + $0x4] sm:$0xf] %vm3094_vm14, %v3130_v8  ;;  %v4461_v28 = vpop.f32.mrf.mxu0  ;;  %v3280_v29 = vadd.f32 %v3279_v19, %v3278_v63  ;;  %v3454_v18 = vadd.f32 %v3453_v40, %v3452_v0  ;;  %v3386_v59 = vsel %vm3255_vm15, %v3341_v38, 0.0  ;;  %v3531_v60 = vsel %vm3429_vm0, %v3341_v38, 0.0 }
 0x2b3   : > { %3107 = vst.msk [vmem:[%s5401_s17 + $0x30] sm:$0xf] %vm3094_vm14, %v4401_v3  ;;  %v4404_v36 = vpack.c.bf16 %v4461_v28, %v4461_v28  ;;  %3151 = vrot.lane.b32.xlu0 %v4401_v3, %s4540_s20  ;;  %v3382_v42 = vsel %vm3255_vm15, %v3339_v26, 0.0  ;;  %v3527_v37 = vsel %vm3429_vm0, %v3339_v26, 0.0  ;;  %v3342_v14 = vmul.f32 %v4461_v28, %v4461_v28 }
 0x2b4   : > { %v2890_v33 = vpop.f32.mrf.mxu0  ;;  %v3383_v51 = vadd.f32 %v3382_v42, %v3381_v16  ;;  %v3528_v25 = vadd.f32 %v3527_v37, %v3526_v7  ;;  %v3285_v24 = vsel %vm3255_vm15, %v4461_v28, 0.0  ;;  %v3459_v23 = vsel %vm3429_vm0, %v4461_v28, 0.0 }
 0x2b5   : > { %3110 = vst.msk [vmem:[%s5401_s17 + $0x3c] sm:$0xf] %vm3094_vm14, %v4404_v36  ;;  %v4402_v44 = vpack.c.bf16 %v2890_v33, %v2890_v33  ;;  %v3281_v9 = vsel %vm3255_vm15, %v2890_v33, 0.0  ;;  %v3134_v45 = vpop.permute.xlu1 %3133  ;;  %v3340_v50 = vmul.f32 %v2890_v33, %v2890_v33  ;;  %v3455_v52 = vsel %vm3429_vm0, %v2890_v33, 0.0 }
 0x2b6   : > { %v3282_v49 = vadd.f32 %v3281_v9, %v3280_v29  ;;  %3226 = vst.msk [vmem:[%s5547_s23 + $0xc] sm:$0xf] %vm3094_vm14, %v3134_v45  ;;  %v3456_v58 = vadd.f32 %v3455_v52, %v3454_v18  ;;  %v3388_v47 = vsel %vm3255_vm15, %v3342_v14, 0.0  ;;  %v3533_v11 = vsel %vm3429_vm0, %v3342_v14, 0.0 }
 0x2b7   : > { %3108 = vst.msk [vmem:[%s5401_s17 + $0x34] sm:$0xf] %vm3094_vm14, %v4402_v44  ;;  %3155 = vrot.lane.b32.xlu0 %v4403_v15, %s4540_s20  ;;  %3153 = vrot.lane.b32.xlu1 %v4402_v44, %s4540_s20  ;;  %v3384_v61 = vsel %vm3255_vm15, %v3340_v50, 0.0  ;;  %v3529_v54 = vsel %vm3429_vm0, %v3340_v50, 0.0 }
 0x2b8   : > { %v3284_v48 = vadd.f32 %v3283_v56, %v3282_v49  ;;  %v3385_v55 = vadd.f32 %v3384_v61, %v3383_v51  ;;  %v3458_v17 = vadd.f32 %v3457_v57, %v3456_v58  ;;  %v3530_v32 = vadd.f32 %v3529_v54, %v3528_v25 }
 0x2ba   : > { %v3286_v35 = vadd.f32 %v3285_v24, %v3284_v48  ;;  %v3387_v30 = vadd.f32 %v3386_v59, %v3385_v55  ;;  %v3460_v39 = vadd.f32 %v3459_v23, %v3458_v17  ;;  %v3532_v31 = vadd.f32 %v3531_v60, %v3530_v32 }
 0x2bb   : > { %3157 = vrot.lane.b32.xlu1 %v4404_v36, %s4540_s20 }
 0x2bc   : > { %v3389_v34 = vadd.f32 %v3388_v47, %v3387_v30  ;;  %v3534_v41 = vadd.f32 %v3533_v11, %v3532_v31 }
 0x2d5   : > { %v3136_v53 = vpop.permute.xlu0 %3135 }
 0x2d6   : > { %3227 = vst.msk [vmem:[%s5547_s23 + $0x10] sm:$0xf] %vm3094_vm14, %v3136_v53  ;;  %v4464_v2 = vpop.f32.mrf.mxu1 }
 0x2d7   : > { %v4407_v20 = vpack.c.bf16 %v4464_v2, %v4464_v2  ;;  %v3345_v13 = vmul.f32 %v4464_v2, %v4464_v2  ;;  %v3291_v40 = vsel %vm3255_vm15, %v4464_v2, 0.0  ;;  %v3465_v36 = vsel %vm3429_vm0, %v4464_v2, 0.0 }
 0x2d8   : > { %v2903_v46 = vpop.f32.mrf.mxu1 }
 0x2d9   : > { %3113 = vst.msk [vmem:[%s5401_s17 + $0x48] sm:$0xf] %vm3094_vm14, %v4407_v20  ;;  %v4405_v62 = vpack.c.bf16 %v2903_v46, %v2903_v46  ;;  %v3287_v43 = vsel %vm3255_vm15, %v2903_v46, 0.0  ;;  %v3140_v63 = vpop.permute.xlu0 %3139  ;;  %v3343_v1 = vmul.f32 %v2903_v46, %v2903_v46  ;;  %v3461_v27 = vsel %vm3429_vm0, %v2903_v46, 0.0  ;;  %v3138_v4 = vpop.permute.xlu1 %3137 }
 0x2da   : > { %v3288_v0 = vadd.f32 %v3287_v43, %v3286_v35  ;;  %3229 = vst.msk [vmem:[%s5547_s23 + $0x18] sm:$0xf] %vm3094_vm14, %v3140_v63  ;;  %v4465_v16 = vpop.f32.mrf.mxu1  ;;  %v3462_v7 = vadd.f32 %v3461_v27, %v3460_v39  ;;  %3228 = vst.msk [vmem:[%s5547_s23 + $0x14] sm:$0xf] %vm3094_vm14, %v3138_v4  ;;  %v3394_v45 = vsel %vm3255_vm15, %v3345_v13, 0.0  ;;  %v3539_v49 = vsel %vm3429_vm0, %v3345_v13, 0.0 }
 0x2db   : > { %3111 = vst.msk [vmem:[%s5401_s17 + $0x40] sm:$0xf] %vm3094_vm14, %v4405_v62  ;;  %v4408_v5 = vpack.c.bf16 %v4465_v16, %v4465_v16  ;;  %3159 = vrot.lane.b32.xlu0 %v4405_v62, %s4540_s20  ;;  %v3390_v6 = vsel %vm3255_vm15, %v3343_v1, 0.0  ;;  %v3535_v10 = vsel %vm3429_vm0, %v3343_v1, 0.0  ;;  %v3346_v42 = vmul.f32 %v4465_v16, %v4465_v16 }
 0x2dc   : > { %v2906_v22 = vpop.f32.mrf.mxu1  ;;  %v3391_v15 = vadd.f32 %v3390_v6, %v3389_v34  ;;  %v3536_v12 = vadd.f32 %v3535_v10, %v3534_v41  ;;  %v3293_v50 = vsel %vm3255_vm15, %v4465_v16, 0.0  ;;  %v3467_v51 = vsel %vm3429_vm0, %v4465_v16, 0.0 }
 0x2dd   : > { %3114 = vst.msk [vmem:[%s5401_s17 + $0x4c] sm:$0xf] %vm3094_vm14, %v4408_v5  ;;  %v4406_v3 = vpack.c.bf16 %v2906_v22, %v2906_v22  ;;  %v3289_v19 = vsel %vm3255_vm15, %v2906_v22, 0.0  ;;  %v3344_v21 = vmul.f32 %v2906_v22, %v2906_v22  ;;  %v3463_v8 = vsel %vm3429_vm0, %v2906_v22, 0.0  ;;  %v3142_v26 = vpop.permute.xlu1 %3141 }
 0x2de   : > { %v3290_v28 = vadd.f32 %v3289_v19, %v3288_v0  ;;  %v3464_v29 = vadd.f32 %v3463_v8, %v3462_v7  ;;  %3230 = vst.msk [vmem:[%s5547_s23 + $0x1c] sm:$0xf] %vm3094_vm14, %v3142_v26  ;;  %v3396_v25 = vsel %vm3255_vm15, %v3346_v42, 0.0  ;;  %v3541_v14 = vsel %vm3429_vm0, %v3346_v42, 0.0 }
 0x2df   : > { %3163 = vrot.lane.b32.xlu0 %v4407_v20, %s4540_s20  ;;  %3112 = vst.msk [vmem:[%s5401_s17 + $0x44] sm:$0xf] %vm3094_vm14, %v4406_v3  ;;  %v3392_v37 = vsel %vm3255_vm15, %v3344_v21, 0.0  ;;  %v3537_v33 = vsel %vm3429_vm0, %v3344_v21, 0.0  ;;  %3161 = vrot.lane.b32.xlu1 %v4406_v3, %s4540_s20 }
 0x2e0   : > { %v3292_v18 = vadd.f32 %v3291_v40, %v3290_v28  ;;  %v3393_v38 = vadd.f32 %v3392_v37, %v3391_v15  ;;  %v3466_v44 = vadd.f32 %v3465_v36, %v3464_v29  ;;  %v3538_v9 = vadd.f32 %v3537_v33, %v3536_v12 }
 0x2e2   : > { %v3395_v52 = vadd.f32 %v3394_v45, %v3393_v38  ;;  %v3540_v56 = vadd.f32 %v3539_v49, %v3538_v9  ;;  %v3294_v57 = vadd.f32 %v3293_v50, %v3292_v18  ;;  %v3468_v58 = vadd.f32 %v3467_v51, %v3466_v44 }
 0x2e3   : > { %3165 = vrot.lane.b32.xlu1 %v4408_v5, %s4540_s20 }
 0x2e4   : > { %v3397_v48 = vadd.f32 %v3396_v25, %v3395_v52  ;;  %v3542_v61 = vadd.f32 %v3541_v14, %v3540_v56 }
 0x2fd   : > { %v3144_v54 = vpop.permute.xlu0 %3143 }
 0x2fe   : > { %3231 = vst.msk [vmem:[%s5547_s23 + $0x20] sm:$0xf] %vm3094_vm14, %v3144_v54 }
 0x301   : > { %v3148_v24 = vpop.permute.xlu0 %3147  ;;  %v3146_v55 = vpop.permute.xlu1 %3145 }
 0x302   : > { %3233 = vst.msk [vmem:[%s5547_s23 + $0x28] sm:$0xf] %vm3094_vm14, %v3148_v24  ;;  %v4468_v17 = vpop.f32.mrf.mxu1  ;;  %3232 = vst.msk [vmem:[%s5547_s23 + $0x24] sm:$0xf] %vm3094_vm14, %v3146_v55 }
 0x303   : > { %v4411_v32 = vpack.c.bf16 %v4468_v17, %v4468_v17  ;;  %v3349_v20 = vmul.f32 %v4468_v17, %v4468_v17  ;;  %v3299_v27 = vsel %vm3255_vm15, %v4468_v17, 0.0  ;;  %v3473_v7 = vsel %vm3429_vm0, %v4468_v17, 0.0 }
 0x304   : > { %v2919_v59 = vpop.f32.mrf.mxu1 }
 0x305   : > { %3117 = vst.msk [vmem:[%s5401_s17 + $0x58] sm:$0xf] %vm3094_vm14, %v4411_v32  ;;  %v4409_v60 = vpack.c.bf16 %v2919_v59, %v2919_v59  ;;  %v3295_v23 = vsel %vm3255_vm15, %v2919_v59, 0.0  ;;  %v3347_v30 = vmul.f32 %v2919_v59, %v2919_v59  ;;  %v3469_v39 = vsel %vm3429_vm0, %v2919_v59, 0.0  ;;  %v3150_v31 = vpop.permute.xlu1 %3149 }
 0x306   : > { %v3296_v35 = vadd.f32 %v3295_v23, %v3294_v57  ;;  %v4469_v47 = vpop.f32.mrf.mxu1  ;;  %v3470_v11 = vadd.f32 %v3469_v39, %v3468_v58  ;;  %3234 = vst.msk [vmem:[%s5547_s23 + $0x2c] sm:$0xf] %vm3094_vm14, %v3150_v31  ;;  %v3402_v3 = vsel %vm3255_vm15, %v3349_v20, 0.0  ;;  %v3547_v19 = vsel %vm3429_vm0, %v3349_v20, 0.0 }
 0x307   : > { %3115 = vst.msk [vmem:[%s5401_s17 + $0x50] sm:$0xf] %vm3094_vm14, %v4409_v60  ;;  %v4412_v34 = vpack.c.bf16 %v4469_v47, %v4469_v47  ;;  %3167 = vrot.lane.b32.xlu0 %v4409_v60, %s4540_s20  ;;  %v3398_v41 = vsel %vm3255_vm15, %v3347_v30, 0.0  ;;  %v3543_v53 = vsel %vm3429_vm0, %v3347_v30, 0.0  ;;  %v3350_v5 = vmul.f32 %v4469_v47, %v4469_v47 }
 0x308   : > { %v2922_v2 = vpop.f32.mrf.mxu1  ;;  %v3399_v46 = vadd.f32 %v3398_v41, %v3397_v48  ;;  %v3544_v62 = vadd.f32 %v3543_v53, %v3542_v61  ;;  %v3301_v21 = vsel %vm3255_vm15, %v4469_v47, 0.0  ;;  %v3475_v8 = vsel %vm3429_vm0, %v4469_v47, 0.0 }
 0x309   : > { %3118 = vst.msk [vmem:[%s5401_s17 + $0x5c] sm:$0xf] %vm3094_vm14, %v4412_v34  ;;  %v4410_v43 = vpack.c.bf16 %v2922_v2, %v2922_v2  ;;  %v3297_v63 = vsel %vm3255_vm15, %v2922_v2, 0.0  ;;  %v3348_v0 = vmul.f32 %v2922_v2, %v2922_v2  ;;  %v3471_v1 = vsel %vm3429_vm0, %v2922_v2, 0.0 }
 0x30a   : > { %v3298_v4 = vadd.f32 %v3297_v63, %v3296_v35  ;;  %v3472_v16 = vadd.f32 %v3471_v1, %v3470_v11  ;;  %v3404_v36 = vsel %vm3255_vm15, %v3350_v5, 0.0  ;;  %v3549_v42 = vsel %vm3429_vm0, %v3350_v5, 0.0 }
 0x30b   : > { %3171 = vrot.lane.b32.xlu0 %v4411_v32, %s4540_s20  ;;  %3116 = vst.msk [vmem:[%s5401_s17 + $0x54] sm:$0xf] %vm3094_vm14, %v4410_v43  ;;  %v3400_v6 = vsel %vm3255_vm15, %v3348_v0, 0.0  ;;  %v3545_v10 = vsel %vm3429_vm0, %v3348_v0, 0.0  ;;  %3169 = vrot.lane.b32.xlu1 %v4410_v43, %s4540_s20 }
 0x30c   : > { %v3300_v22 = vadd.f32 %v3299_v27, %v3298_v4  ;;  %v3401_v13 = vadd.f32 %v3400_v6, %v3399_v46  ;;  %v3474_v15 = vadd.f32 %v3473_v7, %v3472_v16  ;;  %v3546_v12 = vadd.f32 %v3545_v10, %v3544_v62 }
 0x30e   : > { %v3403_v26 = vadd.f32 %v3402_v3, %v3401_v13  ;;  %v3548_v40 = vadd.f32 %v3547_v19, %v3546_v12  ;;  %v3302_v28 = vadd.f32 %v3301_v21, %v3300_v22  ;;  %v3476_v29 = vadd.f32 %v3475_v8, %v3474_v15 }
 0x30f   : > { %3173 = vrot.lane.b32.xlu1 %v4412_v34, %s4540_s20 }
 0x310   : > { %v3405_v37 = vadd.f32 %v3404_v36, %v3403_v26  ;;  %v3550_v33 = vadd.f32 %v3549_v42, %v3548_v40 }
 0x325   : > { %v3152_v18 = vpop.permute.xlu0 %3151 }
 0x326   : > { %3235 = vst.msk [vmem:[%s5547_s23 + $0x30] sm:$0xf] %vm3094_vm14, %v3152_v18 }
 0x329   : > { %v3156_v38 = vpop.permute.xlu0 %3155  ;;  %v3154_v44 = vpop.permute.xlu1 %3153 }
 0x32a   : > { %3237 = vst.msk [vmem:[%s5547_s23 + $0x38] sm:$0xf] %vm3094_vm14, %v3156_v38  ;;  %3236 = vst.msk [vmem:[%s5547_s23 + $0x34] sm:$0xf] %vm3094_vm14, %v3154_v44 }
 0x32d   : > { %v3158_v9 = vpop.permute.xlu1 %3157 }
 0x32e   : > { %3238 = vst.msk [vmem:[%s5547_s23 + $0x3c] sm:$0xf] %vm3094_vm14, %v3158_v9 }
 0x332   : > { %v4472_v45 = vpop.f32.mrf.mxu1 }
 0x333   : > { %v4415_v49 = vpack.c.bf16 %v4472_v45, %v4472_v45  ;;  %v3353_v11 = vmul.f32 %v4472_v45, %v4472_v45  ;;  %v3307_v46 = vsel %vm3255_vm15, %v4472_v45, 0.0  ;;  %v3481_v43 = vsel %vm3429_vm0, %v4472_v45, 0.0 }
 0x334   : > { %v2935_v50 = vpop.f32.mrf.mxu1 }
 0x335   : > { %3121 = vst.msk [vmem:[%s5401_s17 + $0x68] sm:$0xf] %vm3094_vm14, %v4415_v49  ;;  %v4413_v51 = vpack.c.bf16 %v2935_v50, %v2935_v50  ;;  %v3351_v61 = vmul.f32 %v2935_v50, %v2935_v50  ;;  %v3303_v55 = vsel %vm3255_vm15, %v2935_v50, 0.0  ;;  %v3477_v32 = vsel %vm3429_vm0, %v2935_v50, 0.0 }
 0x336   : > { %v4473_v52 = vpop.f32.mrf.mxu1  ;;  %v3304_v23 = vadd.f32 %v3303_v55, %v3302_v28  ;;  %v3478_v31 = vadd.f32 %v3477_v32, %v3476_v29  ;;  %v3410_v62 = vsel %vm3255_vm15, %v3353_v11, 0.0  ;;  %v3555_v27 = vsel %vm3429_vm0, %v3353_v11, 0.0 }
 0x337   : > { %3119 = vst.msk [vmem:[%s5401_s17 + $0x60] sm:$0xf] %vm3094_vm14, %v4413_v51  ;;  %v4416_v56 = vpack.c.bf16 %v4473_v52, %v4473_v52  ;;  %3175 = vrot.lane.b32.xlu0 %v4413_v51, %s4540_s20  ;;  %v3406_v17 = vsel %vm3255_vm15, %v3351_v61, 0.0  ;;  %v3551_v59 = vsel %vm3429_vm0, %v3351_v61, 0.0  ;;  %v3354_v63 = vmul.f32 %v4473_v52, %v4473_v52 }
 0x338   : > { %v2938_v57 = vpop.f32.mrf.mxu1  ;;  %v3407_v39 = vadd.f32 %v3406_v17, %v3405_v37  ;;  %v3552_v34 = vadd.f32 %v3551_v59, %v3550_v33  ;;  %v3309_v10 = vsel %vm3255_vm15, %v4473_v52, 0.0  ;;  %v3483_v22 = vsel %vm3429_vm0, %v4473_v52, 0.0 }
 0x339   : > { %3122 = vst.msk [vmem:[%s5401_s17 + $0x6c] sm:$0xf] %vm3094_vm14, %v4416_v56  ;;  %v4414_v58 = vpack.c.bf16 %v2938_v57, %v2938_v57  ;;  %v3352_v24 = vmul.f32 %v2938_v57, %v2938_v57  ;;  %v3305_v60 = vsel %vm3255_vm15, %v2938_v57, 0.0  ;;  %v3479_v30 = vsel %vm3429_vm0, %v2938_v57, 0.0 }
 0x33a   : > { %v3306_v41 = vadd.f32 %v3305_v60, %v3304_v23  ;;  %v3480_v2 = vadd.f32 %v3479_v30, %v3478_v31  ;;  %v3412_v12 = vsel %vm3255_vm15, %v3354_v63, 0.0  ;;  %v3557_v26 = vsel %vm3429_vm0, %v3354_v63, 0.0 }
 0x33b   : > { %3179 = vrot.lane.b32.xlu0 %v4415_v49, %s4540_s20  ;;  %3120 = vst.msk [vmem:[%s5401_s17 + $0x64] sm:$0xf] %vm3094_vm14, %v4414_v58  ;;  %3177 = vrot.lane.b32.xlu1 %v4414_v58, %s4540_s20  ;;  %v3408_v35 = vsel %vm3255_vm15, %v3352_v24, 0.0  ;;  %v3553_v47 = vsel %vm3429_vm0, %v3352_v24, 0.0 }
 0x33c   : > { %v3409_v53 = vadd.f32 %v3408_v35, %v3407_v39  ;;  %v3554_v20 = vadd.f32 %v3553_v47, %v3552_v34  ;;  %v3308_v0 = vadd.f32 %v3307_v46, %v3306_v41  ;;  %v3482_v16 = vadd.f32 %v3481_v43, %v3480_v2 }
 0x33e   : > { %v3411_v4 = vadd.f32 %v3410_v62, %v3409_v53  ;;  %v3556_v5 = vadd.f32 %v3555_v27, %v3554_v20  ;;  %v3310_v8 = vadd.f32 %v3309_v10, %v3308_v0  ;;  %v3484_v29 = vadd.f32 %v3483_v22, %v3482_v16 }
 0x33f   : > { %3181 = vrot.lane.b32.xlu1 %v4416_v56, %s4540_s20 }
 0x340   : > { %v3413_v28 = vadd.f32 %v3412_v12, %v3411_v4  ;;  %v3558_v18 = vadd.f32 %v3557_v26, %v3556_v5 }
 0x34d   : > { %v3160_v25 = vpop.permute.xlu0 %3159 }
 0x34e   : > { %3239 = vst.msk [vmem:[%s5547_s23 + $0x40] sm:$0xf] %vm3094_vm14, %v3160_v25 }
 0x351   : > { %v3164_v14 = vpop.permute.xlu0 %3163  ;;  %v3162_v48 = vpop.permute.xlu1 %3161 }
 0x352   : > { %3241 = vst.msk [vmem:[%s5547_s23 + $0x48] sm:$0xf] %vm3094_vm14, %v3164_v14  ;;  %3240 = vst.msk [vmem:[%s5547_s23 + $0x44] sm:$0xf] %vm3094_vm14, %v3162_v48 }
 0x355   : > { %v3166_v54 = vpop.permute.xlu1 %3165 }
 0x356   : > { %3242 = vst.msk [vmem:[%s5547_s23 + $0x4c] sm:$0xf] %vm3094_vm14, %v3166_v54 }
 0x362   : > { %v4476_v1 = vpop.f32.mrf.mxu1 }
 0x363   : > { %v4419_v7 = vpack.c.bf16 %v4476_v1, %v4476_v1  ;;  %v3315_v38 = vsel %vm3255_vm15, %v4476_v1, 0.0  ;;  %v3357_v49 = vmul.f32 %v4476_v1, %v4476_v1  ;;  %v3489_v56 = vsel %vm3429_vm0, %v4476_v1, 0.0 }
 0x364   : > { %v2951_v6 = vpop.f32.mrf.mxu1 }
 0x365   : > { %3125 = vst.msk [vmem:[%s5401_s17 + $0x78] sm:$0xf] %vm3094_vm14, %v4419_v7  ;;  %v4417_v13 = vpack.c.bf16 %v2951_v6, %v2951_v6  ;;  %v3311_v15 = vsel %vm3255_vm15, %v2951_v6, 0.0  ;;  %v3355_v3 = vmul.f32 %v2951_v6, %v2951_v6  ;;  %v3485_v19 = vsel %vm3429_vm0, %v2951_v6, 0.0 }
 0x366   : > { %v4477_v21 = vpop.f32.mrf.mxu1  ;;  %v3312_v33 = vadd.f32 %v3311_v15, %v3310_v8  ;;  %v3486_v45 = vadd.f32 %v3485_v19, %v3484_v29  ;;  %v3418_v59 = vsel %vm3255_vm15, %v3357_v49, 0.0  ;;  %v3563_v60 = vsel %vm3429_vm0, %v3357_v49, 0.0 }
 0x367   : > { %3123 = vst.msk [vmem:[%s5401_s17 + $0x70] sm:$0xf] %vm3094_vm14, %v4417_v13  ;;  %v4420_v40 = vpack.c.bf16 %v4477_v21, %v4477_v21  ;;  %3183 = vrot.lane.b32.xlu0 %v4417_v13, %s4540_s20  ;;  %v3414_v36 = vsel %vm3255_vm15, %v3355_v3, 0.0  ;;  %v3559_v42 = vsel %vm3429_vm0, %v3355_v3, 0.0  ;;  %v3358_v14 = vmul.f32 %v4477_v21, %v4477_v21 }
 0x368   : > { %v2954_v37 = vpop.f32.mrf.mxu1  ;;  %v3415_v57 = vadd.f32 %v3414_v36, %v3413_v28  ;;  %v3560_v25 = vadd.f32 %v3559_v42, %v3558_v18  ;;  %v3317_v24 = vsel %vm3255_vm15, %v4477_v21, 0.0  ;;  %v3491_v23 = vsel %vm3429_vm0, %v4477_v21, 0.0 }
 0x369   : > { %3126 = vst.msk [vmem:[%s5401_s17 + $0x7c] sm:$0xf] %vm3094_vm14, %v4420_v40  ;;  %v4418_v44 = vpack.c.bf16 %v2954_v37, %v2954_v37  ;;  %v3313_v9 = vsel %vm3255_vm15, %v2954_v37, 0.0  ;;  %v3356_v51 = vmul.f32 %v2954_v37, %v2954_v37  ;;  %v3487_v52 = vsel %vm3429_vm0, %v2954_v37, 0.0 }
 0x36a   : > { %v3314_v50 = vadd.f32 %v3313_v9, %v3312_v33  ;;  %v3488_v58 = vadd.f32 %v3487_v52, %v3486_v45  ;;  %v3420_v47 = vsel %vm3255_vm15, %v3358_v14, 0.0  ;;  %v3565_v11 = vsel %vm3429_vm0, %v3358_v14, 0.0 }
 0x36b   : > { %3124 = vst.msk [vmem:[%s5401_s17 + $0x74] sm:$0xf] %vm3094_vm14, %v4418_v44  ;;  %3187 = vrot.lane.b32.xlu0 %v4419_v7, %s4540_s20  ;;  %3185 = vrot.lane.b32.xlu1 %v4418_v44, %s4540_s20  ;;  %v3416_v61 = vsel %vm3255_vm15, %v3356_v51, 0.0  ;;  %v3561_v54 = vsel %vm3429_vm0, %v3356_v51, 0.0 }
 0x36c   : > { %v3316_v48 = vadd.f32 %v3315_v38, %v3314_v50  ;;  %v3417_v55 = vadd.f32 %v3416_v61, %v3415_v57  ;;  %v3490_v17 = vadd.f32 %v3489_v56, %v3488_v58  ;;  %v3562_v32 = vadd.f32 %v3561_v54, %v3560_v25 }
 0x36e   : > { %v3318_v35 = vadd.f32 %v3317_v24, %v3316_v48  ;;  %v3419_v30 = vadd.f32 %v3418_v59, %v3417_v55  ;;  %v3492_v39 = vadd.f32 %v3491_v23, %v3490_v17  ;;  %v3564_v31 = vadd.f32 %v3563_v60, %v3562_v32 }
 0x36f   : > { %3189 = vrot.lane.b32.xlu1 %v4420_v40, %s4540_s20 }
 0x370   : > { %v3319_v34 = vrot.slane %v3318_v35, 4  ;;  %v3421_v41 = vadd.f32 %v3420_v47, %v3419_v30  ;;  %v3493_v53 = vrot.slane %v3492_v39, 4  ;;  %v3566_v2 = vadd.f32 %v3565_v11, %v3564_v31 }
 0x372   : > { %v3320_v20 = vadd.f32 %v3319_v34, %v3318_v35  ;;  %v3422_v46 = vrot.slane %v3421_v41, 4  ;;  %v3494_v62 = vadd.f32 %v3493_v53, %v3492_v39  ;;  %v3567_v43 = vrot.slane %v3566_v2, 4 }
 0x374   : > { %v3321_v63 = vrot.slane %v3320_v20, 2  ;;  %v3423_v0 = vadd.f32 %v3422_v46, %v3421_v41  ;;  %v3495_v1 = vrot.slane %v3494_v62, 2  ;;  %v3568_v27 = vadd.f32 %v3567_v43, %v3566_v2 }
 0x376   : > { %v3322_v4 = vadd.f32 %v3321_v63, %v3320_v20  ;;  %v3424_v16 = vrot.slane %v3423_v0, 2  ;;  %v3496_v7 = vadd.f32 %v3495_v1, %v3494_v62  ;;  %v3569_v5 = vrot.slane %v3568_v27, 2 }
 0x378   : > { %v3323_v6 = vrot.slane %v3322_v4, 1  ;;  %v3425_v10 = vadd.f32 %v3424_v16, %v3423_v0  ;;  %v3497_v13 = vrot.slane %v3496_v7, 1  ;;  %v3570_v15 = vadd.f32 %v3569_v5, %v3568_v27 }
 0x379   : > { %v3168_v22 = vpop.permute.xlu0 %3167 }
 0x37a   : > { %3243 = vst.msk [vmem:[%s5547_s23 + $0x50] sm:$0xf] %vm3094_vm14, %v3168_v22  ;;  %v3324_v12 = vadd.f32 %v3323_v6, %v3322_v4  ;;  %v3498_v3 = vadd.f32 %v3497_v13, %v3496_v7  ;;  %v3571_v19 = vrot.slane %v3570_v15, 1  ;;  %v3426_v21 = vrot.slane %v3425_v10, 1 }
 0x37c   : > { %3326 = vst.msk [vmem:[%s253_s27] sm:$0x1] %vm3325_vm1, %v3324_v12  ;;  %3500 = vrot.lane.b32.xlu0 %v3498_v3, %s4540_s20  ;;  %v3572_v26 = vadd.f32 %v3571_v19, %v3570_v15  ;;  %v3427_v40 = vadd.f32 %v3426_v21, %v3425_v10 }
 0x37d   : > { %v3172_v8 = vpop.permute.xlu0 %3171  ;;  %v3170_v28 = vpop.permute.xlu1 %3169 }
 0x37e   : > { %3245 = vst.msk [vmem:[%s5547_s23 + $0x58] sm:$0xf] %vm3094_vm14, %v3172_v8  ;;  %3244 = vst.msk [vmem:[%s5547_s23 + $0x54] sm:$0xf] %vm3094_vm14, %v3170_v28  ;;  %3574 = vrot.lane.b32.xlu1 %v3572_v26, %s4540_s20 }
 0x37f   : > { %3428 = vst.msk [vmem:[%s253_s27 + $0x1] sm:$0x1] %vm3325_vm1, %v3427_v40 }
 0x381   : > { %v3174_v29 = vpop.permute.xlu1 %3173 }
 0x382   : > { %3246 = vst.msk [vmem:[%s5547_s23 + $0x5c] sm:$0xf] %vm3094_vm14, %v3174_v29 }
 0x3a9   : > { %v3176_v36 = vpop.permute.xlu0 %3175 }
 0x3aa   : > { %3247 = vst.msk [vmem:[%s5547_s23 + $0x60] sm:$0xf] %vm3094_vm14, %v3176_v36 }
 0x3ad   : > { %v3180_v42 = vpop.permute.xlu0 %3179  ;;  %v3178_v37 = vpop.permute.xlu1 %3177 }
 0x3ae   : > { %3249 = vst.msk [vmem:[%s5547_s23 + $0x68] sm:$0xf] %vm3094_vm14, %v3180_v42  ;;  %3248 = vst.msk [vmem:[%s5547_s23 + $0x64] sm:$0xf] %vm3094_vm14, %v3178_v37 }
 0x3b1   : > { %v3182_v33 = vpop.permute.xlu1 %3181 }
 0x3b2   : > { %3250 = vst.msk [vmem:[%s5547_s23 + $0x6c] sm:$0xf] %vm3094_vm14, %v3182_v33 }
 0x3d9   : > { %v3184_v18 = vpop.permute.xlu0 %3183 }
 0x3da   : > { %3251 = vst.msk [vmem:[%s5547_s23 + $0x70] sm:$0xf] %vm3094_vm14, %v3184_v18 }
 0x3dd   : > { %v3188_v38 = vpop.permute.xlu0 %3187  ;;  %v3186_v44 = vpop.permute.xlu1 %3185 }
 0x3de   : > { %3253 = vst.msk [vmem:[%s5547_s23 + $0x78] sm:$0xf] %vm3094_vm14, %v3188_v38  ;;  %3252 = vst.msk [vmem:[%s5547_s23 + $0x74] sm:$0xf] %vm3094_vm14, %v3186_v44 }
 0x3e1   : > { %v3190_v9 = vpop.permute.xlu1 %3189 }
 0x3e2   : > { %3254 = vst.msk [vmem:[%s5547_s23 + $0x7c] sm:$0xf] %vm3094_vm14, %v3190_v9 }
 0x3ee   : > { %v3501_v45 = vpop.permute.xlu0 %3500 }
 0x3ef   : > { %3503 = vst.msk [vmem:[%s257_s30] sm:$0x1] %vm3325_vm1, %v3501_v45 }
 0x3f0   : > { %v3575_v49 = vpop.permute.xlu1 %3574 }
 0x3f1   : > { %3577 = vst.msk [vmem:[%s257_s30 + $0x1] sm:$0x1] %vm3325_vm1, %v3575_v49 }
 0x3f2 PF: > { %s16_s18 = sadd.s32 1, %s4529_s18  }
 0x3f3   : > { %p13_p4 = scmp.ge.s32.totalorder %s16_s18, 4  }
 0x3f5   :  { %15 = sbr.rel (!%p13_p4) target bundleno = 1 (0x1), region = 97 }

</bundles_post_ra>
